<compile_context>
chip_gen: v6e
topology: v6e:2x2x1
jax: 0.10.0
libtpu: 0.0.40
codegen_flags: <defaults>
</compile_context>

<pallas_src>
import functools

import jax
import jax.numpy as jnp
from jax.experimental import pallas as pl
from jax.experimental.pallas import tpu as pltpu


def _sigmoid(x):
    # exact: sigmoid(x) = 0.5 * tanh(0.5 * x) + 0.5  (one EUP op, no reciprocal)
    return jnp.tanh(x * 0.5) * 0.5 + 0.5


# ----------------------------------------------------------------------------
# Fully fused LSTMCell_density forward kernel (single pallas_call, no grid)
# ----------------------------------------------------------------------------
def _lstm_cell_kernel(x_ref, prev_c_ref, prev_h_ref,
                      w_emb1_ref, w_emb2_ref, w_gate_ref, w_h2r_ref,
                      freq_ref,
                      next_c_ref, next_h_ref, pred_ref, *, hid, width):
    B = x_ref.shape[0]
    NP = x_ref.shape[2]                     # H*W, lane-dense spatial axis
    n_rows = NP // width

    # ---- boundary masks (computed once, shared by all 4 ConvBlocks) --------
    q = jax.lax.broadcasted_iota(jnp.int32, (1, NP), 1)
    if (width & (width - 1)) == 0:          # power-of-two W: cheap bit ops
        w_idx = jnp.bitwise_and(q, width - 1)
        h_idx = jnp.right_shift(q, width.bit_length() - 1)
    else:
        w_idx = q % width
        h_idx = q // width
    m_hp = h_idx < (n_rows - 1)             # neighbour at h+1 exists
    m_hm = h_idx > 0                        # neighbour at h-1 exists
    m_wp = w_idx < (width - 1)              # neighbour at w+1 exists
    m_wm = w_idx > 0                        # neighbour at w-1 exists
    NEG = jnp.float32(-jnp.inf)

    def tap_mask(dy, dx):
        m = None
        for cond, mm in ((dy == 1, m_hp), (dy == -1, m_hm),
                         (dx == 1, m_wp), (dx == -1, m_wm)):
            if cond:
                m = mm if m is None else (m & mm)
        return m

    def conv_bn_pool(x, w2d):
        """ConvBlock in (B, C, H*W) layout.
        conv3x3(pad=1, bias=False) -> BatchNorm2d(affine=False, training batch
        stats) -> MaxPool2d(3, stride=1, pad=1).
        x: (B, Cin, NP) f32, w2d: (Cout, 9*Cin) bf16  ->  (B, Cout, NP) f32."""
        Cin = x.shape[1]
        Cout = w2d.shape[0]
        x2 = x.reshape(B * Cin, NP)

        # im2col via roll + boundary mask (no padding copies, no concat shifts)
        cols = []
        for dy in (-1, 0, 1):
            for dx in (-1, 0, 1):
                delta = dy * width + dx
                t = x2 if delta == 0 else pltpu.roll(x2, (-delta) % NP, axis=1)
                t = t.astype(jnp.bfloat16)
                m = tap_mask(dy, dx)
                if m is not None:
                    t = jnp.where(m, t, 0)
                cols.append(t.reshape(B, Cin, NP))
        patches = jnp.concatenate(cols, axis=1)          # (B, 9*Cin, NP) bf16

        # one MXU matmul per image: (Cout, 9*Cin) x (9*Cin, NP), f32 acc
        y = jnp.stack(
            [jnp.dot(w2d, patches[b], preferred_element_type=jnp.float32)
             for b in range(B)], axis=0)                 # (B, Cout, NP) f32

        # BatchNorm2d(affine=False), training batch stats (biased variance),
        # fused mean/var: single read pass (sum + sum of squares)
        inv_n = 1.0 / (B * NP)
        s1 = jnp.sum(jnp.sum(y, axis=2, keepdims=True), axis=0, keepdims=True)
        s2 = jnp.sum(jnp.sum(y * y, axis=2, keepdims=True), axis=0, keepdims=True)
        mean = s1 * inv_n
        var = s2 * inv_n - mean * mean
        y = (y - mean) * jax.lax.rsqrt(var + 1e-5)

        # MaxPool2d(3, stride=1, pad=1): separable (H pass, W pass) via rolls
        yr = y.reshape(B * Cout, NP)
        m1 = jnp.maximum(yr, jnp.where(m_hp, pltpu.roll(yr, NP - width, axis=1), NEG))
        m1 = jnp.maximum(m1, jnp.where(m_hm, pltpu.roll(yr, width, axis=1), NEG))
        m2 = jnp.maximum(m1, jnp.where(m_wp, pltpu.roll(m1, NP - 1, axis=1), NEG))
        m2 = jnp.maximum(m2, jnp.where(m_wm, pltpu.roll(m1, 1, axis=1), NEG))
        return m2.reshape(B, Cout, NP)

    x = x_ref[...]                          # (B, 2, NP)
    prev_c = prev_c_ref[...]                # (B, hid, NP)
    prev_h = prev_h_ref[...]                # (B, hid, NP)

    # embedding = ConvBlock(2 -> emb) -> ReLU -> ConvBlock(emb -> emb)
    e1 = jnp.maximum(conv_bn_pool(x, w_emb1_ref[...]), 0.0)
    x_emb = conv_bn_pool(e1, w_emb2_ref[...])

    # torch.cat([prev_h, x_emb], dim=1): channel axis = sublane axis -> cheap
    x_and_h = jnp.concatenate([prev_h, x_emb], axis=1)   # (B, hid+emb, NP)

    # fused f/i/c/o gate ConvBlock (Cout = 4*hid = 128); BN stats & maxpool are
    # per-channel, so identical to four separate ConvBlocks.
    gates = conv_bn_pool(x_and_h, w_gate_ref[...])       # (B, 4*hid, NP)
    f_g = _sigmoid(gates[:, 0 * hid:1 * hid])
    i_g = _sigmoid(gates[:, 1 * hid:2 * hid])
    c_g = jnp.tanh(gates[:, 2 * hid:3 * hid])
    o_g = _sigmoid(gates[:, 3 * hid:4 * hid])

    # LSTM state update (fully in-kernel)
    next_c = prev_c * f_g + i_g * c_g
    next_h = jnp.tanh(next_c) * o_g
    next_c_ref[...] = next_c                # lane-dense (B, hid, NP) store
    next_h_ref[...] = next_h

    # hidden_to_result: ConvBlock(hid -> 2) -> Softmax over channels, take ch 0
    # softmax(r)[ch0] == sigmoid(r0 - r1)   (exact, no exp/sum/reciprocal)
    r = conv_bn_pool(next_h, w_h2r_ref[...])             # (B, 2, NP)
    corr = _sigmoid(r[:, 0:1, :] - r[:, 1:2, :])         # (B, 1, NP)

    f0 = freq_ref[:, 0:1, :]                             # (1, 1, NP): 1 - fm
    f1 = freq_ref[:, 1:2, :]                             # (1, 1, NP): fm
    pred_ref[...] = jnp.concatenate([f0 - corr, f1 + corr], axis=1)


# ----------------------------------------------------------------------------
# LSTMCell_density in JAX/Pallas
# ----------------------------------------------------------------------------
class LSTMCellDensityPallas:
    def __init__(self, frequency_map, embedding_size=16, hidden_state_size=32,
                 n_cells_hor=16, n_cells_ver=16, key=None):
        self.emb = embedding_size
        self.hid = hidden_state_size
        self.H = n_cells_hor
        self.W = n_cells_ver
        hw = self.H * self.W

        # freq_map = cat([1 - fm, fm], dim=0).unsqueeze(0), kept as (1, 2, H*W)
        fm = frequency_map.reshape(1, self.H, self.W).astype(jnp.float32)
        self.freq = jnp.concatenate([1.0 - fm, fm], axis=0).reshape(1, 2, hw)

        if key is None:
            key = jax.random.PRNGKey(42)
        ks = jax.random.split(key, 7)

        def conv_w(k, cin, cout):            # HWIO (3,3,cin,cout) f32 init
            return jax.random.normal(k, (3, 3, cin, cout),
                                     jnp.float32) / jnp.sqrt(9.0 * cin)

        def pack(w):                         # -> (Cout, 9*Cin) bf16, K=(kh,kw,cin)
            kh, kw, cin, cout = w.shape
            return (jnp.transpose(w, (3, 0, 1, 2))
                    .reshape(cout, kh * kw * cin).astype(jnp.bfloat16))

        self.w_emb1 = pack(conv_w(ks[0], 2, self.emb))
        self.w_emb2 = pack(conv_w(ks[1], self.emb, self.emb))
        self.w_h2r = pack(conv_w(ks[2], self.hid, 2))
        # fuse the four gate convs along Cout: order f, i, c, o
        gate_ws = [conv_w(ks[3 + g], self.hid + self.emb, self.hid)
                   for g in range(4)]
        self.w_gate = pack(jnp.concatenate(gate_ws, axis=-1))  # (4*hid, 9*(hid+emb))

    def init_state(self, batch_size):
        z = jnp.zeros((batch_size, self.hid, self.H, self.W), jnp.float32)
        return (z, z)

    def __call__(self, x_nchw, prev_state):
        prev_c_nchw, prev_h_nchw = prev_state
        B = x_nchw.shape[0]
        hw = self.H * self.W

        # NCHW -> (B, C, H*W): pure reshapes, no transposes anywhere.
        x = x_nchw.reshape(B, x_nchw.shape[1], hw)
        pc = prev_c_nchw.reshape(B, self.hid, hw)
        ph = prev_h_nchw.reshape(B, self.hid, hw)

        vmem = pl.BlockSpec(memory_space=pltpu.MemorySpace.VMEM)
        next_c, next_h, pred = pl.pallas_call(
            functools.partial(_lstm_cell_kernel, hid=self.hid, width=self.W),
            out_shape=(
                jax.ShapeDtypeStruct((B, self.hid, hw), jnp.float32),
                jax.ShapeDtypeStruct((B, self.hid, hw), jnp.float32),
                jax.ShapeDtypeStruct((B, 2, hw), jnp.float32),
            ),
            in_specs=[vmem] * 8,
            out_specs=(vmem, vmem, vmem),
        )(x, pc, ph, self.w_emb1, self.w_emb2, self.w_gate, self.w_h2r,
          self.freq)

        s4 = (B, self.hid, self.H, self.W)
        return ((next_c.reshape(s4), next_h.reshape(s4)),
                pred.reshape(B, 2, self.H, self.W))


if __name__ == "__main__":
    B, H, W = 2, 16, 16
    EMB, HID = 16, 32

    key = jax.random.PRNGKey(0)
    k1, k2, k3, k4 = jax.random.split(key, 4)
    frequency_map = jax.random.uniform(k1, (1, H, W), jnp.float32)   # (1,H,W)
    x = jax.random.normal(k2, (B, 2, H, W), jnp.float32)             # NCHW
    prev_c = jax.random.normal(k3, (B, HID, H, W), jnp.float32)
    prev_h = jax.random.normal(k4, (B, HID, H, W), jnp.float32)

    model = LSTMCellDensityPallas(frequency_map, embedding_size=EMB,
                                  hidden_state_size=HID,
                                  n_cells_hor=H, n_cells_ver=W,
                                  key=jax.random.PRNGKey(42))

    fwd = jax.jit(model.__call__)
    (next_c, next_h), prediction = fwd(x, (prev_c, prev_h))
    jax.block_until_ready((next_c, next_h, prediction))

    assert next_c.shape == (B, HID, H, W)
    assert next_h.shape == (B, HID, H, W)
    assert prediction.shape == (B, 2, H, W)
    assert bool(jnp.all(jnp.isfinite(next_c)))
    assert bool(jnp.all(jnp.isfinite(next_h)))
    assert bool(jnp.all(jnp.isfinite(prediction)))

    print("KERNEL_OK")
</pallas_src>

<mosaic_0001>
module attributes {stable_mosaic.version = 11 : i64} {
  func.func @_lstm_cell_kernel(%arg0: memref<2x2x256xf32, #tpu.memory_space<vmem>>, %arg1: memref<2x32x256xf32, #tpu.memory_space<vmem>>, %arg2: memref<2x32x256xf32, #tpu.memory_space<vmem>>, %arg3: memref<16x18xbf16, #tpu.memory_space<vmem>>, %arg4: memref<16x144xbf16, #tpu.memory_space<vmem>>, %arg5: memref<128x432xbf16, #tpu.memory_space<vmem>>, %arg6: memref<2x288xbf16, #tpu.memory_space<vmem>>, %arg7: memref<1x2x256xf32, #tpu.memory_space<vmem>>, %arg8: memref<2x32x256xf32, #tpu.memory_space<vmem>>, %arg9: memref<2x32x256xf32, #tpu.memory_space<vmem>>, %arg10: memref<2x2x256xf32, #tpu.memory_space<vmem>>) attributes {dimension_semantics = [], scalar_prefetch = 0 : i64, scratch_operands = 0 : i64, tpu.core_type = #tpu.core_type<tc>} {
    %0 = tpu.iota {dimensions = array<i32: 1>} : vector<1x256xi32>
    %c15_i32 = arith.constant 15 : i32
    %1 = vector.broadcast %c15_i32 : i32 to vector<1x256xi32>
    %2 = arith.andi %0, %1 : vector<1x256xi32>
    %c4_i32 = arith.constant 4 : i32
    %3 = vector.broadcast %c4_i32 : i32 to vector<1x256xi32>
    %4 = arith.shrsi %0, %3 : vector<1x256xi32>
    %c15_i32_0 = arith.constant 15 : i32
    %5 = vector.broadcast %c15_i32_0 : i32 to vector<1x256xi32>
    %6 = arith.cmpi slt, %4, %5 : vector<1x256xi32>
    %c0_i32 = arith.constant 0 : i32
    %7 = vector.broadcast %c0_i32 : i32 to vector<1x256xi32>
    %8 = arith.cmpi sgt, %4, %7 : vector<1x256xi32>
    %c15_i32_1 = arith.constant 15 : i32
    %9 = vector.broadcast %c15_i32_1 : i32 to vector<1x256xi32>
    %10 = arith.cmpi slt, %2, %9 : vector<1x256xi32>
    %c0_i32_2 = arith.constant 0 : i32
    %11 = vector.broadcast %c0_i32_2 : i32 to vector<1x256xi32>
    %12 = arith.cmpi sgt, %2, %11 : vector<1x256xi32>
    %c0 = arith.constant 0 : index
    %c0_3 = arith.constant 0 : index
    %c0_4 = arith.constant 0 : index
    %13 = vector.load %arg0[%c0, %c0_3, %c0_4] : memref<2x2x256xf32, #tpu.memory_space<vmem>>, vector<2x2x256xf32>
    %c0_5 = arith.constant 0 : index
    %c0_6 = arith.constant 0 : index
    %c0_7 = arith.constant 0 : index
    %14 = vector.load %arg1[%c0_5, %c0_6, %c0_7] : memref<2x32x256xf32, #tpu.memory_space<vmem>>, vector<2x32x256xf32>
    %c0_8 = arith.constant 0 : index
    %c0_9 = arith.constant 0 : index
    %c0_10 = arith.constant 0 : index
    %15 = vector.load %arg2[%c0_8, %c0_9, %c0_10] : memref<2x32x256xf32, #tpu.memory_space<vmem>>, vector<2x32x256xf32>
    %c0_11 = arith.constant 0 : index
    %c0_12 = arith.constant 0 : index
    %16 = vector.load %arg3[%c0_11, %c0_12] : memref<16x18xbf16, #tpu.memory_space<vmem>>, vector<16x18xbf16>
    %17 = vector.shape_cast %13 : vector<2x2x256xf32> to vector<4x256xf32>
    %c17_i32 = arith.constant 17 : i32
    %18 = tpu.dynamic_rotate %17 by %c17_i32 dim 1 : vector<4x256xf32>, i32 -> vector<4x256xf32>
    %19 = arith.truncf %18 : vector<4x256xf32> to vector<4x256xbf16>
    %20 = arith.andi %8, %12 : vector<1x256xi1>
    %c0_i32_13 = arith.constant 0 : i32
    %21 = arith.sitofp %c0_i32_13 : i32 to bf16
    %22 = vector.shape_cast %20 : vector<1x256xi1> to vector<1x256xi1>
    %23 = vector.broadcast %22 : vector<1x256xi1> to vector<4x256xi1>
    %24 = vector.broadcast %21 : bf16 to vector<4x256xbf16>
    %25 = arith.select %23, %19, %24 : vector<4x256xi1>, vector<4x256xbf16>
    %26 = vector.shape_cast %25 : vector<4x256xbf16> to vector<2x2x256xbf16>
    %c16_i32 = arith.constant 16 : i32
    %27 = tpu.dynamic_rotate %17 by %c16_i32 dim 1 : vector<4x256xf32>, i32 -> vector<4x256xf32>
    %28 = arith.truncf %27 : vector<4x256xf32> to vector<4x256xbf16>
    %c0_i32_14 = arith.constant 0 : i32
    %29 = arith.sitofp %c0_i32_14 : i32 to bf16
    %30 = vector.shape_cast %8 : vector<1x256xi1> to vector<1x256xi1>
    %31 = vector.broadcast %30 : vector<1x256xi1> to vector<4x256xi1>
    %32 = vector.broadcast %29 : bf16 to vector<4x256xbf16>
    %33 = arith.select %31, %28, %32 : vector<4x256xi1>, vector<4x256xbf16>
    %34 = vector.shape_cast %33 : vector<4x256xbf16> to vector<2x2x256xbf16>
    %c15_i32_15 = arith.constant 15 : i32
    %35 = tpu.dynamic_rotate %17 by %c15_i32_15 dim 1 : vector<4x256xf32>, i32 -> vector<4x256xf32>
    %36 = arith.truncf %35 : vector<4x256xf32> to vector<4x256xbf16>
    %37 = arith.andi %8, %10 : vector<1x256xi1>
    %c0_i32_16 = arith.constant 0 : i32
    %38 = arith.sitofp %c0_i32_16 : i32 to bf16
    %39 = vector.shape_cast %37 : vector<1x256xi1> to vector<1x256xi1>
    %40 = vector.broadcast %39 : vector<1x256xi1> to vector<4x256xi1>
    %41 = vector.broadcast %38 : bf16 to vector<4x256xbf16>
    %42 = arith.select %40, %36, %41 : vector<4x256xi1>, vector<4x256xbf16>
    %43 = vector.shape_cast %42 : vector<4x256xbf16> to vector<2x2x256xbf16>
    %c1_i32 = arith.constant 1 : i32
    %44 = tpu.dynamic_rotate %17 by %c1_i32 dim 1 : vector<4x256xf32>, i32 -> vector<4x256xf32>
    %45 = arith.truncf %44 : vector<4x256xf32> to vector<4x256xbf16>
    %c0_i32_17 = arith.constant 0 : i32
    %46 = arith.sitofp %c0_i32_17 : i32 to bf16
    %47 = vector.shape_cast %12 : vector<1x256xi1> to vector<1x256xi1>
    %48 = vector.broadcast %47 : vector<1x256xi1> to vector<4x256xi1>
    %49 = vector.broadcast %46 : bf16 to vector<4x256xbf16>
    %50 = arith.select %48, %45, %49 : vector<4x256xi1>, vector<4x256xbf16>
    %51 = vector.shape_cast %50 : vector<4x256xbf16> to vector<2x2x256xbf16>
    %52 = arith.truncf %17 : vector<4x256xf32> to vector<4x256xbf16>
    %53 = vector.shape_cast %52 : vector<4x256xbf16> to vector<2x2x256xbf16>
    %c255_i32 = arith.constant 255 : i32
    %54 = tpu.dynamic_rotate %17 by %c255_i32 dim 1 : vector<4x256xf32>, i32 -> vector<4x256xf32>
    %55 = arith.truncf %54 : vector<4x256xf32> to vector<4x256xbf16>
    %c0_i32_18 = arith.constant 0 : i32
    %56 = arith.sitofp %c0_i32_18 : i32 to bf16
    %57 = vector.shape_cast %10 : vector<1x256xi1> to vector<1x256xi1>
    %58 = vector.broadcast %57 : vector<1x256xi1> to vector<4x256xi1>
    %59 = vector.broadcast %56 : bf16 to vector<4x256xbf16>
    %60 = arith.select %58, %55, %59 : vector<4x256xi1>, vector<4x256xbf16>
    %61 = vector.shape_cast %60 : vector<4x256xbf16> to vector<2x2x256xbf16>
    %c241_i32 = arith.constant 241 : i32
    %62 = tpu.dynamic_rotate %17 by %c241_i32 dim 1 : vector<4x256xf32>, i32 -> vector<4x256xf32>
    %63 = arith.truncf %62 : vector<4x256xf32> to vector<4x256xbf16>
    %64 = arith.andi %6, %12 : vector<1x256xi1>
    %c0_i32_19 = arith.constant 0 : i32
    %65 = arith.sitofp %c0_i32_19 : i32 to bf16
    %66 = vector.shape_cast %64 : vector<1x256xi1> to vector<1x256xi1>
    %67 = vector.broadcast %66 : vector<1x256xi1> to vector<4x256xi1>
    %68 = vector.broadcast %65 : bf16 to vector<4x256xbf16>
    %69 = arith.select %67, %63, %68 : vector<4x256xi1>, vector<4x256xbf16>
    %70 = vector.shape_cast %69 : vector<4x256xbf16> to vector<2x2x256xbf16>
    %c240_i32 = arith.constant 240 : i32
    %71 = tpu.dynamic_rotate %17 by %c240_i32 dim 1 : vector<4x256xf32>, i32 -> vector<4x256xf32>
    %72 = arith.truncf %71 : vector<4x256xf32> to vector<4x256xbf16>
    %c0_i32_20 = arith.constant 0 : i32
    %73 = arith.sitofp %c0_i32_20 : i32 to bf16
    %74 = vector.shape_cast %6 : vector<1x256xi1> to vector<1x256xi1>
    %75 = vector.broadcast %74 : vector<1x256xi1> to vector<4x256xi1>
    %76 = vector.broadcast %73 : bf16 to vector<4x256xbf16>
    %77 = arith.select %75, %72, %76 : vector<4x256xi1>, vector<4x256xbf16>
    %78 = vector.shape_cast %77 : vector<4x256xbf16> to vector<2x2x256xbf16>
    %c239_i32 = arith.constant 239 : i32
    %79 = tpu.dynamic_rotate %17 by %c239_i32 dim 1 : vector<4x256xf32>, i32 -> vector<4x256xf32>
    %80 = arith.truncf %79 : vector<4x256xf32> to vector<4x256xbf16>
    %81 = arith.andi %6, %10 : vector<1x256xi1>
    %c0_i32_21 = arith.constant 0 : i32
    %82 = arith.sitofp %c0_i32_21 : i32 to bf16
    %83 = vector.shape_cast %81 : vector<1x256xi1> to vector<1x256xi1>
    %84 = vector.broadcast %83 : vector<1x256xi1> to vector<4x256xi1>
    %85 = vector.broadcast %82 : bf16 to vector<4x256xbf16>
    %86 = arith.select %84, %80, %85 : vector<4x256xi1>, vector<4x256xbf16>
    %87 = vector.shape_cast %86 : vector<4x256xbf16> to vector<2x2x256xbf16>
    %88 = tpu.concatenate %26, %34, %43, %51, %53, %61, %70, %78, %87 in 1 : vector<2x2x256xbf16>, vector<2x2x256xbf16>, vector<2x2x256xbf16>, vector<2x2x256xbf16>, vector<2x2x256xbf16>, vector<2x2x256xbf16>, vector<2x2x256xbf16>, vector<2x2x256xbf16>, vector<2x2x256xbf16> -> vector<2x18x256xbf16>
    %89 = vector.extract_strided_slice %88 {offsets = [0, 0, 0], sizes = [1, 18, 256], strides = [1, 1, 1]} : vector<2x18x256xbf16> to vector<1x18x256xbf16>
    %90 = vector.shape_cast %89 : vector<1x18x256xbf16> to vector<18x256xbf16>
    %cst = arith.constant dense<0.000000e+00> : vector<16x256xf32>
    %91 = tpu.matmul %16, %90, %cst {dimension_numbers = #tpu.dot_dimension_numbers<[1], [0], [0], [1], [0, 0, 1, 1], [], []>} : vector<16x18xbf16>, vector<18x256xbf16>, vector<16x256xf32> -> vector<16x256xf32>
    %92 = vector.extract_strided_slice %88 {offsets = [1, 0, 0], sizes = [1, 18, 256], strides = [1, 1, 1]} : vector<2x18x256xbf16> to vector<1x18x256xbf16>
    %93 = vector.shape_cast %92 : vector<1x18x256xbf16> to vector<18x256xbf16>
    %cst_22 = arith.constant dense<0.000000e+00> : vector<16x256xf32>
    %94 = tpu.matmul %16, %93, %cst_22 {dimension_numbers = #tpu.dot_dimension_numbers<[1], [0], [0], [1], [0, 0, 1, 1], [], []>} : vector<16x18xbf16>, vector<18x256xbf16>, vector<16x256xf32> -> vector<16x256xf32>
    %95 = vector.shape_cast %91 : vector<16x256xf32> to vector<1x16x256xf32>
    %96 = vector.shape_cast %94 : vector<16x256xf32> to vector<1x16x256xf32>
    %97 = tpu.concatenate %95, %96 in 0 : vector<1x16x256xf32>, vector<1x16x256xf32> -> vector<2x16x256xf32>
    %cst_23 = arith.constant dense<0.000000e+00> : vector<2x16xf32>
    %98 = vector.multi_reduction <add>, %97, %cst_23 [2] : vector<2x16x256xf32> to vector<2x16xf32>
    %99 = vector.shape_cast %98 : vector<2x16xf32> to vector<2x16x1xf32>
    %cst_24 = arith.constant dense<0.000000e+00> : vector<16x1xf32>
    %100 = vector.multi_reduction <add>, %99, %cst_24 [0] : vector<2x16x1xf32> to vector<16x1xf32>
    %101 = vector.shape_cast %100 : vector<16x1xf32> to vector<1x16x1xf32>
    %102 = arith.mulf %97, %97 : vector<2x16x256xf32>
    %cst_25 = arith.constant dense<0.000000e+00> : vector<2x16xf32>
    %103 = vector.multi_reduction <add>, %102, %cst_25 [2] : vector<2x16x256xf32> to vector<2x16xf32>
    %104 = vector.shape_cast %103 : vector<2x16xf32> to vector<2x16x1xf32>
    %cst_26 = arith.constant dense<0.000000e+00> : vector<16x1xf32>
    %105 = vector.multi_reduction <add>, %104, %cst_26 [0] : vector<2x16x1xf32> to vector<16x1xf32>
    %106 = vector.shape_cast %105 : vector<16x1xf32> to vector<1x16x1xf32>
    %cst_27 = arith.constant 0.001953125 : f32
    %107 = vector.broadcast %cst_27 : f32 to vector<1x16x1xf32>
    %108 = arith.mulf %101, %107 : vector<1x16x1xf32>
    %cst_28 = arith.constant 0.001953125 : f32
    %109 = vector.broadcast %cst_28 : f32 to vector<1x16x1xf32>
    %110 = arith.mulf %106, %109 : vector<1x16x1xf32>
    %111 = arith.mulf %108, %108 : vector<1x16x1xf32>
    %112 = arith.subf %110, %111 : vector<1x16x1xf32>
    %113 = vector.broadcast %108 : vector<1x16x1xf32> to vector<2x16x256xf32>
    %114 = arith.subf %97, %113 : vector<2x16x256xf32>
    %cst_29 = arith.constant 9.99999974E-6 : f32
    %115 = vector.broadcast %cst_29 : f32 to vector<1x16x1xf32>
    %116 = arith.addf %112, %115 : vector<1x16x1xf32>
    %117 = math.rsqrt %116 : vector<1x16x1xf32>
    %118 = vector.broadcast %117 : vector<1x16x1xf32> to vector<2x16x256xf32>
    %119 = arith.mulf %114, %118 : vector<2x16x256xf32>
    %120 = vector.shape_cast %119 : vector<2x16x256xf32> to vector<32x256xf32>
    %c240_i32_30 = arith.constant 240 : i32
    %121 = tpu.dynamic_rotate %120 by %c240_i32_30 dim 1 : vector<32x256xf32>, i32 -> vector<32x256xf32>
    %cst_31 = arith.constant 0xFF800000 : f32
    %122 = vector.shape_cast %6 : vector<1x256xi1> to vector<1x256xi1>
    %123 = vector.broadcast %122 : vector<1x256xi1> to vector<32x256xi1>
    %124 = vector.broadcast %cst_31 : f32 to vector<32x256xf32>
    %125 = arith.select %123, %121, %124 : vector<32x256xi1>, vector<32x256xf32>
    %126 = arith.maximumf %120, %125 : vector<32x256xf32>
    %c16_i32_32 = arith.constant 16 : i32
    %127 = tpu.dynamic_rotate %120 by %c16_i32_32 dim 1 : vector<32x256xf32>, i32 -> vector<32x256xf32>
    %cst_33 = arith.constant 0xFF800000 : f32
    %128 = vector.shape_cast %8 : vector<1x256xi1> to vector<1x256xi1>
    %129 = vector.broadcast %128 : vector<1x256xi1> to vector<32x256xi1>
    %130 = vector.broadcast %cst_33 : f32 to vector<32x256xf32>
    %131 = arith.select %129, %127, %130 : vector<32x256xi1>, vector<32x256xf32>
    %132 = arith.maximumf %126, %131 : vector<32x256xf32>
    %c255_i32_34 = arith.constant 255 : i32
    %133 = tpu.dynamic_rotate %132 by %c255_i32_34 dim 1 : vector<32x256xf32>, i32 -> vector<32x256xf32>
    %cst_35 = arith.constant 0xFF800000 : f32
    %134 = vector.shape_cast %10 : vector<1x256xi1> to vector<1x256xi1>
    %135 = vector.broadcast %134 : vector<1x256xi1> to vector<32x256xi1>
    %136 = vector.broadcast %cst_35 : f32 to vector<32x256xf32>
    %137 = arith.select %135, %133, %136 : vector<32x256xi1>, vector<32x256xf32>
    %138 = arith.maximumf %132, %137 : vector<32x256xf32>
    %c1_i32_36 = arith.constant 1 : i32
    %139 = tpu.dynamic_rotate %132 by %c1_i32_36 dim 1 : vector<32x256xf32>, i32 -> vector<32x256xf32>
    %cst_37 = arith.constant 0xFF800000 : f32
    %140 = vector.shape_cast %12 : vector<1x256xi1> to vector<1x256xi1>
    %141 = vector.broadcast %140 : vector<1x256xi1> to vector<32x256xi1>
    %142 = vector.broadcast %cst_37 : f32 to vector<32x256xf32>
    %143 = arith.select %141, %139, %142 : vector<32x256xi1>, vector<32x256xf32>
    %144 = arith.maximumf %138, %143 : vector<32x256xf32>
    %145 = vector.shape_cast %144 : vector<32x256xf32> to vector<2x16x256xf32>
    %cst_38 = arith.constant 0.000000e+00 : f32
    %146 = vector.broadcast %cst_38 : f32 to vector<2x16x256xf32>
    %147 = arith.maximumf %145, %146 : vector<2x16x256xf32>
    %c0_39 = arith.constant 0 : index
    %c0_40 = arith.constant 0 : index
    %148 = vector.load %arg4[%c0_39, %c0_40] : memref<16x144xbf16, #tpu.memory_space<vmem>>, vector<16x144xbf16>
    %149 = vector.shape_cast %147 : vector<2x16x256xf32> to vector<32x256xf32>
    %c17_i32_41 = arith.constant 17 : i32
    %150 = tpu.dynamic_rotate %149 by %c17_i32_41 dim 1 : vector<32x256xf32>, i32 -> vector<32x256xf32>
    %151 = arith.truncf %150 : vector<32x256xf32> to vector<32x256xbf16>
    %152 = arith.andi %8, %12 : vector<1x256xi1>
    %c0_i32_42 = arith.constant 0 : i32
    %153 = arith.sitofp %c0_i32_42 : i32 to bf16
    %154 = vector.shape_cast %152 : vector<1x256xi1> to vector<1x256xi1>
    %155 = vector.broadcast %154 : vector<1x256xi1> to vector<32x256xi1>
    %156 = vector.broadcast %153 : bf16 to vector<32x256xbf16>
    %157 = arith.select %155, %151, %156 : vector<32x256xi1>, vector<32x256xbf16>
    %158 = vector.shape_cast %157 : vector<32x256xbf16> to vector<2x16x256xbf16>
    %c16_i32_43 = arith.constant 16 : i32
    %159 = tpu.dynamic_rotate %149 by %c16_i32_43 dim 1 : vector<32x256xf32>, i32 -> vector<32x256xf32>
    %160 = arith.truncf %159 : vector<32x256xf32> to vector<32x256xbf16>
    %c0_i32_44 = arith.constant 0 : i32
    %161 = arith.sitofp %c0_i32_44 : i32 to bf16
    %162 = vector.shape_cast %8 : vector<1x256xi1> to vector<1x256xi1>
    %163 = vector.broadcast %162 : vector<1x256xi1> to vector<32x256xi1>
    %164 = vector.broadcast %161 : bf16 to vector<32x256xbf16>
    %165 = arith.select %163, %160, %164 : vector<32x256xi1>, vector<32x256xbf16>
    %166 = vector.shape_cast %165 : vector<32x256xbf16> to vector<2x16x256xbf16>
    %c15_i32_45 = arith.constant 15 : i32
    %167 = tpu.dynamic_rotate %149 by %c15_i32_45 dim 1 : vector<32x256xf32>, i32 -> vector<32x256xf32>
    %168 = arith.truncf %167 : vector<32x256xf32> to vector<32x256xbf16>
    %169 = arith.andi %8, %10 : vector<1x256xi1>
    %c0_i32_46 = arith.constant 0 : i32
    %170 = arith.sitofp %c0_i32_46 : i32 to bf16
    %171 = vector.shape_cast %169 : vector<1x256xi1> to vector<1x256xi1>
    %172 = vector.broadcast %171 : vector<1x256xi1> to vector<32x256xi1>
    %173 = vector.broadcast %170 : bf16 to vector<32x256xbf16>
    %174 = arith.select %172, %168, %173 : vector<32x256xi1>, vector<32x256xbf16>
    %175 = vector.shape_cast %174 : vector<32x256xbf16> to vector<2x16x256xbf16>
    %c1_i32_47 = arith.constant 1 : i32
    %176 = tpu.dynamic_rotate %149 by %c1_i32_47 dim 1 : vector<32x256xf32>, i32 -> vector<32x256xf32>
    %177 = arith.truncf %176 : vector<32x256xf32> to vector<32x256xbf16>
    %c0_i32_48 = arith.constant 0 : i32
    %178 = arith.sitofp %c0_i32_48 : i32 to bf16
    %179 = vector.shape_cast %12 : vector<1x256xi1> to vector<1x256xi1>
    %180 = vector.broadcast %179 : vector<1x256xi1> to vector<32x256xi1>
    %181 = vector.broadcast %178 : bf16 to vector<32x256xbf16>
    %182 = arith.select %180, %177, %181 : vector<32x256xi1>, vector<32x256xbf16>
    %183 = vector.shape_cast %182 : vector<32x256xbf16> to vector<2x16x256xbf16>
    %184 = arith.truncf %149 : vector<32x256xf32> to vector<32x256xbf16>
    %185 = vector.shape_cast %184 : vector<32x256xbf16> to vector<2x16x256xbf16>
    %c255_i32_49 = arith.constant 255 : i32
    %186 = tpu.dynamic_rotate %149 by %c255_i32_49 dim 1 : vector<32x256xf32>, i32 -> vector<32x256xf32>
    %187 = arith.truncf %186 : vector<32x256xf32> to vector<32x256xbf16>
    %c0_i32_50 = arith.constant 0 : i32
    %188 = arith.sitofp %c0_i32_50 : i32 to bf16
    %189 = vector.shape_cast %10 : vector<1x256xi1> to vector<1x256xi1>
    %190 = vector.broadcast %189 : vector<1x256xi1> to vector<32x256xi1>
    %191 = vector.broadcast %188 : bf16 to vector<32x256xbf16>
    %192 = arith.select %190, %187, %191 : vector<32x256xi1>, vector<32x256xbf16>
    %193 = vector.shape_cast %192 : vector<32x256xbf16> to vector<2x16x256xbf16>
    %c241_i32_51 = arith.constant 241 : i32
    %194 = tpu.dynamic_rotate %149 by %c241_i32_51 dim 1 : vector<32x256xf32>, i32 -> vector<32x256xf32>
    %195 = arith.truncf %194 : vector<32x256xf32> to vector<32x256xbf16>
    %196 = arith.andi %6, %12 : vector<1x256xi1>
    %c0_i32_52 = arith.constant 0 : i32
    %197 = arith.sitofp %c0_i32_52 : i32 to bf16
    %198 = vector.shape_cast %196 : vector<1x256xi1> to vector<1x256xi1>
    %199 = vector.broadcast %198 : vector<1x256xi1> to vector<32x256xi1>
    %200 = vector.broadcast %197 : bf16 to vector<32x256xbf16>
    %201 = arith.select %199, %195, %200 : vector<32x256xi1>, vector<32x256xbf16>
    %202 = vector.shape_cast %201 : vector<32x256xbf16> to vector<2x16x256xbf16>
    %c240_i32_53 = arith.constant 240 : i32
    %203 = tpu.dynamic_rotate %149 by %c240_i32_53 dim 1 : vector<32x256xf32>, i32 -> vector<32x256xf32>
    %204 = arith.truncf %203 : vector<32x256xf32> to vector<32x256xbf16>
    %c0_i32_54 = arith.constant 0 : i32
    %205 = arith.sitofp %c0_i32_54 : i32 to bf16
    %206 = vector.shape_cast %6 : vector<1x256xi1> to vector<1x256xi1>
    %207 = vector.broadcast %206 : vector<1x256xi1> to vector<32x256xi1>
    %208 = vector.broadcast %205 : bf16 to vector<32x256xbf16>
    %209 = arith.select %207, %204, %208 : vector<32x256xi1>, vector<32x256xbf16>
    %210 = vector.shape_cast %209 : vector<32x256xbf16> to vector<2x16x256xbf16>
    %c239_i32_55 = arith.constant 239 : i32
    %211 = tpu.dynamic_rotate %149 by %c239_i32_55 dim 1 : vector<32x256xf32>, i32 -> vector<32x256xf32>
    %212 = arith.truncf %211 : vector<32x256xf32> to vector<32x256xbf16>
    %213 = arith.andi %6, %10 : vector<1x256xi1>
    %c0_i32_56 = arith.constant 0 : i32
    %214 = arith.sitofp %c0_i32_56 : i32 to bf16
    %215 = vector.shape_cast %213 : vector<1x256xi1> to vector<1x256xi1>
    %216 = vector.broadcast %215 : vector<1x256xi1> to vector<32x256xi1>
    %217 = vector.broadcast %214 : bf16 to vector<32x256xbf16>
    %218 = arith.select %216, %212, %217 : vector<32x256xi1>, vector<32x256xbf16>
    %219 = vector.shape_cast %218 : vector<32x256xbf16> to vector<2x16x256xbf16>
    %220 = tpu.concatenate %158, %166, %175, %183, %185, %193, %202, %210, %219 in 1 : vector<2x16x256xbf16>, vector<2x16x256xbf16>, vector<2x16x256xbf16>, vector<2x16x256xbf16>, vector<2x16x256xbf16>, vector<2x16x256xbf16>, vector<2x16x256xbf16>, vector<2x16x256xbf16>, vector<2x16x256xbf16> -> vector<2x144x256xbf16>
    %221 = vector.extract_strided_slice %220 {offsets = [0, 0, 0], sizes = [1, 144, 256], strides = [1, 1, 1]} : vector<2x144x256xbf16> to vector<1x144x256xbf16>
    %222 = vector.shape_cast %221 : vector<1x144x256xbf16> to vector<144x256xbf16>
    %cst_57 = arith.constant dense<0.000000e+00> : vector<16x256xf32>
    %223 = tpu.matmul %148, %222, %cst_57 {dimension_numbers = #tpu.dot_dimension_numbers<[1], [0], [0], [1], [0, 0, 1, 1], [], []>} : vector<16x144xbf16>, vector<144x256xbf16>, vector<16x256xf32> -> vector<16x256xf32>
    %224 = vector.extract_strided_slice %220 {offsets = [1, 0, 0], sizes = [1, 144, 256], strides = [1, 1, 1]} : vector<2x144x256xbf16> to vector<1x144x256xbf16>
    %225 = vector.shape_cast %224 : vector<1x144x256xbf16> to vector<144x256xbf16>
    %cst_58 = arith.constant dense<0.000000e+00> : vector<16x256xf32>
    %226 = tpu.matmul %148, %225, %cst_58 {dimension_numbers = #tpu.dot_dimension_numbers<[1], [0], [0], [1], [0, 0, 1, 1], [], []>} : vector<16x144xbf16>, vector<144x256xbf16>, vector<16x256xf32> -> vector<16x256xf32>
    %227 = vector.shape_cast %223 : vector<16x256xf32> to vector<1x16x256xf32>
    %228 = vector.shape_cast %226 : vector<16x256xf32> to vector<1x16x256xf32>
    %229 = tpu.concatenate %227, %228 in 0 : vector<1x16x256xf32>, vector<1x16x256xf32> -> vector<2x16x256xf32>
    %cst_59 = arith.constant dense<0.000000e+00> : vector<2x16xf32>
    %230 = vector.multi_reduction <add>, %229, %cst_59 [2] : vector<2x16x256xf32> to vector<2x16xf32>
    %231 = vector.shape_cast %230 : vector<2x16xf32> to vector<2x16x1xf32>
    %cst_60 = arith.constant dense<0.000000e+00> : vector<16x1xf32>
    %232 = vector.multi_reduction <add>, %231, %cst_60 [0] : vector<2x16x1xf32> to vector<16x1xf32>
    %233 = vector.shape_cast %232 : vector<16x1xf32> to vector<1x16x1xf32>
    %234 = arith.mulf %229, %229 : vector<2x16x256xf32>
    %cst_61 = arith.constant dense<0.000000e+00> : vector<2x16xf32>
    %235 = vector.multi_reduction <add>, %234, %cst_61 [2] : vector<2x16x256xf32> to vector<2x16xf32>
    %236 = vector.shape_cast %235 : vector<2x16xf32> to vector<2x16x1xf32>
    %cst_62 = arith.constant dense<0.000000e+00> : vector<16x1xf32>
    %237 = vector.multi_reduction <add>, %236, %cst_62 [0] : vector<2x16x1xf32> to vector<16x1xf32>
    %238 = vector.shape_cast %237 : vector<16x1xf32> to vector<1x16x1xf32>
    %cst_63 = arith.constant 0.001953125 : f32
    %239 = vector.broadcast %cst_63 : f32 to vector<1x16x1xf32>
    %240 = arith.mulf %233, %239 : vector<1x16x1xf32>
    %cst_64 = arith.constant 0.001953125 : f32
    %241 = vector.broadcast %cst_64 : f32 to vector<1x16x1xf32>
    %242 = arith.mulf %238, %241 : vector<1x16x1xf32>
    %243 = arith.mulf %240, %240 : vector<1x16x1xf32>
    %244 = arith.subf %242, %243 : vector<1x16x1xf32>
    %245 = vector.broadcast %240 : vector<1x16x1xf32> to vector<2x16x256xf32>
    %246 = arith.subf %229, %245 : vector<2x16x256xf32>
    %cst_65 = arith.constant 9.99999974E-6 : f32
    %247 = vector.broadcast %cst_65 : f32 to vector<1x16x1xf32>
    %248 = arith.addf %244, %247 : vector<1x16x1xf32>
    %249 = math.rsqrt %248 : vector<1x16x1xf32>
    %250 = vector.broadcast %249 : vector<1x16x1xf32> to vector<2x16x256xf32>
    %251 = arith.mulf %246, %250 : vector<2x16x256xf32>
    %252 = vector.shape_cast %251 : vector<2x16x256xf32> to vector<32x256xf32>
    %c240_i32_66 = arith.constant 240 : i32
    %253 = tpu.dynamic_rotate %252 by %c240_i32_66 dim 1 : vector<32x256xf32>, i32 -> vector<32x256xf32>
    %cst_67 = arith.constant 0xFF800000 : f32
    %254 = vector.shape_cast %6 : vector<1x256xi1> to vector<1x256xi1>
    %255 = vector.broadcast %254 : vector<1x256xi1> to vector<32x256xi1>
    %256 = vector.broadcast %cst_67 : f32 to vector<32x256xf32>
    %257 = arith.select %255, %253, %256 : vector<32x256xi1>, vector<32x256xf32>
    %258 = arith.maximumf %252, %257 : vector<32x256xf32>
    %c16_i32_68 = arith.constant 16 : i32
    %259 = tpu.dynamic_rotate %252 by %c16_i32_68 dim 1 : vector<32x256xf32>, i32 -> vector<32x256xf32>
    %cst_69 = arith.constant 0xFF800000 : f32
    %260 = vector.shape_cast %8 : vector<1x256xi1> to vector<1x256xi1>
    %261 = vector.broadcast %260 : vector<1x256xi1> to vector<32x256xi1>
    %262 = vector.broadcast %cst_69 : f32 to vector<32x256xf32>
    %263 = arith.select %261, %259, %262 : vector<32x256xi1>, vector<32x256xf32>
    %264 = arith.maximumf %258, %263 : vector<32x256xf32>
    %c255_i32_70 = arith.constant 255 : i32
    %265 = tpu.dynamic_rotate %264 by %c255_i32_70 dim 1 : vector<32x256xf32>, i32 -> vector<32x256xf32>
    %cst_71 = arith.constant 0xFF800000 : f32
    %266 = vector.shape_cast %10 : vector<1x256xi1> to vector<1x256xi1>
    %267 = vector.broadcast %266 : vector<1x256xi1> to vector<32x256xi1>
    %268 = vector.broadcast %cst_71 : f32 to vector<32x256xf32>
    %269 = arith.select %267, %265, %268 : vector<32x256xi1>, vector<32x256xf32>
    %270 = arith.maximumf %264, %269 : vector<32x256xf32>
    %c1_i32_72 = arith.constant 1 : i32
    %271 = tpu.dynamic_rotate %264 by %c1_i32_72 dim 1 : vector<32x256xf32>, i32 -> vector<32x256xf32>
    %cst_73 = arith.constant 0xFF800000 : f32
    %272 = vector.shape_cast %12 : vector<1x256xi1> to vector<1x256xi1>
    %273 = vector.broadcast %272 : vector<1x256xi1> to vector<32x256xi1>
    %274 = vector.broadcast %cst_73 : f32 to vector<32x256xf32>
    %275 = arith.select %273, %271, %274 : vector<32x256xi1>, vector<32x256xf32>
    %276 = arith.maximumf %270, %275 : vector<32x256xf32>
    %277 = vector.shape_cast %276 : vector<32x256xf32> to vector<2x16x256xf32>
    %278 = tpu.concatenate %15, %277 in 1 : vector<2x32x256xf32>, vector<2x16x256xf32> -> vector<2x48x256xf32>
    %c0_74 = arith.constant 0 : index
    %c0_75 = arith.constant 0 : index
    %279 = vector.load %arg5[%c0_74, %c0_75] : memref<128x432xbf16, #tpu.memory_space<vmem>>, vector<128x432xbf16>
    %280 = vector.shape_cast %278 : vector<2x48x256xf32> to vector<96x256xf32>
    %c17_i32_76 = arith.constant 17 : i32
    %281 = tpu.dynamic_rotate %280 by %c17_i32_76 dim 1 : vector<96x256xf32>, i32 -> vector<96x256xf32>
    %282 = arith.truncf %281 : vector<96x256xf32> to vector<96x256xbf16>
    %283 = arith.andi %8, %12 : vector<1x256xi1>
    %c0_i32_77 = arith.constant 0 : i32
    %284 = arith.sitofp %c0_i32_77 : i32 to bf16
    %285 = vector.shape_cast %283 : vector<1x256xi1> to vector<1x256xi1>
    %286 = vector.broadcast %285 : vector<1x256xi1> to vector<96x256xi1>
    %287 = vector.broadcast %284 : bf16 to vector<96x256xbf16>
    %288 = arith.select %286, %282, %287 : vector<96x256xi1>, vector<96x256xbf16>
    %289 = vector.shape_cast %288 : vector<96x256xbf16> to vector<2x48x256xbf16>
    %c16_i32_78 = arith.constant 16 : i32
    %290 = tpu.dynamic_rotate %280 by %c16_i32_78 dim 1 : vector<96x256xf32>, i32 -> vector<96x256xf32>
    %291 = arith.truncf %290 : vector<96x256xf32> to vector<96x256xbf16>
    %c0_i32_79 = arith.constant 0 : i32
    %292 = arith.sitofp %c0_i32_79 : i32 to bf16
    %293 = vector.shape_cast %8 : vector<1x256xi1> to vector<1x256xi1>
    %294 = vector.broadcast %293 : vector<1x256xi1> to vector<96x256xi1>
    %295 = vector.broadcast %292 : bf16 to vector<96x256xbf16>
    %296 = arith.select %294, %291, %295 : vector<96x256xi1>, vector<96x256xbf16>
    %297 = vector.shape_cast %296 : vector<96x256xbf16> to vector<2x48x256xbf16>
    %c15_i32_80 = arith.constant 15 : i32
    %298 = tpu.dynamic_rotate %280 by %c15_i32_80 dim 1 : vector<96x256xf32>, i32 -> vector<96x256xf32>
    %299 = arith.truncf %298 : vector<96x256xf32> to vector<96x256xbf16>
    %300 = arith.andi %8, %10 : vector<1x256xi1>
    %c0_i32_81 = arith.constant 0 : i32
    %301 = arith.sitofp %c0_i32_81 : i32 to bf16
    %302 = vector.shape_cast %300 : vector<1x256xi1> to vector<1x256xi1>
    %303 = vector.broadcast %302 : vector<1x256xi1> to vector<96x256xi1>
    %304 = vector.broadcast %301 : bf16 to vector<96x256xbf16>
    %305 = arith.select %303, %299, %304 : vector<96x256xi1>, vector<96x256xbf16>
    %306 = vector.shape_cast %305 : vector<96x256xbf16> to vector<2x48x256xbf16>
    %c1_i32_82 = arith.constant 1 : i32
    %307 = tpu.dynamic_rotate %280 by %c1_i32_82 dim 1 : vector<96x256xf32>, i32 -> vector<96x256xf32>
    %308 = arith.truncf %307 : vector<96x256xf32> to vector<96x256xbf16>
    %c0_i32_83 = arith.constant 0 : i32
    %309 = arith.sitofp %c0_i32_83 : i32 to bf16
    %310 = vector.shape_cast %12 : vector<1x256xi1> to vector<1x256xi1>
    %311 = vector.broadcast %310 : vector<1x256xi1> to vector<96x256xi1>
    %312 = vector.broadcast %309 : bf16 to vector<96x256xbf16>
    %313 = arith.select %311, %308, %312 : vector<96x256xi1>, vector<96x256xbf16>
    %314 = vector.shape_cast %313 : vector<96x256xbf16> to vector<2x48x256xbf16>
    %315 = arith.truncf %280 : vector<96x256xf32> to vector<96x256xbf16>
    %316 = vector.shape_cast %315 : vector<96x256xbf16> to vector<2x48x256xbf16>
    %c255_i32_84 = arith.constant 255 : i32
    %317 = tpu.dynamic_rotate %280 by %c255_i32_84 dim 1 : vector<96x256xf32>, i32 -> vector<96x256xf32>
    %318 = arith.truncf %317 : vector<96x256xf32> to vector<96x256xbf16>
    %c0_i32_85 = arith.constant 0 : i32
    %319 = arith.sitofp %c0_i32_85 : i32 to bf16
    %320 = vector.shape_cast %10 : vector<1x256xi1> to vector<1x256xi1>
    %321 = vector.broadcast %320 : vector<1x256xi1> to vector<96x256xi1>
    %322 = vector.broadcast %319 : bf16 to vector<96x256xbf16>
    %323 = arith.select %321, %318, %322 : vector<96x256xi1>, vector<96x256xbf16>
    %324 = vector.shape_cast %323 : vector<96x256xbf16> to vector<2x48x256xbf16>
    %c241_i32_86 = arith.constant 241 : i32
    %325 = tpu.dynamic_rotate %280 by %c241_i32_86 dim 1 : vector<96x256xf32>, i32 -> vector<96x256xf32>
    %326 = arith.truncf %325 : vector<96x256xf32> to vector<96x256xbf16>
    %327 = arith.andi %6, %12 : vector<1x256xi1>
    %c0_i32_87 = arith.constant 0 : i32
    %328 = arith.sitofp %c0_i32_87 : i32 to bf16
    %329 = vector.shape_cast %327 : vector<1x256xi1> to vector<1x256xi1>
    %330 = vector.broadcast %329 : vector<1x256xi1> to vector<96x256xi1>
    %331 = vector.broadcast %328 : bf16 to vector<96x256xbf16>
    %332 = arith.select %330, %326, %331 : vector<96x256xi1>, vector<96x256xbf16>
    %333 = vector.shape_cast %332 : vector<96x256xbf16> to vector<2x48x256xbf16>
    %c240_i32_88 = arith.constant 240 : i32
    %334 = tpu.dynamic_rotate %280 by %c240_i32_88 dim 1 : vector<96x256xf32>, i32 -> vector<96x256xf32>
    %335 = arith.truncf %334 : vector<96x256xf32> to vector<96x256xbf16>
    %c0_i32_89 = arith.constant 0 : i32
    %336 = arith.sitofp %c0_i32_89 : i32 to bf16
    %337 = vector.shape_cast %6 : vector<1x256xi1> to vector<1x256xi1>
    %338 = vector.broadcast %337 : vector<1x256xi1> to vector<96x256xi1>
    %339 = vector.broadcast %336 : bf16 to vector<96x256xbf16>
    %340 = arith.select %338, %335, %339 : vector<96x256xi1>, vector<96x256xbf16>
    %341 = vector.shape_cast %340 : vector<96x256xbf16> to vector<2x48x256xbf16>
    %c239_i32_90 = arith.constant 239 : i32
    %342 = tpu.dynamic_rotate %280 by %c239_i32_90 dim 1 : vector<96x256xf32>, i32 -> vector<96x256xf32>
    %343 = arith.truncf %342 : vector<96x256xf32> to vector<96x256xbf16>
    %344 = arith.andi %6, %10 : vector<1x256xi1>
    %c0_i32_91 = arith.constant 0 : i32
    %345 = arith.sitofp %c0_i32_91 : i32 to bf16
    %346 = vector.shape_cast %344 : vector<1x256xi1> to vector<1x256xi1>
    %347 = vector.broadcast %346 : vector<1x256xi1> to vector<96x256xi1>
    %348 = vector.broadcast %345 : bf16 to vector<96x256xbf16>
    %349 = arith.select %347, %343, %348 : vector<96x256xi1>, vector<96x256xbf16>
    %350 = vector.shape_cast %349 : vector<96x256xbf16> to vector<2x48x256xbf16>
    %351 = tpu.concatenate %289, %297, %306, %314, %316, %324, %333, %341, %350 in 1 : vector<2x48x256xbf16>, vector<2x48x256xbf16>, vector<2x48x256xbf16>, vector<2x48x256xbf16>, vector<2x48x256xbf16>, vector<2x48x256xbf16>, vector<2x48x256xbf16>, vector<2x48x256xbf16>, vector<2x48x256xbf16> -> vector<2x432x256xbf16>
    %352 = vector.extract_strided_slice %351 {offsets = [0, 0, 0], sizes = [1, 432, 256], strides = [1, 1, 1]} : vector<2x432x256xbf16> to vector<1x432x256xbf16>
    %353 = vector.shape_cast %352 : vector<1x432x256xbf16> to vector<432x256xbf16>
    %cst_92 = arith.constant dense<0.000000e+00> : vector<128x256xf32>
    %354 = tpu.matmul %279, %353, %cst_92 {dimension_numbers = #tpu.dot_dimension_numbers<[1], [0], [0], [1], [0, 0, 1, 1], [], []>} : vector<128x432xbf16>, vector<432x256xbf16>, vector<128x256xf32> -> vector<128x256xf32>
    %355 = vector.extract_strided_slice %351 {offsets = [1, 0, 0], sizes = [1, 432, 256], strides = [1, 1, 1]} : vector<2x432x256xbf16> to vector<1x432x256xbf16>
    %356 = vector.shape_cast %355 : vector<1x432x256xbf16> to vector<432x256xbf16>
    %cst_93 = arith.constant dense<0.000000e+00> : vector<128x256xf32>
    %357 = tpu.matmul %279, %356, %cst_93 {dimension_numbers = #tpu.dot_dimension_numbers<[1], [0], [0], [1], [0, 0, 1, 1], [], []>} : vector<128x432xbf16>, vector<432x256xbf16>, vector<128x256xf32> -> vector<128x256xf32>
    %358 = vector.shape_cast %354 : vector<128x256xf32> to vector<1x128x256xf32>
    %359 = vector.shape_cast %357 : vector<128x256xf32> to vector<1x128x256xf32>
    %360 = tpu.concatenate %358, %359 in 0 : vector<1x128x256xf32>, vector<1x128x256xf32> -> vector<2x128x256xf32>
    %cst_94 = arith.constant dense<0.000000e+00> : vector<2x128xf32>
    %361 = vector.multi_reduction <add>, %360, %cst_94 [2] : vector<2x128x256xf32> to vector<2x128xf32>
    %362 = vector.shape_cast %361 : vector<2x128xf32> to vector<2x128x1xf32>
    %cst_95 = arith.constant dense<0.000000e+00> : vector<128x1xf32>
    %363 = vector.multi_reduction <add>, %362, %cst_95 [0] : vector<2x128x1xf32> to vector<128x1xf32>
    %364 = vector.shape_cast %363 : vector<128x1xf32> to vector<1x128x1xf32>
    %365 = arith.mulf %360, %360 : vector<2x128x256xf32>
    %cst_96 = arith.constant dense<0.000000e+00> : vector<2x128xf32>
    %366 = vector.multi_reduction <add>, %365, %cst_96 [2] : vector<2x128x256xf32> to vector<2x128xf32>
    %367 = vector.shape_cast %366 : vector<2x128xf32> to vector<2x128x1xf32>
    %cst_97 = arith.constant dense<0.000000e+00> : vector<128x1xf32>
    %368 = vector.multi_reduction <add>, %367, %cst_97 [0] : vector<2x128x1xf32> to vector<128x1xf32>
    %369 = vector.shape_cast %368 : vector<128x1xf32> to vector<1x128x1xf32>
    %cst_98 = arith.constant 0.001953125 : f32
    %370 = vector.broadcast %cst_98 : f32 to vector<1x128x1xf32>
    %371 = arith.mulf %364, %370 : vector<1x128x1xf32>
    %cst_99 = arith.constant 0.001953125 : f32
    %372 = vector.broadcast %cst_99 : f32 to vector<1x128x1xf32>
    %373 = arith.mulf %369, %372 : vector<1x128x1xf32>
    %374 = arith.mulf %371, %371 : vector<1x128x1xf32>
    %375 = arith.subf %373, %374 : vector<1x128x1xf32>
    %376 = vector.broadcast %371 : vector<1x128x1xf32> to vector<2x128x256xf32>
    %377 = arith.subf %360, %376 : vector<2x128x256xf32>
    %cst_100 = arith.constant 9.99999974E-6 : f32
    %378 = vector.broadcast %cst_100 : f32 to vector<1x128x1xf32>
    %379 = arith.addf %375, %378 : vector<1x128x1xf32>
    %380 = math.rsqrt %379 : vector<1x128x1xf32>
    %381 = vector.broadcast %380 : vector<1x128x1xf32> to vector<2x128x256xf32>
    %382 = arith.mulf %377, %381 : vector<2x128x256xf32>
    %383 = vector.shape_cast %382 : vector<2x128x256xf32> to vector<256x256xf32>
    %c240_i32_101 = arith.constant 240 : i32
    %384 = tpu.dynamic_rotate %383 by %c240_i32_101 dim 1 : vector<256x256xf32>, i32 -> vector<256x256xf32>
    %cst_102 = arith.constant 0xFF800000 : f32
    %385 = vector.shape_cast %6 : vector<1x256xi1> to vector<1x256xi1>
    %386 = vector.broadcast %385 : vector<1x256xi1> to vector<256x256xi1>
    %387 = vector.broadcast %cst_102 : f32 to vector<256x256xf32>
    %388 = arith.select %386, %384, %387 : vector<256x256xi1>, vector<256x256xf32>
    %389 = arith.maximumf %383, %388 : vector<256x256xf32>
    %c16_i32_103 = arith.constant 16 : i32
    %390 = tpu.dynamic_rotate %383 by %c16_i32_103 dim 1 : vector<256x256xf32>, i32 -> vector<256x256xf32>
    %cst_104 = arith.constant 0xFF800000 : f32
    %391 = vector.shape_cast %8 : vector<1x256xi1> to vector<1x256xi1>
    %392 = vector.broadcast %391 : vector<1x256xi1> to vector<256x256xi1>
    %393 = vector.broadcast %cst_104 : f32 to vector<256x256xf32>
    %394 = arith.select %392, %390, %393 : vector<256x256xi1>, vector<256x256xf32>
    %395 = arith.maximumf %389, %394 : vector<256x256xf32>
    %c255_i32_105 = arith.constant 255 : i32
    %396 = tpu.dynamic_rotate %395 by %c255_i32_105 dim 1 : vector<256x256xf32>, i32 -> vector<256x256xf32>
    %cst_106 = arith.constant 0xFF800000 : f32
    %397 = vector.shape_cast %10 : vector<1x256xi1> to vector<1x256xi1>
    %398 = vector.broadcast %397 : vector<1x256xi1> to vector<256x256xi1>
    %399 = vector.broadcast %cst_106 : f32 to vector<256x256xf32>
    %400 = arith.select %398, %396, %399 : vector<256x256xi1>, vector<256x256xf32>
    %401 = arith.maximumf %395, %400 : vector<256x256xf32>
    %c1_i32_107 = arith.constant 1 : i32
    %402 = tpu.dynamic_rotate %395 by %c1_i32_107 dim 1 : vector<256x256xf32>, i32 -> vector<256x256xf32>
    %cst_108 = arith.constant 0xFF800000 : f32
    %403 = vector.shape_cast %12 : vector<1x256xi1> to vector<1x256xi1>
    %404 = vector.broadcast %403 : vector<1x256xi1> to vector<256x256xi1>
    %405 = vector.broadcast %cst_108 : f32 to vector<256x256xf32>
    %406 = arith.select %404, %402, %405 : vector<256x256xi1>, vector<256x256xf32>
    %407 = arith.maximumf %401, %406 : vector<256x256xf32>
    %408 = vector.shape_cast %407 : vector<256x256xf32> to vector<2x128x256xf32>
    %409 = vector.extract_strided_slice %408 {offsets = [0, 0, 0], sizes = [2, 32, 256], strides = [1, 1, 1]} : vector<2x128x256xf32> to vector<2x32x256xf32>
    %cst_109 = arith.constant 5.000000e-01 : f32
    %410 = vector.broadcast %cst_109 : f32 to vector<2x32x256xf32>
    %411 = arith.mulf %409, %410 : vector<2x32x256xf32>
    %412 = math.tanh %411 : vector<2x32x256xf32>
    %cst_110 = arith.constant 5.000000e-01 : f32
    %413 = vector.broadcast %cst_110 : f32 to vector<2x32x256xf32>
    %414 = arith.mulf %412, %413 : vector<2x32x256xf32>
    %cst_111 = arith.constant 5.000000e-01 : f32
    %415 = vector.broadcast %cst_111 : f32 to vector<2x32x256xf32>
    %416 = arith.addf %414, %415 : vector<2x32x256xf32>
    %417 = vector.extract_strided_slice %408 {offsets = [0, 32, 0], sizes = [2, 32, 256], strides = [1, 1, 1]} : vector<2x128x256xf32> to vector<2x32x256xf32>
    %cst_112 = arith.constant 5.000000e-01 : f32
    %418 = vector.broadcast %cst_112 : f32 to vector<2x32x256xf32>
    %419 = arith.mulf %417, %418 : vector<2x32x256xf32>
    %420 = math.tanh %419 : vector<2x32x256xf32>
    %cst_113 = arith.constant 5.000000e-01 : f32
    %421 = vector.broadcast %cst_113 : f32 to vector<2x32x256xf32>
    %422 = arith.mulf %420, %421 : vector<2x32x256xf32>
    %cst_114 = arith.constant 5.000000e-01 : f32
    %423 = vector.broadcast %cst_114 : f32 to vector<2x32x256xf32>
    %424 = arith.addf %422, %423 : vector<2x32x256xf32>
    %425 = vector.extract_strided_slice %408 {offsets = [0, 64, 0], sizes = [2, 32, 256], strides = [1, 1, 1]} : vector<2x128x256xf32> to vector<2x32x256xf32>
    %426 = math.tanh %425 : vector<2x32x256xf32>
    %427 = vector.extract_strided_slice %408 {offsets = [0, 96, 0], sizes = [2, 32, 256], strides = [1, 1, 1]} : vector<2x128x256xf32> to vector<2x32x256xf32>
    %cst_115 = arith.constant 5.000000e-01 : f32
    %428 = vector.broadcast %cst_115 : f32 to vector<2x32x256xf32>
    %429 = arith.mulf %427, %428 : vector<2x32x256xf32>
    %430 = math.tanh %429 : vector<2x32x256xf32>
    %cst_116 = arith.constant 5.000000e-01 : f32
    %431 = vector.broadcast %cst_116 : f32 to vector<2x32x256xf32>
    %432 = arith.mulf %430, %431 : vector<2x32x256xf32>
    %cst_117 = arith.constant 5.000000e-01 : f32
    %433 = vector.broadcast %cst_117 : f32 to vector<2x32x256xf32>
    %434 = arith.addf %432, %433 : vector<2x32x256xf32>
    %435 = arith.mulf %14, %416 : vector<2x32x256xf32>
    %436 = arith.mulf %424, %426 : vector<2x32x256xf32>
    %437 = arith.addf %435, %436 : vector<2x32x256xf32>
    %438 = math.tanh %437 : vector<2x32x256xf32>
    %439 = arith.mulf %438, %434 : vector<2x32x256xf32>
    %c0_118 = arith.constant 0 : index
    %c0_119 = arith.constant 0 : index
    %c0_120 = arith.constant 0 : index
    %440 = vector.load %arg8[%c0_118, %c0_119, %c0_120] : memref<2x32x256xf32, #tpu.memory_space<vmem>>, vector<2x32x256xf32>
    tpu.vector_store %arg8[%c0_118, %c0_119, %c0_120], %437 {strides = array<i32>} : memref<2x32x256xf32, #tpu.memory_space<vmem>>, vector<2x32x256xf32>,
    %c0_121 = arith.constant 0 : index
    %c0_122 = arith.constant 0 : index
    %c0_123 = arith.constant 0 : index
    %441 = vector.load %arg9[%c0_121, %c0_122, %c0_123] : memref<2x32x256xf32, #tpu.memory_space<vmem>>, vector<2x32x256xf32>
    tpu.vector_store %arg9[%c0_121, %c0_122, %c0_123], %439 {strides = array<i32>} : memref<2x32x256xf32, #tpu.memory_space<vmem>>, vector<2x32x256xf32>,
    %c0_124 = arith.constant 0 : index
    %c0_125 = arith.constant 0 : index
    %442 = vector.load %arg6[%c0_124, %c0_125] : memref<2x288xbf16, #tpu.memory_space<vmem>>, vector<2x288xbf16>
    %443 = vector.shape_cast %439 : vector<2x32x256xf32> to vector<64x256xf32>
    %c17_i32_126 = arith.constant 17 : i32
    %444 = tpu.dynamic_rotate %443 by %c17_i32_126 dim 1 : vector<64x256xf32>, i32 -> vector<64x256xf32>
    %445 = arith.truncf %444 : vector<64x256xf32> to vector<64x256xbf16>
    %446 = arith.andi %8, %12 : vector<1x256xi1>
    %c0_i32_127 = arith.constant 0 : i32
    %447 = arith.sitofp %c0_i32_127 : i32 to bf16
    %448 = vector.shape_cast %446 : vector<1x256xi1> to vector<1x256xi1>
    %449 = vector.broadcast %448 : vector<1x256xi1> to vector<64x256xi1>
    %450 = vector.broadcast %447 : bf16 to vector<64x256xbf16>
    %451 = arith.select %449, %445, %450 : vector<64x256xi1>, vector<64x256xbf16>
    %452 = vector.shape_cast %451 : vector<64x256xbf16> to vector<2x32x256xbf16>
    %c16_i32_128 = arith.constant 16 : i32
    %453 = tpu.dynamic_rotate %443 by %c16_i32_128 dim 1 : vector<64x256xf32>, i32 -> vector<64x256xf32>
    %454 = arith.truncf %453 : vector<64x256xf32> to vector<64x256xbf16>
    %c0_i32_129 = arith.constant 0 : i32
    %455 = arith.sitofp %c0_i32_129 : i32 to bf16
    %456 = vector.shape_cast %8 : vector<1x256xi1> to vector<1x256xi1>
    %457 = vector.broadcast %456 : vector<1x256xi1> to vector<64x256xi1>
    %458 = vector.broadcast %455 : bf16 to vector<64x256xbf16>
    %459 = arith.select %457, %454, %458 : vector<64x256xi1>, vector<64x256xbf16>
    %460 = vector.shape_cast %459 : vector<64x256xbf16> to vector<2x32x256xbf16>
    %c15_i32_130 = arith.constant 15 : i32
    %461 = tpu.dynamic_rotate %443 by %c15_i32_130 dim 1 : vector<64x256xf32>, i32 -> vector<64x256xf32>
    %462 = arith.truncf %461 : vector<64x256xf32> to vector<64x256xbf16>
    %463 = arith.andi %8, %10 : vector<1x256xi1>
    %c0_i32_131 = arith.constant 0 : i32
    %464 = arith.sitofp %c0_i32_131 : i32 to bf16
    %465 = vector.shape_cast %463 : vector<1x256xi1> to vector<1x256xi1>
    %466 = vector.broadcast %465 : vector<1x256xi1> to vector<64x256xi1>
    %467 = vector.broadcast %464 : bf16 to vector<64x256xbf16>
    %468 = arith.select %466, %462, %467 : vector<64x256xi1>, vector<64x256xbf16>
    %469 = vector.shape_cast %468 : vector<64x256xbf16> to vector<2x32x256xbf16>
    %c1_i32_132 = arith.constant 1 : i32
    %470 = tpu.dynamic_rotate %443 by %c1_i32_132 dim 1 : vector<64x256xf32>, i32 -> vector<64x256xf32>
    %471 = arith.truncf %470 : vector<64x256xf32> to vector<64x256xbf16>
    %c0_i32_133 = arith.constant 0 : i32
    %472 = arith.sitofp %c0_i32_133 : i32 to bf16
    %473 = vector.shape_cast %12 : vector<1x256xi1> to vector<1x256xi1>
    %474 = vector.broadcast %473 : vector<1x256xi1> to vector<64x256xi1>
    %475 = vector.broadcast %472 : bf16 to vector<64x256xbf16>
    %476 = arith.select %474, %471, %475 : vector<64x256xi1>, vector<64x256xbf16>
    %477 = vector.shape_cast %476 : vector<64x256xbf16> to vector<2x32x256xbf16>
    %478 = arith.truncf %443 : vector<64x256xf32> to vector<64x256xbf16>
    %479 = vector.shape_cast %478 : vector<64x256xbf16> to vector<2x32x256xbf16>
    %c255_i32_134 = arith.constant 255 : i32
    %480 = tpu.dynamic_rotate %443 by %c255_i32_134 dim 1 : vector<64x256xf32>, i32 -> vector<64x256xf32>
    %481 = arith.truncf %480 : vector<64x256xf32> to vector<64x256xbf16>
    %c0_i32_135 = arith.constant 0 : i32
    %482 = arith.sitofp %c0_i32_135 : i32 to bf16
    %483 = vector.shape_cast %10 : vector<1x256xi1> to vector<1x256xi1>
    %484 = vector.broadcast %483 : vector<1x256xi1> to vector<64x256xi1>
    %485 = vector.broadcast %482 : bf16 to vector<64x256xbf16>
    %486 = arith.select %484, %481, %485 : vector<64x256xi1>, vector<64x256xbf16>
    %487 = vector.shape_cast %486 : vector<64x256xbf16> to vector<2x32x256xbf16>
    %c241_i32_136 = arith.constant 241 : i32
    %488 = tpu.dynamic_rotate %443 by %c241_i32_136 dim 1 : vector<64x256xf32>, i32 -> vector<64x256xf32>
    %489 = arith.truncf %488 : vector<64x256xf32> to vector<64x256xbf16>
    %490 = arith.andi %6, %12 : vector<1x256xi1>
    %c0_i32_137 = arith.constant 0 : i32
    %491 = arith.sitofp %c0_i32_137 : i32 to bf16
    %492 = vector.shape_cast %490 : vector<1x256xi1> to vector<1x256xi1>
    %493 = vector.broadcast %492 : vector<1x256xi1> to vector<64x256xi1>
    %494 = vector.broadcast %491 : bf16 to vector<64x256xbf16>
    %495 = arith.select %493, %489, %494 : vector<64x256xi1>, vector<64x256xbf16>
    %496 = vector.shape_cast %495 : vector<64x256xbf16> to vector<2x32x256xbf16>
    %c240_i32_138 = arith.constant 240 : i32
    %497 = tpu.dynamic_rotate %443 by %c240_i32_138 dim 1 : vector<64x256xf32>, i32 -> vector<64x256xf32>
    %498 = arith.truncf %497 : vector<64x256xf32> to vector<64x256xbf16>
    %c0_i32_139 = arith.constant 0 : i32
    %499 = arith.sitofp %c0_i32_139 : i32 to bf16
    %500 = vector.shape_cast %6 : vector<1x256xi1> to vector<1x256xi1>
    %501 = vector.broadcast %500 : vector<1x256xi1> to vector<64x256xi1>
    %502 = vector.broadcast %499 : bf16 to vector<64x256xbf16>
    %503 = arith.select %501, %498, %502 : vector<64x256xi1>, vector<64x256xbf16>
    %504 = vector.shape_cast %503 : vector<64x256xbf16> to vector<2x32x256xbf16>
    %c239_i32_140 = arith.constant 239 : i32
    %505 = tpu.dynamic_rotate %443 by %c239_i32_140 dim 1 : vector<64x256xf32>, i32 -> vector<64x256xf32>
    %506 = arith.truncf %505 : vector<64x256xf32> to vector<64x256xbf16>
    %507 = arith.andi %6, %10 : vector<1x256xi1>
    %c0_i32_141 = arith.constant 0 : i32
    %508 = arith.sitofp %c0_i32_141 : i32 to bf16
    %509 = vector.shape_cast %507 : vector<1x256xi1> to vector<1x256xi1>
    %510 = vector.broadcast %509 : vector<1x256xi1> to vector<64x256xi1>
    %511 = vector.broadcast %508 : bf16 to vector<64x256xbf16>
    %512 = arith.select %510, %506, %511 : vector<64x256xi1>, vector<64x256xbf16>
    %513 = vector.shape_cast %512 : vector<64x256xbf16> to vector<2x32x256xbf16>
    %514 = tpu.concatenate %452, %460, %469, %477, %479, %487, %496, %504, %513 in 1 : vector<2x32x256xbf16>, vector<2x32x256xbf16>, vector<2x32x256xbf16>, vector<2x32x256xbf16>, vector<2x32x256xbf16>, vector<2x32x256xbf16>, vector<2x32x256xbf16>, vector<2x32x256xbf16>, vector<2x32x256xbf16> -> vector<2x288x256xbf16>
    %515 = vector.extract_strided_slice %514 {offsets = [0, 0, 0], sizes = [1, 288, 256], strides = [1, 1, 1]} : vector<2x288x256xbf16> to vector<1x288x256xbf16>
    %516 = vector.shape_cast %515 : vector<1x288x256xbf16> to vector<288x256xbf16>
    %cst_142 = arith.constant dense<0.000000e+00> : vector<2x256xf32>
    %517 = tpu.matmul %442, %516, %cst_142 {dimension_numbers = #tpu.dot_dimension_numbers<[1], [0], [0], [1], [0, 0, 1, 1], [], []>} : vector<2x288xbf16>, vector<288x256xbf16>, vector<2x256xf32> -> vector<2x256xf32>
    %518 = vector.extract_strided_slice %514 {offsets = [1, 0, 0], sizes = [1, 288, 256], strides = [1, 1, 1]} : vector<2x288x256xbf16> to vector<1x288x256xbf16>
    %519 = vector.shape_cast %518 : vector<1x288x256xbf16> to vector<288x256xbf16>
    %cst_143 = arith.constant dense<0.000000e+00> : vector<2x256xf32>
    %520 = tpu.matmul %442, %519, %cst_143 {dimension_numbers = #tpu.dot_dimension_numbers<[1], [0], [0], [1], [0, 0, 1, 1], [], []>} : vector<2x288xbf16>, vector<288x256xbf16>, vector<2x256xf32> -> vector<2x256xf32>
    %521 = vector.shape_cast %517 : vector<2x256xf32> to vector<1x2x256xf32>
    %522 = vector.shape_cast %520 : vector<2x256xf32> to vector<1x2x256xf32>
    %523 = tpu.concatenate %521, %522 in 0 : vector<1x2x256xf32>, vector<1x2x256xf32> -> vector<2x2x256xf32>
    %cst_144 = arith.constant dense<0.000000e+00> : vector<2x2xf32>
    %524 = vector.multi_reduction <add>, %523, %cst_144 [2] : vector<2x2x256xf32> to vector<2x2xf32>
    %525 = vector.shape_cast %524 : vector<2x2xf32> to vector<2x2x1xf32>
    %cst_145 = arith.constant dense<0.000000e+00> : vector<2x1xf32>
    %526 = vector.multi_reduction <add>, %525, %cst_145 [0] : vector<2x2x1xf32> to vector<2x1xf32>
    %527 = vector.shape_cast %526 : vector<2x1xf32> to vector<1x2x1xf32>
    %528 = arith.mulf %523, %523 : vector<2x2x256xf32>
    %cst_146 = arith.constant dense<0.000000e+00> : vector<2x2xf32>
    %529 = vector.multi_reduction <add>, %528, %cst_146 [2] : vector<2x2x256xf32> to vector<2x2xf32>
    %530 = vector.shape_cast %529 : vector<2x2xf32> to vector<2x2x1xf32>
    %cst_147 = arith.constant dense<0.000000e+00> : vector<2x1xf32>
    %531 = vector.multi_reduction <add>, %530, %cst_147 [0] : vector<2x2x1xf32> to vector<2x1xf32>
    %532 = vector.shape_cast %531 : vector<2x1xf32> to vector<1x2x1xf32>
    %cst_148 = arith.constant 0.001953125 : f32
    %533 = vector.broadcast %cst_148 : f32 to vector<1x2x1xf32>
    %534 = arith.mulf %527, %533 : vector<1x2x1xf32>
    %cst_149 = arith.constant 0.001953125 : f32
    %535 = vector.broadcast %cst_149 : f32 to vector<1x2x1xf32>
    %536 = arith.mulf %532, %535 : vector<1x2x1xf32>
    %537 = arith.mulf %534, %534 : vector<1x2x1xf32>
    %538 = arith.subf %536, %537 : vector<1x2x1xf32>
    %539 = vector.broadcast %534 : vector<1x2x1xf32> to vector<2x2x256xf32>
    %540 = arith.subf %523, %539 : vector<2x2x256xf32>
    %cst_150 = arith.constant 9.99999974E-6 : f32
    %541 = vector.broadcast %cst_150 : f32 to vector<1x2x1xf32>
    %542 = arith.addf %538, %541 : vector<1x2x1xf32>
    %543 = math.rsqrt %542 : vector<1x2x1xf32>
    %544 = vector.broadcast %543 : vector<1x2x1xf32> to vector<2x2x256xf32>
    %545 = arith.mulf %540, %544 : vector<2x2x256xf32>
    %546 = vector.shape_cast %545 : vector<2x2x256xf32> to vector<4x256xf32>
    %c240_i32_151 = arith.constant 240 : i32
    %547 = tpu.dynamic_rotate %546 by %c240_i32_151 dim 1 : vector<4x256xf32>, i32 -> vector<4x256xf32>
    %cst_152 = arith.constant 0xFF800000 : f32
    %548 = vector.shape_cast %6 : vector<1x256xi1> to vector<1x256xi1>
    %549 = vector.broadcast %548 : vector<1x256xi1> to vector<4x256xi1>
    %550 = vector.broadcast %cst_152 : f32 to vector<4x256xf32>
    %551 = arith.select %549, %547, %550 : vector<4x256xi1>, vector<4x256xf32>
    %552 = arith.maximumf %546, %551 : vector<4x256xf32>
    %c16_i32_153 = arith.constant 16 : i32
    %553 = tpu.dynamic_rotate %546 by %c16_i32_153 dim 1 : vector<4x256xf32>, i32 -> vector<4x256xf32>
    %cst_154 = arith.constant 0xFF800000 : f32
    %554 = vector.shape_cast %8 : vector<1x256xi1> to vector<1x256xi1>
    %555 = vector.broadcast %554 : vector<1x256xi1> to vector<4x256xi1>
    %556 = vector.broadcast %cst_154 : f32 to vector<4x256xf32>
    %557 = arith.select %555, %553, %556 : vector<4x256xi1>, vector<4x256xf32>
    %558 = arith.maximumf %552, %557 : vector<4x256xf32>
    %c255_i32_155 = arith.constant 255 : i32
    %559 = tpu.dynamic_rotate %558 by %c255_i32_155 dim 1 : vector<4x256xf32>, i32 -> vector<4x256xf32>
    %cst_156 = arith.constant 0xFF800000 : f32
    %560 = vector.shape_cast %10 : vector<1x256xi1> to vector<1x256xi1>
    %561 = vector.broadcast %560 : vector<1x256xi1> to vector<4x256xi1>
    %562 = vector.broadcast %cst_156 : f32 to vector<4x256xf32>
    %563 = arith.select %561, %559, %562 : vector<4x256xi1>, vector<4x256xf32>
    %564 = arith.maximumf %558, %563 : vector<4x256xf32>
    %c1_i32_157 = arith.constant 1 : i32
    %565 = tpu.dynamic_rotate %558 by %c1_i32_157 dim 1 : vector<4x256xf32>, i32 -> vector<4x256xf32>
    %cst_158 = arith.constant 0xFF800000 : f32
    %566 = vector.shape_cast %12 : vector<1x256xi1> to vector<1x256xi1>
    %567 = vector.broadcast %566 : vector<1x256xi1> to vector<4x256xi1>
    %568 = vector.broadcast %cst_158 : f32 to vector<4x256xf32>
    %569 = arith.select %567, %565, %568 : vector<4x256xi1>, vector<4x256xf32>
    %570 = arith.maximumf %564, %569 : vector<4x256xf32>
    %571 = vector.shape_cast %570 : vector<4x256xf32> to vector<2x2x256xf32>
    %572 = vector.extract_strided_slice %571 {offsets = [0, 0, 0], sizes = [2, 1, 256], strides = [1, 1, 1]} : vector<2x2x256xf32> to vector<2x1x256xf32>
    %573 = vector.extract_strided_slice %571 {offsets = [0, 1, 0], sizes = [2, 1, 256], strides = [1, 1, 1]} : vector<2x2x256xf32> to vector<2x1x256xf32>
    %574 = arith.subf %572, %573 : vector<2x1x256xf32>
    %cst_159 = arith.constant 5.000000e-01 : f32
    %575 = vector.broadcast %cst_159 : f32 to vector<2x1x256xf32>
    %576 = arith.mulf %574, %575 : vector<2x1x256xf32>
    %577 = math.tanh %576 : vector<2x1x256xf32>
    %cst_160 = arith.constant 5.000000e-01 : f32
    %578 = vector.broadcast %cst_160 : f32 to vector<2x1x256xf32>
    %579 = arith.mulf %577, %578 : vector<2x1x256xf32>
    %cst_161 = arith.constant 5.000000e-01 : f32
    %580 = vector.broadcast %cst_161 : f32 to vector<2x1x256xf32>
    %581 = arith.addf %579, %580 : vector<2x1x256xf32>
    %c0_162 = arith.constant 0 : index
    %c0_163 = arith.constant 0 : index
    %c0_164 = arith.constant 0 : index
    %582 = vector.load %arg7[%c0_162, %c0_163, %c0_164] : memref<1x2x256xf32, #tpu.memory_space<vmem>>, vector<1x1x256xf32>
    %c0_165 = arith.constant 0 : index
    %c1 = arith.constant 1 : index
    %c0_166 = arith.constant 0 : index
    %583 = vector.load %arg7[%c0_165, %c1, %c0_166] : memref<1x2x256xf32, #tpu.memory_space<vmem>>, vector<1x1x256xf32>
    %584 = vector.broadcast %582 : vector<1x1x256xf32> to vector<2x1x256xf32>
    %585 = arith.subf %584, %581 : vector<2x1x256xf32>
    %586 = vector.broadcast %583 : vector<1x1x256xf32> to vector<2x1x256xf32>
    %587 = arith.addf %586, %581 : vector<2x1x256xf32>
    %588 = tpu.concatenate %585, %587 in 1 : vector<2x1x256xf32>, vector<2x1x256xf32> -> vector<2x2x256xf32>
    %c0_167 = arith.constant 0 : index
    %c0_168 = arith.constant 0 : index
    %c0_169 = arith.constant 0 : index
    %589 = vector.load %arg10[%c0_167, %c0_168, %c0_169] : memref<2x2x256xf32, #tpu.memory_space<vmem>>, vector<2x2x256xf32>
    tpu.vector_store %arg10[%c0_167, %c0_168, %c0_169], %588 {strides = array<i32>} : memref<2x2x256xf32, #tpu.memory_space<vmem>>, vector<2x2x256xf32>,
    return
  }
}

</mosaic_0001>

<bundles_post_ra>
// kernel: a_call__.1
= control target key start
LH: loop header
LB: loop body
LE: loop exit
PB: predicated region body
PF: predicated region fallthrough
CT: control target
= control target key end

     0   :  { %v35_v0 = vlaneseq  ;;  %v8153_v1 = vmov 1983009808   ;;  %v15969_v6 = vmov 0   ;;  %s8155_s15 = smov 127   ;;  %s8156_s16 = smov 16   ;;  %v16410_v20 = vmov 0  ;;  %s15935_s0 = inlined_call_operand.vmem [shape: f32[2,2,256], index: 0, kind: input, shape index: {}]   ;;  %s15936_s3 = inlined_call_operand.vmem [shape: bf16[16,18], index: 3, kind: input, shape index: {}]   ;;  %s15937_s4 = inlined_call_operand.vmem [shape: bf16[16,144], index: 4, kind: input, shape index: {}]   ;;  %s15938_s2 = inlined_call_operand.vmem [shape: f32[2,32,256], index: 2, kind: input, shape index: {}]   ;;  %s15939_s5 = inlined_call_operand.vmem [shape: bf16[128,432], index: 5, kind: input, shape index: {}]   ;;  %s15940_s1 = inlined_call_operand.vmem [shape: f32[2,32,256], index: 1, kind: input, shape index: {}]   ;;  %s15941_s8 = inlined_call_operand.vmem [shape: f32[2,32,256], index: 8, kind: output, shape index: {0}]   ;;  %s15942_s9 = inlined_call_operand.vmem [shape: f32[2,32,256], index: 9, kind: output, shape index: {1}]   ;;  %s15943_s6 = inlined_call_operand.vmem [shape: bf16[2,288], index: 6, kind: input, shape index: {}]   ;;  %s15944_s7 = inlined_call_operand.vmem [shape: f32[1,2,256], index: 7, kind: input, shape index: {}]   ;;  %s15945_s10 = inlined_call_operand.vmem [shape: f32[2,2,256], index: 10, kind: output, shape index: {2}]  }
   0x1   :  { %v90_v2 = vunpack.c.l.s4 %v8153_v1  ;;  %v8152_v4 = vld.sshfl [vmem:[%s15935_s0] sm:$0xff pattern:$0x76325410]  ;;  %1088 = vmatprep.mubr.bf16.mxu0 %v15969_v6  ;;  %1137 = vmatprep.mubr.bf16.mxu1 %v15969_v6  ;;  %s8157_s17 = smov 1   ;;  %s8158_s0 = smov 17   ;;  %v16414_v22 = vmov 0 }
   0x2   :  { %v8219_v3 = vshrl.u32 %v35_v0, 7  ;;  %v96_v8 = vcombine.high %v8152_v4, %v8152_v4  ;;  %s8159_s18 = smov 112   ;;  %s8160_s19 = smov 15   ;;  %v8237_v11 = vand.u32 127, %v35_v0  ;;  %v8163_v12 = vmov 1966171168  }
   0x3   :  { %v91_v5 = vunpack.c.0.s8 %v90_v2  ;;  %s8161_s20 = smov 113   ;;  %s8162_s21 = smov 111   ;;  %v132_v13 = vunpack.c.l.s4 %v8163_v12  ;;  %v16417_v23 = vmov 0  ;;  %v16420_v24 = vmov 0 }
   0x4   :  { %16407 = vst [vmem:[#allocation2_spill] sm:$0xff] %v8219_v3  ;;  %v6725_v9 = vpack.i.bf16 %v96_v8, %v8152_v4  ;;  %v6542_v10 = vpack.c.bf16 %v96_v8, %v8152_v4  ;;  %16409 = vst [vmem:[#allocation4_spill] sm:$0xff] %v8237_v11  ;;  %v37_v14 = vadd.s32 128, %v8237_v11  ;;  %v38_v16 = vand.u32 15, %v8237_v11 }
   0x5   :  { %v8227_v7 = vsub.s32 %v91_v5, %v8219_v3  ;;  %v133_v15 = vunpack.c.0.s8 %v132_v13  ;;  %v40_v18 = vshra.s32 %v8237_v11, 4  ;;  %v16423_v25 = vmov 0 }
   0x6   :  { %6726 = vrot.lane.b32.xlu1 %v6725_v9, %s8155_s15  ;;  %6716 = vrot.lane.b32.xlu0 %v6725_v9, %s8156_s16  ;;  %v39_v17 = vand.u32 15, %v37_v14  ;;  %v41_v19 = vshra.s32 %v37_v14, 4  ;;  %vm8242_vm0 = vcmp.gt.s32.totalorder %v38_v16, 0  ;;  %vm8249_vm1 = vcmp.lt.s32.totalorder %v38_v16, 15 }
   0x7   :  { %16408 = vst [vmem:[#allocation3_spill] sm:$0xff] %v8227_v7  ;;  %v16411_v20 = vsel %vm8242_vm0, 4294967295, %v16410_v20  ;;  %v8247_v21 = vsub.s32 %v133_v15, %v8219_v3  ;;  %v16415_v22 = vsel %vm8249_vm1, 4294967295, %v16414_v22  ;;  %vm8257_vm3 = vcmp.gt.s32.totalorder %v40_v18, 0 }
   0x8   :  { %16412 = vst [vmem:[#allocation5_spill] sm:$0xff] %v16411_v20  ;;  %16416 = vst [vmem:[#allocation7_spill] sm:$0xff] %v16415_v22  ;;  %vm8253_vm2 = vcmp.lt.s32.totalorder %v39_v17, 15  ;;  %v16421_v24 = vsel %vm8257_vm3, 4294967295, %v16420_v24  ;;  %vm8261_vm4 = vcmp.gt.s32.totalorder %v39_v17, 0  ;;  %vm8266_vm5 = vcmp.gt.s32.totalorder %v41_v19, 0 }
   0x9   :  { %16413 = vst [vmem:[#allocation6_spill] sm:$0xff] %v8247_v21  ;;  %v16418_v23 = vsel %vm8253_vm2, 4294967295, %v16417_v23  ;;  %16422 = vst [vmem:[#allocation9_spill] sm:$0xff] %v16421_v24  ;;  %v16424_v25 = vsel %vm8261_vm4, 4294967295, %v16423_v25  ;;  %v322_v26 = vrot.slane %v6542_v10, %v8247_v21  ;;  %v16426_v27 = vmov 0 }
   0xa   :  { %6731 = vrot.lane.b32.xlu1 %v6725_v9, %s8157_s17  ;;  %6721 = vrot.lane.b32.xlu0 %v6725_v9, %s8158_s0  ;;  %16419 = vst [vmem:[#allocation8_spill] sm:$0xff] %v16418_v23  ;;  %16425 = vst [vmem:[#allocation10_spill] sm:$0xff] %v16424_v25  ;;  %v16427_v27 = vsel %vm8266_vm5, 4294967295, %v16426_v27  ;;  %vm8282_vm9 = vcmp.lt.s32.totalorder %v40_v18, 15  ;;  %v16429_v28 = vmov 0  ;;  %vm8286_vm10 = vcmp.lt.s32.totalorder %v41_v19, 15 }
   0xb   :  { %16428 = vst [vmem:[#allocation11_spill] sm:$0xff] %v16427_v27  ;;  %vm108_vm6 = vmand %vm8257_vm3, %vm8242_vm0  ;;  %v16430_v28 = vsel %vm8282_vm9, 4294967295, %v16429_v28  ;;  %v16432_v29 = vmov 0  ;;  %v323_v30 = vcombine.high %v322_v26, %v322_v26  ;;  %v330_v32 = vrot.slane %v322_v26, %v8247_v21 }
   0xc   :  { %vm351_vm7 = vmpackc.low %vm8253_vm2, %vm8249_vm1  ;;  %16431 = vst [vmem:[#allocation12_spill] sm:$0xff] %v16430_v28  ;;  %v16433_v29 = vsel %vm8286_vm10, 4294967295, %v16432_v29  ;;  %v8313_v34 = vsub.s32 0, %v8219_v3  ;;  %v8320_v35 = vsub.s32 4, %v8219_v3  ;;  %v16445_v51 = vmov 0 }
   0xd   :  { %vm109_vm8 = vmand %vm8266_vm5, %vm8261_vm4  ;;  %16434 = vst [vmem:[#allocation13_spill] sm:$0xff] %v16433_v29  ;;  %v337_v33 = vrot.slane %v323_v30, %v8247_v21  ;;  %v352_v36 = vsel %vm351_vm7, 65537, %v15969_v6  ;;  %v736_v38 = vrot.slane %v330_v32, %v8247_v21  ;;  %v16448_v54 = vmov 0 }
   0xe   :  { %6741 = vrot.lane.b32.xlu1 %v6725_v9, %s8159_s18  ;;  %6736 = vrot.lane.b32.xlu0 %v6725_v9, %s8160_s19  ;;  %vm166_vm11 = vmpackc.low %vm8266_vm5, %vm8257_vm3  ;;  %16437 = vst [vmem:[#allocation14_spill] sm:$0xff] %v8313_v34  ;;  %v356_v40 = vrot.slane %v352_v36, %v8313_v34  ;;  %v360_v41 = vrot.slane %v352_v36, %v8320_v35  ;;  %v16451_v55 = vmov 0  ;;  %v16456_v62 = vmov 0 }
   0xf   :  { %vm272_vm12 = vmpackc.low %vm8261_vm4, %vm8242_vm0  ;;  %v167_v37 = vsel %vm166_vm11, 65537, %v15969_v6  ;;  %v760_v39 = vrot.slane %v337_v33, %v8247_v21  ;;  %v737_v49 = vcombine.high %v736_v38, %v736_v38  ;;  %v8424_v1 = vrot.slane %v736_v38, %v8247_v21 }
  0x10   :  { %vm8298_vm13 = vmpackc.low %vm109_vm8, %vm108_vm6  ;;  %v171_v42 = vrot.slane %v167_v37, %v8313_v34  ;;  %v273_v43 = vsel %vm272_vm12, 65537, %v15969_v6  ;;  %v175_v46 = vrot.slane %v167_v37, %v8320_v35  ;;  %v16459_v2 = vmov 0 }
  0x11   :  { %vm215_vm6 = vmand %vm8266_vm5, %vm8253_vm2  ;;  %v115_v47 = vsel %vm8298_vm13, 65537, %v15969_v6  ;;  %v761_v50 = vcombine.high %v760_v39, %v760_v39  ;;  %v277_v52 = vrot.slane %v273_v43, %v8313_v34  ;;  %v281_v53 = vrot.slane %v273_v43, %v8320_v35 }
  0x12   :  { %6751 = vrot.lane.b32.xlu1 %v6725_v9, %s8161_s20  ;;  %6746 = vrot.lane.b32.xlu0 %v6725_v9, %s8162_s21  ;;  %vm399_vm8 = vmand %vm8282_vm9, %vm8242_vm0  ;;  %vm8385_vm13 = vcmp.ne.s16.totalorder %v171_v42, 0  ;;  %v119_v58 = vrot.slane %v115_v47, %v8313_v34  ;;  %v123_v59 = vrot.slane %v115_v47, %v8320_v35  ;;  %v8418_v63 = vrot.slane %v737_v49, %v8247_v21 }
  0x13   :  { %vm400_vm14 = vmand %vm8286_vm10, %vm8261_vm4  ;;  %v16452_v55 = vsel %vm8385_vm13, 4294967295, %v16451_v55  ;;  %v8421_v0 = vrot.slane %v761_v50, %v8247_v21  ;;  %v16462_v4 = vmov 0  ;;  %v16465_v31 = vmov 0 }
  0x14   :  { %vm505_vm15 = vmand %vm8282_vm9, %vm8249_vm1  ;;  %16453 = vst [vmem:[#allocation17_spill] sm:$0xff] %v16452_v55  ;;  %v16468_v32 = vmov 0  ;;  %v8464_v38 = vrot.slane %v760_v39, %v8247_v21 }
  0x15   :  { %vm506_vm7 = vmand %vm8286_vm10, %vm8253_vm2  ;;  %vm8453_vm2 = vcmp.ne.s16.totalorder %v123_v59, 0 }
  0x16   :  { %vm16438_vm11 = vmand %vm8257_vm3, %vm8249_vm1  ;;  %v16469_v32 = vsel %vm8453_vm2, 4294967295, %v16468_v32 }
  0x17   :  { %vm8356_vm5 = vmpackc.low %vm215_vm6, %vm16438_vm11  ;;  %vm15954_vm6 = vcmp.lt.s32.totalorder %v8237_v11, 127  ;;  %vm8374_vm11 = vcmp.ne.s16.totalorder %v356_v40, 0  ;;  %16470 = vst [vmem:[#allocation22_spill] sm:$0xff] %v16469_v32 }
  0x18   :  { %vm8361_vm9 = vmpackc.low %vm400_vm14, %vm399_vm8  ;;  %v16446_v51 = vsel %vm8374_vm11, 4294967295, %v16445_v51  ;;  %vm8381_vm8 = vcmp.ne.s16.totalorder %v360_v41, 0  ;;  %v8398_v57 = vsel %vm8356_vm5, 65537, %v15969_v6  ;;  %vm8426_vm5 = vcmp.ne.s16.totalorder %v277_v52, 0 }
  0x19   :  { %vm8369_vm12 = vmpackc.low %vm506_vm7, %vm505_vm15  ;;  %16447 = vst [vmem:[#allocation15_spill] sm:$0xff] %v16446_v51  ;;  %v16449_v54 = vsel %vm8381_vm8, 4294967295, %v16448_v54  ;;  %vm16454_vm15 = vnez %v16430_v28  ;;  %v8406_v60 = vsel %vm8361_vm9, 65537, %v15969_v6  ;;  %v16460_v2 = vsel %vm8426_vm5, 4294967295, %v16459_v2 }
  0x1a   :  { %16450 = vst [vmem:[#allocation16_spill] sm:$0xff] %v16449_v54  ;;  %vm16455_vm7 = vmpackc.low %vm8286_vm10, %vm16454_vm15  ;;  %v8411_v61 = vsel %vm8369_vm12, 65537, %v15969_v6  ;;  %vm8430_vm9 = vcmp.ne.s16.totalorder %v281_v53, 0  ;;  %v225_v9 = vrot.slane %v8398_v57, %v8313_v34  ;;  %v229_v10 = vrot.slane %v8398_v57, %v8320_v35 }
  0x1b   :  { %v458_v56 = vsel %vm16455_vm7, 65537, %v15969_v6  ;;  %vm8413_vm7 = vcmp.ne.s16.totalorder %v175_v46, 0  ;;  %16461 = vst [vmem:[#allocation19_spill] sm:$0xff] %v16460_v2  ;;  %v16463_v4 = vsel %vm8430_vm9, 4294967295, %v16462_v4  ;;  %v410_v14 = vrot.slane %v8406_v60, %v8313_v34 }
  0x1c   :  { %v16457_v62 = vsel %vm8413_vm7, 4294967295, %v16456_v62  ;;  %16464 = vst [vmem:[#allocation20_spill] sm:$0xff] %v16463_v4  ;;  %v462_v5 = vrot.slane %v458_v56, %v8313_v34  ;;  %v466_v8 = vrot.slane %v458_v56, %v8320_v35  ;;  %v414_v15 = vrot.slane %v8406_v60, %v8320_v35 }
  0x1d   :  { %16458 = vst [vmem:[#allocation18_spill] sm:$0xff] %v16457_v62  ;;  %v516_v16 = vrot.slane %v8411_v61, %v8313_v34  ;;  %v520_v17 = vrot.slane %v8411_v61, %v8320_v35  ;;  %vm8449_vm14 = vcmp.ne.s16.totalorder %v119_v58, 0  ;;  %vm16471_vm12 = vcmp.lt.s32.totalorder %v8237_v11, 16 }
  0x1e   :  { %v16466_v31 = vsel %vm8449_vm14, 4294967295, %v16465_v31  ;;  %vm16472_vm4 = vmmov %vm16471_vm12 }
  0x1f   :  { %16467 = vst [vmem:[#allocation21_spill] sm:$0xff] %v16466_v31 }
  0x78   :  { %v6727_v12 = vpop.permute.xlu1 %6726  ;;  %v6717_v13 = vpop.permute.xlu0 %6716 }
  0x79   :  { %v6729_v18 = vunpack.i.h.bf16 %v6727_v12  ;;  %v6728_v19 = vunpack.i.l.bf16 %v6727_v12  ;;  %v6719_v26 = vunpack.i.h.bf16 %v6717_v13  ;;  %v6718_v30 = vunpack.i.l.bf16 %v6717_v13 }
  0x7a   :  { %v16473_v13 = vmov 0 }
  0x7b   :  { %v343_v40 = vsel %vm15954_vm6, %v6728_v19, %v6729_v18  ;;  %v344_v41 = vsel %vm15954_vm6, %v6729_v18, %v6728_v19  ;;  %v158_v42 = vsel %vm16471_vm12, %v6718_v30, %v6719_v26  ;;  %v159_v43 = vsel %vm16472_vm4, %v6719_v26, %v6718_v30 }
  0x7c   :  { %v345_v44 = vpack.c.bf16 %v343_v40, %v343_v40  ;;  %v346_v45 = vpack.c.bf16 %v344_v41, %v344_v41  ;;  %v160_v46 = vpack.c.bf16 %v159_v43, %v159_v43  ;;  %v161_v47 = vpack.c.bf16 %v158_v42, %v158_v42  ;;  %v6732_v48 = vpop.permute.xlu1 %6731  ;;  %v6722_v49 = vpop.permute.xlu0 %6721 }
  0x7d   :  { %v6734_v39 = vunpack.i.h.bf16 %v6732_v48  ;;  %v6733_v50 = vunpack.i.l.bf16 %v6732_v48  ;;  %v6724_v52 = vunpack.i.h.bf16 %v6722_v49  ;;  %v6723_v53 = vunpack.i.l.bf16 %v6722_v49 }
  0x7e   :  { %v363_v56 = vsel %vm8374_vm11, %v345_v44, 0  ;;  %v364_v58 = vsel %vm8381_vm8, %v346_v45, 0  ;;  %v178_v59 = vsel %vm8385_vm13, %v160_v46, 0  ;;  %v179_v12 = vsel %vm8413_vm7, %v161_v47, 0 }
  0x7f   :  { %vm8482_vm4 = vcmp.ne.s16.totalorder %v462_v5, 0  ;;  %vm8486_vm12 = vcmp.ne.s16.totalorder %v466_v8, 0  ;;  %v16476_v18 = vmov 0  ;;  %v367_v19 = vcombine.low %v363_v56, %v364_v58 }
  0x80   :  { %v16474_v13 = vsel %vm8482_vm4, 4294967295, %v16473_v13  ;;  %v16477_v18 = vsel %vm8486_vm12, 4294967295, %v16476_v18  ;;  %v182_v26 = vcombine.low %v178_v59, %v179_v12  ;;  %vm16479_vm6 = vcmp.lt.s32.totalorder %v8237_v11, 1  ;;  %v6742_v43 = vpop.permute.xlu1 %6741 }
  0x81   :  { %16475 = vst [vmem:[#allocation23_spill] sm:$0xff] %v16474_v13  ;;  %16478 = vst [vmem:[#allocation24_spill] sm:$0xff] %v16477_v18  ;;  %v264_v30 = vsel %vm16479_vm6, %v6733_v50, %v6734_v39  ;;  %vm16481_vm7 = vcmp.lt.s32.totalorder %v8237_v11, 17  ;;  %v374_v44 = vrot.slane %v367_v19, %v8247_v21  ;;  %v16483_v59 = vmov 0 }
  0x82   :  { %vm16480_vm11 = vmmov %vm16479_vm6  ;;  %v267_v42 = vpack.c.bf16 %v264_v30, %v264_v30  ;;  %v104_v5 = vsel %vm16481_vm7, %v6723_v53, %v6724_v52  ;;  %v189_v45 = vrot.slane %v182_v26, %v8247_v21  ;;  %vm8509_vm6 = vcmp.ne.s16.totalorder %v225_v9, 0 }
  0x83   :  { %v265_v40 = vsel %vm16480_vm11, %v6734_v39, %v6733_v50  ;;  %vm16482_vm8 = vmmov %vm16481_vm7  ;;  %v107_v47 = vpack.c.bf16 %v104_v5, %v104_v5  ;;  %v6744_v39 = vunpack.i.h.bf16 %v6742_v43  ;;  %v6743_v50 = vunpack.i.l.bf16 %v6742_v43 }
  0x84   :  { %v266_v41 = vpack.c.bf16 %v265_v40, %v265_v40  ;;  %v105_v8 = vsel %vm16482_vm8, %v6724_v52, %v6723_v53  ;;  %v285_v49 = vsel %vm8430_vm9, %v267_v42, 0  ;;  %v375_v56 = vcombine.high %v374_v44, %v374_v44  ;;  %v6737_v40 = vpop.permute.xlu0 %6736 }
  0x85   :  { %v106_v46 = vpack.c.bf16 %v105_v8, %v105_v8  ;;  %v8506_v58 = vrot.slane %v374_v44, %v8247_v21  ;;  %v190_v52 = vcombine.high %v189_v45, %v189_v45  ;;  %v197_v53 = vrot.slane %v189_v45, %v8247_v21 }
  0x86   :  { %v284_v48 = vsel %vm8426_vm5, %v266_v41, 0  ;;  %v16484_v59 = vsel %vm8509_vm6, 4294967295, %v16483_v59  ;;  %v127_v26 = vsel %vm8453_vm2, %v107_v47, 0  ;;  %vm16486_vm7 = vcmp.lt.s32.totalorder %v8237_v11, 112 }
  0x87   :  { %16485 = vst [vmem:[#allocation25_spill] sm:$0xff] %v16484_v59  ;;  %v288_v12 = vcombine.low %v284_v48, %v285_v49  ;;  %v126_v19 = vsel %vm8449_vm14, %v106_v46, 0  ;;  %v449_v30 = vsel %vm16486_vm7, %v6743_v50, %v6744_v39  ;;  %vm8524_vm13 = vcmp.ne.s16.totalorder %v229_v10, 0 }
  0x88   :  { %v16487_v9 = vmov 0  ;;  %v8529_v41 = vrot.slane %v375_v56, %v8247_v21  ;;  %v204_v42 = vrot.slane %v190_v52, %v8247_v21  ;;  %v594_v5 = vcombine.low %v197_v53, %v197_v53 }
  0x89   :  { %v16488_v9 = vsel %vm8524_vm13, 4294967295, %v16487_v9  ;;  %v295_v43 = vrot.slane %v288_v12, %v8247_v21  ;;  %v130_v44 = vcombine.low %v126_v19, %v127_v26  ;;  %v450_v57 = vsel %vm16486_vm7, %v6744_v39, %v6743_v50  ;;  %v6752_v12 = vpop.permute.xlu1 %6751 }
  0x8a   :  { %16489 = vst [vmem:[#allocation26_spill] sm:$0xff] %v16488_v9  ;;  %v451_v10 = vpack.c.bf16 %v449_v30, %v449_v30  ;;  %v8538_v45 = vrot.slane %v594_v5, %v8247_v21  ;;  %v617_v46 = vcombine.low %v204_v42, %v204_v42  ;;  %v452_v47 = vpack.c.bf16 %v450_v57, %v450_v57 }
  0x8b   :  { %v6739_v48 = vunpack.i.h.bf16 %v6737_v40  ;;  %vm8543_vm8 = vcmp.ne.s16.totalorder %v410_v14, 0  ;;  %v16490_v49 = vmov 0  ;;  %vm8550_vm11 = vcmp.ne.s16.totalorder %v414_v15, 0 }
  0x8c   :  { %v16491_v49 = vsel %vm8543_vm8, 4294967295, %v16490_v49  ;;  %v16493_v56 = vmov 0  ;;  %v778_v39 = vcombine.low %v8506_v58, %v8506_v58  ;;  %v296_v50 = vcombine.high %v295_v43, %v295_v43 }
  0x8d   :  { %16492 = vst [vmem:[#allocation27_spill] sm:$0xff] %v16491_v49  ;;  %v16494_v56 = vsel %vm8550_vm11, 4294967295, %v16493_v56  ;;  %v303_v52 = vrot.slane %v295_v43, %v8247_v21  ;;  %v137_v53 = vrot.slane %v130_v44, %v8247_v21  ;;  %vm8561_vm7 = vcmp.ne.s16.totalorder %v516_v16, 0  ;;  %v6747_v44 = vpop.permute.xlu0 %6746 }
  0x8e   :  { %16495 = vst [vmem:[#allocation28_spill] sm:$0xff] %v16494_v56  ;;  %v16496_v14 = vmov 0  ;;  %v602_v60 = vcombine.high %v8538_v45, %v8538_v45  ;;  %v469_v15 = vsel %vm8482_vm4, %v451_v10, 0  ;;  %v470_v19 = vsel %vm8486_vm12, %v452_v47, 0 }
  0x8f   :  { %v16497_v14 = vsel %vm8561_vm7, 4294967295, %v16496_v14  ;;  %v6738_v26 = vunpack.i.l.bf16 %v6737_v40  ;;  %vm8574_vm14 = vcmp.ne.s16.totalorder %v520_v17, 0  ;;  %v16499_v30 = vmov 0 }
  0x90   :  { %16498 = vst [vmem:[#allocation29_spill] sm:$0xff] %v16497_v14  ;;  %v16500_v30 = vsel %vm8574_vm14, 4294967295, %v16499_v30  ;;  %v8579_v16 = vrot.slane %v617_v46, %v8247_v21  ;;  %v8582_v42 = vrot.slane %v296_v50, %v8247_v21  ;;  %v138_v5 = vcombine.high %v137_v53, %v137_v53 }
  0x91   :  { %16501 = vst [vmem:[#allocation30_spill] sm:$0xff] %v16500_v30  ;;  %v145_v43 = vrot.slane %v137_v53, %v8247_v21  ;;  %v684_v57 = vcombine.low %v303_v52, %v303_v52  ;;  %vm16502_vm2 = vcmp.lt.s32.totalorder %v8237_v11, 15  ;;  %v6754_v61 = vunpack.i.h.bf16 %v6752_v12 }
  0x92   :  { %v210_v40 = vsel %vm16502_vm2, %v6738_v26, %v6739_v48  ;;  %vm16503_vm5 = vmmov %vm16502_vm2  ;;  %v152_v17 = vrot.slane %v138_v5, %v8247_v21  ;;  %v473_v46 = vcombine.low %v469_v15, %v470_v19  ;;  %v6753_v6 = vunpack.i.l.bf16 %v6752_v12 }
  0x93   :  { %v211_v35 = vsel %vm16503_vm5, %v6739_v48, %v6738_v26  ;;  %v8591_v10 = vrot.slane %v145_v43, %v8247_v21  ;;  %v213_v50 = vpack.c.bf16 %v210_v40, %v210_v40  ;;  %v6749_v8 = vunpack.i.h.bf16 %v6747_v44 }
  0x94   :  { %v212_v47 = vpack.c.bf16 %v211_v35, %v211_v35  ;;  %v6748_v53 = vunpack.i.l.bf16 %v6747_v44  ;;  %vm16504_vm2 = vcmp.lt.s32.totalorder %v8237_v11, 113  ;;  %vm16506_vm9 = vcmp.lt.s32.totalorder %v8237_v11, 111 }
  0x95   :  { %v557_v37 = vcombine.high %v8591_v10, %v8591_v10  ;;  %v233_v15 = vsel %vm8524_vm13, %v213_v50, 0  ;;  %v395_v12 = vsel %vm16504_vm2, %v6753_v6, %v6754_v61  ;;  %vm16505_vm5 = vmmov %vm16504_vm2  ;;  %vm15981_vm4 = vcmask 1041408  }
  0x96   :  { %v232_v26 = vsel %vm8509_vm6, %v212_v47, 0  ;;  %v396_v19 = vsel %vm16505_vm5, %v6754_v61, %v6753_v6  ;;  %v501_v5 = vsel %vm16506_vm9, %v6748_v53, %v6749_v8  ;;  %v8610_v43 = vrot.slane %v152_v17, %v8247_v21  ;;  %vm16507_vm6 = vmmov %vm16506_vm9 }
  0x97   :  { %v236_v44 = vcombine.low %v232_v26, %v233_v15  ;;  %v397_v40 = vpack.c.bf16 %v395_v12, %v395_v12  ;;  %v398_v35 = vpack.c.bf16 %v396_v19, %v396_v19  ;;  %v502_v47 = vsel %vm16507_vm6, %v6749_v8, %v6748_v53 }
  0x98   :  { %v503_v50 = vpack.c.bf16 %v501_v5, %v501_v5  ;;  %v480_v48 = vrot.slane %v473_v46, %v8247_v21  ;;  %v571_v36 = vrot.slane %v557_v37, %v8247_v21  ;;  %vm15984_vm2 = vcmask 1042432  }
  0x99   :  { %v243_v6 = vrot.slane %v236_v44, %v8247_v21  ;;  %v417_v61 = vsel %vm8543_vm8, %v397_v40, 0  ;;  %v418_v17 = vsel %vm8550_vm11, %v398_v35, 0  ;;  %v504_v26 = vpack.c.bf16 %v502_v47, %v502_v47 }
  0x9a   :  { %v421_v15 = vcombine.low %v417_v61, %v418_v17  ;;  %v523_v8 = vsel %vm8561_vm7, %v503_v50, 0  ;;  %v488_v53 = vrot.slane %v480_v48, %v8247_v21  ;;  %v616_v46 = vrot.slane %v602_v60, %v8247_v21 }
  0x9b   :  { %v244_v37 = vcombine.high %v243_v6, %v243_v6  ;;  %v251_v12 = vrot.slane %v243_v6, %v8247_v21  ;;  %v524_v19 = vsel %vm8574_vm14, %v504_v26, 0  ;;  %v8629_v5 = vrot.slane %v684_v57, %v8247_v21 }
  0x9c   :  { %vm15982_vm5 = vcmask 1045504   ;;  %v428_v44 = vrot.slane %v421_v15, %v8247_v21  ;;  %v527_v40 = vcombine.low %v523_v8, %v524_v19  ;;  %v8636_v35 = vrot.slane %v778_v39, %v8247_v21 }
  0x9d   :  { %v876_v60 = vcombine.low %v488_v53, %v488_v53  ;;  %vm15983_vm6 = vcmask 1046528   ;;  %v579_v47 = vcombine.high %v8610_v43, %v8610_v43  ;;  %v258_v50 = vrot.slane %v244_v37, %v8247_v21 }
  0x9e   :  { %v646_v57 = vrot.slane %v251_v12, %v8247_v21  ;;  %vm16508_vm9 = vcmask 1040384   ;;  %v534_v61 = vrot.slane %v527_v40, %v8247_v21  ;;  %v436_v17 = vrot.slane %v428_v44, %v8247_v21 }
  0x9f   :  { %v976_v6 = vsel %vm16508_vm9, %v571_v36, %v616_v46  ;;  %v786_v58 = vcombine.high %v8636_v35, %v8636_v35  ;;  %v8648_v39 = vrot.slane %v876_v60, %v8247_v21  ;;  %v706_v8 = vrot.slane %v8629_v5, %v8247_v21 }
  0xa0   :  { %v647_v26 = vcombine.low %v646_v57, %v646_v57  ;;  %v661_v15 = vrot.slane %v646_v57, %v8247_v21  ;;  %v429_v53 = vcombine.high %v428_v44, %v428_v44  ;;  %v542_v37 = vrot.slane %v534_v61, %v8247_v21 }
  0xa1   :  { %v800_v36 = vrot.slane %v786_v58, %v8247_v21  ;;  %v8656_v46 = vrot.slane %v436_v17, %v8247_v21  ;;  %v898_v12 = vrot.slane %v8648_v39, %v8247_v21  ;;  %v8661_v19 = vrot.slane %v258_v50, %v8247_v21 }
  0xa2   :  { %v987_v40 = vsel %vm15981_vm4, %v976_v6, %v661_v15  ;;  %v535_v60 = vcombine.high %v534_v61, %v534_v61  ;;  %v481_v57 = vcombine.high %v480_v48, %v480_v48  ;;  %v932_v52 = vrot.slane %v542_v37, %v8247_v21 }
  0xa3   :  { %v802_v44 = vcombine.low %v800_v36, %v800_v36  ;;  %v849_v33 = vrot.slane %v8656_v46, %v8247_v21  ;;  %v443_v58 = vrot.slane %v429_v53, %v8247_v21  ;;  %v900_v17 = vcombine.low %v898_v12, %v898_v12 }
  0xa4   :  { %v996_v34 = vsel %vm15984_vm2, %v987_v40, %v706_v8  ;;  %v549_v3 = vrot.slane %v535_v60, %v8247_v21  ;;  %v495_v50 = vrot.slane %v481_v57, %v8247_v21  ;;  %v933_v7 = vcombine.high %v932_v52, %v932_v52 }
  0xa5   :  { %v940_v6 = vrot.slane %v932_v52, %v8247_v21  ;;  %v851_v61 = vcombine.low %v849_v33, %v849_v33  ;;  %v16509_v48 = vcombine.low %v8418_v63, %v8418_v63  ;;  %vm16510_vm9 = vcmask 1043456  }
  0xa6   :  { %vm16511_vm4 = vcmask 1044480   ;;  %v954_v53 = vrot.slane %v549_v3, %v8247_v21  ;;  %v593_v36 = vrot.slane %v579_v47, %v8247_v21  ;;  %v625_v8 = vcombine.high %v8579_v16, %v8579_v16 }
  0xa7   :  { %v1005_v15 = vsel %vm16510_vm9, %v996_v34, %v16509_v48  ;;  %v947_v12 = vrot.slane %v933_v7, %v8247_v21  ;;  %v683_v33 = vrot.slane %v8661_v19, %v8247_v21  ;;  %v16512_v34 = vcombine.low %v8582_v42, %v8582_v42 }
  0xa8   :  { %v1014_v37 = vsel %vm16511_vm4, %v1005_v15, %v802_v44  ;;  %v955_v3 = vcombine.high %v954_v53, %v954_v53  ;;  %v962_v47 = vrot.slane %v954_v53, %v8247_v21  ;;  %v639_v60 = vrot.slane %v625_v8, %v8247_v21 }
  0xa9   :  { %v1023_v40 = vsel %vm15982_vm5, %v1014_v37, %v851_v61  ;;  %v714_v63 = vrot.slane %v16512_v34, %v8247_v21  ;;  %vm16513_vm4 = vcmask 1040384   ;;  %v803_v57 = vcombine.low %v8529_v41, %v8529_v41 }
  0xaa   :  { %v1033_v52 = vsel %vm15983_vm6, %v1023_v40, %v900_v17  ;;  %6544 = vmatprep.subr.msk.bf16.mxu0 %vm16513_vm4, %v947_v12  ;;  %vm16514_vm9 = vmmov %vm16513_vm4  ;;  %v858_v44 = vrot.slane %v443_v58, %v8247_v21  ;;  %v901_v61 = vcombine.low %v495_v50, %v495_v50  ;;  %v969_v42 = vrot.slane %v955_v3, %v8247_v21 }
  0xab   :  { %v1051_v7 = vsel %vm16514_vm9, %v940_v6, 0  ;;  %vm16515_vm5 = vmmov %vm16513_vm4  ;;  %v729_v48 = vrot.slane %v714_v63, %v8247_v21  ;;  %v810_v37 = vrot.slane %v803_v57, %v8247_v21  ;;  %v654_v50 = vrot.slane %v647_v26, %v8247_v21 }
  0xac   :  { %1069 = vmatpush1.bf16.msra.mxu0 %v1051_v7  ;;  %v1100_v17 = vsel %vm16515_vm5, %v962_v47, 0  ;;  %vm16516_vm6 = vmmov %vm16513_vm4  ;;  %v873_v6 = vrot.slane %v858_v44, %v8247_v21  ;;  %v908_v53 = vrot.slane %v901_v61, %v8247_v21  ;;  %vm16517_vm4 = vcmask 1041408  }
  0xad   :  { %v982_v15 = vsel %vm16516_vm6, %v593_v36, %v639_v60  ;;  %1070 = vmatprep.subr.bf16.mxu0 %v1033_v52  ;;  %vm16518_vm9 = vmmov %vm16515_vm5  ;;  %v692_v8 = vcombine.low %v8629_v5, %v8629_v5  ;;  %v793_v36 = vrot.slane %v8636_v35, %v8247_v21  ;;  %v811_v12 = vcombine.high %v810_v37, %v810_v37 }
  0xae   :  { %v991_v41 = vsel %vm16517_vm4, %v982_v15, %v683_v33  ;;  %6546 = vmatprep.subr.msk.bf16.mxu1 %vm16518_vm9, %v969_v42  ;;  %v875_v40 = vcombine.low %v873_v6, %v873_v6  ;;  %v923_v34 = vrot.slane %v908_v53, %v8247_v21  ;;  %v609_v33 = vrot.slane %v8538_v45, %v8247_v21 }
  0xaf   :  { %v1000_v58 = vsel %vm15984_vm2, %v991_v41, %v729_v48  ;;  %1118 = vmatpush1.bf16.msra.mxu1 %v1100_v17  ;;  %v16519_v52 = vcombine.low %v8421_v0, %v8421_v0  ;;  %vm16520_vm6 = vcmask 1043456   ;;  %v699_v26 = vrot.slane %v692_v8, %v8247_v21 }
  0xb0   :  { %v835_v5 = vcombine.low %v8656_v46, %v8656_v46  ;;  %v884_v35 = vcombine.low %v8648_v39, %v8648_v39  ;;  %v825_v47 = vrot.slane %v811_v12, %v8247_v21  ;;  %v925_v60 = vcombine.low %v923_v34, %v923_v34  ;;  %vm16523_vm9 = vmmov %vm16520_vm6 }
  0xb1   :  { %v1009_v3 = vsel %vm16520_vm6, %v1000_v58, %v16519_v52  ;;  %v801_v7 = vcombine.low %v793_v36, %v793_v36  ;;  %v16521_v45 = vrot.slane %v8591_v10, %v8247_v21  ;;  %v586_v46 = vrot.slane %v8610_v43, %v8247_v21 }
  0xb2   :  { %v842_v0 = vrot.slane %v835_v5, %v8247_v21  ;;  %v891_v61 = vrot.slane %v884_v35, %v8247_v21  ;;  %v827_v17 = vcombine.low %v825_v47, %v825_v47  ;;  %v669_v48 = vcombine.low %v8661_v19, %v8661_v19 }
  0xb3   :  { %v973_v57 = vsel %vm16515_vm5, %v16521_v45, %v609_v33  ;;  %v715_v15 = vcombine.low %v714_v63, %v714_v63  ;;  %v16522_v41 = vcombine.low %v8424_v1, %v8424_v1  ;;  %vm16524_vm6 = vcmask 1044480  }
  0xb4   :  { %v985_v42 = vsel %vm16517_vm4, %v973_v57, %v654_v50  ;;  %v850_v6 = vcombine.low %v842_v0, %v842_v0  ;;  %v899_v10 = vcombine.low %v891_v61, %v891_v61  ;;  %v632_v50 = vrot.slane %v8579_v16, %v8247_v21  ;;  %vm16525_vm5 = vmmov %vm16524_vm6 }
  0xb5   :  { %v994_v39 = vsel %vm15984_vm2, %v985_v42, %v699_v26  ;;  %v1018_v8 = vsel %vm16524_vm6, %v1009_v3, %v827_v17  ;;  %v676_v36 = vrot.slane %v669_v48, %v8247_v21  ;;  %v818_v12 = vrot.slane %v810_v37, %v8247_v21  ;;  %v7876_v26 = vld [vmem:[%s15936_s3] sm:$0xff]  }
  0xb6   :  { %v1003_v58 = vsel %vm16523_vm9, %v994_v39, %v16522_v41  ;;  %vm16526_vm4 = vcmask 1045504   ;;  %v722_v34 = vrot.slane %v715_v15, %v8247_v21  ;;  %v859_v1 = vcombine.low %v858_v44, %v858_v44 }
  0xb7   :  { %v1012_v43 = vsel %vm16525_vm5, %v1003_v58, %v801_v7  ;;  %v1027_v19 = vsel %vm16526_vm4, %v1018_v8, %v875_v40  ;;  %vm16527_vm2 = vmmov %vm16526_vm4  ;;  %vm16528_vm7 = vcmask 1046528   ;;  %v909_v16 = vcombine.low %v908_v53, %v908_v53 }
  0xb8   :  { %v1021_v63 = vsel %vm16527_vm2, %v1012_v43, %v850_v6  ;;  %v1039_v33 = vsel %vm16528_vm7, %v1027_v19, %v925_v60  ;;  %vm16529_vm9 = vmmov %vm16528_vm7  ;;  %vm16530_vm14 = vcmask 1040384   ;;  %v866_v37 = vrot.slane %v859_v1, %v8247_v21 }
  0xb9   :  { %v1030_v52 = vsel %vm16529_vm9, %v1021_v63, %v899_v10  ;;  %v979_v3 = vsel %vm16530_vm14, %v586_v46, %v632_v50  ;;  %1119 = vmatprep.subr.bf16.mxu1 %v1039_v33  ;;  %vm16531_vm6 = vcmask 1041408   ;;  %vm1046_vm2 = vcmask 146432  }
  0xba   :  { %1071 = vmatpush1.bf16.msra.mxu0 %v1030_v52  ;;  %v989_v40 = vsel %vm16531_vm6, %v979_v3, %v676_v36  ;;  %v826_v5 = vcombine.low %v818_v12, %v818_v12  ;;  %v916_v44 = vrot.slane %v909_v16, %v8247_v21  ;;  %vm16532_vm7 = vcmask 1042432  }
  0xbb   :  { %v998_v35 = vsel %vm16532_vm7, %v989_v40, %v722_v34  ;;  %v874_v47 = vcombine.low %v866_v37, %v866_v37  ;;  %v16533_v53 = vcombine.low %v8464_v38, %v8464_v38  ;;  %vm16534_vm14 = vcmask 1043456  }
  0xbc   :  { %v924_v7 = vcombine.low %v916_v44, %v916_v44  ;;  %vm16535_vm6 = vcmp.lt.s32.totalorder %v8237_v11, 112 }
  0xbd   :  { %v1007_v60 = vsel %vm16534_vm14, %v998_v35, %v16533_v53  ;;  %6545 = vmatmul.mubr.msk.bf16.vlgmr.msra.gmra.mxu0 %vm1046_vm2, %v7876_v26 }
  0xbe   :  { %v1016_v45 = vsel %vm16525_vm5, %v1007_v60, %v826_v5  ;;  %vm16539_vm5 = vcmp.lt.s32.totalorder %v8237_v11, 16 }
  0xbf   :  { %v1025_v57 = vsel %vm16526_vm4, %v1016_v45, %v874_v47  ;;  %vm16540_vm4 = vmmov %vm16539_vm5 }
  0xc0   :  { %v1036_v0 = vsel %vm16529_vm9, %v1025_v57, %v924_v7  ;;  %vm16541_vm9 = vmmov %vm16540_vm4 }
  0xc1   :  { %1120 = vmatpush1.bf16.msra.mxu1 %v1036_v0 }
  0xc4   :  { %6547 = vmatmul.mubr.msk.bf16.vlgmr.msra.gmra.mxu1 %vm1046_vm2, %v7876_v26  ;;  %vm16536_vm2 = vmmov %vm16535_vm6 }
  0xc5   :  { %vm16537_vm7 = vmmov %vm16536_vm2 }
  0xc6   :  { %vm16538_vm14 = vmmov %vm16536_vm2 }
 0x17d   :  { %v8767_v61 = vpop.f32.mrf.mxu0 }
 0x17e   :  { %v1162_v38 = vmul.f32 %v8767_v61, %v8767_v61 }
 0x17f   :  { %v8769_v42 = vpop.f32.mrf.mxu0 }
 0x180   :  { %v1148_v46 = vadd.f32 %v8769_v42, %v8767_v61  ;;  %v1163_v17 = vmul.f32 %v8769_v42, %v8769_v42 }
 0x181   :  { %v1094_v39 = vpop.f32.mrf.mxu0 }
 0x182   :  { %1149 = vadd.xlane.f32.xlu0 %v1148_v46  ;;  %v1170_v48 = vadd.f32 %v1163_v17, %v1162_v38  ;;  %v1164_v34 = vmul.f32 %v1094_v39, %v1094_v39 }
 0x183   :  { %v1096_v6 = vpop.f32.mrf.mxu0 }
 0x184   :  { %v1139_v15 = vpop.f32.mrf.mxu1  ;;  %1171 = vadd.xlane.f32.xlu1 %v1170_v48  ;;  %v1151_v58 = vadd.f32 %v1096_v6, %v1094_v39  ;;  %v1165_v63 = vmul.f32 %v1096_v6, %v1096_v6 }
 0x185   :  { %v1166_v50 = vmul.f32 %v1139_v15, %v1139_v15 }
 0x186   :  { %v8777_v10 = vpop.f32.mrf.mxu1  ;;  %v1173_v1 = vadd.f32 %v1165_v63, %v1164_v34 }
 0x187   :  { %v1154_v41 = vadd.f32 %v8777_v10, %v1139_v15  ;;  %v1167_v8 = vmul.f32 %v8777_v10, %v8777_v10 }
 0x188   :  { %v1143_v43 = vpop.f32.mrf.mxu1  ;;  %1152 = vadd.xlane.f32.xlu1 %v1151_v58 }
 0x189   :  { %1155 = vadd.xlane.f32.xlu0 %v1154_v41  ;;  %v1176_v19 = vadd.f32 %v1167_v8, %v1166_v50  ;;  %v1168_v52 = vmul.f32 %v1143_v43, %v1143_v43 }
 0x18a   :  { %v1145_v36 = vpop.f32.mrf.mxu1 }
 0x18b   :  { %v1157_v12 = vadd.f32 %v1145_v36, %v1143_v43  ;;  %v1169_v33 = vmul.f32 %v1145_v36, %v1145_v36 }
 0x18c   :  { %1177 = vadd.xlane.f32.xlu1 %v1176_v19 }
 0x18d   :  { %1158 = vadd.xlane.f32.xlu0 %v1157_v12  ;;  %v1179_v16 = vadd.f32 %v1169_v33, %v1168_v52 }
 0x191   :  { %1174 = vadd.xlane.f32.xlu0 %v1173_v1 }
 0x195   :  { %1180 = vadd.xlane.f32.xlu0 %v1179_v16 }
 0x20b   :  { %v1150_v3 = vpop.xlane.xlu0 %1149 }
 0x20d   :  { %v1172_v26 = vpop.xlane.xlu1 %1171 }
 0x211   :  { %v1153_v40 = vpop.xlane.xlu1 %1152 }
 0x212   :  { %v1156_v37 = vpop.xlane.xlu0 %1155 }
 0x213   :  { %v1160_v5 = vadd.f32 %v1156_v37, %v1150_v3 }
 0x215   :  { %v1178_v35 = vpop.xlane.xlu1 %1177  ;;  %v1184_v47 = vmul.f32 0.001953125, %v1160_v5 }
 0x216   :  { %v1159_v44 = vpop.xlane.xlu0 %1158  ;;  %v1182_v53 = vadd.f32 %v1178_v35, %v1172_v26 }
 0x217   :  { %v1161_v60 = vadd.f32 %v1159_v44, %v1153_v40  ;;  %v1188_v57 = vmul.f32 %v1184_v47, %v1184_v47  ;;  %v1196_v19 = vsub.f32 %v1139_v15, %v1184_v47  ;;  %v1192_v34 = vsub.f32 %v8767_v61, %v1184_v47 }
 0x218   :  { %v1186_v7 = vmul.f32 0.001953125, %v1182_v53  ;;  %v1193_v44 = vsub.f32 %v8769_v42, %v1184_v47 }
 0x219   :  { %v1185_v0 = vmul.f32 0.001953125, %v1161_v60 }
 0x21a   :  { %v1175_v45 = vpop.xlane.xlu0 %1174  ;;  %v1190_v46 = vsub.f32 %v1186_v7, %v1188_v57 }
 0x21b   :  { %v1189_v41 = vmul.f32 %v1185_v0, %v1185_v0  ;;  %v1198_v63 = vsub.f32 %v1143_v43, %v1185_v0  ;;  %v1194_v1 = vsub.f32 %v1094_v39, %v1185_v0  ;;  %v1195_v52 = vsub.f32 %v1096_v6, %v1185_v0 }
 0x21c   :  { %v1200_v48 = vadd.f32 1e-05, %v1190_v46  ;;  %v1199_v39 = vsub.f32 %v1145_v36, %v1185_v0  ;;  %v1197_v6 = vsub.f32 %v8777_v10, %v1184_v47 }
 0x21e   :  { %v1181_v38 = vpop.xlane.xlu0 %1180  ;;  %7928 = vrsqrt.f32 %v1200_v48 }
 0x21f   :  { %v1183_v17 = vadd.f32 %v1181_v38, %v1175_v45 }
 0x221   :  { %v1187_v58 = vmul.f32 0.001953125, %v1183_v17 }
 0x223   :  { %v1191_v50 = vsub.f32 %v1187_v58, %v1189_v41 }
 0x225   :  { %v1201_v8 = vadd.f32 1e-05, %v1191_v50 }
 0x227   :  { %7930 = vrsqrt.f32 %v1201_v8 }
 0x22b   :  { %v7929_v12 = vpop.eup %7928 }
 0x22c   :  { %v8783_v16 = vmul.f32 %v7929_v12, %v1196_v19  ;;  %v1204_v26 = vmul.f32 %v7929_v12, %v1192_v34  ;;  %v1205_v61 = vmul.f32 %v7929_v12, %v1193_v44  ;;  %v1209_v53 = vmul.f32 %v7929_v12, %v1197_v6 }
 0x234   :  { %v7931_v33 = vpop.eup %7930 }
 0x235   :  { %v8785_v3 = vmul.f32 %v7931_v33, %v1198_v63  ;;  %v1206_v37 = vmul.f32 %v7931_v33, %v1194_v1  ;;  %v1207_v35 = vmul.f32 %v7931_v33, %v1195_v52  ;;  %v1211_v43 = vmul.f32 %v7931_v33, %v1199_v39 }
 0x237   :  { %v6760_v40 = vpack.i.bf16 %v8785_v3, %v8783_v16  ;;  %v6755_v5 = vpack.i.bf16 %v1206_v37, %v1204_v26  ;;  %v6765_v15 = vpack.i.bf16 %v1207_v35, %v1205_v61  ;;  %v6770_v60 = vpack.i.bf16 %v1211_v43, %v1209_v53 }
 0x239   :  { %6761 = vrot.lane.b32.xlu0 %v6760_v40, %s8159_s18  ;;  %6756 = vrot.lane.b32.xlu1 %v6755_v5, %s8159_s18 }
 0x23d   :  { %6776 = vrot.lane.b32.xlu0 %v6755_v5, %s8156_s16  ;;  %6766 = vrot.lane.b32.xlu1 %v6765_v15, %s8159_s18 }
 0x241   :  { %6786 = vrot.lane.b32.xlu0 %v6765_v15, %s8156_s16  ;;  %6771 = vrot.lane.b32.xlu1 %v6770_v60, %s8159_s18 }
 0x245   :  { %6781 = vrot.lane.b32.xlu1 %v6760_v40, %s8156_s16 }
 0x249   :  { %6791 = vrot.lane.b32.xlu1 %v6770_v60, %s8156_s16 }
 0x2ab   :  { %v6762_v42 = vpop.permute.xlu0 %6761  ;;  %v6757_v36 = vpop.permute.xlu1 %6756 }
 0x2ac   :  { %v6759_v10 = vunpack.i.h.bf16 %v6757_v36  ;;  %v6758_v47 = vunpack.i.l.bf16 %v6757_v36  ;;  %v6764_v19 = vunpack.i.h.bf16 %v6762_v42  ;;  %v6763_v44 = vunpack.i.l.bf16 %v6762_v42 }
 0x2af   :  { %v6777_v7 = vpop.permute.xlu0 %6776  ;;  %v6767_v45 = vpop.permute.xlu1 %6766 }
 0x2b0   :  { %v6769_v57 = vunpack.i.h.bf16 %v6767_v45  ;;  %v6768_v0 = vunpack.i.l.bf16 %v6767_v45  ;;  %v6779_v63 = vunpack.i.h.bf16 %v6777_v7  ;;  %v6778_v34 = vunpack.i.l.bf16 %v6777_v7 }
 0x2b2   :  { %v1228_v46 = vsel %vm16535_vm6, %v6758_v47, %v6768_v0  ;;  %v1229_v38 = vsel %vm16536_vm2, %v6759_v10, %v6769_v57  ;;  %v1232_v17 = vsel %vm16537_vm7, %v6768_v0, %v6758_v47  ;;  %v1233_v48 = vsel %vm16538_vm14, %v6769_v57, %v6759_v10  ;;  %vm16542_vm6 = vmmov %vm16540_vm4 }
 0x2b3   :  { %v1236_v41 = vsel %vm16454_vm15, %v1228_v46, -inf  ;;  %v1237_v58 = vsel %vm8286_vm10, %v1232_v17, -inf  ;;  %v1238_v50 = vsel %vm16454_vm15, %v1229_v38, -inf  ;;  %v6787_v8 = vpop.permute.xlu0 %6786  ;;  %v6772_v12 = vpop.permute.xlu1 %6771  ;;  %v1239_v1 = vsel %vm8286_vm10, %v1233_v48, -inf  ;;  %vm16544_vm14 = vmmov %vm16537_vm7 }
 0x2b4   :  { %v6789_v33 = vunpack.i.h.bf16 %v6787_v8  ;;  %v6788_v52 = vunpack.i.l.bf16 %v6787_v8  ;;  %v6774_v40 = vunpack.i.h.bf16 %v6772_v12  ;;  %v6773_v5 = vunpack.i.l.bf16 %v6772_v12 }
 0x2b5   :  { %v1244_v39 = vmax.f32 %v1204_v26, %v1236_v41  ;;  %v1245_v15 = vmax.f32 %v1205_v61, %v1237_v58  ;;  %v1246_v6 = vmax.f32 %v1206_v37, %v1238_v50  ;;  %v1247_v60 = vmax.f32 %v1207_v35, %v1239_v1 }
 0x2b6   :  { %v1268_v36 = vsel %vm16539_vm5, %v6778_v34, %v6788_v52  ;;  %v1272_v45 = vsel %vm16540_vm4, %v6788_v52, %v6778_v34  ;;  %v1273_v7 = vsel %vm16541_vm9, %v6789_v33, %v6779_v63  ;;  %v1269_v47 = vsel %vm16542_vm6, %v6779_v63, %v6789_v33  ;;  %vm16545_vm5 = vmmov %vm16537_vm7 }
 0x2b7   :  { %v6782_v10 = vpop.permute.xlu1 %6781  ;;  %v1276_v42 = vsel %vm8257_vm3, %v1272_v45, -inf  ;;  %vm16543_vm2 = vnez %v16427_v27  ;;  %v1278_v37 = vsel %vm8257_vm3, %v1273_v7, -inf  ;;  %v1231_v35 = vsel %vm16537_vm7, %v6764_v19, %v6774_v40  ;;  %vm16546_vm4 = vmmov %vm16545_vm5 }
 0x2b8   :  { %v1277_v26 = vsel %vm16543_vm2, %v1268_v36, -inf  ;;  %v1235_v61 = vsel %vm16544_vm14, %v6774_v40, %v6764_v19  ;;  %v1230_v57 = vsel %vm16545_vm5, %v6763_v44, %v6773_v5  ;;  %v1234_v0 = vsel %vm16546_vm4, %v6773_v5, %v6763_v44  ;;  %vm16547_vm9 = vmmov %vm16542_vm6 }
 0x2b9   :  { %v1242_v46 = vsel %vm16454_vm15, %v1231_v35, -inf  ;;  %v1243_v38 = vsel %vm8286_vm10, %v1235_v61, -inf  ;;  %v1240_v17 = vsel %vm16454_vm15, %v1230_v57, -inf  ;;  %v1241_v48 = vsel %vm8286_vm10, %v1234_v0, -inf  ;;  %vm16548_vm7 = vmmov %vm16542_vm6 }
 0x2ba   :  { %v1279_v41 = vsel %vm16543_vm2, %v1269_v47, -inf  ;;  %v1250_v58 = vmax.f32 %v8785_v3, %v1242_v46  ;;  %v1251_v50 = vmax.f32 %v1211_v43, %v1243_v38  ;;  %v1248_v8 = vmax.f32 %v8783_v16, %v1240_v17  ;;  %vm16549_vm14 = vmmov %vm16542_vm6 }
 0x2bb   :  { %v6792_v12 = vpop.permute.xlu1 %6791  ;;  %v6784_v19 = vunpack.i.h.bf16 %v6782_v10  ;;  %v6783_v63 = vunpack.i.l.bf16 %v6782_v10  ;;  %v1249_v33 = vmax.f32 %v1209_v53, %v1241_v48  ;;  %v1284_v52 = vmax.f32 %v1244_v39, %v1276_v42 }
 0x2bc   :  { %v6794_v34 = vunpack.i.h.bf16 %v6792_v12  ;;  %v6793_v1 = vunpack.i.l.bf16 %v6792_v12  ;;  %v1286_v40 = vmax.f32 %v1246_v6, %v1278_v37  ;;  %v1285_v5 = vmax.f32 %v1245_v15, %v1277_v26 }
 0x2bd   :  { %v1287_v45 = vmax.f32 %v1247_v60, %v1279_v41  ;;  %vm16550_vm5 = vcmp.lt.s32.totalorder %v8237_v11, 127 }
 0x2be   :  { %v1270_v44 = vsel %vm16547_vm9, %v6783_v63, %v6793_v1  ;;  %v1271_v36 = vsel %vm16542_vm6, %v6784_v19, %v6794_v34  ;;  %v1274_v3 = vsel %vm16548_vm7, %v6793_v1, %v6783_v63  ;;  %v1275_v16 = vsel %vm16549_vm14, %v6794_v34, %v6784_v19  ;;  %vm16551_vm4 = vmmov %vm16550_vm5 }
 0x2bf   :  { %v1280_v43 = vsel %vm8257_vm3, %v1274_v3, -inf  ;;  %v1281_v53 = vsel %vm16543_vm2, %v1270_v44, -inf  ;;  %v1282_v39 = vsel %vm8257_vm3, %v1275_v16, -inf  ;;  %v1283_v15 = vsel %vm16543_vm2, %v1271_v36, -inf  ;;  %vm16552_vm9 = vmmov %vm16551_vm4 }
 0x2c0   :  { %v6795_v6 = vpack.i.bf16 %v1286_v40, %v1284_v52  ;;  %v1288_v7 = vmax.f32 %v1248_v8, %v1280_v43  ;;  %v8865_v10 = vmax.f32 %v1250_v58, %v1282_v39  ;;  %v1289_v42 = vmax.f32 %v1249_v33, %v1281_v53  ;;  %vm16553_vm6 = vmmov %vm16551_vm4 }
 0x2c1   :  { %v8869_v26 = vmax.f32 %v1251_v50, %v1283_v15  ;;  %v6805_v37 = vpack.i.bf16 %v1287_v45, %v1285_v5  ;;  %vm16554_vm7 = vnez %v16418_v23  ;;  %vm16555_vm14 = vmmov %vm16551_vm4 }
 0x2c2   :  { %6796 = vrot.lane.b32.xlu0 %v6795_v6, %s8155_s15  ;;  %v6800_v47 = vpack.i.bf16 %v8865_v10, %v1288_v7 }
 0x2c3   :  { %v6810_v35 = vpack.i.bf16 %v8869_v26, %v1289_v42 }
 0x2c4   :  { %6801 = vrot.lane.b32.xlu1 %v6800_v47, %s8155_s15 }
 0x2c6   :  { %6806 = vrot.lane.b32.xlu0 %v6805_v37, %s8155_s15 }
 0x2c8   :  { %6811 = vrot.lane.b32.xlu1 %v6810_v35, %s8155_s15 }
 0x2ca   :  { %6816 = vrot.lane.b32.xlu0 %v6795_v6, %s8157_s17 }
 0x2cc   :  { %6821 = vrot.lane.b32.xlu1 %v6800_v47, %s8157_s17 }
 0x2ce   :  { %6826 = vrot.lane.b32.xlu0 %v6805_v37, %s8157_s17 }
 0x2d0   :  { %6831 = vrot.lane.b32.xlu1 %v6810_v35, %s8157_s17 }
 0x334   :  { %v6797_v60 = vpop.permute.xlu0 %6796 }
 0x335   :  { %v6799_v0 = vunpack.i.h.bf16 %v6797_v60  ;;  %v6798_v46 = vunpack.i.l.bf16 %v6797_v60 }
 0x336   :  { %v6802_v61 = vpop.permute.xlu1 %6801 }
 0x337   :  { %v6804_v34 = vunpack.i.h.bf16 %v6802_v61  ;;  %v6803_v1 = vunpack.i.l.bf16 %v6802_v61 }
 0x338   :  { %v6807_v57 = vpop.permute.xlu0 %6806 }
 0x339   :  { %v6809_v38 = vunpack.i.h.bf16 %v6807_v57  ;;  %v6808_v17 = vunpack.i.l.bf16 %v6807_v57 }
 0x33a   :  { %v6812_v48 = vpop.permute.xlu1 %6811 }
 0x33b   :  { %v1308_v41 = vsel %vm16550_vm5, %v6798_v46, %v6808_v17  ;;  %v1309_v58 = vsel %vm16551_vm4, %v6799_v0, %v6809_v38  ;;  %v1312_v50 = vsel %vm16552_vm9, %v6808_v17, %v6798_v46  ;;  %v1313_v8 = vsel %vm16553_vm6, %v6809_v38, %v6799_v0  ;;  %vm16556_vm5 = vmmov %vm16551_vm4 }
 0x33c   :  { %v1316_v12 = vsel %vm8249_vm1, %v1308_v41, -inf  ;;  %v1317_v19 = vsel %vm16554_vm7, %v1312_v50, -inf  ;;  %v6817_v63 = vpop.permute.xlu0 %6816  ;;  %v1318_v33 = vsel %vm8249_vm1, %v1309_v58, -inf  ;;  %v1319_v44 = vsel %vm16554_vm7, %v1313_v8, -inf  ;;  %vm16557_vm9 = vmmov %vm16551_vm4 }
 0x33d   :  { %v6814_v36 = vunpack.i.h.bf16 %v6812_v48  ;;  %v6813_v3 = vunpack.i.l.bf16 %v6812_v48  ;;  %v1324_v43 = vmax.f32 %v1284_v52, %v1316_v12  ;;  %v1325_v53 = vmax.f32 %v1285_v5, %v1317_v19 }
 0x33e   :  { %v6822_v16 = vpop.permute.xlu1 %6821  ;;  %v1326_v35 = vmax.f32 %v1286_v40, %v1318_v33  ;;  %v1327_v60 = vmax.f32 %v1287_v45, %v1319_v44  ;;  %v6819_v5 = vunpack.i.h.bf16 %v6817_v63  ;;  %v6818_v57 = vunpack.i.l.bf16 %v6817_v63 }
 0x33f   :  { %v1310_v39 = vsel %vm16555_vm14, %v6803_v1, %v6813_v3  ;;  %v1311_v15 = vsel %vm16556_vm5, %v6804_v34, %v6814_v36  ;;  %v1314_v6 = vsel %vm16551_vm4, %v6813_v3, %v6803_v1  ;;  %v1315_v47 = vsel %vm16557_vm9, %v6814_v36, %v6804_v34 }
 0x340   :  { %v6827_v37 = vpop.permute.xlu0 %6826  ;;  %v1320_v61 = vsel %vm8249_vm1, %v1310_v39, -inf  ;;  %v1321_v52 = vsel %vm16554_vm7, %v1314_v6, -inf  ;;  %v6824_v0 = vunpack.i.h.bf16 %v6822_v16  ;;  %v6823_v46 = vunpack.i.l.bf16 %v6822_v16 }
 0x341   :  { %v1322_v17 = vsel %vm8249_vm1, %v1311_v15, -inf  ;;  %v1323_v48 = vsel %vm16554_vm7, %v1315_v47, -inf  ;;  %v6829_v41 = vunpack.i.h.bf16 %v6827_v37  ;;  %v6828_v40 = vunpack.i.l.bf16 %v6827_v37 }
 0x342   :  { %v6832_v38 = vpop.permute.xlu1 %6831  ;;  %v1328_v45 = vmax.f32 %v1288_v7, %v1320_v61  ;;  %v1329_v58 = vmax.f32 %v1289_v42, %v1321_v52  ;;  %vm16558_vm6 = vcmp.lt.s32.totalorder %v8237_v11, 1  ;;  %vm16562_vm9 = vnez %v16424_v25 }
 0x343   :  { %v6834_v50 = vunpack.i.h.bf16 %v6832_v38  ;;  %v6833_v8 = vunpack.i.l.bf16 %v6832_v38  ;;  %v1348_v12 = vsel %vm16558_vm6, %v6818_v57, %v6828_v40  ;;  %vm16559_vm14 = vmmov %vm16558_vm6  ;;  %v1330_v37 = vmax.f32 %v8865_v10, %v1322_v17 }
 0x344   :  { %v1349_v19 = vsel %vm16559_vm14, %v6819_v5, %v6829_v41  ;;  %vm16560_vm5 = vmmov %vm16558_vm6  ;;  %v1357_v7 = vsel %vm16562_vm9, %v1348_v12, -inf  ;;  %v1331_v61 = vmax.f32 %v8869_v26, %v1323_v48 }
 0x345   :  { %v1352_v63 = vsel %vm16560_vm5, %v6828_v40, %v6818_v57  ;;  %vm16561_vm4 = vmmov %vm16560_vm5  ;;  %v1359_v33 = vsel %vm16562_vm9, %v1349_v19, -inf  ;;  %v1365_v36 = vmax.f32 %v1325_v53, %v1357_v7  ;;  %v68_v7 = vld [vmem:[%s15938_s2] sm:$0xff] }
 0x346   :  { %v1353_v34 = vsel %vm16561_vm4, %v6829_v41, %v6819_v5  ;;  %v1356_v1 = vsel %vm8242_vm0, %v1352_v63, -inf  ;;  %v1367_v16 = vmax.f32 %v1327_v60, %v1359_v33  ;;  %vm16563_vm6 = vmmov %vm16561_vm4  ;;  %v1355_v47 = vsel %vm16561_vm4, %v6834_v50, %v6824_v0 }
 0x347   :  { %v1358_v42 = vsel %vm8242_vm0, %v1353_v34, -inf  ;;  %v1364_v44 = vmax.f32 %v1324_v43, %v1356_v1  ;;  %v1350_v39 = vsel %vm16563_vm6, %v6823_v46, %v6833_v8  ;;  %vm16564_vm14 = vmmov %vm16561_vm4  ;;  %v1362_v52 = vsel %vm8242_vm0, %v1355_v47, -inf  ;;  %v7877_v1 = vld [vmem:[%s15937_s4 + $0x4] ss:$8 sps:$4 sm:$0xff]  }
 0x348   :  { %v1366_v3 = vmax.f32 %v1326_v35, %v1358_v42  ;;  %v1351_v15 = vsel %vm16564_vm14, %v6824_v0, %v6834_v50  ;;  %vm16565_vm5 = vmmov %vm16561_vm4  ;;  %v1361_v60 = vsel %vm16562_vm9, %v1350_v39, -inf  ;;  %v1373_v38 = vmax.f32 %v1365_v36, 0.0  ;;  %v70_v42 = vld [vmem:[%s15938_s2 + $0x10] sm:$0xff]  ;;  %v71_v39 = vld [vmem:[%s15938_s2 + $0x18] sm:$0xff] }
 0x349   :  { %v1354_v6 = vsel %vm16565_vm5, %v6833_v8, %v6823_v46  ;;  %v1372_v43 = vmax.f32 %v1364_v44, 0.0  ;;  %v1363_v5 = vsel %vm16562_vm9, %v1351_v15, -inf  ;;  %v1369_v0 = vmax.f32 %v1329_v58, %v1361_v60  ;;  %v80_v44 = vld [vmem:[%s15938_s2 + $0x60] sm:$0xff]  ;;  %v82_v36 = vld [vmem:[%s15938_s2 + $0x70] sm:$0xff]  ;;  %v75_v60 = vld [vmem:[%s15938_s2 + $0x38] sm:$0xff] }
 0x34a   :  { %v1374_v53 = vmax.f32 %v1366_v3, 0.0  ;;  %v1360_v35 = vsel %vm8242_vm0, %v1354_v6, -inf  ;;  %v1370_v46 = vmax.f32 %v1330_v37, %v1362_v52  ;;  %v1371_v10 = vmax.f32 %v1331_v61, %v1363_v5  ;;  %v72_v15 = vld [vmem:[%s15938_s2 + $0x20] sm:$0xff]  ;;  %v74_v6 = vld [vmem:[%s15938_s2 + $0x30] sm:$0xff] }
 0x34b   :  { %v1368_v57 = vmax.f32 %v1328_v45, %v1360_v35  ;;  %v1375_v26 = vmax.f32 %v1367_v16, 0.0  ;;  %v1377_v40 = vmax.f32 %v1369_v0, 0.0  ;;  %vm1651_vm6 = vcmask 130048   ;;  %v69_v16 = vld [vmem:[%s15938_s2 + $0x8] sm:$0xff]  ;;  %v76_v47 = vld [vmem:[%s15938_s2 + $0x40] sm:$0xff]  ;;  %v78_v37 = vld [vmem:[%s15938_s2 + $0x50] sm:$0xff] }
 0x34c   :  { %v6835_v17 = vpack.i.bf16 %v1374_v53, %v1372_v43  ;;  %v1378_v41 = vmax.f32 %v1370_v46, 0.0  ;;  %v1379_v50 = vmax.f32 %v1371_v10, 0.0  ;;  %v8951_v58 = vpack.c.bf16 %v1374_v53, %v1372_v43  ;;  %6558 = vmatprep.mubr.msk.bf16.mxu0 %vm1651_vm6, %v7877_v1  ;;  %6567 = vmatprep.mubr.msk.bf16.mxu1 %vm1651_vm6, %v7877_v1  ;;  %v73_v35 = vld [vmem:[%s15938_s2 + $0x28] sm:$0xff] }
 0x34d   :  { %v1376_v48 = vmax.f32 %v1368_v57, 0.0  ;;  %v6845_v12 = vpack.i.bf16 %v1375_v26, %v1373_v38  ;;  %v8949_v45 = vpack.c.bf16 %v1375_v26, %v1373_v38  ;;  %v8993_v33 = vpack.i.bf16 %v70_v42, %v68_v7 }
 0x34e   :  { %6836 = vrot.lane.b32.xlu0 %v6835_v17, %s8159_s18  ;;  %v6850_v19 = vpack.i.bf16 %v1379_v50, %v1377_v40  ;;  %v8953_v63 = vpack.c.bf16 %v1379_v50, %v1377_v40  ;;  %v9004_v3 = vpack.i.bf16 %v82_v36, %v80_v44  ;;  %v9024_v61 = vpack.i.bf16 %v74_v6, %v72_v15  ;;  %v81_v36 = vld [vmem:[%s15938_s2 + $0x68] sm:$0xff] }
 0x34f   :  { %v6840_v8 = vpack.i.bf16 %v1378_v41, %v1376_v48  ;;  %v8955_v34 = vpack.c.bf16 %v1378_v41, %v1376_v48  ;;  %v9028_v43 = vpack.i.bf16 %v71_v39, %v69_v16  ;;  %v9032_v53 = vpack.i.bf16 %v78_v37, %v76_v47  ;;  %v83_v16 = vld [vmem:[%s15938_s2 + $0x78] sm:$0xff] }
 0x350   :  { %v7025_v52 = vpack.i.bf16 %v75_v60, %v73_v35  ;;  %vm16566_vm14 = vcmp.lt.s32.totalorder %v8237_v11, 112 }
 0x351   :  { %6841 = vrot.lane.b32.xlu1 %v6840_v8, %s8159_s18  ;;  %vm16567_vm5 = vmmov %vm16566_vm14 }
 0x352   :  { %6846 = vrot.lane.b32.xlu0 %v6845_v12, %s8159_s18  ;;  %vm16568_vm4 = vmmov %vm16567_vm5 }
 0x353   :  { %vm16569_vm6 = vmmov %vm16568_vm4 }
 0x354   :  { %vm16573_vm9 = vmmov %vm16568_vm4 }
 0x355   :  { %6851 = vrot.lane.b32.xlu1 %v6850_v19, %s8159_s18 }
 0x356   :  { %6856 = vrot.lane.b32.xlu0 %v6835_v17, %s8161_s20 }
 0x359   :  { %6861 = vrot.lane.b32.xlu1 %v6840_v8, %s8161_s20 }
 0x35a   :  { %6866 = vrot.lane.b32.xlu0 %v6845_v12, %s8161_s20 }
 0x35d   :  { %6871 = vrot.lane.b32.xlu1 %v6850_v19, %s8161_s20 }
 0x35e   :  { %6876 = vrot.lane.b32.xlu0 %v6835_v17, %s8155_s15 }
 0x361   :  { %6881 = vrot.lane.b32.xlu1 %v6840_v8, %s8155_s15 }
 0x362   :  { %6886 = vrot.lane.b32.xlu0 %v6845_v12, %s8155_s15 }
 0x365   :  { %6891 = vrot.lane.b32.xlu1 %v6850_v19, %s8155_s15 }
 0x366   :  { %6896 = vrot.lane.b32.xlu0 %v6835_v17, %s8157_s17 }
 0x369   :  { %6901 = vrot.lane.b32.xlu1 %v6840_v8, %s8157_s17 }
 0x36a   :  { %6906 = vrot.lane.b32.xlu0 %v6845_v12, %s8157_s17 }
 0x36d   :  { %6911 = vrot.lane.b32.xlu1 %v6850_v19, %s8157_s17 }
 0x36e   :  { %6916 = vrot.lane.b32.xlu0 %v6835_v17, %s8160_s19 }
 0x371   :  { %6921 = vrot.lane.b32.xlu1 %v6840_v8, %s8160_s19 }
 0x372   :  { %6926 = vrot.lane.b32.xlu0 %v6845_v12, %s8160_s19 }
 0x375   :  { %6931 = vrot.lane.b32.xlu1 %v6850_v19, %s8160_s19 }
 0x376   :  { %6936 = vrot.lane.b32.xlu0 %v6835_v17, %s8156_s16 }
 0x379   :  { %6941 = vrot.lane.b32.xlu1 %v6840_v8, %s8156_s16 }
 0x37a   :  { %6946 = vrot.lane.b32.xlu0 %v6845_v12, %s8156_s16 }
 0x37d   :  { %6951 = vrot.lane.b32.xlu1 %v6850_v19, %s8156_s16 }
 0x37e   :  { %6956 = vrot.lane.b32.xlu0 %v6835_v17, %s8158_s0 }
 0x381   :  { %6961 = vrot.lane.b32.xlu1 %v6840_v8, %s8158_s0 }
 0x382   :  { %6966 = vrot.lane.b32.xlu0 %v6845_v12, %s8158_s0 }
 0x385   :  { %6971 = vrot.lane.b32.xlu1 %v6850_v19, %s8158_s0 }
 0x386   :  { %6976 = vrot.lane.b32.xlu0 %v6835_v17, %s8162_s21 }
 0x389   :  { %6981 = vrot.lane.b32.xlu1 %v6840_v8, %s8162_s21 }
 0x38a   :  { %6986 = vrot.lane.b32.xlu0 %v6845_v12, %s8162_s21 }
 0x38d   :  { %6991 = vrot.lane.b32.xlu1 %v6850_v19, %s8162_s21 }
 0x38e   :  { %6996 = vrot.lane.b32.xlu0 %v8993_v33, %s8158_s0 }
 0x391   :  { %7001 = vrot.lane.b32.xlu1 %v9024_v61, %s8158_s0 }
 0x392   :  { %7011 = vrot.lane.b32.xlu0 %v9004_v3, %s8158_s0 }
 0x395   :  { %7006 = vrot.lane.b32.xlu1 %v9032_v53, %s8158_s0 }
 0x396   :  { %7016 = vrot.lane.b32.xlu0 %v9028_v43, %s8158_s0 }
 0x399   :  { %7026 = vrot.lane.b32.xlu1 %v7025_v52, %s8160_s19 }
 0x39a   :  { %7021 = vrot.lane.b32.xlu0 %v9024_v61, %s8160_s19 }
 0x39d   :  { %7036 = vrot.lane.b32.xlu1 %v9028_v43, %s8160_s19 }
 0x39e   :  { %7031 = vrot.lane.b32.xlu0 %v8993_v33, %s8160_s19 }
 0x3a1   :  { %7046 = vrot.lane.b32.xlu1 %v7025_v52, %s8156_s16 }
 0x3a2   :  { %7041 = vrot.lane.b32.xlu0 %v9024_v61, %s8156_s16 }
 0x3a5   :  { %7056 = vrot.lane.b32.xlu1 %v9028_v43, %s8156_s16 }
 0x3a6   :  { %7051 = vrot.lane.b32.xlu0 %v8993_v33, %s8156_s16 }
 0x3a9   :  { %7061 = vrot.lane.b32.xlu1 %v9024_v61, %s8159_s18 }
 0x3aa   :  { %7066 = vrot.lane.b32.xlu0 %v7025_v52, %s8159_s18 }
 0x3ad   :  { %7071 = vrot.lane.b32.xlu1 %v8993_v33, %s8159_s18 }
 0x3ae   :  { %7076 = vrot.lane.b32.xlu0 %v9028_v43, %s8159_s18 }
 0x3b1   :  { %7081 = vrot.lane.b32.xlu1 %v8993_v33, %s8155_s15 }
 0x3b2   :  { %7086 = vrot.lane.b32.xlu0 %v9028_v43, %s8155_s15 }
 0x3b5   :  { %7091 = vrot.lane.b32.xlu1 %v9024_v61, %s8161_s20 }
 0x3b6   :  { %7096 = vrot.lane.b32.xlu0 %v7025_v52, %s8161_s20 }
 0x3b9   :  { %7101 = vrot.lane.b32.xlu1 %v8993_v33, %s8161_s20 }
 0x3ba   :  { %7106 = vrot.lane.b32.xlu0 %v9028_v43, %s8161_s20 }
 0x3bd   :  { %7111 = vrot.lane.b32.xlu1 %v9024_v61, %s8155_s15 }
 0x3be   :  { %7116 = vrot.lane.b32.xlu0 %v7025_v52, %s8155_s15 }
 0x3c0   :  { %v6837_v5 = vpop.permute.xlu0 %6836 }
 0x3c1   :  { %7121 = vrot.lane.b32.xlu1 %v9024_v61, %s8157_s17  ;;  %v6839_v46 = vunpack.i.h.bf16 %v6837_v5  ;;  %v6838_v10 = vunpack.i.l.bf16 %v6837_v5 }
 0x3c2   :  { %7126 = vrot.lane.b32.xlu0 %v7025_v52, %s8157_s17 }
 0x3c3   :  { %v6842_v57 = vpop.permute.xlu1 %6841 }
 0x3c4   :  { %v6847_v0 = vpop.permute.xlu0 %6846  ;;  %v6844_v17 = vunpack.i.h.bf16 %v6842_v57  ;;  %v6843_v48 = vunpack.i.l.bf16 %v6842_v57 }
 0x3c5   :  { %v6849_v38 = vunpack.i.h.bf16 %v6847_v0  ;;  %v6848_v26 = vunpack.i.l.bf16 %v6847_v0  ;;  %7131 = vrot.lane.b32.xlu1 %v8993_v33, %s8157_s17  ;;  %v9115_v0 = vpack.i.bf16 %v83_v16, %v81_v36 }
 0x3c6   :  { %7136 = vrot.lane.b32.xlu0 %v9028_v43, %s8157_s17 }
 0x3c7   :  { %v1598_v41 = vsel %vm16566_vm14, %v6848_v26, %v6838_v10  ;;  %v1599_v40 = vsel %vm16567_vm5, %v6849_v38, %v6839_v46  ;;  %v1594_v50 = vsel %vm16568_vm4, %v6838_v10, %v6848_v26  ;;  %v1595_v8 = vsel %vm16569_vm6, %v6839_v46, %v6849_v38  ;;  %v6852_v12 = vpop.permute.xlu1 %6851  ;;  %vm16571_vm5 = vmmov %vm16568_vm4 }
 0x3c8   :  { %v6857_v19 = vpop.permute.xlu0 %6856  ;;  %v1603_v1 = vpack.c.bf16 %v1599_v40, %v1598_v41  ;;  %v1602_v7 = vpack.c.bf16 %v1595_v8, %v1594_v50  ;;  %v6854_v42 = vunpack.i.h.bf16 %v6852_v12  ;;  %v6853_v44 = vunpack.i.l.bf16 %v6852_v12  ;;  %vm16572_vm6 = vmmov %vm16568_vm4 }
 0x3c9   :  { %vm16570_vm14 = vnez %v16474_v13  ;;  %7141 = vrot.lane.b32.xlu1 %v9024_v61, %s8162_s21  ;;  %v6859_v46 = vunpack.i.h.bf16 %v6857_v19  ;;  %v6858_v10 = vunpack.i.l.bf16 %v6857_v19  ;;  %v77_v61 = vld [vmem:[%s15938_s2 + $0x48] sm:$0xff] }
 0x3ca   :  { %6550 = vmatprep.subr.msk.bf16.mxu0 %vm8486_vm12, %v1603_v1  ;;  %v1606_v39 = vsel %vm16570_vm14, %v1602_v7, 0  ;;  %v1600_v15 = vsel %vm16571_vm5, %v6853_v44, %v6843_v48  ;;  %v1601_v6 = vsel %vm16568_vm4, %v6854_v42, %v6844_v17  ;;  %v1596_v47 = vsel %vm16572_vm6, %v6843_v48, %v6853_v44  ;;  %7146 = vrot.lane.b32.xlu0 %v7025_v52, %s8162_s21 }
 0x3cb   :  { %1656 = vmatpush1.bf16.msra.mxu0 %v1606_v39  ;;  %v6862_v37 = vpop.permute.xlu1 %6861  ;;  %v1605_v35 = vpack.c.bf16 %v1601_v6, %v1600_v15  ;;  %v1597_v60 = vsel %vm16573_vm9, %v6844_v17, %v6854_v42  ;;  %v79_v17 = vld [vmem:[%s15938_s2 + $0x58] sm:$0xff]  ;;  %vm16574_vm9 = vcmp.lt.s32.totalorder %v8237_v11, 113 }
 0x3cc   :  { %v6867_v5 = vpop.permute.xlu0 %6866  ;;  %v1604_v57 = vpack.c.bf16 %v1597_v60, %v1596_v47  ;;  %v6864_v52 = vunpack.i.h.bf16 %v6862_v37  ;;  %v6863_v48 = vunpack.i.l.bf16 %v6862_v37  ;;  %vm16575_vm5 = vmmov %vm16574_vm9  ;;  %v9139_v36 = vpack.i.bf16 %v79_v17, %v77_v61 }
 0x3cd   :  { %v6869_v38 = vunpack.i.h.bf16 %v6867_v5  ;;  %v6868_v26 = vunpack.i.l.bf16 %v6867_v5  ;;  %6559 = vmatprep.subr.msk.bf16.mxu1 %vm8486_vm12, %v1605_v35  ;;  %vm16576_vm4 = vmmov %vm16575_vm5  ;;  %7151 = vrot.lane.b32.xlu1 %v8993_v33, %s8162_s21 }
 0x3ce   :  { %v1608_v41 = vsel %vm16570_vm14, %v1604_v57, 0  ;;  %7156 = vrot.lane.b32.xlu0 %v9028_v43, %s8162_s21  ;;  %vm16577_vm6 = vmmov %vm16576_vm4 }
 0x3cf   :  { %v1566_v40 = vsel %vm16574_vm9, %v6868_v26, %v6858_v10  ;;  %v1567_v50 = vsel %vm16575_vm5, %v6869_v38, %v6859_v46  ;;  %v1562_v8 = vsel %vm16576_vm4, %v6858_v10, %v6868_v26  ;;  %v1563_v43 = vsel %vm16577_vm6, %v6859_v46, %v6869_v38  ;;  %1699 = vmatpush1.bf16.msra.mxu1 %v1608_v41  ;;  %v6872_v12 = vpop.permute.xlu1 %6871  ;;  %vm16578_vm9 = vmmov %vm16576_vm4 }
 0x3d0   :  { %v6877_v19 = vpop.permute.xlu0 %6876  ;;  %v1571_v1 = vpack.c.bf16 %v1567_v50, %v1566_v40  ;;  %v1570_v7 = vpack.c.bf16 %v1563_v43, %v1562_v8  ;;  %v6874_v42 = vunpack.i.h.bf16 %v6872_v12  ;;  %v6873_v44 = vunpack.i.l.bf16 %v6872_v12  ;;  %vm16579_vm5 = vmmov %vm16576_vm4 }
 0x3d1   :  { %vm16580_vm6 = vmmov %vm16576_vm4  ;;  %7161 = vrot.lane.b32.xlu1 %v9004_v3, %s8160_s19  ;;  %v6879_v5 = vunpack.i.h.bf16 %v6877_v19  ;;  %v6878_v57 = vunpack.i.l.bf16 %v6877_v19 }
 0x3d2   :  { %6551 = vmatprep.subr.msk.bf16.mxu0 %vm8550_vm11, %v1571_v1  ;;  %v1574_v16 = vsel %vm8543_vm8, %v1570_v7, 0  ;;  %v1568_v39 = vsel %vm16578_vm9, %v6873_v44, %v6863_v48  ;;  %v1569_v15 = vsel %vm16579_vm5, %v6874_v42, %v6864_v52  ;;  %v1564_v6 = vsel %vm16576_vm4, %v6863_v48, %v6873_v44  ;;  %7166 = vrot.lane.b32.xlu0 %v9115_v0, %s8160_s19 }
 0x3d3   :  { %1658 = vmatpush1.bf16.msra.mxu0 %v1574_v16  ;;  %v6882_v33 = vpop.permute.xlu1 %6881  ;;  %v1573_v47 = vpack.c.bf16 %v1569_v15, %v1568_v39  ;;  %v1565_v37 = vsel %vm16580_vm6, %v6864_v52, %v6874_v42  ;;  %vm16581_vm9 = vcmp.lt.s32.totalorder %v8237_v11, 127 }
 0x3d4   :  { %v6887_v35 = vpop.permute.xlu0 %6886  ;;  %v1572_v60 = vpack.c.bf16 %v1565_v37, %v1564_v6  ;;  %v6884_v38 = vunpack.i.h.bf16 %v6882_v33  ;;  %v6883_v26 = vunpack.i.l.bf16 %v6882_v33  ;;  %vm16582_vm5 = vmmov %vm16581_vm9 }
 0x3d5   :  { %v6889_v46 = vunpack.i.h.bf16 %v6887_v35  ;;  %v6888_v10 = vunpack.i.l.bf16 %v6887_v35  ;;  %6560 = vmatprep.subr.msk.bf16.mxu1 %vm8550_vm11, %v1573_v47  ;;  %vm16583_vm4 = vmmov %vm16582_vm5  ;;  %7171 = vrot.lane.b32.xlu1 %v9032_v53, %s8160_s19 }
 0x3d6   :  { %v1576_v48 = vsel %vm8543_vm8, %v1572_v60, 0  ;;  %7176 = vrot.lane.b32.xlu0 %v9139_v36, %s8160_s19  ;;  %vm16584_vm6 = vmmov %vm16583_vm4 }
 0x3d7   :  { %v1534_v52 = vsel %vm16581_vm9, %v6888_v10, %v6878_v57  ;;  %v1535_v41 = vsel %vm16582_vm5, %v6889_v46, %v6879_v5  ;;  %v1530_v61 = vsel %vm16583_vm4, %v6878_v57, %v6888_v10  ;;  %v1531_v17 = vsel %vm16584_vm6, %v6879_v5, %v6889_v46  ;;  %1701 = vmatpush1.bf16.msra.mxu1 %v1576_v48  ;;  %v6892_v40 = vpop.permute.xlu1 %6891  ;;  %vm16587_vm6 = vmmov %vm16583_vm4 }
 0x3d8   :  { %v6897_v50 = vpop.permute.xlu0 %6896  ;;  %v1539_v8 = vpack.c.bf16 %v1535_v41, %v1534_v52  ;;  %v1538_v43 = vpack.c.bf16 %v1531_v17, %v1530_v61  ;;  %v6894_v12 = vunpack.i.h.bf16 %v6892_v40  ;;  %v6893_v19 = vunpack.i.l.bf16 %v6892_v40  ;;  %vm16588_vm8 = vmmov %vm16583_vm4 }
 0x3d9   :  { %vm16585_vm9 = vnez %v16449_v54  ;;  %vm16586_vm5 = vnez %v16446_v51  ;;  %vm16589_vm11 = vmmov %vm16583_vm4  ;;  %7181 = vrot.lane.b32.xlu1 %v9004_v3, %s8156_s16  ;;  %v6899_v47 = vunpack.i.h.bf16 %v6897_v50  ;;  %v6898_v37 = vunpack.i.l.bf16 %v6897_v50 }
 0x3da   :  { %6552 = vmatprep.subr.msk.bf16.mxu0 %vm16585_vm9, %v1539_v8  ;;  %v1542_v1 = vsel %vm16586_vm5, %v1538_v43, 0  ;;  %v1536_v7 = vsel %vm16583_vm4, %v6893_v19, %v6883_v26  ;;  %v1537_v42 = vsel %vm16587_vm6, %v6894_v12, %v6884_v38  ;;  %v1532_v44 = vsel %vm16588_vm8, %v6883_v26, %v6893_v19  ;;  %7186 = vrot.lane.b32.xlu0 %v9115_v0, %s8156_s16 }
 0x3db   :  { %1660 = vmatpush1.bf16.msra.mxu0 %v1542_v1  ;;  %v6902_v16 = vpop.permute.xlu1 %6901  ;;  %v1541_v39 = vpack.c.bf16 %v1537_v42, %v1536_v7  ;;  %v1533_v15 = vsel %vm16589_vm11, %v6884_v38, %v6894_v12  ;;  %vm16590_vm11 = vcmp.lt.s32.totalorder %v8237_v11, 1 }
 0x3dc   :  { %v6907_v6 = vpop.permute.xlu0 %6906  ;;  %1661 = vmatprep.subr.bf16.mxu0 %v8949_v45  ;;  %v1540_v33 = vpack.c.bf16 %v1533_v15, %v1532_v44  ;;  %v6904_v5 = vunpack.i.h.bf16 %v6902_v16  ;;  %v6903_v57 = vunpack.i.l.bf16 %v6902_v16  ;;  %vm16591_vm8 = vmmov %vm16590_vm11 }
 0x3dd   :  { %v6909_v35 = vunpack.i.h.bf16 %v6907_v6  ;;  %v6908_v60 = vunpack.i.l.bf16 %v6907_v6  ;;  %6561 = vmatprep.subr.msk.bf16.mxu1 %vm16585_vm9, %v1541_v39  ;;  %vm16592_vm4 = vmmov %vm16591_vm8  ;;  %7191 = vrot.lane.b32.xlu1 %v9032_v53, %s8156_s16 }
 0x3de   :  { %v1544_v46 = vsel %vm16586_vm5, %v1540_v33, 0  ;;  %7196 = vrot.lane.b32.xlu0 %v9139_v36, %s8156_s16  ;;  %vm16593_vm6 = vmmov %vm16592_vm4 }
 0x3df   :  { %v1494_v45 = vsel %vm16590_vm11, %v6898_v37, %v6908_v60  ;;  %v1495_v10 = vsel %vm16591_vm8, %v6899_v47, %v6909_v35  ;;  %1662 = vmatpush1.bf16.msra.mxu0 %v8951_v58  ;;  %v1498_v38 = vsel %vm16592_vm4, %v6908_v60, %v6898_v37  ;;  %v1499_v26 = vsel %vm16593_vm6, %v6909_v35, %v6899_v47  ;;  %v6912_v48 = vpop.permute.xlu1 %6911  ;;  %vm16596_vm6 = vmmov %vm16592_vm4 }
 0x3e0   :  { %v6917_v52 = vpop.permute.xlu0 %6916  ;;  %v1503_v41 = vpack.c.bf16 %v1495_v10, %v1494_v45  ;;  %v1502_v61 = vpack.c.bf16 %v1499_v26, %v1498_v38  ;;  %1703 = vmatpush1.bf16.msra.mxu1 %v1544_v46  ;;  %v6914_v17 = vunpack.i.h.bf16 %v6912_v48  ;;  %v6913_v40 = vunpack.i.l.bf16 %v6912_v48  ;;  %vm16597_vm9 = vmmov %vm16592_vm4 }
 0x3e1   :  { %1704 = vmatprep.subr.bf16.mxu1 %v8953_v63  ;;  %vm16594_vm11 = vnez %v16463_v4  ;;  %vm16595_vm8 = vnez %v16460_v2  ;;  %vm16598_vm5 = vmmov %vm16592_vm4  ;;  %7206 = vrot.lane.b32.xlu1 %v9004_v3, %s8159_s18  ;;  %v6919_v42 = vunpack.i.h.bf16 %v6917_v52  ;;  %v6918_v44 = vunpack.i.l.bf16 %v6917_v52 }
 0x3e2   :  { %6553 = vmatprep.subr.msk.bf16.mxu0 %vm16594_vm11, %v1503_v41  ;;  %v1506_v58 = vsel %vm16595_vm8, %v1502_v61, 0  ;;  %v1496_v50 = vsel %vm16592_vm4, %v6903_v57, %v6913_v40  ;;  %v1497_v8 = vsel %vm16596_vm6, %v6904_v5, %v6914_v17  ;;  %v1500_v43 = vsel %vm16597_vm9, %v6913_v40, %v6903_v57  ;;  %7201 = vrot.lane.b32.xlu0 %v9115_v0, %s8158_s0 }
 0x3e3   :  { %1664 = vmatpush1.bf16.msra.mxu0 %v1506_v58  ;;  %v6922_v63 = vpop.permute.xlu1 %6921  ;;  %v1505_v12 = vpack.c.bf16 %v1497_v8, %v1496_v50  ;;  %v1501_v19 = vsel %vm16598_vm5, %v6914_v17, %v6904_v5  ;;  %vm16599_vm9 = vcmp.lt.s32.totalorder %v8237_v11, 15 }
 0x3e4   :  { %v6927_v1 = vpop.permute.xlu0 %6926  ;;  %1705 = vmatpush1.bf16.msra.mxu1 %v8955_v34  ;;  %v1504_v7 = vpack.c.bf16 %v1501_v19, %v1500_v43  ;;  %v6924_v15 = vunpack.i.h.bf16 %v6922_v63  ;;  %v6923_v6 = vunpack.i.l.bf16 %v6922_v63  ;;  %vm16600_vm5 = vmmov %vm16599_vm9 }
 0x3e5   :  { %v6929_v16 = vunpack.i.h.bf16 %v6927_v1  ;;  %v6928_v39 = vunpack.i.l.bf16 %v6927_v1  ;;  %6562 = vmatprep.subr.msk.bf16.mxu1 %vm16594_vm11, %v1505_v12  ;;  %vm16601_vm4 = vmmov %vm16600_vm5 }
 0x3e6   :  { %v1508_v33 = vsel %vm16595_vm8, %v1504_v7, 0  ;;  %vm16602_vm6 = vmmov %vm16601_vm4  ;;  %vm16611_vm8 = vnez %v16457_v62 }
 0x3e7   :  { %v1462_v47 = vsel %vm16599_vm9, %v6918_v44, %v6928_v39  ;;  %v1463_v34 = vsel %vm16600_vm5, %v6919_v42, %v6929_v16  ;;  %v1466_v37 = vsel %vm16601_vm4, %v6928_v39, %v6918_v44  ;;  %v1467_v35 = vsel %vm16602_vm6, %v6929_v16, %v6919_v42  ;;  %v6932_v60 = vpop.permute.xlu1 %6931  ;;  %vm16604_vm5 = vmmov %vm16601_vm4 }
 0x3e8   :  { %v6937_v5 = vpop.permute.xlu0 %6936  ;;  %v1471_v57 = vpack.c.bf16 %v1463_v34, %v1462_v47  ;;  %v1470_v46 = vpack.c.bf16 %v1467_v35, %v1466_v37  ;;  %1707 = vmatpush1.bf16.msra.mxu1 %v1508_v33  ;;  %v6934_v45 = vunpack.i.h.bf16 %v6932_v60  ;;  %v6933_v10 = vunpack.i.l.bf16 %v6932_v60  ;;  %vm16605_vm6 = vmmov %vm16601_vm4 }
 0x3e9   :  { %vm16603_vm9 = vnez %v16484_v59  ;;  %vm16606_vm11 = vmmov %vm16601_vm4  ;;  %v6939_v50 = vunpack.i.h.bf16 %v6937_v5  ;;  %v6938_v8 = vunpack.i.l.bf16 %v6937_v5 }
 0x3ea   :  { %6554 = vmatprep.subr.msk.bf16.mxu0 %vm8524_vm13, %v1471_v57  ;;  %v1474_v38 = vsel %vm16603_vm9, %v1470_v46, 0  ;;  %v1464_v26 = vsel %vm16604_vm5, %v6923_v6, %v6933_v10  ;;  %v1465_v48 = vsel %vm16601_vm4, %v6924_v15, %v6934_v45  ;;  %v1468_v52 = vsel %vm16605_vm6, %v6933_v10, %v6923_v6 }
 0x3eb   :  { %1666 = vmatpush1.bf16.msra.mxu0 %v1474_v38  ;;  %v6942_v41 = vpop.permute.xlu1 %6941  ;;  %v1473_v61 = vpack.c.bf16 %v1465_v48, %v1464_v26  ;;  %v1469_v17 = vsel %vm16606_vm11, %v6934_v45, %v6924_v15  ;;  %vm16607_vm5 = vcmp.lt.s32.totalorder %v8237_v11, 16 }
 0x3ec   :  { %v6947_v40 = vpop.permute.xlu0 %6946  ;;  %v1472_v58 = vpack.c.bf16 %v1469_v17, %v1468_v52  ;;  %v6944_v12 = vunpack.i.h.bf16 %v6942_v41  ;;  %v6943_v19 = vunpack.i.l.bf16 %v6942_v41  ;;  %vm16608_vm4 = vmmov %vm16607_vm5 }
 0x3ed   :  { %v6949_v43 = vunpack.i.h.bf16 %v6947_v40  ;;  %v6948_v63 = vunpack.i.l.bf16 %v6947_v40  ;;  %6563 = vmatprep.subr.msk.bf16.mxu1 %vm8524_vm13, %v1473_v61  ;;  %vm16609_vm11 = vmmov %vm16608_vm4 }
 0x3ee   :  { %v1476_v1 = vsel %vm16603_vm9, %v1472_v58, 0  ;;  %vm16610_vm6 = vmmov %vm16608_vm4 }
 0x3ef   :  { %v1430_v7 = vsel %vm16607_vm5, %v6938_v8, %v6948_v63  ;;  %v1431_v42 = vsel %vm16608_vm4, %v6939_v50, %v6949_v43  ;;  %v1434_v44 = vsel %vm16609_vm11, %v6948_v63, %v6938_v8  ;;  %v1435_v16 = vsel %vm16610_vm6, %v6949_v43, %v6939_v50  ;;  %1709 = vmatpush1.bf16.msra.mxu1 %v1476_v1  ;;  %v6952_v39 = vpop.permute.xlu1 %6951  ;;  %vm16613_vm11 = vmmov %vm16608_vm4 }
 0x3f0   :  { %v6957_v15 = vpop.permute.xlu0 %6956  ;;  %v1439_v6 = vpack.c.bf16 %v1431_v42, %v1430_v7  ;;  %v1438_v33 = vpack.c.bf16 %v1435_v16, %v1434_v44  ;;  %v6954_v47 = vunpack.i.h.bf16 %v6952_v39  ;;  %v6953_v34 = vunpack.i.l.bf16 %v6952_v39  ;;  %vm16614_vm6 = vmmov %vm16608_vm4 }
 0x3f1   :  { %vm16612_vm5 = vnez %v16452_v55  ;;  %vm16615_vm12 = vmmov %vm16608_vm4  ;;  %v6959_v26 = vunpack.i.h.bf16 %v6957_v15  ;;  %v6958_v48 = vunpack.i.l.bf16 %v6957_v15 }
 0x3f2   :  { %6555 = vmatprep.subr.msk.bf16.mxu0 %vm16611_vm8, %v1439_v6  ;;  %v1442_v37 = vsel %vm16612_vm5, %v1438_v33, 0  ;;  %v1432_v35 = vsel %vm16608_vm4, %v6943_v19, %v6953_v34  ;;  %v1433_v60 = vsel %vm16613_vm11, %v6944_v12, %v6954_v47  ;;  %v1436_v5 = vsel %vm16614_vm6, %v6953_v34, %v6943_v19 }
 0x3f3   :  { %1668 = vmatpush1.bf16.msra.mxu0 %v1442_v37  ;;  %v6962_v57 = vpop.permute.xlu1 %6961  ;;  %v1441_v46 = vpack.c.bf16 %v1433_v60, %v1432_v35  ;;  %v1437_v45 = vsel %vm16615_vm12, %v6954_v47, %v6944_v12  ;;  %vm16616_vm4 = vcmp.lt.s32.totalorder %v8237_v11, 17 }
 0x3f4   :  { %v6967_v10 = vpop.permute.xlu0 %6966  ;;  %v1440_v38 = vpack.c.bf16 %v1437_v45, %v1436_v5  ;;  %v6964_v61 = vunpack.i.h.bf16 %v6962_v57  ;;  %v6963_v17 = vunpack.i.l.bf16 %v6962_v57  ;;  %vm16617_vm11 = vmmov %vm16616_vm4 }
 0x3f5   :  { %v6969_v52 = vunpack.i.h.bf16 %v6967_v10  ;;  %v6968_v41 = vunpack.i.l.bf16 %v6967_v10  ;;  %6564 = vmatprep.subr.msk.bf16.mxu1 %vm16611_vm8, %v1441_v46  ;;  %vm16618_vm12 = vmmov %vm16616_vm4  ;;  %vm16620_vm8 = vnez %v16469_v32 }
 0x3f6   :  { %v1444_v40 = vsel %vm16612_vm5, %v1440_v38, 0  ;;  %vm16619_vm6 = vmmov %vm16616_vm4 }
 0x3f7   :  { %v1398_v58 = vsel %vm16616_vm4, %v6958_v48, %v6968_v41  ;;  %v1399_v50 = vsel %vm16617_vm11, %v6959_v26, %v6969_v52  ;;  %v1402_v8 = vsel %vm16618_vm12, %v6968_v41, %v6958_v48  ;;  %v1403_v43 = vsel %vm16619_vm6, %v6969_v52, %v6959_v26  ;;  %1711 = vmatpush1.bf16.msra.mxu1 %v1444_v40  ;;  %v6972_v63 = vpop.permute.xlu1 %6971  ;;  %vm16622_vm11 = vmmov %vm16619_vm6 }
 0x3f8   :  { %v6977_v12 = vpop.permute.xlu0 %6976  ;;  %v1407_v19 = vpack.c.bf16 %v1399_v50, %v1398_v58  ;;  %v1406_v1 = vpack.c.bf16 %v1403_v43, %v1402_v8  ;;  %v6974_v7 = vunpack.i.h.bf16 %v6972_v63  ;;  %v6973_v42 = vunpack.i.l.bf16 %v6972_v63  ;;  %vm16623_vm12 = vmmov %vm16619_vm6  ;;  %v7879_v63 = vld [vmem:[%s15937_s4] ss:$8 sps:$4 sm:$0xff]  }
 0x3f9   :  { %vm16621_vm4 = vnez %v16466_v31  ;;  %vm16624_vm14 = vmmov %vm16619_vm6  ;;  %v6979_v35 = vunpack.i.h.bf16 %v6977_v12  ;;  %v6978_v60 = vunpack.i.l.bf16 %v6977_v12 }
 0x3fa   :  { %6556 = vmatprep.subr.msk.bf16.mxu0 %vm16620_vm8, %v1407_v19  ;;  %v1410_v44 = vsel %vm16621_vm4, %v1406_v1, 0  ;;  %v1400_v16 = vsel %vm16622_vm11, %v6963_v17, %v6973_v42  ;;  %v1401_v39 = vsel %vm16623_vm12, %v6964_v61, %v6974_v7  ;;  %v1404_v15 = vsel %vm16619_vm6, %v6973_v42, %v6963_v17 }
 0x3fb   :  { %1670 = vmatpush1.bf16.msra.mxu0 %v1410_v44  ;;  %v6982_v6 = vpop.permute.xlu1 %6981  ;;  %v1409_v33 = vpack.c.bf16 %v1401_v39, %v1400_v16  ;;  %v1405_v47 = vsel %vm16624_vm14, %v6974_v7, %v6964_v61  ;;  %vm16625_vm11 = vcmp.lt.s32.totalorder %v8237_v11, 111 }
 0x3fc   :  { %v6987_v34 = vpop.permute.xlu0 %6986  ;;  %v1408_v37 = vpack.c.bf16 %v1405_v47, %v1404_v15  ;;  %v6984_v46 = vunpack.i.h.bf16 %v6982_v6  ;;  %v6983_v45 = vunpack.i.l.bf16 %v6982_v6  ;;  %vm16626_vm12 = vmmov %vm16625_vm11 }
 0x3fd   :  { %v6989_v5 = vunpack.i.h.bf16 %v6987_v34  ;;  %v6988_v57 = vunpack.i.l.bf16 %v6987_v34  ;;  %6565 = vmatprep.subr.msk.bf16.mxu1 %vm16620_vm8, %v1409_v33  ;;  %vm16627_vm14 = vmmov %vm16625_vm11  ;;  %vm16629_vm8 = vnez %v16500_v30 }
 0x3fe   :  { %v1412_v10 = vsel %vm16621_vm4, %v1408_v37, 0  ;;  %vm16628_vm6 = vmmov %vm16625_vm11 }
 0x3ff   :  { %v1630_v38 = vsel %vm16625_vm11, %v6988_v57, %v6978_v60  ;;  %v1631_v26 = vsel %vm16626_vm12, %v6989_v5, %v6979_v35  ;;  %v1626_v48 = vsel %vm16627_vm14, %v6978_v60, %v6988_v57  ;;  %v1627_v52 = vsel %vm16628_vm6, %v6979_v35, %v6989_v5  ;;  %1713 = vmatpush1.bf16.msra.mxu1 %v1412_v10  ;;  %v6992_v41 = vpop.permute.xlu1 %6991  ;;  %vm16631_vm12 = vmmov %vm16628_vm6 }
 0x400   :  { %v1635_v61 = vpack.c.bf16 %v1631_v26, %v1630_v38  ;;  %v1634_v17 = vpack.c.bf16 %v1627_v52, %v1626_v48  ;;  %v6994_v40 = vunpack.i.h.bf16 %v6992_v41  ;;  %v6993_v58 = vunpack.i.l.bf16 %v6992_v41  ;;  %vm16632_vm14 = vmmov %vm16628_vm6  ;;  %v9328_v44 = vpop.permute.xlu0 %6996 }
 0x401   :  { %vm16630_vm11 = vnez %v16497_v14  ;;  %vm16633_vm5 = vmmov %vm16628_vm6 }
 0x402   :  { %6557 = vmatprep.subr.msk.bf16.mxu0 %vm16629_vm8, %v1635_v61  ;;  %v1638_v50 = vsel %vm16630_vm11, %v1634_v17, 0  ;;  %v1632_v8 = vsel %vm16631_vm12, %v6993_v58, %v6983_v45  ;;  %v1633_v43 = vsel %vm16632_vm14, %v6994_v40, %v6984_v46  ;;  %v1628_v12 = vsel %vm16628_vm6, %v6983_v45, %v6993_v58 }
 0x403   :  { %1686 = vmatpush2.bf16.msra.mxu0 %v1638_v50  ;;  %v1637_v19 = vpack.c.bf16 %v1633_v43, %v1632_v8  ;;  %v1629_v1 = vsel %vm16633_vm5, %v6984_v46, %v6994_v40  ;;  %v9334_v15 = vpop.permute.xlu1 %7001  ;;  %vm16635_vm5 = vcmp.lt.s32.totalorder %v8237_v11, 15 }
 0x404   :  { %v1636_v7 = vpack.c.bf16 %v1629_v1, %v1628_v12  ;;  %v9330_v16 = vpop.permute.xlu0 %7011  ;;  %vm16636_vm12 = vmmov %vm16635_vm5 }
 0x405   :  { %6566 = vmatprep.subr.msk.bf16.mxu1 %vm16629_vm8, %v1637_v19  ;;  %vm16637_vm14 = vmmov %vm16635_vm5 }
 0x406   :  { %1688 = vmatmul.mubr.bf16.vlgmr.msra.gmra.mxu0 %v7879_v63  ;;  %v1640_v42 = vsel %vm16630_vm11, %v1636_v7, 0  ;;  %vm16638_vm6 = vmmov %vm16635_vm5 }
 0x407   :  { %1729 = vmatpush2.bf16.msra.mxu1 %v1640_v42  ;;  %v9336_v33 = vpop.permute.xlu1 %7006  ;;  %vm16639_vm11 = vmmov %vm16635_vm5 }
 0x408   :  { %v9332_v39 = vpop.permute.xlu0 %7016  ;;  %16634 = vst [vmem:[#allocation31_spill] sm:$0xff] %v9336_v33  ;;  %vm16640_vm8 = vmmov %vm16635_vm5 }
 0x40a   :  { %1731 = vmatmul.mubr.bf16.vlgmr.msra.gmra.mxu1 %v7879_v63 }
 0x40b   :  { %v7027_v37 = vpop.permute.xlu1 %7026 }
 0x40c   :  { %v7022_v6 = vpop.permute.xlu0 %7021  ;;  %v7029_v35 = vunpack.i.h.bf16 %v7027_v37  ;;  %v7028_v60 = vunpack.i.l.bf16 %v7027_v37 }
 0x40d   :  { %v7024_v47 = vunpack.i.h.bf16 %v7022_v6  ;;  %v7023_v34 = vunpack.i.l.bf16 %v7022_v6 }
 0x40f   :  { %v2239_v45 = vsel %vm16635_vm5, %v7023_v34, %v7028_v60  ;;  %v2240_v10 = vsel %vm16636_vm12, %v7024_v47, %v7029_v35  ;;  %v7037_v38 = vpop.permute.xlu1 %7036  ;;  %v2251_v41 = vsel %vm16637_vm14, %v7028_v60, %v7023_v34  ;;  %v2252_v61 = vsel %vm16638_vm6, %v7029_v35, %v7024_v47  ;;  %vm16641_vm12 = vmmov %vm16635_vm5 }
 0x410   :  { %v7032_v5 = vpop.permute.xlu0 %7031  ;;  %v7039_v26 = vunpack.i.h.bf16 %v7037_v38  ;;  %v7038_v48 = vunpack.i.l.bf16 %v7037_v38  ;;  %v2264_v52 = vpack.c.bf16 %v2240_v10, %v2239_v45  ;;  %v2263_v58 = vpack.c.bf16 %v2252_v61, %v2251_v41 }
 0x411   :  { %v7034_v57 = vunpack.i.h.bf16 %v7032_v5  ;;  %v7033_v46 = vunpack.i.l.bf16 %v7032_v5  ;;  %vm16682_vm14 = vcmp.lt.s32.totalorder %v8237_v11, 16 }
 0x412   :  { %6600 = vmatprep.subr.msk.bf16.mxu0 %vm8524_vm13, %v2264_v52  ;;  %v2275_v63 = vsel %vm16603_vm9, %v2263_v58, 0  ;;  %vm16683_vm6 = vmmov %vm16682_vm14 }
 0x413   :  { %v2237_v17 = vsel %vm16639_vm11, %v7033_v46, %v7038_v48  ;;  %v2238_v40 = vsel %vm16640_vm8, %v7034_v57, %v7039_v26  ;;  %v2249_v50 = vsel %vm16635_vm5, %v7038_v48, %v7033_v46  ;;  %v2250_v43 = vsel %vm16641_vm12, %v7039_v26, %v7034_v57  ;;  %2955 = vmatpush1.bf16.msra.mxu0 %v2275_v63 }
 0x414   :  { %v2262_v8 = vpack.c.bf16 %v2238_v40, %v2237_v17  ;;  %v2261_v12 = vpack.c.bf16 %v2250_v43, %v2249_v50  ;;  %v9412_v43 = vpop.permute.xlu1 %7046  ;;  %vm16680_vm8 = vcmp.lt.s32.totalorder %v8237_v11, 112 }
 0x415   :  { %vm16681_vm11 = vmmov %vm16680_vm8 }
 0x416   :  { %6601 = vmatprep.subr.msk.bf16.mxu0 %vm8524_vm13, %v2262_v8  ;;  %v2273_v19 = vsel %vm16603_vm9, %v2261_v12, 0  ;;  %v9408_v8 = vpop.permute.xlu0 %7041  ;;  %vm16684_vm5 = vmmov %vm16680_vm8 }
 0x417   :  { %2957 = vmatpush1.bf16.msra.mxu0 %v2273_v19  ;;  %vm16685_vm12 = vmmov %vm16684_vm5 }
 0x418   :  { %v9422_v12 = vpop.permute.xlu1 %7056 }
 0x41a   :  { %v9418_v63 = vpop.permute.xlu0 %7051 }
 0x41e   :  { %v9428_v19 = vpop.permute.xlu0 %7066 }
 0x4c6   :  { %v9362_v1 = vpop.f32.mrf.mxu0 }
 0x4c7   :  { %v1755_v7 = vmul.f32 %v9362_v1, %v9362_v1 }
 0x4c8   :  { %v9366_v42 = vpop.f32.mrf.mxu0 }
 0x4c9   :  { %v1741_v6 = vadd.f32 %v9366_v42, %v9362_v1  ;;  %v1756_v47 = vmul.f32 %v9366_v42, %v9366_v42 }
 0x4ca   :  { %v9372_v34 = vpop.f32.mrf.mxu0  ;;  %v9374_v37 = vpop.f32.mrf.mxu1 }
 0x4cb   :  { %1742 = vadd.xlane.f32.xlu0 %v1741_v6  ;;  %v1763_v35 = vadd.f32 %v1756_v47, %v1755_v7  ;;  %v1759_v5 = vmul.f32 %v9374_v37, %v9374_v37  ;;  %v1757_v41 = vmul.f32 %v9372_v34, %v9372_v34  ;;  %v9432_v7 = vpop.permute.xlu1 %7061  ;;  %v9438_v6 = vpop.permute.xlu0 %7076 }
 0x4cc   :  { %v9376_v60 = vpop.f32.mrf.mxu1  ;;  %v9384_v45 = vpop.f32.mrf.mxu0  ;;  %16642 = vst [vmem:[#allocation32_spill] sm:$0xff] %v9432_v7 }
 0x4cd   :  { %1764 = vadd.xlane.f32.xlu1 %v1763_v35  ;;  %v1747_v57 = vadd.f32 %v9376_v60, %v9374_v37  ;;  %v1760_v46 = vmul.f32 %v9376_v60, %v9376_v60  ;;  %v1758_v48 = vmul.f32 %v9384_v45, %v9384_v45  ;;  %v1744_v61 = vadd.f32 %v9384_v45, %v9372_v34 }
 0x4ce   :  { %v9386_v10 = vpop.f32.mrf.mxu1 }
 0x4cf   :  { %1748 = vadd.xlane.f32.xlu0 %v1747_v57  ;;  %v1769_v38 = vadd.f32 %v1760_v46, %v1759_v5  ;;  %v1766_v40 = vadd.f32 %v1758_v48, %v1757_v41  ;;  %v1761_v58 = vmul.f32 %v9386_v10, %v9386_v10  ;;  %v9442_v47 = vpop.permute.xlu1 %7071  ;;  %v9448_v35 = vpop.permute.xlu0 %7086 }
 0x4d0   :  { %v9388_v26 = vpop.f32.mrf.mxu1  ;;  %16643 = vst [vmem:[#allocation33_spill] sm:$0xff] %v9442_v47 }
 0x4d1   :  { %v1750_v52 = vadd.f32 %v9388_v26, %v9386_v10  ;;  %1770 = vadd.xlane.f32.xlu1 %v1769_v38  ;;  %v1762_v17 = vmul.f32 %v9388_v26, %v9388_v26 }
 0x4d3   :  { %1751 = vadd.xlane.f32.xlu0 %v1750_v52  ;;  %v1772_v50 = vadd.f32 %v1762_v17, %v1761_v58  ;;  %v9452_v5 = vpop.permute.xlu1 %7081  ;;  %v9458_v57 = vpop.permute.xlu0 %7096 }
 0x4d4   :  { %16644 = vst [vmem:[#allocation34_spill] sm:$0xff] %v9452_v5 }
 0x4d5   :  { %1745 = vadd.xlane.f32.xlu1 %v1744_v61 }
 0x4d7   :  { %1767 = vadd.xlane.f32.xlu0 %v1766_v40  ;;  %v9460_v46 = vpop.permute.xlu1 %7091 }
 0x4d8   :  { %16645 = vst [vmem:[#allocation35_spill] sm:$0xff] %v9460_v46 }
 0x4db   :  { %1773 = vadd.xlane.f32.xlu0 %v1772_v50  ;;  %v9468_v38 = vpop.permute.xlu1 %7101 }
 0x4dc   :  { %16646 = vst [vmem:[#allocation36_spill] sm:$0xff] %v9468_v38 }
 0x4e3   :  { %v16757_v24 = vld [vmem:[#allocation36_spill] sm:$0xff] }
 0x4e6   :  { %7216 = vrot.lane.b32.xlu1 %v9139_v36, %s8158_s0 }
 0x4ea   :  { %7226 = vrot.lane.b32.xlu1 %v9139_v36, %s8159_s18 }
 0x4ee   :  { %7236 = vrot.lane.b32.xlu1 %v9139_v36, %s8155_s15 }
 0x4f1   :  { %7211 = vrot.lane.b32.xlu0 %v9115_v0, %s8159_s18 }
 0x4f2   :  { %7246 = vrot.lane.b32.xlu1 %v9115_v0, %s8161_s20 }
 0x4f5   :  { %7221 = vrot.lane.b32.xlu0 %v9032_v53, %s8159_s18 }
 0x4f6   :  { %7256 = vrot.lane.b32.xlu1 %v9139_v36, %s8161_s20 }
 0x4f9   :  { %7231 = vrot.lane.b32.xlu0 %v9032_v53, %s8155_s15 }
 0x4fa   :  { %7266 = vrot.lane.b32.xlu1 %v9115_v0, %s8155_s15 }
 0x4fd   :  { %7241 = vrot.lane.b32.xlu0 %v9004_v3, %s8161_s20 }
 0x4fe   :  { %7276 = vrot.lane.b32.xlu1 %v9115_v0, %s8157_s17 }
 0x501   :  { %7251 = vrot.lane.b32.xlu0 %v9032_v53, %s8161_s20 }
 0x502   :  { %7286 = vrot.lane.b32.xlu1 %v9139_v36, %s8157_s17 }
 0x505   :  { %7261 = vrot.lane.b32.xlu0 %v9004_v3, %s8155_s15 }
 0x506   :  { %7296 = vrot.lane.b32.xlu1 %v9115_v0, %s8162_s21  ;;  %v9464_v0 = vpop.permute.xlu0 %7106 }
 0x509   :  { %7271 = vrot.lane.b32.xlu0 %v9004_v3, %s8157_s17 }
 0x50a   :  { %7306 = vrot.lane.b32.xlu1 %v9139_v36, %s8162_s21  ;;  %v9470_v48 = vpop.permute.xlu0 %7116  ;;  %v9472_v36 = vpop.permute.xlu1 %7111 }
 0x50b   :  { %16647 = vst [vmem:[#allocation37_spill] sm:$0xff] %v9472_v36 }
 0x50d   :  { %7281 = vrot.lane.b32.xlu0 %v9032_v53, %s8157_s17 }
 0x50e   :  { %v9474_v52 = vpop.permute.xlu0 %7126  ;;  %v9476_v41 = vpop.permute.xlu1 %7121 }
 0x50f   :  { %16648 = vst [vmem:[#allocation38_spill] sm:$0xff] %v9476_v41 }
 0x511   :  { %7291 = vrot.lane.b32.xlu0 %v9004_v3, %s8162_s21 }
 0x512   :  { %v9478_v61 = vpop.permute.xlu0 %7136  ;;  %v9480_v17 = vpop.permute.xlu1 %7131 }
 0x513   :  { %16649 = vst [vmem:[#allocation39_spill] sm:$0xff] %v9480_v17 }
 0x515   :  { %7301 = vrot.lane.b32.xlu0 %v9032_v53, %s8162_s21 }
 0x516   :  { %v9482_v3 = vpop.permute.xlu0 %7146  ;;  %v9484_v40 = vpop.permute.xlu1 %7141 }
 0x517   :  { %16650 = vst [vmem:[#allocation40_spill] sm:$0xff] %v9484_v40 }
 0x51a   :  { %v9486_v58 = vpop.permute.xlu0 %7156  ;;  %v9488_v53 = vpop.permute.xlu1 %7151 }
 0x51b   :  { %16651 = vst [vmem:[#allocation41_spill] sm:$0xff] %v9488_v53 }
 0x51e   :  { %v9490_v50 = vpop.permute.xlu0 %7166  ;;  %v9492_v21 = vpop.permute.xlu1 %7161 }
 0x51f   :  { %16652 = vst [vmem:[#allocation42_spill] sm:$0xff] %v9492_v21 }
 0x522   :  { %v9494_v9 = vpop.permute.xlu0 %7176  ;;  %v9496_v59 = vpop.permute.xlu1 %7171 }
 0x523   :  { %16653 = vst [vmem:[#allocation43_spill] sm:$0xff] %v9494_v9  ;;  %16654 = vst [vmem:[#allocation44_spill] sm:$0xff] %v9496_v59  ;;  %v16795_v9 = vld [vmem:[#allocation18_spill] sm:$0xff] }
 0x526   :  { %v9498_v4 = vpop.permute.xlu0 %7186  ;;  %v9500_v14 = vpop.permute.xlu1 %7181 }
 0x527   :  { %16655 = vst [vmem:[#allocation45_spill] sm:$0xff] %v9498_v4  ;;  %16656 = vst [vmem:[#allocation46_spill] sm:$0xff] %v9500_v14 }
 0x52a   :  { %v9502_v30 = vpop.permute.xlu0 %7196  ;;  %v9504_v2 = vpop.permute.xlu1 %7191 }
 0x52b   :  { %16657 = vst [vmem:[#allocation47_spill] sm:$0xff] %v9502_v30  ;;  %16658 = vst [vmem:[#allocation48_spill] sm:$0xff] %v9504_v2 }
 0x52e   :  { %v9506_v54 = vpop.permute.xlu0 %7201  ;;  %v9508_v49 = vpop.permute.xlu1 %7206 }
 0x52f   :  { %16659 = vst [vmem:[#allocation49_spill] sm:$0xff] %v9508_v49 }
 0x554   :  { %v1743_v56 = vpop.xlane.xlu0 %1742 }
 0x556   :  { %v1765_v53 = vpop.xlane.xlu1 %1764 }
 0x558   :  { %v1749_v40 = vpop.xlane.xlu0 %1748 }
 0x559   :  { %v1753_v21 = vadd.f32 %v1749_v40, %v1743_v56 }
 0x55a   :  { %v1771_v32 = vpop.xlane.xlu1 %1770 }
 0x55b   :  { %v1777_v17 = vmul.f32 0.001953125, %v1753_v21  ;;  %v1775_v51 = vadd.f32 %v1771_v32, %v1765_v53 }
 0x55c   :  { %v1752_v59 = vpop.xlane.xlu0 %1751 }
 0x55d   :  { %v1779_v62 = vmul.f32 0.001953125, %v1775_v51  ;;  %v1781_v41 = vmul.f32 %v1777_v17, %v1777_v17  ;;  %v1786_v21 = vsub.f32 %v9366_v42, %v1777_v17  ;;  %v1785_v51 = vsub.f32 %v9362_v1, %v1777_v17 }
 0x55e   :  { %v1746_v18 = vpop.xlane.xlu1 %1745  ;;  %v1789_v42 = vsub.f32 %v9374_v37, %v1777_v17 }
 0x55f   :  { %v1754_v14 = vadd.f32 %v1752_v59, %v1746_v18  ;;  %v1783_v36 = vsub.f32 %v1779_v62, %v1781_v41 }
 0x560   :  { %v1768_v13 = vpop.xlane.xlu0 %1767 }
 0x561   :  { %v1778_v55 = vmul.f32 0.001953125, %v1754_v14  ;;  %v1793_v46 = vadd.f32 1e-05, %v1783_v36 }
 0x562   :  { %v9544_v36 = vpop.permute.xlu1 %7216 }
 0x563   :  { %v1782_v49 = vmul.f32 %v1778_v55, %v1778_v55  ;;  %7932 = vrsqrt.f32 %v1793_v46  ;;  %v1788_v32 = vsub.f32 %v9384_v45, %v1778_v55  ;;  %v1787_v18 = vsub.f32 %v9372_v34, %v1778_v55  ;;  %16660 = vst [vmem:[#allocation50_spill] sm:$0xff] %v9544_v36 }
 0x564   :  { %v1774_v2 = vpop.xlane.xlu0 %1773  ;;  %v1791_v59 = vsub.f32 %v9386_v10, %v1778_v55  ;;  %v1792_v10 = vsub.f32 %v9388_v26, %v1778_v55 }
 0x565   :  { %v1776_v38 = vadd.f32 %v1774_v2, %v1768_v13 }
 0x566   :  { %v9550_v26 = vpop.permute.xlu1 %7226 }
 0x567   :  { %v1780_v5 = vmul.f32 0.001953125, %v1776_v38  ;;  %16663 = vst [vmem:[#allocation53_spill] sm:$0xff] %v9550_v26 }
 0x568   :  { %v9546_v55 = vpop.permute.xlu0 %7211 }
 0x569   :  { %v1784_v47 = vsub.f32 %v1780_v5, %v1782_v49  ;;  %v1790_v5 = vsub.f32 %v9376_v60, %v1777_v17  ;;  %16661 = vst [vmem:[#allocation51_spill] sm:$0xff] %v9546_v55 }
 0x56a   :  { %v9554_v17 = vpop.permute.xlu1 %7236 }
 0x56b   :  { %v1794_v7 = vadd.f32 1e-05, %v1784_v47  ;;  %16665 = vst [vmem:[#allocation55_spill] sm:$0xff] %v9554_v17 }
 0x56c   :  { %v9548_v60 = vpop.permute.xlu0 %7221 }
 0x56d   :  { %7934 = vrsqrt.f32 %v1794_v7  ;;  %16662 = vst [vmem:[#allocation52_spill] sm:$0xff] %v9548_v60 }
 0x56e   :  { %v9558_v53 = vpop.permute.xlu1 %7246 }
 0x56f   :  { %16667 = vst [vmem:[#allocation57_spill] sm:$0xff] %v9558_v53 }
 0x570   :  { %v7933_v56 = vpop.eup %7932  ;;  %v9552_v41 = vpop.permute.xlu0 %7231 }
 0x571   :  { %v9515_v2 = vmul.f32 %v7933_v56, %v1786_v21  ;;  %v1797_v49 = vmul.f32 %v7933_v56, %v1785_v51  ;;  %v9526_v1 = vmul.f32 %v7933_v56, %v1789_v42  ;;  %v9538_v46 = vmul.f32 %v7933_v56, %v1790_v5  ;;  %16664 = vst [vmem:[#allocation54_spill] sm:$0xff] %v9552_v41 }
 0x572   :  { %v9562_v21 = vpop.permute.xlu1 %7256 }
 0x573   :  { %16669 = vst [vmem:[#allocation59_spill] sm:$0xff] %v9562_v21 }
 0x574   :  { %v9556_v40 = vpop.permute.xlu0 %7241 }
 0x575   :  { %16666 = vst [vmem:[#allocation56_spill] sm:$0xff] %v9556_v40 }
 0x576   :  { %v9566_v51 = vpop.permute.xlu1 %7266 }
 0x577   :  { %16671 = vst [vmem:[#allocation61_spill] sm:$0xff] %v9566_v51 }
 0x578   :  { %v9560_v56 = vpop.permute.xlu0 %7251 }
 0x579   :  { %16668 = vst [vmem:[#allocation58_spill] sm:$0xff] %v9560_v56 }
 0x57a   :  { %v7935_v62 = vpop.eup %7934 }
 0x57b   :  { %v9517_v13 = vmul.f32 %v7935_v62, %v1788_v32  ;;  %v1799_v14 = vmul.f32 %v7935_v62, %v1787_v18  ;;  %v9522_v45 = vmul.f32 %v7935_v62, %v1791_v59  ;;  %v9534_v37 = vmul.f32 %v7935_v62, %v1792_v10  ;;  %v9570_v62 = vpop.permute.xlu1 %7276 }
 0x57c   :  { %v9564_v32 = vpop.permute.xlu0 %7261  ;;  %16673 = vst [vmem:[#allocation63_spill] sm:$0xff] %v9570_v62 }
 0x57d   :  { %v7315_v7 = vpack.i.bf16 %v9517_v13, %v9515_v2  ;;  %v7310_v47 = vpack.i.bf16 %v1799_v14, %v1797_v49  ;;  %v7330_v34 = vpack.i.bf16 %v9522_v45, %v9526_v1  ;;  %v7335_v38 = vpack.i.bf16 %v9534_v37, %v9538_v46  ;;  %16670 = vst [vmem:[#allocation60_spill] sm:$0xff] %v9564_v32 }
 0x57f   :  { %7316 = vrot.lane.b32.xlu0 %v7315_v7, %s8159_s18  ;;  %7311 = vrot.lane.b32.xlu1 %v7310_v47, %s8159_s18 }
 0x580   :  { %v9568_v18 = vpop.permute.xlu0 %7271 }
 0x581   :  { %16672 = vst [vmem:[#allocation62_spill] sm:$0xff] %v9568_v18 }
 0x583   :  { %7331 = vrot.lane.b32.xlu0 %v7330_v34, %s8159_s18  ;;  %7321 = vrot.lane.b32.xlu1 %v7310_v47, %s8156_s16 }
 0x584   :  { %v9572_v59 = vpop.permute.xlu0 %7281 }
 0x585   :  { %16674 = vst [vmem:[#allocation64_spill] sm:$0xff] %v9572_v59 }
 0x587   :  { %7341 = vrot.lane.b32.xlu0 %v7330_v34, %s8156_s16  ;;  %7326 = vrot.lane.b32.xlu1 %v7315_v7, %s8156_s16  ;;  %v9574_v7 = vpop.permute.xlu1 %7286 }
 0x588   :  { %16675 = vst [vmem:[#allocation65_spill] sm:$0xff] %v9574_v7  ;;  %v9576_v47 = vpop.permute.xlu0 %7291 }
 0x589   :  { %16676 = vst [vmem:[#allocation66_spill] sm:$0xff] %v9576_v47 }
 0x58b   :  { %7336 = vrot.lane.b32.xlu1 %v7335_v38, %s8159_s18  ;;  %v9578_v42 = vpop.permute.xlu1 %7296 }
 0x58c   :  { %16677 = vst [vmem:[#allocation67_spill] sm:$0xff] %v9578_v42  ;;  %v9580_v34 = vpop.permute.xlu0 %7301 }
 0x58d   :  { %16678 = vst [vmem:[#allocation68_spill] sm:$0xff] %v9580_v34 }
 0x58f   :  { %7346 = vrot.lane.b32.xlu1 %v7335_v38, %s8156_s16  ;;  %v9582_v10 = vpop.permute.xlu1 %7306 }
 0x590   :  { %16679 = vst [vmem:[#allocation69_spill] sm:$0xff] %v9582_v10 }
 0x5f1   :  { %v7317_v5 = vpop.permute.xlu0 %7316  ;;  %v7312_v38 = vpop.permute.xlu1 %7311 }
 0x5f2   :  { %v7319_v32 = vunpack.i.h.bf16 %v7317_v5  ;;  %v7318_v51 = vunpack.i.l.bf16 %v7317_v5  ;;  %v7314_v56 = vunpack.i.h.bf16 %v7312_v38  ;;  %v7313_v18 = vunpack.i.l.bf16 %v7312_v38 }
 0x5f4   :  { %v1822_v59 = vsel %vm16680_vm8, %v7314_v56, %v7319_v32  ;;  %v1821_v7 = vsel %vm16681_vm11, %v7313_v18, %v7318_v51  ;;  %vm16686_vm8 = vmmov %vm16683_vm6 }
 0x5f5   :  { %v7322_v21 = vpop.permute.xlu1 %7321  ;;  %v1831_v62 = vsel %vm16454_vm15, %v1822_v59, -inf  ;;  %v1829_v34 = vsel %vm16454_vm15, %v1821_v7, -inf  ;;  %v7332_v47 = vpop.permute.xlu0 %7331  ;;  %vm16687_vm11 = vmmov %vm16683_vm6 }
 0x5f6   :  { %v7324_v42 = vunpack.i.h.bf16 %v7322_v21  ;;  %v7323_v41 = vunpack.i.l.bf16 %v7322_v21  ;;  %v1839_v38 = vmax.f32 %v1799_v14, %v1831_v62  ;;  %v1837_v53 = vmax.f32 %v1797_v49, %v1829_v34 }
 0x5f7   :  { %v1826_v21 = vsel %vm16684_vm5, %v7319_v32, %v7314_v56  ;;  %v1825_v14 = vsel %vm16685_vm12, %v7318_v51, %v7313_v18  ;;  %v7334_v34 = vunpack.i.h.bf16 %v7332_v47  ;;  %vm16690_vm12 = vmmov %vm16684_vm5 }
 0x5f8   :  { %v1830_v18 = vsel %vm8286_vm10, %v1825_v14, -inf }
 0x5f9   :  { %v7327_v10 = vpop.permute.xlu1 %7326  ;;  %v7342_v31 = vpop.permute.xlu0 %7341  ;;  %v1838_v14 = vmax.f32 %v9515_v2, %v1830_v18 }
 0x5fa   :  { %v7329_v5 = vunpack.i.h.bf16 %v7327_v10  ;;  %v7328_v40 = vunpack.i.l.bf16 %v7327_v10  ;;  %v7333_v10 = vunpack.i.l.bf16 %v7332_v47  ;;  %v7344_v47 = vunpack.i.h.bf16 %v7342_v31 }
 0x5fc   :  { %v1865_v17 = vsel %vm16682_vm14, %v7328_v40, %v7323_v41  ;;  %v1866_v60 = vsel %vm16683_vm6, %v7329_v5, %v7324_v42  ;;  %v1862_v56 = vsel %vm16687_vm11, %v7324_v42, %v7329_v5  ;;  %vm16688_vm14 = vmmov %vm16684_vm5 }
 0x5fd   :  { %v1869_v59 = vsel %vm8257_vm3, %v1865_v17, -inf  ;;  %v1871_v7 = vsel %vm8257_vm3, %v1866_v60, -inf  ;;  %v7337_v55 = vpop.permute.xlu1 %7336  ;;  %v1861_v60 = vsel %vm16686_vm8, %v7323_v41, %v7328_v40  ;;  %vm16689_vm6 = vmmov %vm16684_vm5  ;;  %v7343_v41 = vunpack.i.l.bf16 %v7342_v31 }
 0x5fe   :  { %v9604_v49 = vmax.f32 %v1837_v53, %v1869_v59  ;;  %v9606_v62 = vmax.f32 %v1839_v38, %v1871_v7  ;;  %v7339_v26 = vunpack.i.h.bf16 %v7337_v55  ;;  %v7338_v36 = vunpack.i.l.bf16 %v7337_v55  ;;  %vm16691_vm11 = vmmov %vm16686_vm8 }
 0x5ff   :  { %v1832_v55 = vsel %vm8286_vm10, %v1826_v21, -inf  ;;  %v1870_v5 = vsel %vm16543_vm2, %v1861_v60, -inf  ;;  %v1872_v38 = vsel %vm16543_vm2, %v1862_v56, -inf }
 0x600   :  { %v7355_v17 = vpack.i.bf16 %v9606_v62, %v9604_v49  ;;  %v1824_v53 = vsel %vm16688_vm14, %v7334_v34, %v7339_v26  ;;  %v1823_v32 = vsel %vm16689_vm6, %v7333_v10, %v7338_v36  ;;  %v1840_v21 = vmax.f32 %v9517_v13, %v1832_v55  ;;  %vm16692_vm14 = vmmov %vm16686_vm8 }
 0x601   :  { %v7347_v51 = vpop.permute.xlu1 %7346  ;;  %v1835_v40 = vsel %vm16454_vm15, %v1824_v53, -inf  ;;  %v1833_v42 = vsel %vm16454_vm15, %v1823_v32, -inf  ;;  %v1828_v31 = vsel %vm16684_vm5, %v7339_v26, %v7334_v34  ;;  %v1827_v53 = vsel %vm16690_vm12, %v7338_v36, %v7333_v10  ;;  %vm16693_vm6 = vmmov %vm16686_vm8 }
 0x602   :  { %7356 = vrot.lane.b32.xlu0 %v7355_v17, %s8155_s15  ;;  %v7349_v59 = vunpack.i.h.bf16 %v7347_v51  ;;  %v7348_v7 = vunpack.i.l.bf16 %v7347_v51  ;;  %v1843_v32 = vmax.f32 %v9522_v45, %v1835_v40  ;;  %v1841_v28 = vmax.f32 %v9526_v1, %v1833_v42 }
 0x603   :  { %v1878_v51 = vmax.f32 %v1838_v14, %v1870_v5  ;;  %v9643_v13 = vmax.f32 %v1840_v21, %v1872_v38  ;;  %v1836_v10 = vsel %vm8286_vm10, %v1828_v31, -inf  ;;  %v1834_v55 = vsel %vm8286_vm10, %v1827_v53, -inf }
 0x604   :  { %v1868_v60 = vsel %vm16686_vm8, %v7349_v59, %v7344_v47  ;;  %v1867_v56 = vsel %vm16691_vm11, %v7348_v7, %v7343_v41  ;;  %v1864_v45 = vsel %vm16692_vm14, %v7344_v47, %v7349_v59  ;;  %v1863_v1 = vsel %vm16693_vm6, %v7343_v41, %v7348_v7 }
 0x605   :  { %v1875_v2 = vsel %vm8257_vm3, %v1868_v60, -inf  ;;  %v1873_v26 = vsel %vm8257_vm3, %v1867_v56, -inf  ;;  %v1876_v47 = vsel %vm16543_vm2, %v1864_v45, -inf  ;;  %v1844_v41 = vmax.f32 %v9534_v37, %v1836_v10 }
 0x606   :  { %v9653_v36 = vmax.f32 %v1841_v28, %v1873_v26  ;;  %v9655_v34 = vmax.f32 %v1843_v32, %v1875_v2  ;;  %v1874_v28 = vsel %vm16543_vm2, %v1863_v1, -inf  ;;  %v1842_v42 = vmax.f32 %v9538_v46, %v1834_v55 }
 0x607   :  { %v9674_v38 = vmax.f32 %v1844_v41, %v1876_v47  ;;  %v7370_v59 = vpack.i.bf16 %v9643_v13, %v1878_v51  ;;  %vm16694_vm5 = vcmp.lt.s32.totalorder %v8237_v11, 127  ;;  %vm16698_vm14 = vcmp.lt.s32.totalorder %v8237_v11, 1 }
 0x608   :  { %v7350_v18 = vpack.i.bf16 %v1878_v51, %v9653_v36  ;;  %v7360_v40 = vpack.i.bf16 %v9655_v34, %v9643_v13  ;;  %v9672_v5 = vmax.f32 %v1842_v42, %v1874_v28  ;;  %v7380_v37 = vpack.i.bf16 %v9655_v34, %v9653_v36  ;;  %vm16695_vm12 = vmmov %vm16694_vm5 }
 0x609   :  { %vm16696_vm8 = vmmov %vm16694_vm5  ;;  %vm16863_vm10 = vcmp.lt.s32.totalorder %v8237_v11, 111  ;;  %vm16930_vm15 = vcmp.lt.s32.totalorder %v8237_v11, 1 }
 0x60a   :  { %7351 = vrot.lane.b32.xlu1 %v7350_v18, %s8155_s15  ;;  %7361 = vrot.lane.b32.xlu0 %v7360_v40, %s8155_s15  ;;  %v7375_v7 = vpack.i.bf16 %v9674_v38, %v9672_v5  ;;  %vm16697_vm11 = vmmov %vm16694_vm5 }
 0x60b   :  { %vm16699_vm6 = vmmov %vm16698_vm14 }
 0x60e   :  { %7366 = vrot.lane.b32.xlu1 %v7355_v17, %s8157_s17  ;;  %7371 = vrot.lane.b32.xlu0 %v7370_v59, %s8157_s17 }
 0x612   :  { %7376 = vrot.lane.b32.xlu1 %v7375_v7, %s8155_s15  ;;  %7381 = vrot.lane.b32.xlu0 %v7380_v37, %s8157_s17 }
 0x616   :  { %7386 = vrot.lane.b32.xlu1 %v7375_v7, %s8157_s17 }
 0x674   :  { %v7357_v46 = vpop.permute.xlu0 %7356 }
 0x675   :  { %v7359_v31 = vunpack.i.h.bf16 %v7357_v46  ;;  %v7358_v53 = vunpack.i.l.bf16 %v7357_v46 }
 0x67c   :  { %v7352_v21 = vpop.permute.xlu1 %7351  ;;  %v7362_v14 = vpop.permute.xlu0 %7361 }
 0x67d   :  { %v7354_v17 = vunpack.i.h.bf16 %v7352_v21  ;;  %v7363_v32 = vunpack.i.l.bf16 %v7362_v14 }
 0x67f   :  { %v1901_v60 = vsel %vm16694_vm5, %v7358_v53, %v7354_v17  ;;  %v1905_v56 = vsel %vm16695_vm12, %v7354_v17, %v7358_v53  ;;  %v1902_v2 = vsel %vm16696_vm8, %v7359_v31, %v7363_v32  ;;  %v1906_v59 = vsel %vm16697_vm11, %v7363_v32, %v7359_v31  ;;  %vm16700_vm5 = vmmov %vm16699_vm6 }
 0x680   :  { %v1909_v26 = vsel %vm8249_vm1, %v1901_v60, -inf  ;;  %v1910_v45 = vsel %vm16554_vm7, %v1905_v56, -inf  ;;  %v7367_v1 = vpop.permute.xlu1 %7366  ;;  %v7372_v10 = vpop.permute.xlu0 %7371  ;;  %v1911_v55 = vsel %vm8249_vm1, %v1902_v2, -inf  ;;  %vm16701_vm12 = vmmov %vm16700_vm5  ;;  %vm16702_vm8 = vnez %v16424_v25 }
 0x681   :  { %v7369_v18 = vunpack.i.h.bf16 %v7367_v1  ;;  %v7368_v40 = vunpack.i.l.bf16 %v7367_v1  ;;  %v7374_v47 = vunpack.i.h.bf16 %v7372_v10  ;;  %v7373_v28 = vunpack.i.l.bf16 %v7372_v10 }
 0x682   :  { %v1917_v41 = vmax.f32 %v9604_v49, %v1909_v26  ;;  %v1918_v42 = vmax.f32 %v1878_v51, %v1910_v45  ;;  %v1919_v7 = vmax.f32 %v9606_v62, %v1911_v55  ;;  %v1912_v31 = vsel %vm16554_vm7, %v1906_v59, -inf }
 0x683   :  { %v1946_v37 = vsel %vm16698_vm14, %v7374_v47, %v7369_v18  ;;  %v1941_v46 = vsel %vm16699_vm6, %v7368_v40, %v7373_v28  ;;  %v1945_v53 = vsel %vm16700_vm5, %v7373_v28, %v7368_v40  ;;  %v1942_v60 = vsel %vm16701_vm12, %v7369_v18, %v7374_v47  ;;  %v9729_v40 = vld [vmem:[%s15938_s2 + $0x28] sm:$0xff]  ;;  %vm16707_vm14 = vmmov %vm16697_vm11 }
 0x684   :  { %v7377_v17 = vpop.permute.xlu1 %7376  ;;  %v1951_v49 = vsel %vm8242_vm0, %v1946_v37, -inf  ;;  %v1949_v51 = vsel %vm8242_vm0, %v1945_v53, -inf  ;;  %v1950_v62 = vsel %vm16702_vm8, %v1941_v46, -inf  ;;  %v7353_v26 = vunpack.i.l.bf16 %v7352_v21  ;;  %v7382_v18 = vpop.permute.xlu0 %7381  ;;  %16706 = vst [vmem:[#allocation73_spill] sm:$0xff] %v9729_v40  ;;  %vm16708_vm6 = vmmov %vm16697_vm11 }
 0x685   :  { %v9718_v32 = vmax.f32 %v1917_v41, %v1949_v51  ;;  %v9720_v56 = vmax.f32 %v1918_v42, %v1950_v62  ;;  %v9722_v2 = vmax.f32 %v1919_v7, %v1951_v49  ;;  %v7364_v45 = vunpack.i.h.bf16 %v7362_v14  ;;  %vm16709_vm5 = vmmov %vm16708_vm6 }
 0x686   :  { %v7379_v1 = vunpack.i.h.bf16 %v7377_v17  ;;  %v7378_v10 = vunpack.i.l.bf16 %v7377_v17  ;;  %v1952_v55 = vsel %vm16702_vm8, %v1942_v60, -inf  ;;  %v1920_v21 = vmax.f32 %v9643_v13, %v1912_v31 }
 0x687   :  { %16703 = vst [vmem:[#allocation70_spill] sm:$0xff] %v9718_v32  ;;  %16704 = vst [vmem:[#allocation71_spill] sm:$0xff] %v9720_v56  ;;  %v7390_v47 = vpack.i.bf16 %v9720_v56, %v9729_v40  ;;  %v7395_v28 = vpack.i.bf16 %v9722_v2, %v9718_v32  ;;  %v7384_v53 = vunpack.i.h.bf16 %v7382_v18  ;;  %v7383_v17 = vunpack.i.l.bf16 %v7382_v18 }
 0x688   :  { %16705 = vst [vmem:[#allocation72_spill] sm:$0xff] %v9722_v2  ;;  %v1903_v14 = vsel %vm16697_vm11, %v7353_v26, %v7378_v10  ;;  %v1904_v41 = vsel %vm16707_vm14, %v7364_v45, %v7379_v1  ;;  %v7387_v42 = vpop.permute.xlu1 %7386  ;;  %v1907_v59 = vsel %vm16708_vm6, %v7378_v10, %v7353_v26  ;;  %v1908_v7 = vsel %vm16709_vm5, %v7379_v1, %v7364_v45  ;;  %vm16711_vm11 = vmmov %vm16701_vm12 }
 0x689   :  { %v1913_v37 = vsel %vm8249_vm1, %v1903_v14, -inf  ;;  %v1915_v46 = vsel %vm8249_vm1, %v1904_v41, -inf  ;;  %7391 = vrot.lane.b32.xlu1 %v7390_v47, %s8158_s0  ;;  %7396 = vrot.lane.b32.xlu0 %v7395_v28, %s8158_s0  ;;  %v9750_v13 = vmax.f32 %v1920_v21, %v1952_v55  ;;  %v7389_v60 = vunpack.i.h.bf16 %v7387_v42  ;;  %vm16712_vm14 = vmmov %vm16711_vm11 }
 0x68a   :  { %v7388_v49 = vunpack.i.l.bf16 %v7387_v42  ;;  %v1914_v51 = vsel %vm16554_vm7, %v1907_v59, -inf  ;;  %v1916_v62 = vsel %vm16554_vm7, %v1908_v7, -inf  ;;  %v1921_v31 = vmax.f32 %v9653_v36, %v1913_v37  ;;  %vm16713_vm6 = vmmov %vm16711_vm11 }
 0x68b   :  { %16710 = vst [vmem:[#allocation74_spill] sm:$0xff] %v9750_v13  ;;  %v1923_v26 = vmax.f32 %v9655_v34, %v1915_v46  ;;  %v1944_v1 = vsel %vm16711_vm11, %v7384_v53, %v7389_v60  ;;  %v1948_v55 = vsel %vm16713_vm6, %v7389_v60, %v7384_v53  ;;  %v9774_v34 = vld [vmem:[%s15938_s2 + $0x38] sm:$0xff]  ;;  %v1922_v59 = vmax.f32 %v9672_v5, %v1914_v51 }
 0x68c   :  { %v1943_v45 = vsel %vm16701_vm12, %v7383_v17, %v7388_v49  ;;  %v1947_v10 = vsel %vm16712_vm14, %v7388_v49, %v7383_v17  ;;  %v1955_v36 = vsel %vm8242_vm0, %v1948_v55, -inf  ;;  %16714 = vst [vmem:[#allocation75_spill] sm:$0xff] %v9774_v34  ;;  %v7415_v47 = vpack.i.bf16 %v9774_v34, %v9750_v13 }
 0x68d   :  { %7406 = vrot.lane.b32.xlu0 %v7395_v28, %s8156_s16  ;;  %v1953_v18 = vsel %vm8242_vm0, %v1947_v10, -inf  ;;  %v1954_v21 = vsel %vm16702_vm8, %v1943_v45, -inf  ;;  %v1956_v14 = vsel %vm16702_vm8, %v1944_v1, -inf  ;;  %v9784_v42 = vmax.f32 %v1923_v26, %v1955_v36 }
 0x68e   :  { %v9782_v41 = vmax.f32 %v1921_v31, %v1953_v18  ;;  %v1924_v7 = vmax.f32 %v9674_v38, %v1916_v62  ;;  %v9791_v46 = vmax.f32 %v1922_v59, %v1954_v21  ;;  %v7425_v17 = vpack.i.bf16 %v9750_v13, %v9720_v56  ;;  %v7885_v62 = vld [vmem:[%s15939_s5 + $0x4] ss:$16 sps:$4 sm:$0xff]   ;;  %v16732_v59 = vld [vmem:[#allocation33_spill] sm:$0xff] }
 0x68f   :  { %16716 = vst [vmem:[#allocation77_spill] sm:$0xff] %v9784_v42  ;;  %vm16077_vm5 = vcmask 392192   ;;  %2986 = vmatprep.mubr.bf16.mxu0 %v7885_v62  ;;  %v6999_v31 = vunpack.i.h.bf16 %v9328_v44  ;;  %v6998_v26 = vunpack.i.l.bf16 %v9328_v44  ;;  %v7019_v45 = vunpack.i.h.bf16 %v9332_v39 }
 0x690   :  { %16715 = vst [vmem:[#allocation76_spill] sm:$0xff] %v9782_v41  ;;  %v7400_v37 = vpack.i.bf16 %v9784_v42, %v9782_v41  ;;  %16717 = vst [vmem:[#allocation78_spill] sm:$0xff] %v9791_v46  ;;  %v9793_v53 = vmax.f32 %v1924_v7, %v1956_v14  ;;  %v7018_v1 = vunpack.i.l.bf16 %v9332_v39  ;;  %v7014_v10 = vunpack.i.h.bf16 %v9330_v16  ;;  %v16764_v41 = vld [vmem:[#allocation17_spill] sm:$0xff] }
 0x691   :  { %7416 = vrot.lane.b32.xlu0 %v7415_v47, %s8158_s0  ;;  %v7013_v55 = vunpack.i.l.bf16 %v9330_v16  ;;  %vm16719_vm12 = vcmp.lt.s32.totalorder %v8237_v11, 17  ;;  %v7044_v47 = vunpack.i.h.bf16 %v9408_v8  ;;  %v7043_v44 = vunpack.i.l.bf16 %v9408_v8 }
 0x692   :  { %16718 = vst [vmem:[#allocation79_spill] sm:$0xff] %v9793_v53  ;;  %7401 = vrot.lane.b32.xlu1 %v7400_v37, %s8158_s0  ;;  %v7485_v51 = vpack.i.bf16 %v9793_v53, %v9791_v46  ;;  %v9851_v18 = vsel %vm16719_vm12, %v6998_v26, %v7018_v1  ;;  %vm16720_vm11 = vmmov %vm16719_vm12  ;;  %v7203_v8 = vunpack.i.l.bf16 %v9506_v54  ;;  %v7049_v38 = vunpack.i.h.bf16 %v9412_v43 }
 0x693   :  { %v9855_v36 = vsel %vm16720_vm11, %v6999_v31, %v7019_v45  ;;  %vm16721_vm14 = vmmov %vm16720_vm11  ;;  %v7048_v5 = vunpack.i.l.bf16 %v9412_v43  ;;  %v7058_v43 = vunpack.i.l.bf16 %v9422_v12  ;;  %v7059_v62 = vunpack.i.h.bf16 %v9422_v12 }
 0x694   :  { %vm16722_vm6 = vmmov %vm16720_vm11  ;;  %v7073_v21 = vunpack.i.l.bf16 %v16732_v59  ;;  %v7074_v25 = vunpack.i.h.bf16 %v16732_v59  ;;  %vm16826_vm1 = vcmp.lt.s32.totalorder %v8237_v11, 113 }
 0x695   :  { %7426 = vrot.lane.b32.xlu0 %v7425_v17, %s8159_s18  ;;  %vm16723_vm12 = vmmov %vm16722_vm6 }
 0x696   :  { %7411 = vrot.lane.b32.xlu1 %v7425_v17, %s8156_s16  ;;  %vm16725_vm11 = vmmov %vm16722_vm6 }
 0x699   :  { %7436 = vrot.lane.b32.xlu0 %v7425_v17, %s8161_s20 }
 0x69a   :  { %7421 = vrot.lane.b32.xlu1 %v7395_v28, %s8159_s18 }
 0x69d   :  { %7446 = vrot.lane.b32.xlu0 %v7425_v17, %s8155_s15 }
 0x69e   :  { %7431 = vrot.lane.b32.xlu1 %v7395_v28, %s8161_s20 }
 0x6a1   :  { %7456 = vrot.lane.b32.xlu0 %v7425_v17, %s8157_s17 }
 0x6a2   :  { %7441 = vrot.lane.b32.xlu1 %v7395_v28, %s8155_s15 }
 0x6a5   :  { %7466 = vrot.lane.b32.xlu0 %v7425_v17, %s8162_s21 }
 0x6a6   :  { %7451 = vrot.lane.b32.xlu1 %v7395_v28, %s8157_s17 }
 0x6a9   :  { %7476 = vrot.lane.b32.xlu0 %v7425_v17, %s8160_s19 }
 0x6aa   :  { %7461 = vrot.lane.b32.xlu1 %v7395_v28, %s8162_s21 }
 0x6ad   :  { %7486 = vrot.lane.b32.xlu0 %v7485_v51, %s8156_s16 }
 0x6ae   :  { %7471 = vrot.lane.b32.xlu1 %v7395_v28, %s8160_s19  ;;  %v7880_v28 = vld [vmem:[%s15939_s5 + $0xc] ss:$16 sps:$4 sm:$0xff]  }
 0x6af   :  { %6624 = vmatprep.mubr.msk.bf16.mxu1 %vm16077_vm5, %v7880_v28  ;;  %v2058_v28 = vsel %vm16722_vm6, %v7019_v45, %v6999_v31  ;;  %v7204_v45 = vunpack.i.h.bf16 %v9506_v54  ;;  %v9903_v54 = vsel %vm16723_vm12, %v7013_v55, %v7203_v8 }
 0x6b0   :  { %16724 = vst [vmem:[#allocation80_spill] sm:$0xff] %v9903_v54  ;;  %v16771_v54 = vunpack.i.h.bf16 %v9438_v6 }
 0x6b1   :  { %7496 = vrot.lane.b32.xlu0 %v7400_v37, %s8159_s18  ;;  %v9912_v17 = vsel %vm16725_vm11, %v7014_v10, %v7204_v45 }
 0x6b2   :  { %7481 = vrot.lane.b32.xlu1 %v7400_v37, %s8156_s16  ;;  %16726 = vst [vmem:[#allocation81_spill] sm:$0xff] %v9912_v17 }
 0x6b5   :  { %7506 = vrot.lane.b32.xlu0 %v7400_v37, %s8161_s20 }
 0x6b6   :  { %7491 = vrot.lane.b32.xlu1 %v7485_v51, %s8158_s0 }
 0x6b9   :  { %7516 = vrot.lane.b32.xlu0 %v7400_v37, %s8155_s15 }
 0x6ba   :  { %7501 = vrot.lane.b32.xlu1 %v7485_v51, %s8159_s18 }
 0x6bd   :  { %7526 = vrot.lane.b32.xlu0 %v7400_v37, %s8157_s17 }
 0x6be   :  { %7511 = vrot.lane.b32.xlu1 %v7485_v51, %s8161_s20 }
 0x6c1   :  { %7536 = vrot.lane.b32.xlu0 %v7400_v37, %s8162_s21 }
 0x6c2   :  { %7521 = vrot.lane.b32.xlu1 %v7485_v51, %s8155_s15 }
 0x6c5   :  { %7546 = vrot.lane.b32.xlu0 %v7400_v37, %s8160_s19 }
 0x6c6   :  { %7531 = vrot.lane.b32.xlu1 %v7485_v51, %s8157_s17 }
 0x6ca   :  { %7541 = vrot.lane.b32.xlu1 %v7485_v51, %s8162_s21 }
 0x6ce   :  { %7551 = vrot.lane.b32.xlu1 %v7485_v51, %s8160_s19  ;;  %v2057_v51 = vsel %vm16721_vm14, %v7018_v1, %v6998_v26  ;;  %vm16728_vm14 = vcmp.lt.s32.totalorder %v8237_v11, 16 }
 0x6cf   :  { %v2069_v1 = vpack.c.bf16 %v2058_v28, %v2057_v51  ;;  %v9923_v28 = vsel %vm16728_vm14, %v7043_v44, %v7048_v5  ;;  %v16729_v51 = vld [vmem:[#allocation32_spill] sm:$0xff]  ;;  %vm16730_vm6 = vmmov %vm16728_vm14 }
 0x6d0   :  { %v7063_v26 = vunpack.i.l.bf16 %v16729_v51  ;;  %v2155_v14 = vsel %vm16730_vm6, %v7048_v5, %v7043_v44  ;;  %vm16731_vm12 = vmmov %vm16730_vm6  ;;  %v7064_v49 = vunpack.i.h.bf16 %v16729_v51  ;;  %v16737_v44 = vunpack.i.l.bf16 %v9418_v63 }
 0x6d1   :  { %v9919_v31 = vsel %vm16621_vm4, %v2069_v1, 0  ;;  %v2156_v12 = vsel %vm16731_vm12, %v7049_v38, %v7044_v47  ;;  %v9936_v1 = vsel %vm16725_vm11, %v7203_v8, %v7013_v55  ;;  %vm16734_vm14 = vmmov %vm16725_vm11  ;;  %v16739_v55 = vld [vmem:[#allocation34_spill] sm:$0xff]  ;;  %v16745_v8 = vunpack.i.l.bf16 %v9428_v19 }
 0x6d2   :  { %16733 = vst [vmem:[#allocation32_spill] sm:$0xff] %v9936_v1  ;;  %v9942_v39 = vsel %vm16734_vm14, %v7204_v45, %v7014_v10  ;;  %vm16736_vm5 = vmmov %vm16730_vm6  ;;  %v7083_v16 = vunpack.i.l.bf16 %v16739_v55  ;;  %v2167_v10 = vpack.c.bf16 %v2156_v12, %v2155_v14  ;;  %v16740_v45 = vmov %v16737_v44  ;;  %v16747_v12 = vld [vmem:[#allocation35_spill] sm:$0xff] }
 0x6d3   :  { %16735 = vst [vmem:[#allocation33_spill] sm:$0xff] %v9942_v39  ;;  %v9946_v5 = vsel %vm16736_vm5, %v7044_v47, %v7049_v38  ;;  %vm16738_vm6 = vmmov %vm16736_vm5  ;;  %v2153_v38 = vsel %vm16736_vm5, %v7058_v43, %v16740_v45  ;;  %v16741_v47 = vunpack.i.h.bf16 %v9418_v63  ;;  %vm16746_vm14 = vcmp.lt.s32.totalorder %v8237_v11, 112  ;;  %v16769_v39 = vld [vmem:[#allocation37_spill] sm:$0xff] }
 0x6d4   :  { %v9952_v51 = vsel %vm16738_vm6, %v16737_v44, %v7058_v43  ;;  %vm16742_vm12 = vmmov %vm16736_vm5  ;;  %v9977_v14 = vsel %vm16746_vm14, %v16745_v8, %v7063_v26  ;;  %v16748_v45 = vunpack.i.h.bf16 %v9428_v19  ;;  %v16786_v2 = vunpack.i.h.bf16 %v16769_v39 }
 0x6d5   :  { %v2154_v44 = vsel %vm16742_vm12, %v7059_v62, %v16741_v47  ;;  %v16743_v23 = vmov %v16741_v47  ;;  %vm16744_vm11 = vmmov %vm16736_vm5 }
 0x6d6   :  { %v9971_v59 = vsel %vm16744_vm11, %v16743_v23, %v7059_v62  ;;  %vm16749_vm6 = vmmov %vm16746_vm14  ;;  %v16750_v23 = vunpack.i.l.bf16 %v9438_v6  ;;  %v16753_v43 = vmov %v16748_v45  ;;  %v2165_v46 = vpack.c.bf16 %v2154_v44, %v2153_v38 }
 0x6d7   :  { %v9986_v63 = vsel %vm16749_vm6, %v16748_v45, %v7064_v49  ;;  %vm16751_vm5 = vmmov %vm16749_vm6  ;;  %v16755_v45 = vunpack.i.h.bf16 %v9438_v6  ;;  %vm16760_vm6 = vcmp.lt.s32.totalorder %v8237_v11, 127  ;;  %v16766_v44 = vunpack.i.l.bf16 %v16747_v12 }
 0x6d8   :  { %v9992_v62 = vsel %vm16751_vm5, %v16750_v23, %v7073_v21  ;;  %vm16752_vm12 = vmmov %vm16751_vm5  ;;  %v7094_v23 = vunpack.i.h.bf16 %v16747_v12 }
 0x6d9   :  { %v2635_v22 = vsel %vm16752_vm12, %v7063_v26, %v16745_v8  ;;  %vm16754_vm11 = vmmov %vm16751_vm5  ;;  %v16759_v26 = vunpack.i.l.bf16 %v9448_v35  ;;  %vm16765_vm12 = vnez %v16764_v41 }
 0x6da   :  { %v2636_v27 = vsel %vm16754_vm11, %v7064_v49, %v16753_v43  ;;  %vm16756_vm14 = vmmov %vm16751_vm5  ;;  %v16761_v49 = vunpack.i.h.bf16 %v16739_v55  ;;  %v16762_v43 = vunpack.i.h.bf16 %v9448_v35  ;;  %v10032_v38 = vsel %vm16765_vm12, %v2167_v10, 0 }
 0x6db   :  { %v10008_v29 = vsel %vm16756_vm14, %v16755_v45, %v7074_v25  ;;  %v10018_v19 = vsel %vm16760_vm6, %v16759_v26, %v7083_v16  ;;  %vm16763_vm5 = vmmov %vm16760_vm6  ;;  %v2168_v45 = vpack.c.bf16 %v9946_v5, %v9923_v28  ;;  %v16767_v26 = vunpack.i.l.bf16 %v9458_v57 }
 0x6dc   :  { %v10026_v8 = vsel %vm16763_vm5, %v16762_v43, %v16761_v49  ;;  %vm16768_vm11 = vcmp.lt.s32.totalorder %v8237_v11, 113  ;;  %v2659_v43 = vpack.c.bf16 %v2636_v27, %v2635_v22  ;;  %v16770_v10 = vunpack.i.l.bf16 %v9438_v6  ;;  %vm16772_vm6 = vmmov %vm16756_vm14  ;;  %v16781_v6 = vld [vmem:[#allocation23_spill] sm:$0xff] }
 0x6dd   :  { %v10040_v53 = vsel %vm16768_vm11, %v16767_v26, %v16766_v44  ;;  %v2634_v44 = vsel %vm16772_vm6, %v7074_v25, %v16771_v54  ;;  %v16773_v26 = vunpack.i.h.bf16 %v9458_v57  ;;  %vm16774_vm5 = vmmov %vm16768_vm11  ;;  %v16775_v22 = vunpack.i.l.bf16 %v16757_v24 }
 0x6de   :  { %v2633_v17 = vsel %vm16756_vm14, %v7073_v21, %v16770_v10  ;;  %v16776_v27 = vunpack.i.l.bf16 %v9464_v0  ;;  %vm16777_vm11 = vmmov %vm16774_vm5  ;;  %v10073_v25 = vsel %vm16765_vm12, %v2165_v46, 0  ;;  %vm16782_vm6 = vnez %v16781_v6 }
 0x6df   :  { %v10059_v49 = vsel %vm16774_vm5, %v16773_v26, %v7094_v23  ;;  %vm16780_vm14 = vmmov %vm16774_vm5  ;;  %v10087_v33 = vsel %vm16782_vm6, %v2659_v43, 0  ;;  %v2657_v30 = vpack.c.bf16 %v2634_v44, %v2633_v17  ;;  %vm16785_vm5 = vcmp.lt.s32.totalorder %v8237_v11, 127 }
 0x6e0   :  { %v10067_v28 = vsel %vm16777_vm11, %v16776_v27, %v16775_v22  ;;  %v16779_v22 = vunpack.i.h.bf16 %v9464_v0  ;;  %vm16788_vm11 = vmmov %vm16785_vm5 }
 0x6fb   :  { %v9895_v7 = vpop.permute.xlu0 %7396  ;;  %v9956_v20 = vpop.permute.xlu1 %7391 }
 0x6ff   :  { %v9926_v37 = vpop.permute.xlu0 %7406 }
 0x700   :  { %v7409_v54 = vunpack.i.h.bf16 %v9926_v37  ;;  %v7408_v10 = vunpack.i.l.bf16 %v9926_v37  ;;  %v16783_v37 = vunpack.i.l.bf16 %v16769_v39 }
 0x703   :  { %v9994_v47 = vpop.permute.xlu0 %7416 }
 0x704   :  { %v10012_v42 = vpop.permute.xlu1 %7401 }
 0x705   :  { %16758 = vst [vmem:[#allocation34_spill] sm:$0xff] %v10012_v42  ;;  %v16778_v42 = vunpack.i.h.bf16 %v16757_v24 }
 0x707   :  { %v7427_v1 = vpop.permute.xlu0 %7426  ;;  %v10083_v27 = vsel %vm16780_vm14, %v16779_v22, %v16778_v42  ;;  %v16787_v42 = vunpack.i.h.bf16 %v9470_v48  ;;  %vm16790_vm14 = vcmp.lt.s32.totalorder %v8237_v11, 16 }
 0x708   :  { %v7412_v21 = vpop.permute.xlu1 %7411  ;;  %vm16791_vm8 = vmmov %vm16790_vm14  ;;  %v7429_v44 = vunpack.i.h.bf16 %v7427_v1  ;;  %v7428_v40 = vunpack.i.l.bf16 %v7427_v1  ;;  %v16800_v1 = vunpack.i.h.bf16 %v16739_v55 }
 0x709   :  { %v7414_v26 = vunpack.i.h.bf16 %v7412_v21  ;;  %v7413_v5 = vunpack.i.l.bf16 %v7412_v21  ;;  %v16784_v21 = vunpack.i.l.bf16 %v9470_v48  ;;  %v10105_v43 = vsel %vm16788_vm11, %v16787_v42, %v16786_v2  ;;  %v16794_v42 = vld [vmem:[#allocation38_spill] sm:$0xff] }
 0x70a   :  { %16789 = vst [vmem:[#allocation35_spill] sm:$0xff] %v10105_v43  ;;  %v7124_v4 = vunpack.i.h.bf16 %v16794_v42  ;;  %vm16796_vm11 = vnez %v16795_v9  ;;  %v10120_v43 = vsel %vm16782_vm6, %v2657_v30, 0 }
 0x70b   :  { %v10097_v32 = vsel %vm16785_vm5, %v16784_v21, %v16783_v37  ;;  %v2145_v22 = vsel %vm16790_vm14, %v7408_v10, %v7413_v5  ;;  %v2146_v17 = vsel %vm16791_vm8, %v7409_v54, %v7414_v26  ;;  %vm16792_vm5 = vmmov %vm16791_vm8  ;;  %vm16798_vm8 = vcmp.lt.s32.totalorder %v8237_v11, 127 }
 0x70c   :  { %v7422_v46 = vpop.permute.xlu1 %7421  ;;  %v2170_v34 = vpack.c.bf16 %v2146_v17, %v2145_v22  ;;  %v2157_v37 = vsel %vm16792_vm5, %v7413_v5, %v7408_v10  ;;  %vm16793_vm0 = vmmov %vm16792_vm5  ;;  %v16797_v22 = vunpack.i.l.bf16 %v9448_v35  ;;  %vm16802_vm14 = vcmp.lt.s32.totalorder %v8237_v11, 112 }
 0x70d   :  { %v2158_v21 = vsel %vm16793_vm0, %v7414_v26, %v7409_v54  ;;  %v7424_v56 = vunpack.i.h.bf16 %v7422_v46  ;;  %v7423_v13 = vunpack.i.l.bf16 %v7422_v46  ;;  %v16799_v54 = vunpack.i.h.bf16 %v9448_v35  ;;  %vm16801_vm0 = vmmov %vm16798_vm8 }
 0x70e   :  { %v2169_v2 = vpack.c.bf16 %v2158_v21, %v2157_v37  ;;  %6602 = vmatprep.subr.msk.bf16.mxu0 %vm16796_vm11, %v2170_v34  ;;  %v2441_v5 = vsel %vm16798_vm8, %v7083_v16, %v16797_v22  ;;  %v7123_v26 = vunpack.i.l.bf16 %v16794_v42  ;;  %vm16803_vm5 = vmmov %vm16802_vm14  ;;  %v7418_v16 = vunpack.i.l.bf16 %v9994_v47 }
 0x70f   :  { %v2442_v10 = vsel %vm16801_vm0, %v16800_v1, %v16799_v54  ;;  %v2649_v34 = vsel %vm16802_vm14, %v7428_v40, %v7423_v13  ;;  %v2650_v30 = vsel %vm16803_vm5, %v7429_v44, %v7424_v56  ;;  %vm16804_vm8 = vmmov %vm16803_vm5  ;;  %v16806_v22 = vunpack.i.l.bf16 %v9458_v57 }
 0x710   :  { %v2181_v46 = vsel %vm16765_vm12, %v2169_v2, 0  ;;  %v7432_v35 = vpop.permute.xlu1 %7431  ;;  %v2662_v17 = vpack.c.bf16 %v2650_v30, %v2649_v34  ;;  %v2637_v55 = vsel %vm16804_vm8, %v7423_v13, %v7428_v40  ;;  %vm16805_vm0 = vmmov %vm16803_vm5  ;;  %v16807_v54 = vunpack.i.l.bf16 %v16747_v12  ;;  %v7437_v12 = vpop.permute.xlu0 %7436  ;;  %v16811_v30 = vld [vmem:[#allocation24_spill] sm:$0xff] }
 0x711   :  { %2959 = vmatpush1.bf16.msra.mxu0 %v2181_v46  ;;  %v2638_v37 = vsel %vm16805_vm0, %v7424_v56, %v7429_v44  ;;  %vm16808_vm14 = vcmp.lt.s32.totalorder %v8237_v11, 113  ;;  %v16809_v1 = vunpack.i.h.bf16 %v9458_v57  ;;  %v2465_v13 = vpack.c.bf16 %v2442_v10, %v2441_v5 }
 0x712   :  { %6603 = vmatprep.subr.msk.bf16.mxu0 %vm16796_vm11, %v2168_v45  ;;  %v2661_v21 = vpack.c.bf16 %v2638_v37, %v2637_v55  ;;  %v10152_v2 = vsel %vm16808_vm14, %v16807_v54, %v16806_v22  ;;  %vm16810_vm5 = vmmov %vm16808_vm14  ;;  %v7394_v56 = vunpack.i.h.bf16 %v9956_v20  ;;  %v7399_v45 = vunpack.i.h.bf16 %v9895_v7 }
 0x713   :  { %v10158_v40 = vsel %vm16810_vm5, %v7094_v23, %v16809_v1  ;;  %v7398_v44 = vunpack.i.l.bf16 %v9895_v7  ;;  %v7419_v34 = vunpack.i.h.bf16 %v9994_v47  ;;  %vm16812_vm8 = vnez %v16811_v30 }
 0x714   :  { %6613 = vmatprep.subr.msk.bf16.mxu1 %vm16812_vm8, %v2662_v17  ;;  %v16813_v46 = vunpack.i.l.bf16 %v9474_v52  ;;  %vm16814_vm0 = vcmp.lt.s32.totalorder %v8237_v11, 1  ;;  %v7433_v23 = vunpack.i.l.bf16 %v7432_v35  ;;  %v2673_v5 = vsel %vm16782_vm6, %v2661_v21, 0  ;;  %v10189_v37 = vpop.permute.xlu1 %7441 }
 0x715   :  { %v2466_v7 = vpack.c.bf16 %v10026_v8, %v10018_v19  ;;  %v16815_v47 = vunpack.i.h.bf16 %v9474_v52  ;;  %vm16816_vm14 = vmmov %vm16814_vm0  ;;  %vm16817_vm5 = vcmp.lt.s32.totalorder %v8237_v11, 17  ;;  %v7434_v55 = vunpack.i.h.bf16 %v7432_v35  ;;  %2961 = vmatpush1.bf16.msra.mxu0 %v10032_v38  ;;  %3068 = vmatpush1.bf16.msra.mxu1 %v2673_v5 }
 0x716   :  { %v10172_v57 = vsel %vm16814_vm0, %v7123_v26, %v16813_v46  ;;  %v2050_v17 = vsel %vm16817_vm5, %v7399_v45, %v7418_v16  ;;  %vm16818_vm0 = vmmov %vm16817_vm5  ;;  %v7393_v22 = vunpack.i.l.bf16 %v9956_v20  ;;  %v7438_v54 = vunpack.i.l.bf16 %v7437_v12  ;;  %v16821_v46 = vld [vmem:[#allocation15_spill] sm:$0xff] }
 0x717   :  { %v10184_v10 = vsel %vm16816_vm14, %v7124_v4, %v16815_v47  ;;  %v2062_v21 = vsel %vm16818_vm0, %v7418_v16, %v7399_v45  ;;  %v16819_v1 = vpack.c.bf16 %v9971_v59, %v9952_v51  ;;  %v16820_v35 = vpack.c.bf16 %v9986_v63, %v9977_v14  ;;  %vm16823_vm5 = vmmov %vm16818_vm0  ;;  %v16829_v47 = vld [vmem:[#allocation39_spill] sm:$0xff] }
 0x718   :  { %v2563_v38 = vpack.c.bf16 %v10158_v40, %v10152_v2  ;;  %vm16822_vm14 = vnez %v16821_v46  ;;  %v2049_v20 = vsel %vm16823_vm5, %v7398_v44, %v7394_v56  ;;  %v16824_v51 = vunpack.i.h.bf16 %v9334_v15  ;;  %vm16825_vm7 = vmmov %vm16818_vm0 }
 0x719   :  { %6604 = vmatprep.subr.msk.bf16.mxu0 %vm16796_vm11, %v16819_v1  ;;  %6614 = vmatprep.subr.msk.bf16.mxu1 %vm16812_vm8, %v16820_v35  ;;  %v10208_v16 = vsel %vm16822_vm14, %v2465_v13, 0  ;;  %v7439_v45 = vunpack.i.h.bf16 %v7437_v12  ;;  %v2061_v14 = vsel %vm16825_vm7, %v7394_v56, %v7398_v44  ;;  %v2553_v63 = vsel %vm16826_vm1, %v7438_v54, %v7433_v23  ;;  %vm16828_vm2 = vmmov %vm16818_vm0 }
 0x71a   :  { %v2048_v59 = vsel %vm16818_vm0, %v16824_v51, %v7419_v34  ;;  %v2074_v2 = vpack.c.bf16 %v2050_v17, %v2049_v20  ;;  %v2073_v40 = vpack.c.bf16 %v2062_v21, %v2061_v14  ;;  %v16827_v13 = vmov %v16824_v51  ;;  %vm16830_vm5 = vmmov %vm16826_vm1  ;;  %2963 = vmatpush1.bf16.msra.mxu0 %v10073_v25  ;;  %v16834_v21 = vld [vmem:[#allocation22_spill] sm:$0xff] }
 0x71b   :  { %v2060_v5 = vsel %vm16828_vm2, %v7419_v34, %v16827_v13  ;;  %v7133_v1 = vunpack.i.l.bf16 %v16829_v47  ;;  %v2554_v35 = vsel %vm16830_vm5, %v7439_v45, %v7434_v55  ;;  %3070 = vmatpush1.bf16.msra.mxu1 %v10087_v33  ;;  %vm16831_vm7 = vmmov %vm16826_vm1  ;;  %v2542_v44 = vsel %vm16826_vm1, %v7434_v55, %v7439_v45  ;;  %v16843_v45 = vld [vmem:[#allocation40_spill] sm:$0xff] }
 0x71c   :  { %v2541_v56 = vsel %vm16831_vm7, %v7433_v23, %v7438_v54  ;;  %v7134_v12 = vunpack.i.h.bf16 %v16829_v47  ;;  %v16832_v17 = vunpack.i.l.bf16 %v9334_v15  ;;  %vm16833_vm2 = vmmov %vm16818_vm0  ;;  %vm16835_vm0 = vnez %v16834_v21 }
 0x71d   :  { %6605 = vmatprep.subr.msk.bf16.mxu0 %vm16835_vm0, %v2074_v2  ;;  %v16836_v25 = vpack.c.bf16 %v10008_v29, %v9992_v62  ;;  %v16837_v33 = vunpack.i.l.bf16 %v9464_v0  ;;  %v16838_v23 = vunpack.i.l.bf16 %v16757_v24  ;;  %vm16839_vm5 = vmmov %vm16826_vm1  ;;  %v16840_v54 = vunpack.i.h.bf16 %v9464_v0  ;;  %v7447_v29 = vpop.permute.xlu0 %7446  ;;  %v10258_v62 = vpop.permute.xlu1 %7451 }
 0x71e   :  { %v2047_v34 = vsel %vm16833_vm2, %v16832_v17, %v7393_v22  ;;  %v16841_v20 = vunpack.i.h.bf16 %v16757_v24  ;;  %vm16842_vm7 = vmmov %vm16826_vm1  ;;  %v7143_v14 = vunpack.i.l.bf16 %v16843_v45  ;;  %v16844_v13 = vmov %v16832_v17 }
 0x71f   :  { %6615 = vmatprep.subr.msk.bf16.mxu1 %vm16812_vm8, %v16836_v25  ;;  %v2537_v55 = vsel %vm16839_vm5, %v16838_v23, %v16837_v33  ;;  %v2072_v2 = vpack.c.bf16 %v2048_v59, %v2047_v34  ;;  %vm16845_vm1 = vmmov %vm16833_vm2  ;;  %v2564_v25 = vpack.c.bf16 %v10059_v49, %v10040_v53  ;;  %v2085_v24 = vsel %vm16621_vm4, %v2073_v40, 0 }
 0x720   :  { %v2538_v51 = vsel %vm16842_vm7, %v16841_v20, %v16840_v54  ;;  %v2059_v17 = vsel %vm16845_vm1, %v7393_v22, %v16844_v13  ;;  %v2566_v0 = vpack.c.bf16 %v2554_v35, %v2553_v63  ;;  %v2565_v23 = vpack.c.bf16 %v2542_v44, %v2541_v56  ;;  %v16848_v22 = vld [vmem:[#allocation41_spill] sm:$0xff]  ;;  %2965 = vmatpush1.bf16.msra.mxu0 %v2085_v24  ;;  %v16852_v56 = vld [vmem:[#allocation28_spill] sm:$0xff] }
 0x721   :  { %v2071_v33 = vpack.c.bf16 %v2060_v5, %v2059_v17  ;;  %v16846_v54 = vunpack.i.l.bf16 %v9478_v61  ;;  %vm16847_vm2 = vcmp.lt.s32.totalorder %v8237_v11, 1  ;;  %v16125_v15 = vunpack.i.h.bf16 %v16843_v45  ;;  %3072 = vmatpush1.bf16.msra.mxu1 %v10120_v43  ;;  %v16851_v5 = vld [vmem:[#allocation42_spill] sm:$0xff]  ;;  %6606 = vmatprep.subr.msk.bf16.mxu0 %vm16835_vm0, %v2072_v2  ;;  %v16854_v43 = vld [vmem:[#allocation27_spill] sm:$0xff] }
 0x722   :  { %v16124_v34 = vunpack.i.l.bf16 %v16848_v22  ;;  %v2561_v53 = vpack.c.bf16 %v2538_v51, %v2537_v55  ;;  %v16849_v49 = vunpack.i.h.bf16 %v9478_v61  ;;  %vm16850_vm5 = vmmov %vm16847_vm2  ;;  %v16122_v40 = vunpack.i.h.bf16 %v16848_v22 }
 0x723   :  { %v10274_v59 = vsel %vm16847_vm2, %v7133_v1, %v16846_v54  ;;  %v16123_v35 = vunpack.i.l.bf16 %v16851_v5  ;;  %vm16853_vm7 = vnez %v16852_v56  ;;  %vm16855_vm1 = vnez %v16854_v43 }
 0x724   :  { %v10285_v63 = vsel %vm16850_vm5, %v7134_v12, %v16849_v49  ;;  %6616 = vmatprep.subr.msk.bf16.mxu1 %vm16853_vm7, %v2566_v0  ;;  %v2575_v44 = vsel %vm16855_vm1, %v2563_v38, 0  ;;  %v16126_v55 = vunpack.i.h.bf16 %v16851_v5  ;;  %v2562_v20 = vpack.c.bf16 %v10083_v27, %v10067_v28 }
 0x725   :  { %v16856_v51 = vunpack.i.l.bf16 %v9470_v48  ;;  %v16857_v13 = vunpack.i.l.bf16 %v16769_v39  ;;  %vm16858_vm2 = vcmp.lt.s32.totalorder %v8237_v11, 127  ;;  %v16859_v2 = vunpack.i.h.bf16 %v9470_v48 }
 0x726   :  { %v16860_v24 = vunpack.i.h.bf16 %v16769_v39  ;;  %vm16861_vm5 = vmmov %vm16858_vm2  ;;  %v16862_v38 = vunpack.i.l.bf16 %v9482_v3  ;;  %v7443_v27 = vunpack.i.l.bf16 %v10189_v37  ;;  %v2083_v54 = vsel %vm16621_vm4, %v2071_v33, 0 }
 0x727   :  { %v2443_v17 = vsel %vm16858_vm2, %v16857_v13, %v16856_v51  ;;  %v2577_v48 = vsel %vm16855_vm1, %v2565_v23, 0  ;;  %v16864_v39 = vunpack.i.h.bf16 %v9482_v3  ;;  %vm16865_vm2 = vmmov %vm16863_vm10  ;;  %v16866_v51 = vunpack.i.l.bf16 %v9486_v58  ;;  %v10342_v23 = vpop.permute.xlu1 %7461  ;;  %2967 = vmatpush1.bf16.msra.mxu0 %v2083_v54 }
 0x728   :  { %v2444_v0 = vsel %vm16861_vm5, %v16860_v24, %v16859_v2  ;;  %v10316_v28 = vsel %vm16863_vm10, %v16862_v38, %v7143_v14  ;;  %vm16867_vm10 = vmmov %vm16865_vm2  ;;  %v7444_v33 = vunpack.i.h.bf16 %v10189_v37  ;;  %v10340_v2 = vpop.permute.xlu0 %7456  ;;  %3074 = vmatpush1.bf16.msra.mxu1 %v2577_v48  ;;  %v2573_v24 = vsel %vm16855_vm1, %v2561_v53, 0 }
 0x729   :  { %v10329_v49 = vsel %vm16865_vm2, %v16864_v39, %v16125_v15  ;;  %v10337_v13 = vsel %vm16867_vm10, %v16866_v51, %v16124_v34  ;;  %v16868_v38 = vunpack.i.h.bf16 %v9486_v58  ;;  %vm16869_vm5 = vmmov %vm16865_vm2  ;;  %v16870_v51 = vunpack.i.l.bf16 %v9490_v50  ;;  %6617 = vmatprep.subr.msk.bf16.mxu1 %vm16853_vm7, %v2564_v25 }
 0x72a   :  { %vm16871_vm2 = vcmp.lt.s32.totalorder %v8237_v11, 15  ;;  %v7448_v54 = vunpack.i.l.bf16 %v7447_v29  ;;  %v16872_v53 = vpack.c.bf16 %v9855_v36, %v9851_v18  ;;  %v2467_v48 = vpack.c.bf16 %v2444_v0, %v2443_v17  ;;  %v16876_v36 = vld [vmem:[#allocation46_spill] sm:$0xff] }
 0x72b   :  { %v10352_v39 = vsel %vm16869_vm5, %v16868_v38, %v16122_v40  ;;  %v10360_v37 = vsel %vm16871_vm2, %v16123_v35, %v16870_v51  ;;  %v16873_v38 = vunpack.i.h.bf16 %v9490_v50  ;;  %vm16874_vm10 = vmmov %vm16871_vm2  ;;  %v16875_v51 = vld [vmem:[#allocation44_spill] sm:$0xff]  ;;  %v7449_v18 = vunpack.i.h.bf16 %v7447_v29 }
 0x72c   :  { %6607 = vmatprep.subr.msk.bf16.mxu0 %vm16835_vm0, %v16872_v53  ;;  %v7174_v35 = vunpack.i.h.bf16 %v16875_v51  ;;  %v7173_v34 = vunpack.i.l.bf16 %v16875_v51  ;;  %v16129_v15 = vunpack.i.l.bf16 %v16876_v36  ;;  %vm16877_vm5 = vcmp.lt.s32.totalorder %v8237_v11, 127  ;;  %3076 = vmatpush1.bf16.msra.mxu1 %v2575_v44 }
 0x72d   :  { %v10375_v40 = vsel %vm16874_vm10, %v16126_v55, %v16873_v38  ;;  %v2457_v53 = vsel %vm16877_vm5, %v7448_v54, %v7443_v27  ;;  %v16878_v25 = vunpack.i.l.bf16 %v9474_v52  ;;  %vm16879_vm2 = vcmp.lt.s32.totalorder %v8237_v11, 1  ;;  %2969 = vmatpush1.bf16.msra.mxu0 %v9919_v31  ;;  %vm16882_vm3 = vmmov %vm16877_vm5  ;;  %6618 = vmatprep.subr.msk.bf16.mxu1 %vm16853_vm7, %v2562_v20 }
 0x72e   :  { %v16880_v0 = vunpack.i.h.bf16 %v9474_v52  ;;  %vm16881_vm10 = vmmov %vm16879_vm2  ;;  %v16130_v38 = vunpack.i.h.bf16 %v16876_v36  ;;  %v2458_v55 = vsel %vm16877_vm5, %v7449_v18, %v7444_v33  ;;  %v16884_v52 = vld [vmem:[#allocation16_spill] sm:$0xff]  ;;  %v10417_v31 = vsel %vm16822_vm14, %v2467_v48, 0  ;;  %v16896_v48 = vld [vmem:[#allocation45_spill] sm:$0xff] }
 0x72f   :  { %v10388_v17 = vsel %vm16879_vm2, %v16878_v25, %v7123_v26  ;;  %v2445_v26 = vsel %vm16882_vm3, %v7443_v27, %v7448_v54  ;;  %vm16883_vm2 = vmmov %vm16882_vm3  ;;  %v16887_v44 = vunpack.i.l.bf16 %v9478_v61  ;;  %vm16888_vm3 = vcmp.lt.s32.totalorder %v8237_v11, 1 }
 0x730   :  { %v10396_v29 = vsel %vm16881_vm10, %v16880_v0, %v7124_v4  ;;  %v2446_v42 = vsel %vm16883_vm2, %v7444_v33, %v7449_v18  ;;  %vm16885_vm10 = vnez %v16884_v52  ;;  %v16886_v4 = vld [vmem:[#allocation35_spill] sm:$0xff]  ;;  %v16889_v8 = vunpack.i.h.bf16 %v9478_v61  ;;  %vm16890_vm5 = vmmov %vm16888_vm3  ;;  %v7467_v61 = vpop.permute.xlu0 %7466  ;;  %3078 = vmatpush1.bf16.msra.mxu1 %v2573_v24 }
 0x731   :  { %6608 = vmatprep.subr.msk.bf16.mxu0 %vm16885_vm10, %v2466_v7  ;;  %v2468_v25 = vpack.c.bf16 %v16886_v4, %v10097_v32  ;;  %v10425_v19 = vsel %vm16888_vm3, %v16887_v44, %v7133_v1  ;;  %v16891_v32 = vld [vmem:[#allocation43_spill] sm:$0xff]  ;;  %vm16893_vm2 = vcmp.lt.s32.totalorder %v8237_v11, 15  ;;  %v10451_v1 = vpop.permute.xlu1 %7471  ;;  %v2359_v54 = vpack.c.bf16 %v10396_v29, %v10388_v17  ;;  %v16915_v29 = vld [vmem:[#allocation70_spill] sm:$0xff] }
 0x732   :  { %v10433_v7 = vsel %vm16890_vm5, %v16889_v8, %v7134_v12  ;;  %v16892_v20 = vunpack.i.l.bf16 %v16891_v32  ;;  %v16894_v33 = vunpack.i.h.bf16 %v16891_v32  ;;  %vm16895_vm3 = vmmov %vm16893_vm2  ;;  %v16897_v18 = vunpack.i.l.bf16 %v16896_v48  ;;  %2971 = vmatpush2.bf16.msra.mxu0 %v10208_v16  ;;  %v16902_v12 = vld [vmem:[#allocation74_spill] sm:$0xff]  ;;  %v16905_v16 = vld [vmem:[#allocation73_spill] sm:$0xff] }
 0x733   :  { %vm16898_vm5 = vcmp.lt.s32.totalorder %v8237_v11, 16  ;;  %v7463_v4 = vunpack.i.l.bf16 %v10342_v23  ;;  %v2470_v44 = vpack.c.bf16 %v2458_v55, %v2457_v53  ;;  %v2469_v8 = vpack.c.bf16 %v2446_v42, %v2445_v26  ;;  %v16901_v53 = vld [vmem:[#allocation48_spill] sm:$0xff] }
 0x734   :  { %v10441_v27 = vsel %vm16893_vm2, %v7173_v34, %v16892_v20  ;;  %v10449_v47 = vsel %vm16895_vm3, %v7174_v35, %v16894_v33  ;;  %v10463_v0 = vsel %vm16898_vm5, %v16129_v15, %v16897_v18  ;;  %v16899_v20 = vunpack.i.h.bf16 %v16896_v48  ;;  %vm16900_vm2 = vmmov %vm16898_vm5  ;;  %v16903_v15 = vld [vmem:[#allocation71_spill] sm:$0xff] }
 0x735   :  { %v7464_v17 = vunpack.i.h.bf16 %v10342_v23  ;;  %v2357_v55 = vpack.c.bf16 %v10433_v7, %v10425_v19  ;;  %v7468_v18 = vunpack.i.l.bf16 %v7467_v61  ;;  %6619 = vmatprep.subr.msk.bf16.mxu1 %vm16885_vm10, %v2470_v44  ;;  %v16906_v23 = vld [vmem:[#allocation75_spill] sm:$0xff]  ;;  %v16907_v19 = vunpack.i.l.bf16 %v9482_v3 }
 0x736   :  { %v10472_v33 = vsel %vm16900_vm2, %v16130_v38, %v16899_v20  ;;  %v16904_v20 = vpack.c.bf16 %v16902_v12, %v16903_v15  ;;  %v2384_v24 = vpack.c.bf16 %v16906_v23, %v16905_v16  ;;  %v7469_v38 = vunpack.i.h.bf16 %v7467_v61 }
 0x737   :  { %vm16908_vm3 = vcmp.lt.s32.totalorder %v8237_v11, 111  ;;  %v16909_v15 = vunpack.i.h.bf16 %v9482_v3  ;;  %v16910_v12 = vunpack.i.h.bf16 %v16843_v45  ;;  %v7453_v61 = vunpack.i.l.bf16 %v10258_v62  ;;  %v8137_v3 = vld [vmem:[%s15938_s2 + $0x30] sm:$0xff] }
 0x738   :  { %2972 = vmatprep.subr.bf16.mxu0 %v16904_v20  ;;  %v10497_v7 = vsel %vm16908_vm3, %v7143_v14, %v16907_v19  ;;  %vm16911_vm5 = vmmov %vm16908_vm3  ;;  %v2481_v16 = vsel %vm16822_vm14, %v2469_v8, 0  ;;  %v8136_v14 = vld [vmem:[%s15938_s2 + $0x20] sm:$0xff]  ;;  %v7454_v23 = vunpack.i.h.bf16 %v10258_v62  ;;  %v8138_v62 = vld [vmem:[%s15938_s2 + $0x8] sm:$0xff] }
 0x739   :  { %v10505_v44 = vsel %vm16911_vm5, %v16910_v12, %v16909_v15  ;;  %vm16912_vm2 = vmmov %vm16908_vm3  ;;  %v2383_v45 = vpack.c.bf16 %v8137_v3, %v8136_v14  ;;  %v10521_v15 = vpop.permute.xlu1 %7481  ;;  %v16914_v12 = vld [vmem:[#allocation72_spill] sm:$0xff]  ;;  %3080 = vmatpush1.bf16.msra.mxu1 %v2481_v16  ;;  %v7458_v14 = vunpack.i.l.bf16 %v10340_v2  ;;  %v16921_v16 = vunpack.i.h.bf16 %v9486_v58 }
 0x73a   :  { %v2745_v20 = vsel %vm16912_vm2, %v7468_v18, %v7463_v4  ;;  %vm16913_vm3 = vmmov %vm16912_vm2  ;;  %v16916_v26 = vpack.c.bf16 %v16914_v12, %v16915_v29  ;;  %v2734_v42 = vsel %vm16912_vm2, %v7464_v17, %v7469_v38  ;;  %6620 = vmatprep.subr.msk.bf16.mxu1 %vm16885_vm10, %v2468_v25  ;;  %v8139_v29 = vld [vmem:[%s15938_s2 + $0x18] sm:$0xff]  ;;  %v16922_v3 = vunpack.i.h.bf16 %v16848_v22 }
 0x73b   :  { %v2746_v19 = vsel %vm16913_vm3, %v7469_v38, %v7464_v17  ;;  %vm16917_vm5 = vmmov %vm16912_vm2  ;;  %v16918_v38 = vunpack.i.l.bf16 %v9486_v58  ;;  %v16919_v17 = vunpack.i.l.bf16 %v16848_v22  ;;  %v2337_v58 = vsel %vm16930_vm15, %v7453_v61, %v7458_v14 }
 0x73c   :  { %2973 = vmatpush2.bf16.msra.mxu0 %v16916_v26  ;;  %v2733_v8 = vsel %vm16917_vm5, %v7463_v4, %v7468_v18  ;;  %v2382_v26 = vpack.c.bf16 %v8139_v29, %v8138_v62  ;;  %v2755_v4 = vpack.c.bf16 %v10505_v44, %v10497_v7  ;;  %vm16920_vm3 = vmmov %vm16912_vm2  ;;  %v7459_v18 = vunpack.i.h.bf16 %v10340_v2 }
 0x73d   :  { %2974 = vmatprep.subr.bf16.mxu0 %v2384_v24  ;;  %v2729_v25 = vsel %vm16920_vm3, %v16919_v17, %v16918_v38  ;;  %v10548_v24 = vpop.permute.xlu0 %7476  ;;  %vm16923_vm5 = vmmov %vm16912_vm2  ;;  %v16924_v7 = vunpack.i.l.bf16 %v16851_v5  ;;  %v16925_v44 = vunpack.i.l.bf16 %v9490_v50  ;;  %vm16926_vm2 = vcmp.lt.s32.totalorder %v8237_v11, 15  ;;  %v8140_v17 = vld [vmem:[%s15938_s2] sm:$0xff]  ;;  %3082 = vmatpush1.bf16.msra.mxu1 %v10417_v31 }
 0x73e   :  { %v2730_v12 = vsel %vm16923_vm5, %v16922_v3, %v16921_v16  ;;  %v16927_v29 = vunpack.i.h.bf16 %v16851_v5  ;;  %v16928_v2 = vunpack.i.h.bf16 %v9490_v50  ;;  %vm16929_vm3 = vmmov %vm16926_vm2  ;;  %v2758_v22 = vpack.c.bf16 %v2746_v19, %v2745_v20  ;;  %v8141_v16 = vld [vmem:[%s15938_s2 + $0x10] sm:$0xff]  ;;  %v16934_v19 = vld [vmem:[#allocation19_spill] sm:$0xff] }
 0x73f   :  { %v2257_v62 = vsel %vm16926_vm2, %v16925_v44, %v16924_v7  ;;  %v2381_v3 = vpack.c.bf16 %v8141_v16, %v8140_v17  ;;  %v2757_v7 = vpack.c.bf16 %v2734_v42, %v2733_v8  ;;  %vm16931_vm5 = vmmov %vm16930_vm15  ;;  %v2753_v42 = vpack.c.bf16 %v2730_v12, %v2729_v25  ;;  %v10605_v8 = vpop.permute.xlu1 %7491 }
 0x740   :  { %v2258_v38 = vsel %vm16929_vm3, %v16928_v2, %v16927_v29  ;;  %v2338_v50 = vsel %vm16931_vm5, %v7454_v23, %v7459_v18  ;;  %2975 = vmatpush2.bf16.msra.mxu0 %v2383_v45  ;;  %vm16932_vm2 = vmmov %vm16931_vm5  ;;  %vm16935_vm3 = vnez %v16934_v19  ;;  %v16936_v29 = vld [vmem:[#allocation30_spill] sm:$0xff]  ;;  %v16938_v31 = vunpack.i.l.bf16 %v16891_v32 }
 0x741   :  { %v2349_v5 = vsel %vm16932_vm2, %v7458_v14, %v7453_v61  ;;  %vm16933_vm15 = vmmov %vm16932_vm2  ;;  %v10585_v44 = vsel %vm16935_vm3, %v2359_v54, 0  ;;  %vm16937_vm14 = vnez %v16936_v29  ;;  %2976 = vmatprep.subr.bf16.mxu0 %v2382_v26  ;;  %v10591_v45 = vsel %vm16935_vm3, %v2357_v55, 0 }
 0x742   :  { %v2350_v20 = vsel %vm16933_vm15, %v7459_v18, %v7454_v23  ;;  %6621 = vmatprep.subr.msk.bf16.mxu1 %vm16937_vm14, %v2758_v22  ;;  %vm16939_vm5 = vcmp.lt.s32.totalorder %v8237_v11, 15  ;;  %v16940_v54 = vunpack.i.h.bf16 %v16891_v32  ;;  %v16942_v14 = vunpack.i.l.bf16 %v16876_v36  ;;  %v16949_v18 = vld [vmem:[#allocation47_spill] sm:$0xff] }
 0x743   :  { %v2255_v61 = vsel %vm16939_vm5, %v16938_v31, %v7173_v34  ;;  %vm16941_vm2 = vmmov %vm16939_vm5  ;;  %v16943_v55 = vunpack.i.l.bf16 %v16896_v48  ;;  %vm16944_vm15 = vcmp.lt.s32.totalorder %v8237_v11, 16  ;;  %v16945_v25 = vunpack.i.h.bf16 %v16876_v36  ;;  %v16955_v36 = vld [vmem:[#allocation29_spill] sm:$0xff] }
 0x744   :  { %v2256_v23 = vsel %vm16941_vm2, %v16940_v54, %v7174_v35  ;;  %v16946_v34 = vunpack.i.h.bf16 %v16896_v48  ;;  %vm16947_vm5 = vmmov %vm16944_vm15  ;;  %v16948_v32 = vunpack.i.l.bf16 %v16901_v53  ;;  %v16950_v35 = vunpack.i.l.bf16 %v16949_v18  ;;  %2977 = vmatpush2.bf16.msra.mxu0 %v2381_v3 }
 0x745   :  { %v2161_v26 = vsel %vm16944_vm15, %v16943_v55, %v16942_v14  ;;  %vm16951_vm2 = vmmov %vm16947_vm5  ;;  %v16952_v2 = vunpack.i.h.bf16 %v16901_v53  ;;  %v16953_v22 = vunpack.i.h.bf16 %v16949_v18  ;;  %vm16956_vm10 = vnez %v16955_v36 }
 0x746   :  { %v2162_v51 = vsel %vm16947_vm5, %v16946_v34, %v16945_v25  ;;  %v2159_v12 = vsel %vm16951_vm2, %v16950_v35, %v16948_v32  ;;  %vm16954_vm15 = vmmov %vm16951_vm2  ;;  %v2769_v48 = vsel %vm16956_vm10, %v2757_v7, 0  ;;  %v2362_v16 = vpack.c.bf16 %v2338_v50, %v2337_v58  ;;  %v16962_v7 = vld [vmem:[#allocation49_spill] sm:$0xff]  ;;  %v10650_v50 = vpop.permute.xlu0 %7486 }
 0x747   :  { %v2160_v17 = vsel %vm16954_vm15, %v16953_v22, %v16952_v2  ;;  %v2361_v31 = vpack.c.bf16 %v2350_v20, %v2349_v5  ;;  %v2269_v54 = vpack.c.bf16 %v2258_v38, %v2257_v62  ;;  %v16957_v14 = vmov %v16950_v35  ;;  %vm16959_vm5 = vmmov %vm16951_vm2  ;;  %3094 = vmatpush2.bf16.msra.mxu1 %v2769_v48  ;;  %v16963_v5 = vld [vmem:[#allocation20_spill] sm:$0xff] }
 0x748   :  { %v16958_v55 = vmov %v16948_v32  ;;  %v16960_v34 = vmov %v16953_v22  ;;  %v16961_v32 = vmov %v16952_v2  ;;  %v7209_v58 = vunpack.i.h.bf16 %v16962_v7 }
 0x749   :  { %v10639_v25 = vsel %vm16959_vm5, %v16958_v55, %v16957_v14  ;;  %v10647_v35 = vsel %vm16951_vm2, %v16961_v32, %v16960_v34  ;;  %v2267_v62 = vpack.c.bf16 %v2256_v23, %v2255_v61  ;;  %v7208_v38 = vunpack.i.l.bf16 %v16962_v7  ;;  %v10712_v55 = vld [vmem:[%s15939_s5 + $0x8] ss:$16 sps:$4 sm:$0xff]  }
 0x74a   :  { %vm16964_vm15 = vnez %v16963_v5  ;;  %v16965_v20 = vpack.c.bf16 %v10329_v49, %v10316_v28  ;;  %v2767_v53 = vsel %vm16956_vm10, %v2755_v4, 0  ;;  %v2173_v18 = vpack.c.bf16 %v2162_v51, %v2161_v26  ;;  %v16967_v51 = vld [vmem:[#allocation50_spill] sm:$0xff]  ;;  %v10803_v7 = vld [vmem:[%s15939_s5 + $0x28] ss:$16 sps:$4 sm:$0xff]  }
 0x74b   :  { %6609 = vmatprep.subr.msk.bf16.mxu0 %vm16964_vm15, %v2362_v16  ;;  %v2171_v2 = vpack.c.bf16 %v2160_v17, %v2159_v12  ;;  %v7474_v3 = vunpack.i.h.bf16 %v10451_v1  ;;  %v7473_v61 = vunpack.i.l.bf16 %v10451_v1  ;;  %v2754_v23 = vpack.c.bf16 %v10352_v39, %v10337_v13  ;;  %v7502_v39 = vpop.permute.xlu1 %7501 }
 0x74c   :  { %6622 = vmatprep.subr.msk.bf16.mxu1 %vm16937_vm14, %v16965_v20  ;;  %v2765_v22 = vsel %vm16956_vm10, %v2753_v42, 0  ;;  %v2373_v28 = vsel %vm16935_vm3, %v2361_v31, 0  ;;  %v2270_v49 = vpack.c.bf16 %v10375_v40, %v10360_v37  ;;  %v2281_v4 = vsel %vm16603_vm9, %v2269_v54, 0  ;;  %v7497_v31 = vpop.permute.xlu0 %7496 }
 0x74d   :  { %v2268_v26 = vpack.c.bf16 %v10449_v47, %v10441_v27  ;;  %v7219_v1 = vunpack.i.h.bf16 %v16967_v51  ;;  %v7479_v12 = vunpack.i.h.bf16 %v10548_v24  ;;  %v7478_v13 = vunpack.i.l.bf16 %v10548_v24  ;;  %2979 = vmatpush2.bf16.msra.mxu0 %v2373_v28  ;;  %3096 = vmatpush2.bf16.msra.mxu1 %v2767_v53 }
 0x74e   :  { %v10681_v42 = vsel %vm16603_vm9, %v2267_v62, 0  ;;  %v16968_v40 = vpack.c.bf16 %v10184_v10, %v10172_v57  ;;  %6623 = vmatprep.subr.msk.bf16.mxu1 %vm16937_vm14, %v2754_v23  ;;  %v2174_v37 = vpack.c.bf16 %v10472_v33, %v10463_v0  ;;  %v10694_v27 = vsel %vm16765_vm12, %v2173_v18, 0  ;;  %v16973_v62 = vld [vmem:[#allocation31_spill] sm:$0xff] }
 0x74f   :  { %v10700_v24 = vsel %vm16765_vm12, %v2171_v2, 0  ;;  %v7218_v57 = vunpack.i.l.bf16 %v16967_v51  ;;  %vm16969_vm5 = vcmp.lt.s32.totalorder %v8237_v11, 15  ;;  %v7483_v16 = vunpack.i.l.bf16 %v10521_v15 }
 0x750   :  { %6610 = vmatprep.subr.msk.bf16.mxu0 %vm16964_vm15, %v16968_v40  ;;  %v2241_v10 = vsel %vm16969_vm5, %v7473_v61, %v7478_v13  ;;  %vm16970_vm2 = vmmov %vm16969_vm5  ;;  %v7484_v54 = vunpack.i.h.bf16 %v10521_v15  ;;  %v7503_v14 = vunpack.i.l.bf16 %v7502_v39  ;;  %v16974_v20 = vunpack.i.h.bf16 %v16973_v62  ;;  %v16976_v15 = vld [vmem:[#allocation53_spill] sm:$0xff] }
 0x751   :  { %v2242_v17 = vsel %vm16970_vm2, %v7474_v3, %v7479_v12  ;;  %vm16971_vm3 = vmmov %vm16970_vm2  ;;  %vm16975_vm5 = vcmp.lt.s32.totalorder %v8237_v11, 17  ;;  %v7229_v18 = vunpack.i.h.bf16 %v16976_v15  ;;  %v7488_v2 = vunpack.i.l.bf16 %v10650_v50  ;;  %2981 = vmatpush2.bf16.msra.mxu0 %v10585_v44  ;;  %3098 = vmatpush2.bf16.msra.mxu1 %v2765_v22 }
 0x752   :  { %v2253_v34 = vsel %vm16971_vm3, %v7478_v13, %v7473_v61  ;;  %vm16972_vm10 = vmmov %vm16970_vm2  ;;  %v10724_v53 = vsel %vm16975_vm5, %v16974_v20, %v7219_v1  ;;  %v7504_v23 = vunpack.i.h.bf16 %v7502_v39  ;;  %v16977_v61 = vld [vmem:[#allocation51_spill] sm:$0xff]  ;;  %v7498_v13 = vunpack.i.l.bf16 %v7497_v31  ;;  %6632 = vmatprep.subr.msk.bf16.mxu1 %vm8524_vm13, %v2270_v49 }
 0x753   :  { %v2254_v32 = vsel %vm16972_vm10, %v7479_v12, %v7474_v3  ;;  %v7214_v28 = vunpack.i.h.bf16 %v16977_v61  ;;  %v7213_v3 = vunpack.i.l.bf16 %v16977_v61  ;;  %v7489_v12 = vunpack.i.h.bf16 %v10650_v50  ;;  %v10744_v50 = vld [vmem:[%s15939_s5 + $0x2c] ss:$16 sps:$4 sm:$0xff]   ;;  %v16987_v61 = vld [vmem:[#allocation52_spill] sm:$0xff] }
 0x754   :  { %v16978_v40 = vpack.c.bf16 %v10285_v63, %v10274_v59  ;;  %vm16980_vm10 = vcmp.lt.s32.totalorder %v8237_v11, 16  ;;  %v7499_v22 = vunpack.i.h.bf16 %v7497_v31  ;;  %v2266_v39 = vpack.c.bf16 %v2242_v17, %v2241_v10  ;;  %3100 = vmatmul.mubr.bf16.vlgmr.msra.gmra.mxu1 %v10712_v55 }
 0x755   :  { %v2151_v44 = vsel %vm16980_vm10, %v7483_v16, %v7488_v2  ;;  %v2265_v47 = vpack.c.bf16 %v2254_v32, %v2253_v34  ;;  %vm16981_vm3 = vmmov %vm16980_vm10  ;;  %vm16982_vm2 = vcmp.lt.s32.totalorder %v8237_v11, 112  ;;  %v7228_v17 = vunpack.i.l.bf16 %v16976_v15  ;;  %3181 = vmatpush1.bf16.msra.mxu1 %v2281_v4 }
 0x756   :  { %6611 = vmatprep.subr.msk.bf16.mxu0 %vm16964_vm15, %v16978_v40  ;;  %v2152_v59 = vsel %vm16981_vm3, %v7484_v54, %v7489_v12  ;;  %v2655_v63 = vsel %vm16982_vm2, %v7503_v14, %v7498_v13  ;;  %vm16983_vm5 = vmmov %vm16981_vm3  ;;  %v2644_v32 = vsel %vm16982_vm2, %v7499_v22, %v7504_v23  ;;  %v7224_v40 = vunpack.i.h.bf16 %v16987_v61  ;;  %6633 = vmatprep.subr.msk.bf16.mxu1 %vm8524_vm13, %v2268_v26 }
 0x757   :  { %v2163_v49 = vsel %vm16983_vm5, %v7488_v2, %v7483_v16  ;;  %vm16984_vm10 = vmmov %vm16981_vm3  ;;  %2983 = vmatpush2.bf16.msra.mxu0 %v10591_v45  ;;  %v7223_v16 = vunpack.i.l.bf16 %v16987_v61  ;;  %v2653_v2 = vsel %vm16982_vm2, %v7213_v3, %v7208_v38 }
 0x758   :  { %v2164_v10 = vsel %vm16984_vm10, %v7489_v12, %v7484_v54  ;;  %vm16985_vm15 = vmmov %vm16982_vm2  ;;  %6612 = vmatprep.subr.msk.bf16.mxu0 %vm8524_vm13, %v2266_v39  ;;  %v16990_v54 = vunpack.i.l.bf16 %v16973_v62  ;;  %vm16991_vm10 = vcmp.lt.s32.totalorder %v8237_v11, 17  ;;  %v2176_v12 = vpack.c.bf16 %v2152_v59, %v2151_v44 }
 0x759   :  { %v2656_v31 = vsel %vm16985_vm15, %v7504_v23, %v7499_v22  ;;  %vm16986_vm3 = vmmov %vm16982_vm2  ;;  %v2277_v23 = vsel %vm16603_vm9, %v2265_v47, 0  ;;  %v10798_v22 = vld [vmem:[%s15939_s5] ss:$16 sps:$4 sm:$0xff]   ;;  %v2175_v39 = vpack.c.bf16 %v2164_v10, %v2163_v49  ;;  %v7512_v47 = vpop.permute.xlu1 %7511  ;;  %3183 = vmatpush1.bf16.msra.mxu1 %v10681_v42  ;;  %v2651_v10 = vsel %vm16982_vm2, %v7228_v17, %v7223_v16 }
 0x75a   :  { %v2643_v34 = vsel %vm16986_vm3, %v7498_v13, %v7503_v14  ;;  %vm16988_vm15 = vmmov %vm16982_vm2  ;;  %v10781_v14 = vsel %vm16991_vm10, %v16990_v54, %v7218_v57  ;;  %v2668_v13 = vpack.c.bf16 %v2656_v31, %v2655_v63  ;;  %v16995_v44 = vmov %v16990_v54  ;;  %6634 = vmatprep.subr.msk.bf16.mxu1 %vm16796_vm11, %v2176_v12 }
 0x75b   :  { %v2641_v45 = vsel %vm16988_vm15, %v7208_v38, %v7213_v3  ;;  %vm16989_vm5 = vmmov %vm16982_vm2  ;;  %vm16993_vm15 = vcmask 392192   ;;  %v16994_v38 = vld [vmem:[#allocation55_spill] sm:$0xff]  ;;  %2985 = vmatpush2.bf16.msra.mxu0 %v2277_v23  ;;  %v16997_v63 = vunpack.i.h.bf16 %v16973_v62  ;;  %v7494_v62 = vunpack.i.h.bf16 %v10605_v8  ;;  %v17004_v23 = vld [vmem:[#allocation56_spill] sm:$0xff] }
 0x75c   :  { %v2642_v4 = vsel %vm16989_vm5, %v7209_v58, %v7214_v28  ;;  %vm16992_vm3 = vmmov %vm16982_vm2  ;;  %6625 = vmatprep.mubr.msk.bf16.mxu1 %vm16993_vm15, %v10744_v50  ;;  %v7238_v31 = vunpack.i.l.bf16 %v16994_v38  ;;  %6645 = vmatprep.subr.msk.bf16.mxu0 %vm16812_vm8, %v2668_v13  ;;  %v7493_v54 = vunpack.i.l.bf16 %v10605_v8  ;;  %v7244_v12 = vunpack.i.h.bf16 %v17004_v23 }
 0x75d   :  { %v2654_v26 = vsel %vm16992_vm3, %v7214_v28, %v7209_v58  ;;  %v2667_v58 = vpack.c.bf16 %v2644_v32, %v2643_v34  ;;  %v7239_v28 = vunpack.i.h.bf16 %v16994_v38  ;;  %v2665_v3 = vpack.c.bf16 %v2642_v4, %v2641_v45  ;;  %vm16996_vm5 = vmmov %vm16991_vm10  ;;  %v7507_v34 = vpop.permute.xlu0 %7506  ;;  %v10837_v32 = vld [vmem:[%s15939_s5 + $0x24] ss:$16 sps:$4 sm:$0xff]   ;;  %v10848_v4 = vld [vmem:[%s15939_s5 + $0x4c] ss:$16 sps:$4 sm:$0xff]   ;;  %3110 = vmatmul.mubr.bf16.gmra.mxu1 %v10803_v7 }
 0x75e   :  { %v10811_v59 = vsel %vm16996_vm5, %v7218_v57, %v16995_v44  ;;  %vm16998_vm10 = vmmov %vm16996_vm5  ;;  %v2666_v51 = vpack.c.bf16 %v2654_v26, %v2653_v2  ;;  %v17000_v57 = vld [vmem:[#allocation57_spill] sm:$0xff]  ;;  %v7513_v26 = vunpack.i.l.bf16 %v7512_v47  ;;  %2987 = vmatmul.mubr.bf16.vlgmr.msra.gmra.mxu0 %v10798_v22  ;;  %v2187_v2 = vsel %vm16765_vm12, %v2175_v39, 0 }
 0x75f   :  { %v10819_v49 = vsel %vm16998_vm10, %v7219_v1, %v16997_v63  ;;  %vm16999_vm3 = vmmov %vm16982_vm2  ;;  %v7249_v1 = vunpack.i.h.bf16 %v17000_v57  ;;  %v7248_v15 = vunpack.i.l.bf16 %v17000_v57  ;;  %3185 = vmatpush1.bf16.msra.mxu1 %v2187_v2  ;;  %v2677_v8 = vsel %vm16782_vm6, %v2665_v3, 0  ;;  %2996 = vmatprep.mubr.bf16.mxu0 %v10837_v32  ;;  %v17010_v57 = vld [vmem:[#allocation54_spill] sm:$0xff]  ;;  %v11025_v38 = vld [vmem:[%s15939_s5 + $0x8c] ss:$16 sps:$4 sm:$0xff]  }
 0x760   :  { %v2652_v42 = vsel %vm16999_vm3, %v7229_v18, %v7224_v40  ;;  %vm17001_vm15 = vmmov %vm16982_vm2  ;;  %v7508_v39 = vunpack.i.l.bf16 %v7507_v34  ;;  %6635 = vmatprep.subr.msk.bf16.mxu1 %vm16796_vm11, %v2174_v37  ;;  %v7509_v44 = vunpack.i.h.bf16 %v7507_v34  ;;  %vm17005_vm3 = vcmask 392192   ;;  %v10883_v37 = vld [vmem:[%s15939_s5 + $0x20] ss:$16 sps:$4 sm:$0xff]  }
 0x761   :  { %v2639_v61 = vsel %vm17001_vm15, %v7223_v16, %v7228_v17  ;;  %vm17002_vm5 = vmmov %vm16982_vm2  ;;  %v2679_v17 = vsel %vm16782_vm6, %v2667_v58, 0  ;;  %v7514_v16 = vunpack.i.h.bf16 %v7512_v47  ;;  %v7243_v47 = vunpack.i.l.bf16 %v17004_v23  ;;  %6626 = vmatprep.mubr.msk.bf16.mxu1 %vm17005_vm3, %v10848_v4 }
 0x762   :  { %v2640_v45 = vsel %vm17002_vm5, %v7224_v40, %v7229_v18  ;;  %v17003_v18 = vld [vmem:[#allocation34_spill] sm:$0xff]  ;;  %3294 = vmatpush1.bf16.msra.mxu0 %v2679_v17  ;;  %v2664_v63 = vpack.c.bf16 %v2652_v42, %v2651_v10  ;;  %vm17006_vm2 = vmmov %vm16998_vm10  ;;  %vm17007_vm15 = vcmp.lt.s32.totalorder %v8237_v11, 113  ;;  %v10888_v42 = vld [vmem:[%s15939_s5 + $0x48] ss:$16 sps:$4 sm:$0xff]   ;;  %v7234_v34 = vunpack.i.h.bf16 %v17010_v57 }
 0x763   :  { %v7404_v40 = vunpack.i.h.bf16 %v17003_v18  ;;  %v7403_v13 = vunpack.i.l.bf16 %v17003_v18  ;;  %6646 = vmatprep.subr.msk.bf16.mxu0 %vm16812_vm8, %v2666_v51  ;;  %v2663_v58 = vpack.c.bf16 %v2640_v45, %v2639_v61  ;;  %v2559_v33 = vsel %vm17007_vm15, %v7513_v26, %v7508_v39  ;;  %vm17008_vm5 = vmmov %vm17006_vm2  ;;  %v10897_v45 = vpop.permute.xlu1 %7521  ;;  %3187 = vmatpush1.bf16.msra.mxu1 %v10694_v27  ;;  %v17015_v18 = vld [vmem:[#allocation59_spill] sm:$0xff] }
 0x764   :  { %vm17011_vm3 = vmmov %vm17007_vm15  ;;  %v17016_v23 = vpack.c.bf16 %v10647_v35, %v10639_v25 }
 0x765   :  { %v2056_v3 = vsel %vm16998_vm10, %v7404_v40, %v7494_v62  ;;  %v2055_v0 = vsel %vm17006_vm2, %v7403_v13, %v7493_v54  ;;  %v2067_v10 = vsel %vm17008_vm5, %v7493_v54, %v7403_v13  ;;  %vm17009_vm10 = vmmov %vm17006_vm2  ;;  %v2560_v61 = vsel %vm17011_vm3, %v7514_v16, %v7509_v44  ;;  %v10924_v13 = vld [vmem:[%s15939_s5 + $0x44] ss:$16 sps:$4 sm:$0xff]   ;;  %3120 = vmatmul.mubr.bf16.gmra.mxu1 %v10888_v42 }
 0x766   :  { %v2068_v51 = vsel %vm17009_vm10, %v7494_v62, %v7404_v40  ;;  %3296 = vmatpush1.bf16.msra.mxu0 %v2677_v8  ;;  %vm17012_vm2 = vmmov %vm17011_vm3  ;;  %v7233_v54 = vunpack.i.l.bf16 %v17010_v57  ;;  %v7259_v40 = vunpack.i.h.bf16 %v17015_v18  ;;  %6636 = vmatprep.subr.msk.bf16.mxu1 %vm16796_vm11, %v17016_v23  ;;  %v2675_v27 = vsel %vm16782_vm6, %v2663_v58, 0  ;;  %v17019_v58 = vld [vmem:[#allocation58_spill] sm:$0xff] }
 0x767   :  { %v2547_v2 = vsel %vm17012_vm2, %v7508_v39, %v7513_v26  ;;  %vm17013_vm15 = vmmov %vm17012_vm2  ;;  %6647 = vmatprep.subr.msk.bf16.mxu0 %vm16812_vm8, %v2664_v63  ;;  %v2080_v8 = vpack.c.bf16 %v2056_v3, %v2055_v0  ;;  %v2546_v35 = vsel %vm17012_vm2, %v7244_v12, %v7249_v1  ;;  %v10933_v39 = vld [vmem:[%s15939_s5 + $0x6c] ss:$16 sps:$4 sm:$0xff]   ;;  %2997 = vmatmul.mubr.bf16.gmra.mxu0 %v10883_v37  ;;  %v7253_v57 = vunpack.i.l.bf16 %v17019_v58 }
 0x768   :  { %v2548_v17 = vsel %vm17013_vm15, %v7509_v44, %v7514_v16  ;;  %vm17014_vm5 = vmmov %vm17012_vm2  ;;  %v10919_v16 = vpop.permute.xlu0 %7516  ;;  %v7254_v44 = vunpack.i.h.bf16 %v17019_v58  ;;  %v2572_v3 = vpack.c.bf16 %v2560_v61, %v2559_v33  ;;  %v2079_v63 = vpack.c.bf16 %v2068_v51, %v2067_v10  ;;  %3189 = vmatpush1.bf16.msra.mxu1 %v10700_v24  ;;  %v10963_v51 = vpop.permute.xlu1 %7531  ;;  %3006 = vmatprep.mubr.bf16.mxu0 %v10924_v13 }
 0x769   :  { %v2558_v62 = vsel %vm17014_vm5, %v7249_v1, %v7244_v12  ;;  %vm17017_vm10 = vmmov %vm17012_vm2  ;;  %v2571_v0 = vpack.c.bf16 %v2548_v17, %v2547_v2  ;;  %v17020_v1 = vld [vmem:[#allocation80_spill] sm:$0xff]  ;;  %v17021_v12 = vld [vmem:[#allocation81_spill] sm:$0xff]  ;;  %vm17022_vm15 = vcmp.lt.s32.totalorder %v8237_v11, 127  ;;  %6637 = vmatprep.subr.msk.bf16.mxu1 %vm16835_vm0, %v2080_v8  ;;  %v2076_v33 = vpack.c.bf16 %v10724_v53, %v10781_v14 }
 0x76a   :  { %v2557_v26 = vsel %vm17017_vm10, %v7248_v15, %v7243_v47  ;;  %vm17018_vm3 = vmmov %vm17012_vm2  ;;  %3298 = vmatpush1.bf16.msra.mxu0 %v2675_v27  ;;  %v10947_v23 = vsel %vm17022_vm15, %v7239_v28, %v7234_v34  ;;  %v2075_v24 = vpack.c.bf16 %v10819_v49, %v10811_v59  ;;  %v17024_v2 = vld [vmem:[#allocation33_spill] sm:$0xff]  ;;  %v17025_v17 = vld [vmem:[#allocation32_spill] sm:$0xff]  ;;  %vm17027_vm10 = vcmask 392192  }
 0x76b   :  { %v2545_v25 = vsel %vm17018_vm3, %v7243_v47, %v7248_v15  ;;  %v7258_v15 = vunpack.i.l.bf16 %v17015_v18  ;;  %v2078_v47 = vpack.c.bf16 %v17021_v12, %v17020_v1  ;;  %6648 = vmatprep.subr.msk.bf16.mxu0 %vm16853_vm7, %v2572_v3  ;;  %vm17023_vm5 = vmmov %vm17022_vm15  ;;  %v2570_v61 = vpack.c.bf16 %v2558_v62, %v2557_v26  ;;  %6627 = vmatprep.mubr.msk.bf16.mxu1 %vm17027_vm10, %v10933_v39  ;;  %v10983_v26 = vld [vmem:[%s15939_s5 + $0x40] ss:$16 sps:$4 sm:$0xff]   ;;  %v10988_v8 = vld [vmem:[%s15939_s5 + $0x68] ss:$16 sps:$4 sm:$0xff]  }
 0x76c   :  { %v10961_v10 = vsel %vm17023_vm5, %v7238_v31, %v7233_v54  ;;  %v17026_v18 = vpack.c.bf16 %v17024_v2, %v17025_v17  ;;  %v2569_v14 = vpack.c.bf16 %v2546_v35, %v2545_v25  ;;  %vm17028_vm3 = vmmov %vm17012_vm2  ;;  %v7523_v49 = vunpack.i.l.bf16 %v10897_v45  ;;  %v10992_v35 = vpop.permute.xlu0 %7526  ;;  %v7542_v17 = vpop.permute.xlu1 %7541 }
 0x76d   :  { %v2556_v59 = vsel %vm17028_vm3, %v7259_v40, %v7254_v44  ;;  %v2091_v62 = vsel %vm16621_vm4, %v2079_v63, 0  ;;  %v2583_v27 = vsel %vm16855_vm1, %v2571_v0, 0  ;;  %v2555_v25 = vsel %vm17012_vm2, %v7258_v15, %v7253_v57  ;;  %vm17029_vm15 = vmmov %vm17012_vm2  ;;  %v17031_v0 = vld [vmem:[#allocation61_spill] sm:$0xff]  ;;  %3130 = vmatmul.mubr.bf16.gmra.mxu1 %v10988_v8 }
 0x76e   :  { %v2089_v53 = vsel %vm16621_vm4, %v17026_v18, 0  ;;  %v7524_v58 = vunpack.i.h.bf16 %v10897_v45  ;;  %3191 = vmatpush1.bf16.msra.mxu1 %v2091_v62  ;;  %3300 = vmatpush1.bf16.msra.mxu0 %v2583_v27  ;;  %v2543_v3 = vsel %vm17029_vm15, %v7253_v57, %v7258_v15  ;;  %vm17030_vm5 = vmmov %vm17012_vm2  ;;  %v7269_v1 = vunpack.i.h.bf16 %v17031_v0 }
 0x76f   :  { %v2544_v63 = vsel %vm17030_vm5, %v7254_v44, %v7259_v40  ;;  %v7518_v12 = vunpack.i.l.bf16 %v10919_v16  ;;  %6638 = vmatprep.subr.msk.bf16.mxu1 %vm16835_vm0, %v2078_v47  ;;  %6649 = vmatprep.subr.msk.bf16.mxu0 %vm16853_vm7, %v2570_v61  ;;  %vm17032_vm10 = vcmp.lt.s32.totalorder %v8237_v11, 127  ;;  %v17034_v44 = vld [vmem:[#allocation60_spill] sm:$0xff]  ;;  %v7268_v2 = vunpack.i.l.bf16 %v17031_v0 }
 0x770   :  { %v2447_v45 = vsel %vm17032_vm10, %v7233_v54, %v7238_v31  ;;  %vm17033_vm3 = vmmov %vm17032_vm10  ;;  %v7264_v57 = vunpack.i.h.bf16 %v17034_v44  ;;  %v7263_v15 = vunpack.i.l.bf16 %v17034_v44  ;;  %v7519_v47 = vunpack.i.h.bf16 %v10919_v16  ;;  %v11020_v61 = vld [vmem:[%s15939_s5 + $0x64] ss:$16 sps:$4 sm:$0xff]   ;;  %3007 = vmatmul.mubr.bf16.gmra.mxu0 %v10983_v26  ;;  %v7537_v27 = vpop.permute.xlu0 %7536 }
 0x771   :  { %v2448_v40 = vsel %vm17033_vm3, %v7234_v34, %v7239_v28  ;;  %vm17035_vm2 = vmmov %vm17033_vm3  ;;  %v2581_v31 = vsel %vm16855_vm1, %v2569_v14, 0  ;;  %v2568_v34 = vpack.c.bf16 %v2556_v59, %v2555_v25  ;;  %v2567_v54 = vpack.c.bf16 %v2544_v63, %v2543_v3  ;;  %3016 = vmatprep.mubr.bf16.mxu0 %v11020_v61  ;;  %v17041_v63 = vld [vmem:[#allocation67_spill] sm:$0xff]  ;;  %v17044_v44 = vld [vmem:[#allocation66_spill] sm:$0xff] }
 0x772   :  { %v2463_v28 = vsel %vm17035_vm2, %v7523_v49, %v7518_v12  ;;  %vm17036_vm15 = vmmov %vm17035_vm2  ;;  %3193 = vmatpush1.bf16.msra.mxu1 %v2089_v53  ;;  %3302 = vmatpush1.bf16.msra.mxu0 %v2581_v31  ;;  %v2472_v14 = vpack.c.bf16 %v10947_v23, %v10961_v10  ;;  %v2461_v53 = vsel %vm17035_vm2, %v7268_v2, %v7263_v15  ;;  %v7299_v0 = vunpack.i.h.bf16 %v17041_v63 }
 0x773   :  { %v2464_v16 = vsel %vm17036_vm15, %v7524_v58, %v7519_v47  ;;  %vm17037_vm5 = vmmov %vm17035_vm2  ;;  %6639 = vmatprep.subr.msk.bf16.mxu1 %vm16835_vm0, %v2076_v33  ;;  %6650 = vmatprep.subr.msk.bf16.mxu0 %vm16853_vm7, %v2568_v34  ;;  %v2471_v25 = vpack.c.bf16 %v2448_v40, %v2447_v45  ;;  %vm17040_vm15 = vcmask 392192   ;;  %v7543_v33 = vunpack.i.l.bf16 %v7542_v17 }
 0x774   :  { %v2451_v18 = vsel %vm17037_vm5, %v7518_v12, %v7523_v49  ;;  %vm17038_vm10 = vmmov %vm17035_vm2  ;;  %v2087_v49 = vsel %vm16621_vm4, %v2075_v24, 0  ;;  %6628 = vmatprep.mubr.msk.bf16.mxu1 %vm17040_vm15, %v11025_v38  ;;  %v2579_v23 = vsel %vm16855_vm1, %v2567_v54, 0  ;;  %v2476_v10 = vpack.c.bf16 %v2464_v16, %v2463_v28  ;;  %v11064_v24 = vld [vmem:[%s15939_s5 + $0x88] ss:$16 sps:$4 sm:$0xff]  }
 0x775   :  { %v2452_v62 = vsel %vm17038_vm10, %v7519_v47, %v7524_v58  ;;  %vm17039_vm3 = vmmov %vm17035_vm2  ;;  %v11059_v58 = vld [vmem:[%s15939_s5 + $0x60] ss:$16 sps:$4 sm:$0xff]   ;;  %v7544_v12 = vunpack.i.h.bf16 %v7542_v17  ;;  %v7294_v47 = vunpack.i.h.bf16 %v17044_v44  ;;  %v7293_v28 = vunpack.i.l.bf16 %v17044_v44  ;;  %v17046_v54 = vld [vmem:[#allocation63_spill] sm:$0xff]  ;;  %3140 = vmatmul.mubr.bf16.gmra.mxu1 %v11064_v24 }
 0x776   :  { %v2462_v59 = vsel %vm17039_vm3, %v7269_v1, %v7264_v57  ;;  %v2475_v3 = vpack.c.bf16 %v2452_v62, %v2451_v18  ;;  %3195 = vmatpush1.bf16.msra.mxu1 %v2087_v49  ;;  %3304 = vmatpush1.bf16.msra.mxu0 %v2579_v23  ;;  %vm17042_vm5 = vmmov %vm17035_vm2  ;;  %v7298_v31 = vunpack.i.l.bf16 %v17041_v63  ;;  %v7538_v34 = vunpack.i.l.bf16 %v7537_v27  ;;  %v11090_v17 = vld [vmem:[%s15939_s5 + $0xac] ss:$16 sps:$4 sm:$0xff]  }
 0x777   :  { %v2449_v45 = vsel %vm17042_vm5, %v7263_v15, %v7268_v2  ;;  %vm17043_vm10 = vmmov %vm17035_vm2  ;;  %vm17045_vm3 = vnez %v16884_v52  ;;  %v7539_v2 = vunpack.i.h.bf16 %v7537_v27  ;;  %vm17047_vm2 = vnez %v16821_v46  ;;  %v17049_v49 = vld [vmem:[#allocation69_spill] sm:$0xff] }
 0x778   :  { %v2450_v40 = vsel %vm17043_vm10, %v7264_v57, %v7269_v1  ;;  %6640 = vmatprep.subr.msk.bf16.mxu1 %vm17045_vm3, %v2472_v14  ;;  %6651 = vmatprep.subr.msk.bf16.mxu0 %vm17045_vm3, %v2476_v10  ;;  %v2483_v1 = vsel %vm17047_vm2, %v2471_v25, 0  ;;  %v11085_v57 = vld [vmem:[%s15939_s5 + $0x84] ss:$16 sps:$4 sm:$0xff]   ;;  %vm17048_vm15 = vcmp.lt.s32.totalorder %v8237_v11, 111  ;;  %v2487_v62 = vsel %vm17047_vm2, %v2475_v3, 0  ;;  %v17062_v15 = vld [vmem:[#allocation77_spill] sm:$0xff] }
 0x779   :  { %v2751_v18 = vsel %vm17048_vm15, %v7543_v33, %v7538_v34  ;;  %3017 = vmatmul.mubr.bf16.gmra.mxu0 %v11059_v58  ;;  %v2474_v14 = vpack.c.bf16 %v2462_v59, %v2461_v53  ;;  %v2473_v27 = vpack.c.bf16 %v2450_v40, %v2449_v45  ;;  %v7309_v25 = vunpack.i.h.bf16 %v17049_v49  ;;  %vm17050_vm5 = vmmov %vm17048_vm15  ;;  %v17055_v45 = vld [vmem:[#allocation79_spill] sm:$0xff]  ;;  %v17056_v40 = vld [vmem:[#allocation78_spill] sm:$0xff] }
 0x77a   :  { %v2752_v23 = vsel %vm17050_vm5, %v7544_v12, %v7539_v2  ;;  %3197 = vmatpush2.bf16.msra.mxu1 %v2483_v1  ;;  %3306 = vmatpush1.bf16.msra.mxu0 %v2487_v62  ;;  %vm17051_vm10 = vmmov %vm17050_vm5  ;;  %v7308_v53 = vunpack.i.l.bf16 %v17049_v49  ;;  %v17057_v44 = vpack.c.bf16 %v17055_v45, %v17056_v40  ;;  %v7533_v45 = vunpack.i.l.bf16 %v10963_v51 }
 0x77b   :  { %v2739_v10 = vsel %vm17051_vm10, %v7538_v34, %v7543_v33  ;;  %vm17052_vm15 = vmmov %vm17050_vm5  ;;  %6652 = vmatprep.subr.msk.bf16.mxu0 %vm17045_vm3, %v2474_v14  ;;  %v8142_v33 = vld [vmem:[%s15938_s2 + $0x68] sm:$0xff]  ;;  %3026 = vmatprep.mubr.bf16.mxu0 %v11085_v57  ;;  %v2485_v40 = vsel %vm17047_vm2, %v2473_v27, 0  ;;  %v17063_v27 = vld [vmem:[#allocation76_spill] sm:$0xff]  ;;  %v7528_v16 = vunpack.i.l.bf16 %v10992_v35  ;;  %v17074_v56 = vunpack.i.h.bf16 %v17046_v54 }
 0x77c   :  { %v2740_v63 = vsel %vm17052_vm15, %v7539_v2, %v7544_v12  ;;  %vm17053_vm7 = vmmov %vm17050_vm5  ;;  %3198 = vmatprep.subr.bf16.mxu1 %v17057_v44  ;;  %v8143_v12 = vld [vmem:[%s15938_s2 + $0x78] sm:$0xff]  ;;  %v17058_v2 = vld [vmem:[#allocation68_spill] sm:$0xff]  ;;  %v2764_v44 = vpack.c.bf16 %v2752_v23, %v2751_v18  ;;  %v17064_v18 = vpack.c.bf16 %v17062_v15, %v17063_v27 }
 0x77d   :  { %v2750_v3 = vsel %vm17053_vm7, %v7299_v0, %v7294_v47  ;;  %vm17054_vm1 = vmmov %vm17050_vm5  ;;  %v2390_v34 = vpack.c.bf16 %v8143_v12, %v8142_v33  ;;  %v7304_v1 = vunpack.i.h.bf16 %v17058_v2  ;;  %v7303_v62 = vunpack.i.l.bf16 %v17058_v2  ;;  %v11136_v33 = vld [vmem:[%s15939_s5 + $0x80] ss:$16 sps:$4 sm:$0xff]   ;;  %v11141_v2 = vld [vmem:[%s15939_s5 + $0xa8] ss:$16 sps:$4 sm:$0xff]  }
 0x77e   :  { %v2749_v59 = vsel %vm17054_vm1, %v7298_v31, %v7293_v28  ;;  %vm17059_vm7 = vcmask 392192   ;;  %v2737_v14 = vsel %vm17054_vm1, %v7293_v28, %v7298_v31  ;;  %vm17060_vm5 = vmmov %vm17054_vm1  ;;  %v2763_v12 = vpack.c.bf16 %v2740_v63, %v2739_v10  ;;  %v17061_v28 = vld [vmem:[#allocation62_spill] sm:$0xff]  ;;  %3199 = vmatpush2.bf16.msra.mxu1 %v17064_v18  ;;  %3308 = vmatpush1.bf16.msra.mxu0 %v2485_v40  ;;  %v8145_v10 = vld [vmem:[%s15938_s2 + $0x70] sm:$0xff] }
 0x77f   :  { %6629 = vmatprep.mubr.msk.bf16.mxu1 %vm17059_vm7, %v11090_v17  ;;  %v2738_v49 = vsel %vm17060_vm5, %v7294_v47, %v7299_v0  ;;  %v7274_v31 = vunpack.i.h.bf16 %v17061_v28  ;;  %v7273_v0 = vunpack.i.l.bf16 %v17061_v28  ;;  %v7534_v47 = vunpack.i.h.bf16 %v10963_v51  ;;  %v8144_v23 = vld [vmem:[%s15938_s2 + $0x60] sm:$0xff]  ;;  %6653 = vmatprep.subr.msk.bf16.mxu0 %vm16937_vm14, %v2764_v44  ;;  %v8146_v15 = vld [vmem:[%s15938_s2 + $0x48] sm:$0xff]  ;;  %v8147_v40 = vld [vmem:[%s15938_s2 + $0x58] sm:$0xff] }
 0x780   :  { %v2389_v63 = vpack.c.bf16 %v8145_v10, %v8144_v23  ;;  %3200 = vmatprep.subr.bf16.mxu1 %v2390_v34  ;;  %v2762_v51 = vpack.c.bf16 %v2750_v3, %v2749_v59  ;;  %v2388_v28 = vpack.c.bf16 %v8147_v40, %v8146_v15  ;;  %v2761_v27 = vpack.c.bf16 %v2738_v49, %v2737_v14  ;;  %vm17065_vm10 = vmmov %vm17054_vm1  ;;  %v11172_v3 = vld [vmem:[%s15939_s5 + $0xa4] ss:$16 sps:$4 sm:$0xff]   ;;  %v11179_v34 = vld [vmem:[%s15939_s5 + $0xcc] ss:$16 sps:$4 sm:$0xff]  }
 0x781   :  { %v2748_v18 = vsel %vm17065_vm10, %v7309_v25, %v7304_v1  ;;  %vm17066_vm15 = vmmov %vm17054_vm1  ;;  %v7529_v44 = vunpack.i.h.bf16 %v10992_v35  ;;  %3027 = vmatmul.mubr.bf16.gmra.mxu0 %v11136_v33  ;;  %vm17069_vm5 = vnez %v16955_v36  ;;  %3150 = vmatmul.mubr.bf16.gmra.mxu1 %v11141_v2  ;;  %v8148_v49 = vld [vmem:[%s15938_s2 + $0x40] sm:$0xff]  ;;  %v17071_v15 = vld [vmem:[#allocation65_spill] sm:$0xff] }
 0x782   :  { %v2747_v23 = vsel %vm17066_vm15, %v7308_v53, %v7303_v62  ;;  %vm17067_vm7 = vmmov %vm17054_vm1  ;;  %vm17068_vm1 = vcmp.lt.s32.totalorder %v8237_v11, 1  ;;  %v2775_v35 = vsel %vm17069_vm5, %v2763_v12, 0  ;;  %v7289_v40 = vunpack.i.h.bf16 %v17071_v15  ;;  %3201 = vmatpush2.bf16.msra.mxu1 %v2389_v63  ;;  %3036 = vmatprep.mubr.bf16.mxu0 %v11172_v3 }
 0x783   :  { %v2735_v59 = vsel %vm17067_vm7, %v7303_v62, %v7308_v53  ;;  %v2343_v14 = vsel %vm17068_vm1, %v7528_v16, %v7533_v45  ;;  %v8149_v53 = vld [vmem:[%s15938_s2 + $0x50] sm:$0xff]  ;;  %vm17070_vm10 = vmmov %vm17067_vm7  ;;  %3320 = vmatpush2.bf16.msra.mxu0 %v2775_v35  ;;  %v2356_v52 = vsel %vm17068_vm1, %v7534_v47, %v7529_v44  ;;  %3202 = vmatprep.subr.bf16.mxu1 %v2388_v28 }
 0x784   :  { %v2387_v62 = vpack.c.bf16 %v8149_v53, %v8148_v49  ;;  %v2736_v10 = vsel %vm17070_vm10, %v7304_v1, %v7309_v25  ;;  %vm17072_vm15 = vmmov %vm17068_vm1  ;;  %v17076_v25 = vunpack.i.l.bf16 %v17046_v54  ;;  %v7288_v53 = vunpack.i.l.bf16 %v17071_v15  ;;  %6654 = vmatprep.subr.msk.bf16.mxu0 %vm16937_vm14, %v2762_v51 }
 0x785   :  { %v2344_v46 = vsel %vm17072_vm15, %v7529_v44, %v7534_v47  ;;  %vm17073_vm7 = vmmov %vm17068_vm1  ;;  %v17080_v47 = vld [vmem:[#allocation64_spill] sm:$0xff]  ;;  %v2773_v44 = vsel %vm17069_vm5, %v2761_v27, 0  ;;  %v17082_v51 = vunpack.i.h.bf16 %v17046_v54  ;;  %v2760_v15 = vpack.c.bf16 %v2748_v18, %v2747_v23  ;;  %v11236_v27 = vld [vmem:[%s15939_s5 + $0xc8] ss:$16 sps:$4 sm:$0xff]   ;;  %v7552_v54 = vpop.permute.xlu1 %7551 }
 0x786   :  { %v2355_v12 = vsel %vm17073_vm7, %v7533_v45, %v7528_v16  ;;  %vm17075_vm2 = vmmov %vm17068_vm1  ;;  %v17078_v16 = vmov %v17076_v25  ;;  %v7284_v63 = vunpack.i.h.bf16 %v17080_v47  ;;  %v2368_v35 = vpack.c.bf16 %v2344_v46, %v2343_v14  ;;  %3203 = vmatpush2.bf16.msra.mxu1 %v2387_v62  ;;  %v11245_v46 = vld [vmem:[%s15939_s5 + $0xc4] ss:$16 sps:$4 sm:$0xff]   ;;  %v11250_v18 = vld [vmem:[%s15939_s5 + $0xec] ss:$16 sps:$4 sm:$0xff]   ;;  %v7547_v14 = vpop.permute.xlu0 %7546 }
 0x787   :  { %v2342_v49 = vsel %vm17075_vm2, %v7274_v31, %v17074_v56  ;;  %vm17077_vm10 = vmmov %vm17068_vm1  ;;  %v7283_v56 = vunpack.i.l.bf16 %v17080_v47  ;;  %vm17081_vm2 = vcmask 392192   ;;  %3322 = vmatpush2.bf16.msra.mxu0 %v2773_v44  ;;  %v7549_v47 = vunpack.i.h.bf16 %v7547_v14 }
 0x788   :  { %v2341_v1 = vsel %vm17077_vm10, %v7273_v0, %v17076_v25  ;;  %vm17079_vm15 = vmmov %vm17068_vm1  ;;  %6630 = vmatprep.mubr.msk.bf16.mxu1 %vm17081_vm2, %v11179_v34  ;;  %v2367_v25 = vpack.c.bf16 %v2356_v52, %v2355_v12  ;;  %6655 = vmatprep.subr.msk.bf16.mxu0 %vm16937_vm14, %v2760_v15  ;;  %vm17087_vm2 = vnez %v16934_v19  ;;  %v7554_v12 = vunpack.i.h.bf16 %v7552_v54 }
 0x789   :  { %v2353_v45 = vsel %vm17079_vm15, %v17078_v16, %v7273_v0  ;;  %vm17083_vm7 = vmmov %vm17068_vm1  ;;  %v11231_v0 = vld [vmem:[%s15939_s5 + $0xa0] ss:$16 sps:$4 sm:$0xff]   ;;  %v2759_v16 = vpack.c.bf16 %v2736_v10, %v2735_v59  ;;  %vm17084_vm1 = vnez %v16963_v5  ;;  %v2366_v52 = vpack.c.bf16 %v2342_v49, %v2341_v1  ;;  %3160 = vmatmul.mubr.bf16.gmra.mxu1 %v11236_v27 }
 0x78a   :  { %v2354_v28 = vsel %vm17083_vm7, %v17082_v51, %v7274_v31  ;;  %6641 = vmatprep.subr.msk.bf16.mxu1 %vm17084_vm1, %v2368_v35  ;;  %vm17085_vm10 = vmmov %vm17083_vm7  ;;  %3037 = vmatmul.mubr.bf16.gmra.mxu0 %v11231_v0  ;;  %v2379_v62 = vsel %vm17087_vm2, %v2367_v25, 0  ;;  %v7553_v49 = vunpack.i.l.bf16 %v7552_v54  ;;  %v2351_v1 = vsel %vm17083_vm7, %v7288_v53, %v7283_v56 }
 0x78b   :  { %v2365_v31 = vpack.c.bf16 %v2354_v28, %v2353_v45  ;;  %v2340_v23 = vsel %vm17085_vm10, %v7284_v63, %v7289_v40  ;;  %vm17086_vm15 = vmmov %vm17083_vm7  ;;  %v2771_v10 = vsel %vm17069_vm5, %v2759_v16, 0  ;;  %3205 = vmatpush2.bf16.msra.mxu1 %v2379_v62  ;;  %3046 = vmatprep.mubr.bf16.mxu0 %v11245_v46  ;;  %v7548_v44 = vunpack.i.l.bf16 %v7547_v14  ;;  %v7925_v16 = vld [vmem:[%s15939_s5 + $0xe4] ss:$16 sps:$4 sm:$0xff]   ;;  %v7927_v14 = vld [vmem:[%s15939_s5 + $0xe0] ss:$16 sps:$4 sm:$0xff]  }
 0x78c   :  { %v2339_v59 = vsel %vm17086_vm15, %v7283_v56, %v7288_v53  ;;  %3324 = vmatpush2.bf16.msra.mxu0 %v2771_v10  ;;  %vm17088_vm10 = vmmov %vm17083_vm7  ;;  %6642 = vmatprep.subr.msk.bf16.mxu1 %vm17084_vm1, %v2366_v52  ;;  %vm17089_vm15 = vcmask 392192   ;;  %v7921_v53 = vld [vmem:[%s15939_s5 + $0xc0] ss:$16 sps:$4 sm:$0xff]   ;;  %vm17090_vm7 = vcmp.lt.s32.totalorder %v8237_v11, 15  ;;  %v8151_v62 = vld [vmem:[%s15939_s5 + $0xc] ss:$16 sps:$4 sm:$0xff]  }
 0x78d   :  { %v2352_v45 = vsel %vm17088_vm10, %v7289_v40, %v7284_v63  ;;  %6631 = vmatprep.mubr.msk.bf16.mxu1 %vm17089_vm15, %v11250_v18  ;;  %v2377_v51 = vsel %vm17087_vm2, %v2365_v31, 0  ;;  %v2364_v28 = vpack.c.bf16 %v2340_v23, %v2339_v59  ;;  %v7924_v40 = vld [vmem:[%s15939_s5 + $0xe8] ss:$16 sps:$4 sm:$0xff]   ;;  %v2247_v63 = vsel %vm17090_vm7, %v7548_v44, %v7553_v49  ;;  %vm17091_vm10 = vmmov %vm17090_vm7  ;;  %v8150_v23 = vld [vmem:[%s15939_s5 + $0x4] ss:$16 sps:$4 sm:$0xff]  }
 0x78e   :  { %v2363_v56 = vpack.c.bf16 %v2352_v45, %v2351_v1  ;;  %v2248_v35 = vsel %vm17091_vm10, %v7549_v47, %v7554_v12  ;;  %vm17092_vm15 = vmmov %vm17090_vm7 }
 0x78f   :  { %3207 = vmatpush2.bf16.msra.mxu1 %v2377_v51  ;;  %v2259_v15 = vsel %vm17092_vm15, %v7553_v49, %v7548_v44  ;;  %vm17093_vm5 = vmmov %vm17090_vm7  ;;  %v2272_v52 = vpack.c.bf16 %v2248_v35, %v2247_v63 }
 0x790   :  { %v2260_v25 = vsel %vm17093_vm5, %v7554_v12, %v7549_v47  ;;  %6643 = vmatprep.subr.msk.bf16.mxu1 %vm17084_vm1, %v2364_v28  ;;  %v2375_v54 = vsel %vm17087_vm2, %v2363_v56, 0  ;;  %vm17094_vm5 = vcmask 392192  }
 0x791   :  { %3170 = vmatmul.mubr.bf16.gmra.mxu1 %v7924_v40  ;;  %v2271_v31 = vpack.c.bf16 %v2260_v25, %v2259_v15  ;;  %vm17095_vm7 = vmmov %vm17094_vm5 }
 0x792   :  { %3047 = vmatmul.mubr.bf16.gmra.mxu0 %v7921_v53  ;;  %3212 = vmatprep.mubr.bf16.mxu1 %v8150_v23  ;;  %vm17096_vm10 = vmmov %vm17094_vm5 }
 0x793   :  { %3209 = vmatpush2.bf16.msra.mxu1 %v2375_v54  ;;  %3056 = vmatprep.mubr.bf16.mxu0 %v7925_v16  ;;  %v2283_v59 = vsel %vm16603_vm9, %v2271_v31, 0  ;;  %vm17097_vm15 = vmmov %vm17094_vm5 }
 0x794   :  { %6644 = vmatprep.subr.msk.bf16.mxu1 %vm8524_vm13, %v2272_v52 }
 0x797   :  { %3211 = vmatpush2.bf16.msra.mxu1 %v2283_v59 }
 0x79a   :  { %3057 = vmatmul.mubr.bf16.gmra.mxu0 %v7927_v14  ;;  %3213 = vmatmul.mubr.bf16.vlgmr.msra.gmra.mxu1 %v10798_v22 }
 0x79b   :  { %6656 = vmatprep.mubr.msk.bf16.mxu0 %vm17094_vm5, %v8151_v62  ;;  %3222 = vmatprep.mubr.bf16.mxu1 %v10837_v32 }
 0x7a2   :  { %3326 = vmatmul.mubr.bf16.vlgmr.msra.gmra.mxu0 %v10712_v55  ;;  %3223 = vmatmul.mubr.bf16.gmra.mxu1 %v10883_v37 }
 0x7a3   :  { %6657 = vmatprep.mubr.msk.bf16.mxu0 %vm17095_vm7, %v10744_v50  ;;  %3232 = vmatprep.mubr.bf16.mxu1 %v10924_v13  ;;  %vm17098_vm7 = vmmov %vm17094_vm5 }
 0x7aa   :  { %3336 = vmatmul.mubr.bf16.gmra.mxu0 %v10803_v7  ;;  %3233 = vmatmul.mubr.bf16.gmra.mxu1 %v10983_v26 }
 0x7ab   :  { %6658 = vmatprep.mubr.msk.bf16.mxu0 %vm17096_vm10, %v10848_v4  ;;  %3242 = vmatprep.mubr.bf16.mxu1 %v11020_v61  ;;  %vm17099_vm10 = vmmov %vm17094_vm5 }
 0x7b2   :  { %3346 = vmatmul.mubr.bf16.gmra.mxu0 %v10888_v42  ;;  %3243 = vmatmul.mubr.bf16.gmra.mxu1 %v11059_v58 }
 0x7b3   :  { %6659 = vmatprep.mubr.msk.bf16.mxu0 %vm17097_vm15, %v10933_v39  ;;  %3252 = vmatprep.mubr.bf16.mxu1 %v11085_v57  ;;  %vm17100_vm15 = vmmov %vm17094_vm5 }
 0x7ba   :  { %3356 = vmatmul.mubr.bf16.gmra.mxu0 %v10988_v8  ;;  %3253 = vmatmul.mubr.bf16.gmra.mxu1 %v11136_v33 }
 0x7bb   :  { %6660 = vmatprep.mubr.msk.bf16.mxu0 %vm17094_vm5, %v11025_v38  ;;  %3262 = vmatprep.mubr.bf16.mxu1 %v11172_v3 }
 0x7c2   :  { %3366 = vmatmul.mubr.bf16.gmra.mxu0 %v11064_v24  ;;  %3263 = vmatmul.mubr.bf16.gmra.mxu1 %v11231_v0 }
 0x7c3   :  { %6661 = vmatprep.mubr.msk.bf16.mxu0 %vm17098_vm7, %v11090_v17  ;;  %3272 = vmatprep.mubr.bf16.mxu1 %v11245_v46 }
 0x7ca   :  { %3376 = vmatmul.mubr.bf16.gmra.mxu0 %v11141_v2  ;;  %3273 = vmatmul.mubr.bf16.gmra.mxu1 %v7921_v53 }
 0x7cb   :  { %6662 = vmatprep.mubr.msk.bf16.mxu0 %vm17099_vm10, %v11179_v34  ;;  %3282 = vmatprep.mubr.bf16.mxu1 %v7925_v16 }
 0x7d2   :  { %3386 = vmatmul.mubr.bf16.gmra.mxu0 %v11236_v27  ;;  %3283 = vmatmul.mubr.bf16.gmra.mxu1 %v7927_v14 }
 0x7d3   :  { %6663 = vmatprep.mubr.msk.bf16.mxu0 %vm17100_vm15, %v11250_v18 }
 0x7da   :  { %3396 = vmatmul.mubr.bf16.gmra.mxu0 %v7924_v40 }
 0x814   :  { %v3101_v55 = vpop.f32.mrf.mxu1 }
 0x816   :  { %v3103_v50 = vpop.f32.mrf.mxu1 }
 0x818   :  { %v3105_v22 = vpop.f32.mrf.mxu1 }
 0x81a   :  { %v3107_v7 = vpop.f32.mrf.mxu1 }
 0x81d   :  { %v3111_v4 = vpop.f32.mrf.mxu1 }
 0x81e   :  { %v2988_v32 = vpop.f32.mrf.mxu0 }
 0x81f   :  { %v11341_v37 = vadd.f32 %v3101_v55, %v2988_v32  ;;  %v3113_v13 = vpop.f32.mrf.mxu1 }
 0x820   :  { %v2990_v42 = vpop.f32.mrf.mxu0 }
 0x821   :  { %v11343_v39 = vadd.f32 %v3103_v50, %v2990_v42  ;;  %v3115_v8 = vpop.f32.mrf.mxu1  ;;  %v3518_v61 = vmul.f32 %v11341_v37, %v11341_v37 }
 0x822   :  { %v2992_v26 = vpop.f32.mrf.mxu0 }
 0x823   :  { %v3519_v38 = vmul.f32 %v11343_v39, %v11343_v39  ;;  %v11349_v58 = vadd.f32 %v3105_v22, %v2992_v26  ;;  %v3406_v24 = vadd.f32 %v11343_v39, %v11341_v37  ;;  %v3117_v17 = vpop.f32.mrf.mxu1 }
 0x824   :  { %v2994_v57 = vpop.f32.mrf.mxu0 }
 0x825   :  { %v11353_v33 = vadd.f32 %v3107_v7, %v2994_v57  ;;  %3407 = vadd.xlane.f32.xlu0 %v3406_v24  ;;  %v3582_v2 = vadd.f32 %v3519_v38, %v3518_v61  ;;  %v3121_v34 = vpop.f32.mrf.mxu1  ;;  %v3520_v0 = vmul.f32 %v11349_v58, %v11349_v58 }
 0x827   :  { %v2998_v3 = vpop.f32.mrf.mxu0  ;;  %v3521_v27 = vmul.f32 %v11353_v33, %v11353_v33  ;;  %3583 = vadd.xlane.f32.xlu1 %v3582_v2  ;;  %v3123_v10 = vpop.f32.mrf.mxu1  ;;  %v3409_v45 = vadd.f32 %v11353_v33, %v11349_v58 }
 0x828   :  { %v11359_v46 = vadd.f32 %v3111_v4, %v2998_v3 }
 0x829   :  { %v3000_v18 = vpop.f32.mrf.mxu0  ;;  %v3585_v1 = vadd.f32 %v3521_v27, %v3520_v0  ;;  %v3125_v44 = vpop.f32.mrf.mxu1 }
 0x82a   :  { %v3522_v12 = vmul.f32 %v11359_v46, %v11359_v46  ;;  %v11363_v49 = vadd.f32 %v3113_v13, %v3000_v18 }
 0x82b   :  { %v3002_v47 = vpop.f32.mrf.mxu0  ;;  %3586 = vadd.xlane.f32.xlu0 %v3585_v1  ;;  %3410 = vadd.xlane.f32.xlu1 %v3409_v45  ;;  %v3127_v53 = vpop.f32.mrf.mxu1 }
 0x82c   :  { %v3523_v51 = vmul.f32 %v11363_v49, %v11363_v49  ;;  %v3412_v63 = vadd.f32 %v11363_v49, %v11359_v46  ;;  %v11373_v25 = vadd.f32 %v3115_v8, %v3002_v47 }
 0x82d   :  { %v3004_v28 = vpop.f32.mrf.mxu0  ;;  %v3131_v15 = vpop.f32.mrf.mxu1 }
 0x82e   :  { %v11369_v56 = vadd.f32 %v3117_v17, %v3004_v28  ;;  %v3588_v40 = vadd.f32 %v3523_v51, %v3522_v12  ;;  %v3524_v55 = vmul.f32 %v11373_v25, %v11373_v25 }
 0x82f   :  { %3413 = vadd.xlane.f32.xlu0 %v3412_v63  ;;  %v3133_v52 = vpop.f32.mrf.mxu1 }
 0x830   :  { %v3008_v35 = vpop.f32.mrf.mxu0  ;;  %3589 = vadd.xlane.f32.xlu1 %v3588_v40  ;;  %v3525_v31 = vmul.f32 %v11369_v56, %v11369_v56  ;;  %v3415_v59 = vadd.f32 %v11369_v56, %v11373_v25 }
 0x831   :  { %v11375_v16 = vadd.f32 %v3121_v34, %v3008_v35  ;;  %v3135_v62 = vpop.f32.mrf.mxu1 }
 0x832   :  { %v3010_v54 = vpop.f32.mrf.mxu0  ;;  %v3591_v13 = vadd.f32 %v3525_v31, %v3524_v55 }
 0x833   :  { %v11379_v23 = vadd.f32 %v3123_v10, %v3010_v54  ;;  %v3526_v50 = vmul.f32 %v11375_v16, %v11375_v16  ;;  %3416 = vadd.xlane.f32.xlu0 %v3415_v59  ;;  %v3137_v4 = vpop.f32.mrf.mxu1 }
 0x834   :  { %v3012_v14 = vpop.f32.mrf.mxu0 }
 0x835   :  { %v3527_v22 = vmul.f32 %v11379_v23, %v11379_v23  ;;  %v3418_v7 = vadd.f32 %v11379_v23, %v11375_v16  ;;  %v3141_v8 = vpop.f32.mrf.mxu1  ;;  %v11393_v61 = vadd.f32 %v3125_v44, %v3012_v14 }
 0x836   :  { %v3014_v32 = vpop.f32.mrf.mxu0 }
 0x837   :  { %v11391_v42 = vadd.f32 %v3127_v53, %v3014_v32  ;;  %3419 = vadd.xlane.f32.xlu1 %v3418_v7  ;;  %3592 = vadd.xlane.f32.xlu0 %v3591_v13  ;;  %v3594_v24 = vadd.f32 %v3527_v22, %v3526_v50  ;;  %v3143_v17 = vpop.f32.mrf.mxu1  ;;  %v3528_v18 = vmul.f32 %v11393_v61, %v11393_v61 }
 0x839   :  { %v3018_v26 = vpop.f32.mrf.mxu0  ;;  %v3529_v2 = vmul.f32 %v11391_v42, %v11391_v42  ;;  %v3421_v34 = vadd.f32 %v11391_v42, %v11393_v61  ;;  %v3145_v27 = vpop.f32.mrf.mxu1 }
 0x83a   :  { %v11395_v38 = vadd.f32 %v3131_v15, %v3018_v26 }
 0x83b   :  { %v3020_v57 = vpop.f32.mrf.mxu0  ;;  %3595 = vadd.xlane.f32.xlu1 %v3594_v24  ;;  %3422 = vadd.xlane.f32.xlu0 %v3421_v34  ;;  %v3147_v47 = vpop.f32.mrf.mxu1  ;;  %v3597_v51 = vadd.f32 %v3529_v2, %v3528_v18 }
 0x83c   :  { %v11399_v3 = vadd.f32 %v3133_v52, %v3020_v57  ;;  %v3530_v10 = vmul.f32 %v11395_v38, %v11395_v38 }
 0x83d   :  { %v3022_v0 = vpop.f32.mrf.mxu0 }
 0x83e   :  { %v3531_v12 = vmul.f32 %v11399_v3, %v11399_v3  ;;  %v3424_v1 = vadd.f32 %v11399_v3, %v11395_v38  ;;  %v11413_v40 = vadd.f32 %v3135_v62, %v3022_v0 }
 0x83f   :  { %v3024_v45 = vpop.f32.mrf.mxu0  ;;  %3598 = vadd.xlane.f32.xlu0 %v3597_v51 }
 0x840   :  { %v11411_v44 = vadd.f32 %v3137_v4, %v3024_v45  ;;  %3425 = vadd.xlane.f32.xlu1 %v3424_v1  ;;  %17102 = vst [vmem:[#allocation37_spill] sm:$0xff] %v11413_v40  ;;  %v3600_v35 = vadd.f32 %v3531_v12, %v3530_v10  ;;  %v3532_v62 = vmul.f32 %v11413_v40, %v11413_v40 }
 0x841   :  { %v3028_v28 = vpop.f32.mrf.mxu0  ;;  %v3151_v53 = vpop.f32.mrf.mxu1 }
 0x842   :  { %17101 = vst [vmem:[#allocation36_spill] sm:$0xff] %v11411_v44  ;;  %v11415_v63 = vadd.f32 %v3141_v8, %v3028_v28  ;;  %v3533_v52 = vmul.f32 %v11411_v44, %v11411_v44  ;;  %v3427_v59 = vadd.f32 %v11411_v44, %v11413_v40 }
 0x843   :  { %v3030_v15 = vpop.f32.mrf.mxu0  ;;  %v3153_v54 = vpop.f32.mrf.mxu1 }
 0x844   :  { %17103 = vst [vmem:[#allocation38_spill] sm:$0xff] %v11415_v63  ;;  %v11419_v31 = vadd.f32 %v3143_v17, %v3030_v15  ;;  %3601 = vadd.xlane.f32.xlu1 %v3600_v35  ;;  %v3534_v50 = vmul.f32 %v11415_v63, %v11415_v63  ;;  %3428 = vadd.xlane.f32.xlu0 %v3427_v59 }
 0x845   :  { %v3032_v14 = vpop.f32.mrf.mxu0  ;;  %v3155_v55 = vpop.f32.mrf.mxu1  ;;  %v3603_v26 = vadd.f32 %v3533_v52, %v3532_v62 }
 0x846   :  { %17104 = vst [vmem:[#allocation39_spill] sm:$0xff] %v11419_v31  ;;  %v3535_v22 = vmul.f32 %v11419_v31, %v11419_v31  ;;  %v3430_v7 = vadd.f32 %v11419_v31, %v11415_v63  ;;  %v11433_v57 = vadd.f32 %v3145_v27, %v3032_v14 }
 0x847   :  { %v3034_v32 = vpop.f32.mrf.mxu0  ;;  %v3157_v4 = vpop.f32.mrf.mxu1 }
 0x848   :  { %v11431_v13 = vadd.f32 %v3147_v47, %v3034_v32  ;;  %3431 = vadd.xlane.f32.xlu1 %v3430_v7  ;;  %17106 = vst [vmem:[#allocation41_spill] sm:$0xff] %v11433_v57  ;;  %3604 = vadd.xlane.f32.xlu0 %v3603_v26  ;;  %v3606_v2 = vadd.f32 %v3535_v22, %v3534_v50 }
 0x849   :  { %v3161_v24 = vpop.f32.mrf.mxu1  ;;  %v3536_v27 = vmul.f32 %v11433_v57, %v11433_v57 }
 0x84a   :  { %17105 = vst [vmem:[#allocation40_spill] sm:$0xff] %v11431_v13  ;;  %v3038_v8 = vpop.f32.mrf.mxu0  ;;  %v3537_v18 = vmul.f32 %v11431_v13, %v11431_v13  ;;  %v3433_v12 = vadd.f32 %v11431_v13, %v11433_v57 }
 0x84b   :  { %v11435_v17 = vadd.f32 %v3151_v53, %v3038_v8  ;;  %v3163_v0 = vpop.f32.mrf.mxu1 }
 0x84c   :  { %v3040_v34 = vpop.f32.mrf.mxu0  ;;  %3607 = vadd.xlane.f32.xlu1 %v3606_v2  ;;  %3434 = vadd.xlane.f32.xlu0 %v3433_v12 }
 0x84d   :  { %17107 = vst [vmem:[#allocation42_spill] sm:$0xff] %v11435_v17  ;;  %v11439_v10 = vadd.f32 %v3153_v54, %v3040_v34  ;;  %v3165_v45 = vpop.f32.mrf.mxu1  ;;  %v3538_v47 = vmul.f32 %v11435_v17, %v11435_v17  ;;  %v3609_v54 = vadd.f32 %v3537_v18, %v3536_v27 }
 0x84e   :  { %v3042_v1 = vpop.f32.mrf.mxu0 }
 0x84f   :  { %17108 = vst [vmem:[#allocation44_spill] sm:$0xff] %v11439_v10  ;;  %v3539_v51 = vmul.f32 %v11439_v10, %v11439_v10  ;;  %v3436_v28 = vadd.f32 %v11439_v10, %v11435_v17  ;;  %v3167_v35 = vpop.f32.mrf.mxu1  ;;  %v11453_v14 = vadd.f32 %v3155_v55, %v3042_v1 }
 0x850   :  { %v3044_v53 = vpop.f32.mrf.mxu0  ;;  %3610 = vadd.xlane.f32.xlu0 %v3609_v54 }
 0x851   :  { %v11451_v15 = vadd.f32 %v3157_v4, %v3044_v53  ;;  %3437 = vadd.xlane.f32.xlu1 %v3436_v28  ;;  %v3171_v59 = vpop.f32.mrf.mxu1  ;;  %17110 = vst [vmem:[#allocation35_spill] sm:$0xff] %v11453_v14  ;;  %v3612_v50 = vadd.f32 %v3539_v51, %v3538_v47  ;;  %v3540_v55 = vmul.f32 %v11453_v14, %v11453_v14 }
 0x852   :  { %v3048_v52 = vpop.f32.mrf.mxu0 }
 0x853   :  { %17109 = vst [vmem:[#allocation46_spill] sm:$0xff] %v11451_v15  ;;  %v11455_v62 = vadd.f32 %v3161_v24, %v3048_v52  ;;  %v3173_v7 = vpop.f32.mrf.mxu1  ;;  %v3541_v32 = vmul.f32 %v11451_v15, %v11451_v15  ;;  %v3439_v4 = vadd.f32 %v11451_v15, %v11453_v14 }
 0x854   :  { %v3050_v22 = vpop.f32.mrf.mxu0 }
 0x855   :  { %17111 = vst [vmem:[#allocation43_spill] sm:$0xff] %v11455_v62  ;;  %v11459_v26 = vadd.f32 %v3163_v0, %v3050_v22  ;;  %3613 = vadd.xlane.f32.xlu1 %v3612_v50  ;;  %v3175_v2 = vpop.f32.mrf.mxu1  ;;  %v3542_v24 = vmul.f32 %v11455_v62, %v11455_v62  ;;  %3440 = vadd.xlane.f32.xlu0 %v3439_v4 }
 0x856   :  { %v3052_v8 = vpop.f32.mrf.mxu0  ;;  %v3615_v27 = vadd.f32 %v3541_v32, %v3540_v55 }
 0x857   :  { %17112 = vst [vmem:[#allocation45_spill] sm:$0xff] %v11459_v26  ;;  %v3543_v34 = vmul.f32 %v11459_v26, %v11459_v26  ;;  %v3442_v0 = vadd.f32 %v11459_v26, %v11455_v62  ;;  %v3177_v12 = vpop.f32.mrf.mxu1  ;;  %v11473_v28 = vadd.f32 %v3165_v45, %v3052_v8 }
 0x858   :  { %v3054_v18 = vpop.f32.mrf.mxu0 }
 0x859   :  { %v11471_v1 = vadd.f32 %v3167_v35, %v3054_v18  ;;  %3443 = vadd.xlane.f32.xlu1 %v3442_v0  ;;  %17114 = vst [vmem:[#allocation74_spill] sm:$0xff] %v11473_v28  ;;  %3616 = vadd.xlane.f32.xlu0 %v3615_v27  ;;  %v3618_v54 = vadd.f32 %v3543_v34, %v3542_v24 }
 0x85a   :  { %v3058_v47 = vpop.f32.mrf.mxu0  ;;  %v3214_v51 = vpop.f32.mrf.mxu1  ;;  %v3544_v45 = vmul.f32 %v11473_v28, %v11473_v28 }
 0x85b   :  { %17113 = vst [vmem:[#allocation48_spill] sm:$0xff] %v11471_v1  ;;  %v11475_v53 = vadd.f32 %v3171_v59, %v3058_v47  ;;  %v3545_v22 = vmul.f32 %v11471_v1, %v11471_v1  ;;  %v3445_v35 = vadd.f32 %v11471_v1, %v11473_v28 }
 0x85c   :  { %v3060_v52 = vpop.f32.mrf.mxu0  ;;  %v3216_v50 = vpop.f32.mrf.mxu1 }
 0x85d   :  { %17115 = vst [vmem:[#allocation71_spill] sm:$0xff] %v11475_v53  ;;  %v11479_v4 = vadd.f32 %v3173_v7, %v3060_v52  ;;  %3619 = vadd.xlane.f32.xlu1 %v3618_v54  ;;  %v3546_v59 = vmul.f32 %v11475_v53, %v11475_v53  ;;  %3446 = vadd.xlane.f32.xlu0 %v3445_v35 }
 0x85e   :  { %v3062_v32 = vpop.f32.mrf.mxu0  ;;  %v3218_v55 = vpop.f32.mrf.mxu1  ;;  %v3621_v18 = vadd.f32 %v3545_v22, %v3544_v45 }
 0x85f   :  { %17116 = vst [vmem:[#allocation73_spill] sm:$0xff] %v11479_v4  ;;  %v3547_v8 = vmul.f32 %v11479_v4, %v11479_v4  ;;  %v3448_v7 = vadd.f32 %v11479_v4, %v11475_v53  ;;  %v11493_v54 = vadd.f32 %v3175_v2, %v3062_v32 }
 0x860   :  { %v3064_v24 = vpop.f32.mrf.mxu0  ;;  %v3220_v34 = vpop.f32.mrf.mxu1 }
 0x861   :  { %v11491_v0 = vadd.f32 %v3177_v12, %v3064_v24  ;;  %3449 = vadd.xlane.f32.xlu1 %v3448_v7  ;;  %17118 = vst [vmem:[#allocation72_spill] sm:$0xff] %v11493_v54  ;;  %3622 = vadd.xlane.f32.xlu0 %v3621_v18  ;;  %v3624_v36 = vadd.f32 %v3547_v8, %v3546_v59 }
 0x862   :  { %v3327_v27 = vpop.f32.mrf.mxu0  ;;  %v3224_v47 = vpop.f32.mrf.mxu1  ;;  %v3548_v2 = vmul.f32 %v11493_v54, %v11493_v54 }
 0x863   :  { %17117 = vst [vmem:[#allocation75_spill] sm:$0xff] %v11491_v0  ;;  %v11495_v52 = vadd.f32 %v3327_v27, %v3214_v51  ;;  %v3549_v35 = vmul.f32 %v11491_v0, %v11491_v0  ;;  %v3451_v12 = vadd.f32 %v11491_v0, %v11493_v54 }
 0x864   :  { %v3329_v29 = vpop.f32.mrf.mxu0  ;;  %v3226_v43 = vpop.f32.mrf.mxu1 }
 0x865   :  { %v11499_v30 = vadd.f32 %v3329_v29, %v3216_v50  ;;  %3625 = vadd.xlane.f32.xlu1 %v3624_v36  ;;  %v3550_v51 = vmul.f32 %v11495_v52, %v11495_v52  ;;  %3452 = vadd.xlane.f32.xlu0 %v3451_v12  ;;  %v3627_v8 = vadd.f32 %v3549_v35, %v3548_v2 }
 0x866   :  { %v3331_v22 = vpop.f32.mrf.mxu0  ;;  %v3228_v45 = vpop.f32.mrf.mxu1 }
 0x867   :  { %v3551_v32 = vmul.f32 %v11499_v30, %v11499_v30  ;;  %v3454_v29 = vadd.f32 %v11499_v30, %v11495_v52  ;;  %v11513_v18 = vadd.f32 %v3331_v22, %v3218_v55 }
 0x868   :  { %v3333_v50 = vpop.f32.mrf.mxu0  ;;  %v3230_v36 = vpop.f32.mrf.mxu1 }
 0x869   :  { %v11511_v59 = vadd.f32 %v3333_v50, %v3220_v34  ;;  %3455 = vadd.xlane.f32.xlu1 %v3454_v29  ;;  %3628 = vadd.xlane.f32.xlu0 %v3627_v8  ;;  %v3630_v21 = vadd.f32 %v3551_v32, %v3550_v51 }
 0x86a   :  { %v3337_v7 = vpop.f32.mrf.mxu0  ;;  %v3234_v24 = vpop.f32.mrf.mxu1 }
 0x86b   :  { %v11515_v27 = vadd.f32 %v3337_v7, %v3224_v47  ;;  %v3553_v12 = vmul.f32 %v11511_v59, %v11511_v59  ;;  %v3457_v35 = vadd.f32 %v11511_v59, %v11513_v18  ;;  %v3552_v47 = vmul.f32 %v11513_v18, %v11513_v18 }
 0x86c   :  { %v3339_v6 = vpop.f32.mrf.mxu0  ;;  %v3236_v9 = vpop.f32.mrf.mxu1 }
 0x86d   :  { %v3554_v20 = vmul.f32 %v11515_v27, %v11515_v27  ;;  %v11521_v34 = vadd.f32 %v3339_v6, %v3226_v43  ;;  %3631 = vadd.xlane.f32.xlu1 %v3630_v21  ;;  %3458 = vadd.xlane.f32.xlu0 %v3457_v35  ;;  %v3633_v29 = vadd.f32 %v3553_v12, %v3552_v47 }
 0x86e   :  { %v3341_v55 = vpop.f32.mrf.mxu0  ;;  %v3238_v22 = vpop.f32.mrf.mxu1 }
 0x86f   :  { %v3555_v2 = vmul.f32 %v11521_v34, %v11521_v34  ;;  %v11529_v51 = vadd.f32 %v3341_v55, %v3228_v45  ;;  %v3460_v32 = vadd.f32 %v11521_v34, %v11515_v27 }
 0x870   :  { %v3343_v6 = vpop.f32.mrf.mxu0  ;;  %v3240_v43 = vpop.f32.mrf.mxu1 }
 0x871   :  { %v11533_v21 = vadd.f32 %v3343_v6, %v3230_v36  ;;  %3461 = vadd.xlane.f32.xlu1 %v3460_v32  ;;  %v3636_v50 = vadd.f32 %v3555_v2, %v3554_v20  ;;  %v3556_v60 = vmul.f32 %v11529_v51, %v11529_v51  ;;  %3634 = vadd.xlane.f32.xlu0 %v3633_v29 }
 0x872   :  { %v3347_v8 = vpop.f32.mrf.mxu0  ;;  %v3244_v7 = vpop.f32.mrf.mxu1 }
 0x873   :  { %v3557_v45 = vmul.f32 %v11533_v21, %v11533_v21  ;;  %v11539_v55 = vadd.f32 %v3347_v8, %v3234_v24  ;;  %v3463_v35 = vadd.f32 %v11533_v21, %v11529_v51 }
 0x874   :  { %v3349_v41 = vpop.f32.mrf.mxu0  ;;  %v3246_v36 = vpop.f32.mrf.mxu1 }
 0x875   :  { %v3558_v12 = vmul.f32 %v11539_v55, %v11539_v55  ;;  %v11545_v20 = vadd.f32 %v3349_v41, %v3236_v9  ;;  %3637 = vadd.xlane.f32.xlu1 %v3636_v50  ;;  %3464 = vadd.xlane.f32.xlu0 %v3463_v35  ;;  %v3639_v29 = vadd.f32 %v3557_v45, %v3556_v60 }
 0x876   :  { %v3351_v47 = vpop.f32.mrf.mxu0  ;;  %v3248_v2 = vpop.f32.mrf.mxu1 }
 0x877   :  { %v3559_v32 = vmul.f32 %v11545_v20, %v11545_v20  ;;  %v11549_v6 = vadd.f32 %v3351_v47, %v3238_v22  ;;  %v3466_v24 = vadd.f32 %v11545_v20, %v11539_v55 }
 0x878   :  { %v3353_v8 = vpop.f32.mrf.mxu0  ;;  %v3250_v5 = vpop.f32.mrf.mxu1 }
 0x879   :  { %v11553_v48 = vadd.f32 %v3353_v8, %v3240_v43  ;;  %3467 = vadd.xlane.f32.xlu1 %v3466_v24  ;;  %v3642_v9 = vadd.f32 %v3559_v32, %v3558_v12  ;;  %v3560_v19 = vmul.f32 %v11549_v6, %v11549_v6  ;;  %3640 = vadd.xlane.f32.xlu0 %v3639_v29 }
 0x87a   :  { %v3357_v41 = vpop.f32.mrf.mxu0  ;;  %v3254_v50 = vpop.f32.mrf.mxu1 }
 0x87b   :  { %v3561_v22 = vmul.f32 %v11553_v48, %v11553_v48  ;;  %v11559_v47 = vadd.f32 %v3357_v41, %v3244_v7  ;;  %v3469_v60 = vadd.f32 %v11553_v48, %v11549_v6 }
 0x87c   :  { %v3359_v45 = vpop.f32.mrf.mxu0  ;;  %v3256_v35 = vpop.f32.mrf.mxu1 }
 0x87d   :  { %17119 = vst [vmem:[#allocation70_spill] sm:$0xff] %v11559_v47  ;;  %v3562_v43 = vmul.f32 %v11559_v47, %v11559_v47  ;;  %v11565_v12 = vadd.f32 %v3359_v45, %v3246_v36  ;;  %3643 = vadd.xlane.f32.xlu1 %v3642_v9  ;;  %3470 = vadd.xlane.f32.xlu0 %v3469_v60 }
 0x87e   :  { %v3361_v32 = vpop.f32.mrf.mxu0  ;;  %v3258_v24 = vpop.f32.mrf.mxu1  ;;  %v3645_v29 = vadd.f32 %v3561_v22, %v3560_v19 }
 0x87f   :  { %17120 = vst [vmem:[#allocation47_spill] sm:$0xff] %v11565_v12  ;;  %v3563_v8 = vmul.f32 %v11565_v12, %v11565_v12  ;;  %v11569_v11 = vadd.f32 %v3361_v32, %v3248_v2  ;;  %v3472_v7 = vadd.f32 %v11565_v12, %v11559_v47 }
 0x880   :  { %v3363_v41 = vpop.f32.mrf.mxu0  ;;  %v3260_v0 = vpop.f32.mrf.mxu1 }
 0x881   :  { %17121 = vst [vmem:[#allocation49_spill] sm:$0xff] %v11569_v11  ;;  %v11573_v54 = vadd.f32 %v3363_v41, %v3250_v5  ;;  %3473 = vadd.xlane.f32.xlu1 %v3472_v7  ;;  %v3648_v36 = vadd.f32 %v3563_v8, %v3562_v43  ;;  %v3564_v4 = vmul.f32 %v11569_v11, %v11569_v11 }
 0x882   :  { %v3367_v45 = vpop.f32.mrf.mxu0  ;;  %v3264_v9 = vpop.f32.mrf.mxu1  ;;  %3646 = vadd.xlane.f32.xlu0 %v3645_v29 }
 0x883   :  { %17122 = vst [vmem:[#allocation50_spill] sm:$0xff] %v11573_v54  ;;  %v3565_v2 = vmul.f32 %v11573_v54, %v11573_v54  ;;  %v11579_v32 = vadd.f32 %v3367_v45, %v3254_v50  ;;  %v3475_v19 = vadd.f32 %v11573_v54, %v11569_v11 }
 0x884   :  { %v3369_v22 = vpop.f32.mrf.mxu0  ;;  %v3266_v60 = vpop.f32.mrf.mxu1 }
 0x885   :  { %17123 = vst [vmem:[#allocation31_spill] sm:$0xff] %v11579_v32  ;;  %v3566_v5 = vmul.f32 %v11579_v32, %v11579_v32  ;;  %v11585_v43 = vadd.f32 %v3369_v22, %v3256_v35  ;;  %3649 = vadd.xlane.f32.xlu1 %v3648_v36  ;;  %v3651_v29 = vadd.f32 %v3565_v2, %v3564_v4 }
 0x886   :  { %v3371_v8 = vpop.f32.mrf.mxu0  ;;  %v3268_v7 = vpop.f32.mrf.mxu1  ;;  %3476 = vadd.xlane.f32.xlu0 %v3475_v19 }
 0x887   :  { %17124 = vst [vmem:[#allocation53_spill] sm:$0xff] %v11585_v43  ;;  %v3567_v41 = vmul.f32 %v11585_v43, %v11585_v43  ;;  %v11589_v53 = vadd.f32 %v3371_v8, %v3258_v24  ;;  %v3478_v50 = vadd.f32 %v11585_v43, %v11579_v32 }
 0x888   :  { %v3373_v45 = vpop.f32.mrf.mxu0  ;;  %v3270_v1 = vpop.f32.mrf.mxu1 }
 0x889   :  { %17125 = vst [vmem:[#allocation51_spill] sm:$0xff] %v11589_v53  ;;  %v11593_v28 = vadd.f32 %v3373_v45, %v3260_v0  ;;  %3479 = vadd.xlane.f32.xlu1 %v3478_v50  ;;  %v3654_v35 = vadd.f32 %v3567_v41, %v3566_v5  ;;  %v3568_v26 = vmul.f32 %v11589_v53, %v11589_v53 }
 0x88a   :  { %v3377_v22 = vpop.f32.mrf.mxu0  ;;  %v3274_v36 = vpop.f32.mrf.mxu1  ;;  %3652 = vadd.xlane.f32.xlu0 %v3651_v29 }
 0x88b   :  { %17126 = vst [vmem:[#allocation52_spill] sm:$0xff] %v11593_v28  ;;  %v3569_v24 = vmul.f32 %v11593_v28, %v11593_v28  ;;  %v11599_v8 = vadd.f32 %v3377_v22, %v3264_v9  ;;  %v3481_v4 = vadd.f32 %v11593_v28, %v11589_v53 }
 0x88c   :  { %v3379_v2 = vpop.f32.mrf.mxu0  ;;  %v3276_v19 = vpop.f32.mrf.mxu1 }
 0x88d   :  { %17127 = vst [vmem:[#allocation55_spill] sm:$0xff] %v11599_v8  ;;  %v3570_v0 = vmul.f32 %v11599_v8, %v11599_v8  ;;  %v11605_v5 = vadd.f32 %v3379_v2, %v3266_v60  ;;  %3655 = vadd.xlane.f32.xlu1 %v3654_v35  ;;  %v3657_v29 = vadd.f32 %v3569_v24, %v3568_v26 }
 0x88e   :  { %v3381_v41 = vpop.f32.mrf.mxu0  ;;  %v3278_v50 = vpop.f32.mrf.mxu1  ;;  %3482 = vadd.xlane.f32.xlu0 %v3481_v4 }
 0x88f   :  { %17128 = vst [vmem:[#allocation57_spill] sm:$0xff] %v11605_v5  ;;  %v3571_v45 = vmul.f32 %v11605_v5, %v11605_v5  ;;  %v11609_v62 = vadd.f32 %v3381_v41, %v3268_v7  ;;  %v3484_v9 = vadd.f32 %v11605_v5, %v11599_v8 }
 0x890   :  { %v3383_v22 = vpop.f32.mrf.mxu0  ;;  %v3280_v15 = vpop.f32.mrf.mxu1 }
 0x891   :  { %17129 = vst [vmem:[#allocation34_spill] sm:$0xff] %v11609_v62  ;;  %v11613_v14 = vadd.f32 %v3383_v22, %v3270_v1  ;;  %3485 = vadd.xlane.f32.xlu1 %v3484_v9  ;;  %v3660_v60 = vadd.f32 %v3571_v45, %v3570_v0  ;;  %v3572_v35 = vmul.f32 %v11609_v62, %v11609_v62 }
 0x892   :  { %v3387_v2 = vpop.f32.mrf.mxu0  ;;  %3658 = vadd.xlane.f32.xlu0 %v3657_v29  ;;  %v3284_v24 = vpop.f32.mrf.mxu1 }
 0x893   :  { %17130 = vst [vmem:[#allocation56_spill] sm:$0xff] %v11613_v14  ;;  %v3573_v10 = vmul.f32 %v11613_v14, %v11613_v14  ;;  %v11619_v7 = vadd.f32 %v3387_v2, %v3274_v36  ;;  %v3487_v4 = vadd.f32 %v11613_v14, %v11609_v62 }
 0x894   :  { %v3389_v26 = vpop.f32.mrf.mxu0  ;;  %v3286_v2 = vpop.f32.mrf.mxu1 }
 0x895   :  { %17131 = vst [vmem:[#allocation54_spill] sm:$0xff] %v11619_v7  ;;  %v3574_v1 = vmul.f32 %v11619_v7, %v11619_v7  ;;  %v11625_v41 = vadd.f32 %v3389_v26, %v3276_v19  ;;  %3661 = vadd.xlane.f32.xlu1 %v3660_v60  ;;  %v3663_v29 = vadd.f32 %v3573_v10, %v3572_v35 }
 0x896   :  { %v3391_v0 = vpop.f32.mrf.mxu0  ;;  %3488 = vadd.xlane.f32.xlu0 %v3487_v4  ;;  %v3288_v26 = vpop.f32.mrf.mxu1 }
 0x897   :  { %17132 = vst [vmem:[#allocation59_spill] sm:$0xff] %v11625_v41  ;;  %v3575_v45 = vmul.f32 %v11625_v41, %v11625_v41  ;;  %v11629_v9 = vadd.f32 %v3391_v0, %v3278_v50  ;;  %v3490_v36 = vadd.f32 %v11625_v41, %v11619_v7 }
 0x898   :  { %v3393_v22 = vpop.f32.mrf.mxu0 }
 0x899   :  { %17133 = vst [vmem:[#allocation58_spill] sm:$0xff] %v11629_v9  ;;  %v11633_v14 = vadd.f32 %v3393_v22, %v3280_v15  ;;  %3491 = vadd.xlane.f32.xlu1 %v3490_v36  ;;  %v3666_v62 = vadd.f32 %v3575_v45, %v3574_v1  ;;  %v3576_v60 = vmul.f32 %v11629_v9, %v11629_v9  ;;  %v3290_v45 = vpop.f32.mrf.mxu1 }
 0x89a   :  { %v3397_v19 = vpop.f32.mrf.mxu0  ;;  %3664 = vadd.xlane.f32.xlu0 %v3663_v29 }
 0x89b   :  { %17134 = vst [vmem:[#allocation80_spill] sm:$0xff] %v11633_v14  ;;  %v3577_v50 = vmul.f32 %v11633_v14, %v11633_v14  ;;  %v11639_v0 = vadd.f32 %v3397_v19, %v3284_v24  ;;  %v3493_v10 = vadd.f32 %v11633_v14, %v11629_v9 }
 0x89c   :  { %v3399_v35 = vpop.f32.mrf.mxu0 }
 0x89d   :  { %17135 = vst [vmem:[#allocation81_spill] sm:$0xff] %v11639_v0  ;;  %v3578_v15 = vmul.f32 %v11639_v0, %v11639_v0  ;;  %v11645_v4 = vadd.f32 %v3399_v35, %v3286_v2  ;;  %3667 = vadd.xlane.f32.xlu1 %v3666_v62  ;;  %v3669_v29 = vadd.f32 %v3577_v50, %v3576_v60 }
 0x89e   :  { %v3401_v1 = vpop.f32.mrf.mxu0  ;;  %3494 = vadd.xlane.f32.xlu0 %v3493_v10 }
 0x89f   :  { %17136 = vst [vmem:[#allocation33_spill] sm:$0xff] %v11645_v4  ;;  %v3579_v36 = vmul.f32 %v11645_v4, %v11645_v4  ;;  %v11649_v22 = vadd.f32 %v3401_v1, %v3288_v26  ;;  %v3496_v24 = vadd.f32 %v11645_v4, %v11639_v0 }
 0x8a0   :  { %v3403_v19 = vpop.f32.mrf.mxu0 }
 0x8a1   :  { %17137 = vst [vmem:[#allocation32_spill] sm:$0xff] %v11649_v22  ;;  %3497 = vadd.xlane.f32.xlu1 %v3496_v24  ;;  %v11653_v14 = vadd.f32 %v3403_v19, %v3290_v45  ;;  %v3672_v9 = vadd.f32 %v3579_v36, %v3578_v15  ;;  %v3580_v62 = vmul.f32 %v11649_v22, %v11649_v22 }
 0x8a2   :  { %3670 = vadd.xlane.f32.xlu0 %v3669_v29 }
 0x8a3   :  { %17138 = vst [vmem:[#allocation61_spill] sm:$0xff] %v11653_v14  ;;  %v3581_v2 = vmul.f32 %v11653_v14, %v11653_v14  ;;  %v3499_v26 = vadd.f32 %v11653_v14, %v11649_v22 }
 0x8a5   :  { %3673 = vadd.xlane.f32.xlu1 %v3672_v9  ;;  %v3675_v10 = vadd.f32 %v3581_v2, %v3580_v62 }
 0x8a6   :  { %3500 = vadd.xlane.f32.xlu0 %v3499_v26 }
 0x8aa   :  { %3676 = vadd.xlane.f32.xlu0 %v3675_v10 }
 0x8ae   :  { %v3408_v60 = vpop.xlane.xlu0 %3407 }
 0x8b0   :  { %v3584_v50 = vpop.xlane.xlu1 %3583 }
 0x8b4   :  { %v3587_v35 = vpop.xlane.xlu0 %3586  ;;  %v3411_v1 = vpop.xlane.xlu1 %3410 }
 0x8b8   :  { %v3414_v45 = vpop.xlane.xlu0 %3413 }
 0x8b9   :  { %v3590_v15 = vpop.xlane.xlu1 %3589 }
 0x8bc   :  { %v3417_v36 = vpop.xlane.xlu0 %3416 }
 0x8c0   :  { %v11661_v24 = vpop.xlane.xlu1 %3419  ;;  %v11663_v19 = vpop.xlane.xlu0 %3592 }
 0x8c4   :  { %v11665_v4 = vpop.xlane.xlu1 %3595  ;;  %v11667_v29 = vpop.xlane.xlu0 %3422 }
 0x8c8   :  { %v11671_v9 = vpop.xlane.xlu0 %3598 }
 0x8c9   :  { %v11669_v14 = vpop.xlane.xlu1 %3425 }
 0x8cd   :  { %v11673_v62 = vpop.xlane.xlu1 %3601  ;;  %v11675_v2 = vpop.xlane.xlu0 %3428 }
 0x8d1   :  { %v11677_v26 = vpop.xlane.xlu1 %3431  ;;  %v11679_v10 = vpop.xlane.xlu0 %3604 }
 0x8d5   :  { %v11681_v22 = vpop.xlane.xlu1 %3607  ;;  %v11683_v0 = vpop.xlane.xlu0 %3434 }
 0x8d9   :  { %v11687_v7 = vpop.xlane.xlu0 %3610 }
 0x8da   :  { %v11685_v41 = vpop.xlane.xlu1 %3437  ;;  %17140 = vst [vmem:[#allocation67_spill] sm:$0xff] %v11687_v7 }
 0x8db   :  { %17139 = vst [vmem:[#allocation60_spill] sm:$0xff] %v11685_v41 }
 0x8de   :  { %v11689_v5 = vpop.xlane.xlu1 %3613  ;;  %v11691_v8 = vpop.xlane.xlu0 %3440 }
 0x8df   :  { %17141 = vst [vmem:[#allocation66_spill] sm:$0xff] %v11689_v5  ;;  %17142 = vst [vmem:[#allocation63_spill] sm:$0xff] %v11691_v8 }
 0x8e2   :  { %v11693_v17 = vpop.xlane.xlu1 %3443  ;;  %v11695_v28 = vpop.xlane.xlu0 %3616 }
 0x8e3   :  { %17143 = vst [vmem:[#allocation69_spill] sm:$0xff] %v11693_v17  ;;  %17144 = vst [vmem:[#allocation79_spill] sm:$0xff] %v11695_v28 }
 0x8e6   :  { %v11697_v53 = vpop.xlane.xlu1 %3619  ;;  %v11699_v43 = vpop.xlane.xlu0 %3446 }
 0x8e7   :  { %17145 = vst [vmem:[#allocation78_spill] sm:$0xff] %v11697_v53  ;;  %17146 = vst [vmem:[#allocation68_spill] sm:$0xff] %v11699_v43 }
 0x8ea   :  { %v11701_v32 = vpop.xlane.xlu1 %3449  ;;  %v11703_v13 = vpop.xlane.xlu0 %3622 }
 0x8eb   :  { %17147 = vst [vmem:[#allocation62_spill] sm:$0xff] %v11701_v32  ;;  %17148 = vst [vmem:[#allocation77_spill] sm:$0xff] %v11703_v13 }
 0x8ee   :  { %v11705_v57 = vpop.xlane.xlu1 %3625  ;;  %v11707_v31 = vpop.xlane.xlu0 %3452 }
 0x8ef   :  { %17149 = vst [vmem:[#allocation76_spill] sm:$0xff] %v11705_v57  ;;  %17150 = vst [vmem:[#allocation65_spill] sm:$0xff] %v11707_v31 }
 0x8f2   :  { %v3456_v63 = vpop.xlane.xlu1 %3455  ;;  %v11709_v41 = vpop.xlane.xlu0 %3628 }
 0x8f3   :  { %v3502_v5 = vadd.f32 %v3456_v63, %v3408_v60  ;;  %17151 = vst [vmem:[#allocation64_spill] sm:$0xff] %v11709_v41 }
 0x8f5   :  { %v3694_v8 = vmul.f32 0.001953125, %v3502_v5 }
 0x8f6   :  { %v3632_v17 = vpop.xlane.xlu1 %3631  ;;  %v3459_v28 = vpop.xlane.xlu0 %3458 }
 0x8f7   :  { %v3678_v54 = vadd.f32 %v3632_v17, %v3584_v50  ;;  %v3726_v11 = vmul.f32 %v3694_v8, %v3694_v8  ;;  %v3503_v12 = vadd.f32 %v3459_v28, %v3411_v1  ;;  %v3758_v50 = vsub.f32 %v11341_v37, %v3694_v8 }
 0x8f8   :  { %v3759_v28 = vsub.f32 %v11343_v39, %v3694_v8 }
 0x8f9   :  { %v3710_v53 = vmul.f32 0.001953125, %v3678_v54  ;;  %v3695_v47 = vmul.f32 0.001953125, %v3503_v12 }
 0x8fa   :  { %v3635_v32 = vpop.xlane.xlu0 %3634  ;;  %v3462_v63 = vpop.xlane.xlu1 %3461 }
 0x8fb   :  { %v3742_v43 = vsub.f32 %v3710_v53, %v3726_v11  ;;  %v3679_v13 = vadd.f32 %v3635_v32, %v3587_v35  ;;  %v3727_v57 = vmul.f32 %v3695_v47, %v3695_v47  ;;  %v3504_v17 = vadd.f32 %v3462_v63, %v3414_v45 }
 0x8fc   :  { %v3761_v37 = vsub.f32 %v11353_v33, %v3695_v47  ;;  %v3760_v35 = vsub.f32 %v11349_v58, %v3695_v47  ;;  %v3790_v45 = vsub.f32 %v11495_v52, %v3694_v8  ;;  %v3791_v58 = vsub.f32 %v11499_v30, %v3694_v8 }
 0x8fd   :  { %v3822_v44 = vadd.f32 1e-05, %v3742_v43  ;;  %v3711_v7 = vmul.f32 0.001953125, %v3679_v13  ;;  %v3793_v30 = vsub.f32 %v11511_v59, %v3695_v47 }
 0x8fe   :  { %v3638_v60 = vpop.xlane.xlu1 %3637  ;;  %v3465_v5 = vpop.xlane.xlu0 %3464 }
 0x8ff   :  { %7936 = vrsqrt.f32 %v3822_v44  ;;  %v3743_v31 = vsub.f32 %v3711_v7, %v3727_v57  ;;  %v3680_v11 = vadd.f32 %v3638_v60, %v3590_v15  ;;  %v11717_v44 = vmul.f32 0.001953125, %v3504_v17 }
 0x900   :  { %v3505_v57 = vadd.f32 %v3465_v5, %v3417_v36  ;;  %v3792_v60 = vsub.f32 %v11513_v18, %v3695_v47 }
 0x901   :  { %v3823_v40 = vadd.f32 1e-05, %v3743_v31  ;;  %v3712_v13 = vmul.f32 0.001953125, %v3680_v11  ;;  %v3728_v39 = vmul.f32 %v11717_v44, %v11717_v44 }
 0x902   :  { %v11731_v7 = vmul.f32 0.001953125, %v3505_v57 }
 0x903   :  { %7938 = vrsqrt.f32 %v3823_v40  ;;  %v3641_v40 = vpop.xlane.xlu0 %3640  ;;  %v3744_v43 = vsub.f32 %v3712_v13, %v3728_v39 }
 0x904   :  { %v3681_v12 = vadd.f32 %v3641_v40, %v11663_v19  ;;  %v3729_v36 = vmul.f32 %v11731_v7, %v11731_v7  ;;  %v3763_v40 = vsub.f32 %v11363_v49, %v11717_v44 }
 0x905   :  { %v3824_v15 = vadd.f32 1e-05, %v3744_v43  ;;  %v3764_v43 = vsub.f32 %v11373_v25, %v11731_v7 }
 0x906   :  { %v3713_v1 = vmul.f32 0.001953125, %v3681_v12 }
 0x907   :  { %7940 = vrsqrt.f32 %v3824_v15  ;;  %v3471_v47 = vpop.xlane.xlu0 %3470 }
 0x908   :  { %v3745_v63 = vsub.f32 %v3713_v1, %v3729_v36  ;;  %v3507_v12 = vadd.f32 %v3471_v47, %v11667_v29  ;;  %v3765_v29 = vsub.f32 %v11369_v56, %v11731_v7  ;;  %v3795_v56 = vsub.f32 %v11521_v34, %v11717_v44 }
 0x90a   :  { %v3825_v5 = vadd.f32 1e-05, %v3745_v63 }
 0x90b   :  { %v3647_v39 = vpop.xlane.xlu0 %3646 }
 0x90c   :  { %v7937_v41 = vpop.eup %7936  ;;  %7942 = vrsqrt.f32 %v3825_v5 }
 0x90d   :  { %v11713_v53 = vmul.f32 %v7937_v41, %v3758_v50  ;;  %v11715_v54 = vmul.f32 %v7937_v41, %v3759_v28  ;;  %v11745_v19 = vmul.f32 %v7937_v41, %v3790_v45  ;;  %v11752_v52 = vmul.f32 %v7937_v41, %v3791_v58  ;;  %v3468_v50 = vpop.xlane.xlu1 %3467 }
 0x90e   :  { %v3506_v41 = vadd.f32 %v3468_v50, %v11661_v24  ;;  %v11802_v45 = vmul.f32 0.001953125, %v3507_v12  ;;  %v3796_v50 = vsub.f32 %v11529_v51, %v11731_v7 }
 0x90f   :  { %3918 = vrot.lane.b32.xlu1 %v11713_v53, %s8159_s18  ;;  %3982 = vrot.lane.b32.xlu0 %v11715_v54, %s8159_s18 }
 0x910   :  { %v7939_v31 = vpop.eup %7938  ;;  %v11774_v11 = vmul.f32 0.001953125, %v3506_v41  ;;  %v3731_v36 = vmul.f32 %v11802_v45, %v11802_v45 }
 0x911   :  { %v11729_v32 = vmul.f32 %v7939_v31, %v3761_v37  ;;  %v11738_v33 = vmul.f32 %v7939_v31, %v3760_v35  ;;  %v11757_v17 = vmul.f32 %v7939_v31, %v3792_v60  ;;  %v11764_v8 = vmul.f32 %v7939_v31, %v3793_v30  ;;  %v3644_v18 = vpop.xlane.xlu1 %3643 }
 0x912   :  { %v3682_v28 = vadd.f32 %v3644_v18, %v11665_v4  ;;  %v3762_v4 = vsub.f32 %v11359_v46, %v11717_v44  ;;  %v3730_v13 = vmul.f32 %v11774_v11, %v11774_v11  ;;  %v3683_v46 = vadd.f32 %v3647_v39, %v11671_v9 }
 0x913   :  { %4238 = vrot.lane.b32.xlu0 %v11713_v53, %s8156_s16  ;;  %3984 = vrot.lane.b32.xlu1 %v11729_v32, %s8159_s18  ;;  %v3794_v9 = vsub.f32 %v11515_v27, %v11717_v44  ;;  %v3797_v44 = vsub.f32 %v11533_v21, %v11731_v7 }
 0x914   :  { %v7941_v59 = vpop.eup %7940  ;;  %v3714_v31 = vmul.f32 0.001953125, %v3682_v28  ;;  %v3715_v15 = vmul.f32 0.001953125, %v3683_v46  ;;  %v3477_v28 = vpop.xlane.xlu0 %3476 }
 0x915   :  { %v11782_v24 = vmul.f32 %v7941_v59, %v3763_v40  ;;  %v11790_v57 = vmul.f32 %v7941_v59, %v3762_v4  ;;  %v11818_v63 = vmul.f32 %v7941_v59, %v3794_v9  ;;  %v11826_v27 = vmul.f32 %v7941_v59, %v3795_v56  ;;  %v3474_v5 = vpop.xlane.xlu1 %3473 }
 0x916   :  { %v3746_v49 = vsub.f32 %v3714_v31, %v3730_v13  ;;  %v3747_v58 = vsub.f32 %v3715_v15, %v3731_v36  ;;  %v3508_v41 = vadd.f32 %v3474_v5, %v11669_v14  ;;  %v3766_v59 = vsub.f32 %v11375_v16, %v11774_v11 }
 0x917   :  { %4302 = vrot.lane.b32.xlu0 %v11715_v54, %s8156_s16  ;;  %4240 = vrot.lane.b32.xlu1 %v11738_v33, %s8156_s16  ;;  %17152 = vst [vmem:[#allocation82_spill] sm:$0xff] %v11818_v63  ;;  %17153 = vst [vmem:[#allocation83_spill] sm:$0xff] %v11826_v27  ;;  %v3767_v14 = vsub.f32 %v11379_v23, %v11774_v11  ;;  %v3768_v23 = vsub.f32 %v11393_v61, %v11802_v45 }
 0x918   :  { %v3826_v1 = vadd.f32 1e-05, %v3746_v49  ;;  %v3827_v60 = vadd.f32 1e-05, %v3747_v58  ;;  %v11854_v21 = vmul.f32 0.001953125, %v3508_v41  ;;  %v3653_v31 = vpop.xlane.xlu0 %3652  ;;  %v3799_v56 = vsub.f32 %v11545_v20, %v11774_v11 }
 0x919   :  { %v7943_v37 = vpop.eup %7942  ;;  %v3650_v18 = vpop.xlane.xlu1 %3649  ;;  %v3685_v39 = vadd.f32 %v3653_v31, %v11679_v10  ;;  %v3798_v10 = vsub.f32 %v11539_v55, %v11774_v11 }
 0x91a   :  { %v11800_v35 = vmul.f32 %v7943_v37, %v3764_v43  ;;  %v11810_v25 = vmul.f32 %v7943_v37, %v3765_v29  ;;  %7944 = vrsqrt.f32 %v3826_v1  ;;  %v11836_v34 = vmul.f32 %v7943_v37, %v3796_v50 }
 0x91b   :  { %3950 = vrot.lane.b32.xlu0 %v11745_v19, %s8159_s18  ;;  %4304 = vrot.lane.b32.xlu1 %v11729_v32, %s8156_s16  ;;  %7946 = vrsqrt.f32 %v3827_v60  ;;  %v11845_v51 = vmul.f32 %v7943_v37, %v3797_v44  ;;  %v3684_v47 = vadd.f32 %v3650_v18, %v11673_v62  ;;  %v3732_v62 = vmul.f32 %v11854_v21, %v11854_v21 }
 0x91c   :  { %17154 = vst [vmem:[#allocation84_spill] sm:$0xff] %v11836_v34  ;;  %v3509_v37 = vadd.f32 %v3477_v28, %v11675_v2  ;;  %v3483_v49 = vpop.xlane.xlu0 %3482  ;;  %v3769_v2 = vsub.f32 %v11391_v42, %v11802_v45  ;;  %v3717_v29 = vmul.f32 0.001953125, %v3685_v39  ;;  %v3800_v44 = vsub.f32 %v11549_v6, %v11802_v45  ;;  %v17167_v39 = vld [vmem:[#allocation67_spill] sm:$0xff] }
 0x91d   :  { %17155 = vst [vmem:[#allocation85_spill] sm:$0xff] %v11845_v51  ;;  %v3716_v7 = vmul.f32 0.001953125, %v3684_v47  ;;  %v3480_v1 = vpop.xlane.xlu1 %3479 }
 0x91e   :  { %v11878_v46 = vmul.f32 0.001953125, %v3509_v37  ;;  %v3510_v41 = vadd.f32 %v3480_v1, %v11677_v26 }
 0x91f   :  { %4014 = vrot.lane.b32.xlu0 %v11752_v52, %s8159_s18  ;;  %3952 = vrot.lane.b32.xlu1 %v11757_v17, %s8159_s18  ;;  %v3748_v13 = vsub.f32 %v3716_v7, %v3732_v62 }
 0x920   :  { %v3733_v15 = vmul.f32 %v11878_v46, %v11878_v46  ;;  %v3659_v9 = vpop.xlane.xlu0 %3658 }
 0x921   :  { %v3828_v43 = vadd.f32 1e-05, %v3748_v13  ;;  %v3656_v58 = vpop.xlane.xlu1 %3655  ;;  %v3511_v13 = vadd.f32 %v3483_v49, %v11683_v0  ;;  %v17169_v0 = vld [vmem:[#allocation36_spill] sm:$0xff] }
 0x922   :  { %v3749_v42 = vsub.f32 %v3717_v29, %v3733_v15  ;;  %v3686_v47 = vadd.f32 %v3656_v58, %v11681_v22  ;;  %v3773_v49 = vsub.f32 %v17169_v0, %v11878_v46  ;;  %v17171_v58 = vld [vmem:[#allocation70_spill] sm:$0xff] }
 0x923   :  { %4270 = vrot.lane.b32.xlu0 %v11745_v19, %s8156_s16  ;;  %4016 = vrot.lane.b32.xlu1 %v11764_v8, %s8159_s18  ;;  %7948 = vrsqrt.f32 %v3828_v43  ;;  %v3687_v43 = vadd.f32 %v3659_v9, %v17167_v39 }
 0x924   :  { %v3829_v60 = vadd.f32 1e-05, %v3749_v42  ;;  %v11904_v5 = vpop.xlane.xlu0 %3488  ;;  %v3718_v7 = vmul.f32 0.001953125, %v3686_v47 }
 0x925   :  { %v11908_v50 = vpop.xlane.xlu1 %3485  ;;  %v3719_v15 = vmul.f32 0.001953125, %v3687_v43  ;;  %v17177_v43 = vld [vmem:[#allocation50_spill] sm:$0xff] }
 0x926   :  { %7950 = vrsqrt.f32 %v3829_v60 }
 0x927   :  { %4334 = vrot.lane.b32.xlu0 %v11752_v52, %s8156_s16  ;;  %4272 = vrot.lane.b32.xlu1 %v11757_v17, %s8156_s16  ;;  %v7945_v30 = vpop.eup %7944 }
 0x928   :  { %v11852_v40 = vmul.f32 %v7945_v30, %v3766_v59  ;;  %v11862_v16 = vmul.f32 %v7945_v30, %v3767_v14  ;;  %v7947_v4 = vpop.eup %7946  ;;  %v11894_v36 = vmul.f32 %v7945_v30, %v3798_v10  ;;  %v11902_v55 = vmul.f32 %v7945_v30, %v3799_v56  ;;  %v11918_v11 = vpop.xlane.xlu0 %3664 }
 0x929   :  { %v11876_v12 = vmul.f32 %v7947_v4, %v3768_v23  ;;  %v11886_v61 = vmul.f32 %v7947_v4, %v3769_v2  ;;  %v11916_v20 = vmul.f32 %v7947_v4, %v3800_v44  ;;  %v3801_v30 = vsub.f32 %v11553_v48, %v11802_v45  ;;  %v11925_v28 = vpop.xlane.xlu1 %3661 }
 0x92a   :  { %17156 = vst [vmem:[#allocation86_spill] sm:$0xff] %v11852_v40  ;;  %17157 = vst [vmem:[#allocation87_spill] sm:$0xff] %v11862_v16  ;;  %v3770_v59 = vsub.f32 %v11395_v38, %v11854_v21  ;;  %v11938_v48 = vmul.f32 0.001953125, %v3510_v41  ;;  %v3771_v45 = vsub.f32 %v11399_v3, %v11854_v21  ;;  %v17166_v3 = vld [vmem:[#allocation37_spill] sm:$0xff]  ;;  %v11970_v10 = vmul.f32 0.001953125, %v3511_v13 }
 0x92b   :  { %3920 = vrot.lane.b32.xlu0 %v11738_v33, %s8159_s18  ;;  %4336 = vrot.lane.b32.xlu1 %v11764_v8, %s8156_s16  ;;  %17158 = vst [vmem:[#allocation88_spill] sm:$0xff] %v11876_v12  ;;  %17159 = vst [vmem:[#allocation89_spill] sm:$0xff] %v11886_v61  ;;  %v11929_v6 = vmul.f32 %v7947_v4, %v3801_v30  ;;  %v3772_v23 = vsub.f32 %v17166_v3, %v11878_v46 }
 0x92c   :  { %17160 = vst [vmem:[#allocation90_spill] sm:$0xff] %v11894_v36  ;;  %17161 = vst [vmem:[#allocation91_spill] sm:$0xff] %v11902_v55  ;;  %v11940_v26 = vpop.xlane.xlu0 %3494  ;;  %v3734_v22 = vmul.f32 %v11938_v48, %v11938_v48  ;;  %v3802_v56 = vsub.f32 %v17171_v58, %v11854_v21  ;;  %v3735_v60 = vmul.f32 %v11970_v10, %v11970_v10 }
 0x92d   :  { %17162 = vst [vmem:[#allocation92_spill] sm:$0xff] %v11916_v20  ;;  %17163 = vst [vmem:[#allocation93_spill] sm:$0xff] %v11929_v6  ;;  %v11946_v31 = vpop.xlane.xlu1 %3491 }
 0x92e   :  { %v3750_v4 = vsub.f32 %v3718_v7, %v3734_v22  ;;  %v3751_v41 = vsub.f32 %v3719_v15, %v3735_v60  ;;  %v17180_v60 = vld [vmem:[#allocation38_spill] sm:$0xff] }
 0x92f   :  { %3986 = vrot.lane.b32.xlu0 %v11782_v24, %s8159_s18  ;;  %3922 = vrot.lane.b32.xlu1 %v11790_v57, %s8159_s18 }
 0x930   :  { %v7949_v18 = vpop.eup %7948  ;;  %v11957_v37 = vpop.xlane.xlu0 %3670  ;;  %v3830_v29 = vadd.f32 1e-05, %v3750_v4  ;;  %v3831_v22 = vadd.f32 1e-05, %v3751_v41  ;;  %v3774_v41 = vsub.f32 %v17180_v60, %v11938_v48 }
 0x931   :  { %v11936_v14 = vmul.f32 %v7949_v18, %v3770_v59  ;;  %v11950_v38 = vmul.f32 %v7949_v18, %v3771_v45  ;;  %v11964_v1 = vpop.xlane.xlu1 %3667  ;;  %v11990_v30 = vmul.f32 %v7949_v18, %v3802_v56  ;;  %v17173_v59 = vld [vmem:[#allocation47_spill] sm:$0xff] }
 0x932   :  { %7952 = vrsqrt.f32 %v3830_v29  ;;  %v3803_v47 = vsub.f32 %v17173_v59, %v11854_v21  ;;  %v17175_v21 = vld [vmem:[#allocation49_spill] sm:$0xff]  ;;  %v3805_v29 = vsub.f32 %v17177_v43, %v11878_v46  ;;  %v17181_v59 = vld [vmem:[#allocation66_spill] sm:$0xff] }
 0x933   :  { %4242 = vrot.lane.b32.xlu0 %v11790_v57, %s8156_s16  ;;  %3924 = vrot.lane.b32.xlu1 %v11800_v35, %s8159_s18  ;;  %17164 = vst [vmem:[#allocation94_spill] sm:$0xff] %v11936_v14  ;;  %17165 = vst [vmem:[#allocation95_spill] sm:$0xff] %v11950_v38  ;;  %v7951_v62 = vpop.eup %7950  ;;  %v3804_v3 = vsub.f32 %v17175_v21, %v11878_v46  ;;  %7954 = vrsqrt.f32 %v3831_v22 }
 0x934   :  { %v11968_v2 = vmul.f32 %v7951_v62, %v3772_v23  ;;  %v11976_v42 = vpop.xlane.xlu0 %3500  ;;  %v11980_v9 = vmul.f32 %v7951_v62, %v3773_v49  ;;  %17172 = vst [vmem:[#allocation36_spill] sm:$0xff] %v11990_v30  ;;  %v12000_v7 = vmul.f32 %v7949_v18, %v3803_v47  ;;  %v17178_v49 = vld [vmem:[#allocation60_spill] sm:$0xff]  ;;  %v12030_v56 = vmul.f32 %v7951_v62, %v3805_v29 }
 0x935   :  { %v11986_v44 = vpop.xlane.xlu1 %3497  ;;  %v12016_v18 = vmul.f32 %v7951_v62, %v3804_v3  ;;  %v3512_v15 = vadd.f32 %v11908_v50, %v17178_v49  ;;  %v3688_v47 = vadd.f32 %v11925_v28, %v17181_v59  ;;  %v17183_v62 = vld [vmem:[#allocation39_spill] sm:$0xff] }
 0x936   :  { %17168 = vst [vmem:[#allocation37_spill] sm:$0xff] %v11968_v2  ;;  %17170 = vst [vmem:[#allocation67_spill] sm:$0xff] %v11980_v9  ;;  %v3775_v3 = vsub.f32 %v17183_v62, %v11938_v48  ;;  %v17185_v59 = vld [vmem:[#allocation63_spill] sm:$0xff] }
 0x937   :  { %4306 = vrot.lane.b32.xlu0 %v11782_v24, %s8156_s16  ;;  %3988 = vrot.lane.b32.xlu1 %v11810_v25, %s8159_s18  ;;  %17174 = vst [vmem:[#allocation70_spill] sm:$0xff] %v12000_v7  ;;  %17176 = vst [vmem:[#allocation47_spill] sm:$0xff] %v12016_v18  ;;  %v12042_v50 = vmul.f32 0.001953125, %v3512_v15  ;;  %v3720_v43 = vmul.f32 0.001953125, %v3688_v47  ;;  %v3513_v47 = vadd.f32 %v11904_v5, %v17185_v59 }
 0x938   :  { %v11996_v45 = vpop.xlane.xlu0 %3676  ;;  %17179 = vst [vmem:[#allocation49_spill] sm:$0xff] %v12030_v56 }
 0x939   :  { %v12002_v4 = vpop.xlane.xlu1 %3673  ;;  %v3736_v49 = vmul.f32 %v12042_v50, %v12042_v50  ;;  %v12078_v5 = vmul.f32 0.001953125, %v3513_v47 }
 0x93b   :  { %3954 = vrot.lane.b32.xlu0 %v11818_v63, %s8159_s18  ;;  %4244 = vrot.lane.b32.xlu1 %v11800_v35, %s8156_s16  ;;  %v3737_v47 = vmul.f32 %v12078_v5, %v12078_v5 }
 0x93f   :  { %4018 = vrot.lane.b32.xlu0 %v11826_v27, %s8159_s18  ;;  %4308 = vrot.lane.b32.xlu1 %v11810_v25, %s8156_s16  ;;  %v7953_v0 = vpop.eup %7952 }
 0x940   :  { %v12040_v22 = vmul.f32 %v7953_v0, %v3774_v41  ;;  %v12054_v29 = vmul.f32 %v7953_v0, %v3775_v3  ;;  %v7955_v60 = vpop.eup %7954  ;;  %v3752_v41 = vsub.f32 %v3720_v43, %v3736_v49  ;;  %v17186_v3 = vld [vmem:[#allocation41_spill] sm:$0xff] }
 0x942   :  { %17182 = vst [vmem:[#allocation50_spill] sm:$0xff] %v12040_v22  ;;  %17184 = vst [vmem:[#allocation60_spill] sm:$0xff] %v12054_v29  ;;  %v3832_v49 = vadd.f32 1e-05, %v3752_v41 }
 0x943   :  { %4274 = vrot.lane.b32.xlu0 %v11818_v63, %s8156_s16  ;;  %3956 = vrot.lane.b32.xlu1 %v11836_v34, %s8159_s18 }
 0x944   :  { %7956 = vrsqrt.f32 %v3832_v49 }
 0x947   :  { %4338 = vrot.lane.b32.xlu0 %v11826_v27, %s8156_s16  ;;  %4020 = vrot.lane.b32.xlu1 %v11845_v51, %s8159_s18 }
 0x94b   :  { %3926 = vrot.lane.b32.xlu0 %v11852_v40, %s8159_s18  ;;  %4276 = vrot.lane.b32.xlu1 %v11836_v34, %s8156_s16 }
 0x94f   :  { %3990 = vrot.lane.b32.xlu0 %v11862_v16, %s8159_s18  ;;  %4340 = vrot.lane.b32.xlu1 %v11845_v51, %s8156_s16 }
 0x953   :  { %4246 = vrot.lane.b32.xlu0 %v11852_v40, %s8156_s16  ;;  %3928 = vrot.lane.b32.xlu1 %v11876_v12, %s8159_s18 }
 0x957   :  { %4310 = vrot.lane.b32.xlu0 %v11862_v16, %s8156_s16  ;;  %3992 = vrot.lane.b32.xlu1 %v11886_v61, %s8159_s18  ;;  %v17207_v16 = vld [vmem:[#allocation77_spill] sm:$0xff] }
 0x958   :  { %v3691_v40 = vadd.f32 %v11957_v37, %v17207_v16 }
 0x95a   :  { %v3723_v34 = vmul.f32 0.001953125, %v3691_v40 }
 0x95b   :  { %3958 = vrot.lane.b32.xlu0 %v11894_v36, %s8159_s18  ;;  %4248 = vrot.lane.b32.xlu1 %v11876_v12, %s8156_s16  ;;  %v17205_v12 = vld [vmem:[#allocation68_spill] sm:$0xff] }
 0x95f   :  { %4022 = vrot.lane.b32.xlu0 %v11902_v55, %s8159_s18  ;;  %4312 = vrot.lane.b32.xlu1 %v11886_v61, %s8156_s16 }
 0x963   :  { %4278 = vrot.lane.b32.xlu0 %v11894_v36, %s8156_s16  ;;  %3960 = vrot.lane.b32.xlu1 %v11916_v20, %s8159_s18 }
 0x967   :  { %4342 = vrot.lane.b32.xlu0 %v11902_v55, %s8156_s16  ;;  %4024 = vrot.lane.b32.xlu1 %v11929_v6, %s8159_s18  ;;  %v17201_v55 = vld [vmem:[#allocation78_spill] sm:$0xff] }
 0x968   :  { %v3690_v36 = vadd.f32 %v11964_v1, %v17201_v55 }
 0x96b   :  { %3930 = vrot.lane.b32.xlu0 %v11936_v14, %s8159_s18  ;;  %4280 = vrot.lane.b32.xlu1 %v11916_v20, %s8156_s16 }
 0x96f   :  { %3994 = vrot.lane.b32.xlu0 %v11950_v38, %s8159_s18  ;;  %4344 = vrot.lane.b32.xlu1 %v11929_v6, %s8156_s16 }
 0x973   :  { %4250 = vrot.lane.b32.xlu0 %v11936_v14, %s8156_s16  ;;  %3932 = vrot.lane.b32.xlu1 %v11968_v2, %s8159_s18 }
 0x977   :  { %4314 = vrot.lane.b32.xlu0 %v11950_v38, %s8156_s16  ;;  %3996 = vrot.lane.b32.xlu1 %v11980_v9, %s8159_s18 }
 0x97b   :  { %3962 = vrot.lane.b32.xlu0 %v11990_v30, %s8159_s18  ;;  %4252 = vrot.lane.b32.xlu1 %v11968_v2, %s8156_s16 }
 0x97f   :  { %4026 = vrot.lane.b32.xlu0 %v12000_v7, %s8159_s18  ;;  %4316 = vrot.lane.b32.xlu1 %v11980_v9, %s8156_s16 }
 0x981   :  { %v12008_v13 = vpop.permute.xlu0 %3982  ;;  %v12012_v23 = vpop.permute.xlu1 %3918 }
 0x983   :  { %4282 = vrot.lane.b32.xlu0 %v11990_v30, %s8156_s16  ;;  %3964 = vrot.lane.b32.xlu1 %v12016_v18, %s8159_s18 }
 0x985   :  { %v12020_v39 = vpop.permute.xlu0 %4238  ;;  %v12026_v58 = vpop.permute.xlu1 %3984 }
 0x987   :  { %4346 = vrot.lane.b32.xlu0 %v12000_v7, %s8156_s16  ;;  %4028 = vrot.lane.b32.xlu1 %v12030_v56, %s8159_s18  ;;  %v17187_v7 = vld [vmem:[#allocation79_spill] sm:$0xff] }
 0x988   :  { %v3689_v30 = vadd.f32 %v11918_v11, %v17187_v7 }
 0x989   :  { %v12038_v46 = vpop.permute.xlu0 %4302  ;;  %v12044_v21 = vpop.permute.xlu1 %4240 }
 0x98a   :  { %v3721_v2 = vmul.f32 0.001953125, %v3689_v30 }
 0x98b   :  { %3934 = vrot.lane.b32.xlu0 %v12040_v22, %s8159_s18  ;;  %4284 = vrot.lane.b32.xlu1 %v12016_v18, %s8156_s16  ;;  %v3776_v18 = vsub.f32 %v17186_v3, %v11970_v10  ;;  %v17189_v3 = vld [vmem:[#allocation40_spill] sm:$0xff] }
 0x98d   :  { %v12052_v28 = vpop.permute.xlu0 %3950  ;;  %v12058_v15 = vpop.permute.xlu1 %4304  ;;  %v12076_v43 = vmul.f32 %v7955_v60, %v3776_v18  ;;  %v17191_v18 = vld [vmem:[#allocation31_spill] sm:$0xff] }
 0x98e   :  { %v3806_v41 = vsub.f32 %v17191_v18, %v11938_v48 }
 0x98f   :  { %3998 = vrot.lane.b32.xlu0 %v12054_v29, %s8159_s18  ;;  %4348 = vrot.lane.b32.xlu1 %v12030_v56, %s8156_s16  ;;  %17188 = vst [vmem:[#allocation38_spill] sm:$0xff] %v12076_v43  ;;  %v3777_v56 = vsub.f32 %v17189_v3, %v11970_v10  ;;  %v3753_v3 = vsub.f32 %v3721_v2, %v3737_v47 }
 0x990   :  { %v12100_v30 = vmul.f32 %v7953_v0, %v3806_v41 }
 0x991   :  { %v12066_v62 = vpop.permute.xlu0 %4014  ;;  %v12072_v9 = vpop.permute.xlu1 %3952  ;;  %v12090_v7 = vmul.f32 %v7955_v60, %v3777_v56  ;;  %v17193_v56 = vld [vmem:[#allocation53_spill] sm:$0xff]  ;;  %v3833_v14 = vadd.f32 1e-05, %v3753_v3 }
 0x992   :  { %17192 = vst [vmem:[#allocation39_spill] sm:$0xff] %v12100_v30  ;;  %v3807_v18 = vsub.f32 %v17193_v56, %v11938_v48  ;;  %v17195_v48 = vld [vmem:[#allocation51_spill] sm:$0xff]  ;;  %v17197_v56 = vld [vmem:[#allocation52_spill] sm:$0xff] }
 0x993   :  { %4254 = vrot.lane.b32.xlu0 %v12040_v22, %s8156_s16  ;;  %3936 = vrot.lane.b32.xlu1 %v12076_v43, %s8159_s18  ;;  %17190 = vst [vmem:[#allocation66_spill] sm:$0xff] %v12090_v7  ;;  %v3808_v41 = vsub.f32 %v17195_v48, %v11970_v10  ;;  %7958 = vrsqrt.f32 %v3833_v14 }
 0x995   :  { %v12082_v59 = vpop.permute.xlu0 %4270  ;;  %v12086_v11 = vpop.permute.xlu1 %4016 }
 0x997   :  { %4318 = vrot.lane.b32.xlu0 %v12054_v29, %s8156_s16  ;;  %4000 = vrot.lane.b32.xlu1 %v12090_v7, %s8159_s18  ;;  %v12112_v29 = vmul.f32 %v7953_v0, %v3807_v18  ;;  %v12128_v0 = vmul.f32 %v7955_v60, %v3808_v41  ;;  %v3809_v18 = vsub.f32 %v17197_v56, %v11970_v10  ;;  %v17200_v41 = vld [vmem:[#allocation42_spill] sm:$0xff] }
 0x998   :  { %v3778_v20 = vsub.f32 %v17200_v41, %v12042_v50  ;;  %v3722_v41 = vmul.f32 0.001953125, %v3690_v36  ;;  %v3515_v36 = vadd.f32 %v11940_v26, %v17205_v12 }
 0x999   :  { %v12098_v22 = vpop.permute.xlu0 %4334  ;;  %v12102_v38 = vpop.permute.xlu1 %4272  ;;  %17194 = vst [vmem:[#allocation63_spill] sm:$0xff] %v12112_v29  ;;  %17196 = vst [vmem:[#allocation41_spill] sm:$0xff] %v12128_v0 }
 0x99a   :  { %v12190_v12 = vmul.f32 0.001953125, %v3515_v36 }
 0x99b   :  { %3966 = vrot.lane.b32.xlu0 %v12100_v30, %s8159_s18  ;;  %4256 = vrot.lane.b32.xlu1 %v12076_v43, %s8156_s16  ;;  %v17198_v43 = vld [vmem:[#allocation69_spill] sm:$0xff] }
 0x99c   :  { %v3514_v48 = vadd.f32 %v11946_v31, %v17198_v43  ;;  %v3739_v36 = vmul.f32 %v12190_v12, %v12190_v12 }
 0x99d   :  { %v12110_v49 = vpop.permute.xlu0 %3920  ;;  %v12114_v6 = vpop.permute.xlu1 %4336 }
 0x99e   :  { %v12154_v31 = vmul.f32 0.001953125, %v3514_v48 }
 0x99f   :  { %4030 = vrot.lane.b32.xlu0 %v12112_v29, %s8159_s18  ;;  %4320 = vrot.lane.b32.xlu1 %v12090_v7, %s8156_s16  ;;  %v7957_v7 = vpop.eup %7956 }
 0x9a0   :  { %v12152_v56 = vmul.f32 %v7957_v7, %v3778_v20  ;;  %v3738_v20 = vmul.f32 %v12154_v31, %v12154_v31 }
 0x9a1   :  { %v12120_v2 = vpop.permute.xlu0 %3986  ;;  %v12124_v47 = vpop.permute.xlu1 %3922 }
 0x9a2   :  { %17202 = vst [vmem:[#allocation40_spill] sm:$0xff] %v12152_v56  ;;  %v3754_v61 = vsub.f32 %v3722_v41, %v3738_v20 }
 0x9a3   :  { %4286 = vrot.lane.b32.xlu0 %v12100_v30, %s8156_s16  ;;  %3968 = vrot.lane.b32.xlu1 %v12128_v0, %s8159_s18  ;;  %v12142_v30 = vmul.f32 %v7955_v60, %v3809_v18  ;;  %v17203_v60 = vld [vmem:[#allocation44_spill] sm:$0xff] }
 0x9a4   :  { %v3779_v18 = vsub.f32 %v17203_v60, %v12042_v50  ;;  %v3834_v20 = vadd.f32 1e-05, %v3754_v61  ;;  %v17212_v61 = vld [vmem:[#allocation55_spill] sm:$0xff] }
 0x9a5   :  { %v12132_v3 = vpop.permute.xlu0 %4242  ;;  %v12138_v14 = vpop.permute.xlu1 %3924  ;;  %17199 = vst [vmem:[#allocation79_spill] sm:$0xff] %v12142_v30 }
 0x9a6   :  { %v12166_v1 = vmul.f32 %v7957_v7, %v3779_v18  ;;  %v17206_v18 = vld [vmem:[#allocation35_spill] sm:$0xff]  ;;  %7960 = vrsqrt.f32 %v3834_v20 }
 0x9a7   :  { %4350 = vrot.lane.b32.xlu0 %v12112_v29, %s8156_s16  ;;  %4032 = vrot.lane.b32.xlu1 %v12142_v30, %s8159_s18  ;;  %v7959_v29 = vpop.eup %7958 }
 0x9a8   :  { %17204 = vst [vmem:[#allocation31_spill] sm:$0xff] %v12166_v1 }
 0x9a9   :  { %v12150_v10 = vpop.permute.xlu0 %4306  ;;  %v12156_v43 = vpop.permute.xlu1 %3988 }
 0x9ab   :  { %3938 = vrot.lane.b32.xlu0 %v12152_v56, %s8159_s18  ;;  %4288 = vrot.lane.b32.xlu1 %v12128_v0, %s8156_s16  ;;  %v3780_v0 = vsub.f32 %v17206_v18, %v12078_v5  ;;  %v17209_v18 = vld [vmem:[#allocation46_spill] sm:$0xff] }
 0x9ad   :  { %v12164_v55 = vpop.permute.xlu0 %3954  ;;  %v12170_v48 = vpop.permute.xlu1 %4244  ;;  %v12188_v41 = vmul.f32 %v7959_v29, %v3780_v0  ;;  %v3810_v0 = vsub.f32 %v17212_v61, %v12042_v50 }
 0x9af   :  { %4002 = vrot.lane.b32.xlu0 %v12166_v1, %s8159_s18  ;;  %4352 = vrot.lane.b32.xlu1 %v12142_v30, %s8156_s16  ;;  %17208 = vst [vmem:[#allocation53_spill] sm:$0xff] %v12188_v41  ;;  %v3781_v30 = vsub.f32 %v17209_v18, %v12078_v5  ;;  %v12212_v40 = vmul.f32 %v7957_v7, %v3810_v0 }
 0x9b0   :  { %v3755_v18 = vsub.f32 %v3723_v34, %v3739_v36 }
 0x9b1   :  { %v12178_v60 = vpop.permute.xlu0 %4018  ;;  %v12184_v51 = vpop.permute.xlu1 %4308  ;;  %v12202_v37 = vmul.f32 %v7959_v29, %v3781_v30  ;;  %17213 = vst [vmem:[#allocation69_spill] sm:$0xff] %v12212_v40  ;;  %v17214_v30 = vld [vmem:[#allocation57_spill] sm:$0xff] }
 0x9b2   :  { %v3811_v61 = vsub.f32 %v17214_v30, %v12042_v50  ;;  %v3835_v27 = vadd.f32 1e-05, %v3755_v18  ;;  %v17218_v50 = vld [vmem:[#allocation34_spill] sm:$0xff]  ;;  %v17221_v30 = vld [vmem:[#allocation56_spill] sm:$0xff] }
 0x9b3   :  { %4258 = vrot.lane.b32.xlu0 %v12152_v56, %s8156_s16  ;;  %3940 = vrot.lane.b32.xlu1 %v12188_v41, %s8159_s18  ;;  %17211 = vst [vmem:[#allocation52_spill] sm:$0xff] %v12202_v37  ;;  %v3812_v0 = vsub.f32 %v17218_v50, %v12078_v5 }
 0x9b4   :  { %7962 = vrsqrt.f32 %v3835_v27 }
 0x9b5   :  { %v12194_v26 = vpop.permute.xlu0 %4274  ;;  %v12198_v16 = vpop.permute.xlu1 %3956 }
 0x9b6   :  { %17210 = vst [vmem:[#allocation51_spill] sm:$0xff] %v12198_v16 }
 0x9b7   :  { %4322 = vrot.lane.b32.xlu0 %v12166_v1, %s8156_s16  ;;  %4004 = vrot.lane.b32.xlu1 %v12202_v37, %s8159_s18  ;;  %v12224_v1 = vmul.f32 %v7957_v7, %v3811_v61  ;;  %v12240_v7 = vmul.f32 %v7959_v29, %v3812_v0  ;;  %v3813_v61 = vsub.f32 %v17221_v30, %v12078_v5  ;;  %v17225_v0 = vld [vmem:[#allocation43_spill] sm:$0xff] }
 0x9b9   :  { %v12210_v56 = vpop.permute.xlu0 %4338  ;;  %v12214_v16 = vpop.permute.xlu1 %4020  ;;  %17216 = vst [vmem:[#allocation78_spill] sm:$0xff] %v12224_v1  ;;  %17219 = vst [vmem:[#allocation68_spill] sm:$0xff] %v12240_v7 }
 0x9bb   :  { %3970 = vrot.lane.b32.xlu0 %v12212_v40, %s8159_s18  ;;  %4260 = vrot.lane.b32.xlu1 %v12188_v41, %s8156_s16  ;;  %v17222_v41 = vld [vmem:[#allocation62_spill] sm:$0xff] }
 0x9bc   :  { %v3516_v50 = vadd.f32 %v11986_v44, %v17222_v41 }
 0x9bd   :  { %v12222_v20 = vpop.permute.xlu0 %3926  ;;  %v12226_v63 = vpop.permute.xlu1 %4276 }
 0x9be   :  { %17215 = vst [vmem:[#allocation42_spill] sm:$0xff] %v12222_v20  ;;  %v3782_v20 = vsub.f32 %v17225_v0, %v12154_v31  ;;  %v12266_v44 = vmul.f32 0.001953125, %v3516_v50 }
 0x9bf   :  { %4034 = vrot.lane.b32.xlu0 %v12224_v1, %s8159_s18  ;;  %4324 = vrot.lane.b32.xlu1 %v12202_v37, %s8156_s16  ;;  %v7961_v37 = vpop.eup %7960 }
 0x9c0   :  { %v12264_v30 = vmul.f32 %v7961_v37, %v3782_v20  ;;  %v3740_v20 = vmul.f32 %v12266_v44, %v12266_v44 }
 0x9c1   :  { %v12232_v34 = vpop.permute.xlu0 %3990  ;;  %v12236_v36 = vpop.permute.xlu1 %4340 }
 0x9c2   :  { %17217 = vst [vmem:[#allocation44_spill] sm:$0xff] %v12232_v34  ;;  %v17226_v34 = vld [vmem:[#allocation76_spill] sm:$0xff]  ;;  %17228 = vst [vmem:[#allocation57_spill] sm:$0xff] %v12264_v30 }
 0x9c3   :  { %4290 = vrot.lane.b32.xlu0 %v12212_v40, %s8156_s16  ;;  %3972 = vrot.lane.b32.xlu1 %v12240_v7, %s8159_s18  ;;  %v12254_v40 = vmul.f32 %v7959_v29, %v3813_v61  ;;  %v17230_v29 = vld [vmem:[#allocation45_spill] sm:$0xff] }
 0x9c4   :  { %v3783_v61 = vsub.f32 %v17230_v29, %v12154_v31 }
 0x9c5   :  { %v12244_v18 = vpop.permute.xlu0 %4246  ;;  %v12250_v27 = vpop.permute.xlu1 %3928  ;;  %17224 = vst [vmem:[#allocation46_spill] sm:$0xff] %v12254_v40 }
 0x9c6   :  { %17220 = vst [vmem:[#allocation35_spill] sm:$0xff] %v12244_v18  ;;  %17223 = vst [vmem:[#allocation77_spill] sm:$0xff] %v12250_v27  ;;  %v3692_v18 = vadd.f32 %v12002_v4, %v17226_v34  ;;  %v12278_v34 = vmul.f32 %v7961_v37, %v3783_v61  ;;  %v17236_v61 = vld [vmem:[#allocation74_spill] sm:$0xff] }
 0x9c7   :  { %4354 = vrot.lane.b32.xlu0 %v12224_v1, %s8156_s16  ;;  %4036 = vrot.lane.b32.xlu1 %v12254_v40, %s8159_s18  ;;  %v7963_v1 = vpop.eup %7962 }
 0x9c8   :  { %v3724_v0 = vmul.f32 0.001953125, %v3692_v18  ;;  %17232 = vst [vmem:[#allocation62_spill] sm:$0xff] %v12278_v34 }
 0x9c9   :  { %v12262_v5 = vpop.permute.xlu0 %4310  ;;  %v12268_v41 = vpop.permute.xlu1 %3992 }
 0x9ca   :  { %17227 = vst [vmem:[#allocation55_spill] sm:$0xff] %v12262_v5  ;;  %17229 = vst [vmem:[#allocation34_spill] sm:$0xff] %v12268_v41  ;;  %v3756_v27 = vsub.f32 %v3724_v0, %v3740_v20  ;;  %v17234_v41 = vld [vmem:[#allocation65_spill] sm:$0xff] }
 0x9cb   :  { %3942 = vrot.lane.b32.xlu0 %v12264_v30, %s8159_s18  ;;  %4292 = vrot.lane.b32.xlu1 %v12240_v7, %s8156_s16  ;;  %v3517_v18 = vadd.f32 %v11976_v42, %v17234_v41  ;;  %v3784_v7 = vsub.f32 %v17236_v61, %v12190_v12  ;;  %v17240_v61 = vld [vmem:[#allocation48_spill] sm:$0xff] }
 0x9cc   :  { %v3836_v20 = vadd.f32 1e-05, %v3756_v27 }
 0x9cd   :  { %v12276_v4 = vpop.permute.xlu0 %3958  ;;  %v12282_v50 = vpop.permute.xlu1 %4248  ;;  %v12300_v0 = vmul.f32 %v7963_v1, %v3784_v7  ;;  %v12302_v42 = vmul.f32 0.001953125, %v3517_v18  ;;  %v17243_v7 = vld [vmem:[#allocation54_spill] sm:$0xff] }
 0x9ce   :  { %17231 = vst [vmem:[#allocation56_spill] sm:$0xff] %v12276_v4  ;;  %17233 = vst [vmem:[#allocation43_spill] sm:$0xff] %v12282_v50  ;;  %v17237_v4 = vld [vmem:[#allocation64_spill] sm:$0xff]  ;;  %v3814_v27 = vsub.f32 %v17243_v7, %v12154_v31  ;;  %7964 = vrsqrt.f32 %v3836_v20 }
 0x9cf   :  { %4006 = vrot.lane.b32.xlu0 %v12278_v34, %s8159_s18  ;;  %4356 = vrot.lane.b32.xlu1 %v12254_v40, %s8156_s16  ;;  %v3693_v5 = vadd.f32 %v11996_v45, %v17237_v4  ;;  %17238 = vst [vmem:[#allocation45_spill] sm:$0xff] %v12300_v0  ;;  %v3785_v40 = vsub.f32 %v17240_v61, %v12190_v12 }
 0x9d0   :  { %v3741_v18 = vmul.f32 %v12302_v42, %v12302_v42 }
 0x9d1   :  { %v12290_v29 = vpop.permute.xlu0 %4022  ;;  %v12296_v50 = vpop.permute.xlu1 %4312  ;;  %v12314_v4 = vmul.f32 %v7963_v1, %v3785_v40  ;;  %v17246_v40 = vld [vmem:[#allocation59_spill] sm:$0xff] }
 0x9d2   :  { %17235 = vst [vmem:[#allocation76_spill] sm:$0xff] %v12290_v29  ;;  %v3725_v29 = vmul.f32 0.001953125, %v3693_v5  ;;  %v12324_v5 = vmul.f32 %v7961_v37, %v3814_v27  ;;  %v3815_v7 = vsub.f32 %v17246_v40, %v12154_v31  ;;  %v17250_v31 = vld [vmem:[#allocation58_spill] sm:$0xff]  ;;  %v17253_v40 = vld [vmem:[#allocation80_spill] sm:$0xff] }
 0x9d3   :  { %4262 = vrot.lane.b32.xlu0 %v12264_v30, %s8156_s16  ;;  %3944 = vrot.lane.b32.xlu1 %v12300_v0, %s8159_s18  ;;  %17242 = vst [vmem:[#allocation64_spill] sm:$0xff] %v12314_v4  ;;  %v3816_v27 = vsub.f32 %v17250_v31, %v12190_v12  ;;  %v17256_v31 = vld [vmem:[#allocation71_spill] sm:$0xff] }
 0x9d4   :  { %17245 = vst [vmem:[#allocation54_spill] sm:$0xff] %v12324_v5  ;;  %v3757_v61 = vsub.f32 %v3725_v29, %v3741_v18 }
 0x9d5   :  { %v12306_v41 = vpop.permute.xlu0 %4278  ;;  %v12310_v45 = vpop.permute.xlu1 %3960 }
 0x9d6   :  { %17239 = vst [vmem:[#allocation65_spill] sm:$0xff] %v12306_v41  ;;  %17241 = vst [vmem:[#allocation74_spill] sm:$0xff] %v12310_v45  ;;  %v3837_v41 = vadd.f32 1e-05, %v3757_v61 }
 0x9d7   :  { %4326 = vrot.lane.b32.xlu0 %v12278_v34, %s8156_s16  ;;  %4008 = vrot.lane.b32.xlu1 %v12314_v4, %s8159_s18  ;;  %v12336_v34 = vmul.f32 %v7961_v37, %v3815_v7  ;;  %v12352_v37 = vmul.f32 %v7963_v1, %v3816_v27  ;;  %v3817_v7 = vsub.f32 %v17253_v40, %v12190_v12  ;;  %v17260_v12 = vld [vmem:[#allocation73_spill] sm:$0xff] }
 0x9d8   :  { %7966 = vrsqrt.f32 %v3837_v41  ;;  %v3786_v27 = vsub.f32 %v17256_v31, %v12266_v44  ;;  %v3787_v40 = vsub.f32 %v17260_v12, %v12266_v44  ;;  %v17265_v12 = vld [vmem:[#allocation72_spill] sm:$0xff] }
 0x9d9   :  { %v12322_v30 = vpop.permute.xlu0 %4342  ;;  %v12326_v45 = vpop.permute.xlu1 %4024  ;;  %17248 = vst [vmem:[#allocation96_spill] sm:$0xff] %v12336_v34  ;;  %17251 = vst [vmem:[#allocation58_spill] sm:$0xff] %v12352_v37  ;;  %v12364_v41 = vmul.f32 %v7963_v1, %v3817_v7 }
 0x9da   :  { %17244 = vst [vmem:[#allocation48_spill] sm:$0xff] %v12322_v30 }
 0x9db   :  { %3974 = vrot.lane.b32.xlu0 %v12324_v5, %s8159_s18  ;;  %4264 = vrot.lane.b32.xlu1 %v12300_v0, %s8156_s16  ;;  %17255 = vst [vmem:[#allocation99_spill] sm:$0xff] %v12364_v41 }
 0x9dd   :  { %v12334_v20 = vpop.permute.xlu0 %3930  ;;  %v12338_v30 = vpop.permute.xlu1 %4280 }
 0x9de   :  { %17247 = vst [vmem:[#allocation59_spill] sm:$0xff] %v12334_v20 }
 0x9df   :  { %4038 = vrot.lane.b32.xlu0 %v12336_v34, %s8159_s18  ;;  %4328 = vrot.lane.b32.xlu1 %v12314_v4, %s8156_s16  ;;  %v7965_v4 = vpop.eup %7964 }
 0x9e0   :  { %v12384_v7 = vmul.f32 %v7965_v4, %v3787_v40 }
 0x9e1   :  { %v12344_v29 = vpop.permute.xlu0 %3994  ;;  %v12348_v18 = vpop.permute.xlu1 %4344 }
 0x9e2   :  { %17249 = vst [vmem:[#allocation97_spill] sm:$0xff] %v12344_v29  ;;  %17262 = vst [vmem:[#allocation102_spill] sm:$0xff] %v12384_v7 }
 0x9e3   :  { %4294 = vrot.lane.b32.xlu0 %v12324_v5, %s8156_s16  ;;  %3976 = vrot.lane.b32.xlu1 %v12352_v37, %s8159_s18 }
 0x9e5   :  { %v12356_v61 = vpop.permute.xlu0 %4250  ;;  %v12360_v0 = vpop.permute.xlu1 %3932 }
 0x9e6   :  { %17252 = vst [vmem:[#allocation98_spill] sm:$0xff] %v12356_v61  ;;  %17254 = vst [vmem:[#allocation80_spill] sm:$0xff] %v12360_v0  ;;  %v12372_v61 = vmul.f32 %v7965_v4, %v3786_v27  ;;  %v7967_v27 = vpop.eup %7966  ;;  %v3788_v0 = vsub.f32 %v17265_v12, %v12302_v42 }
 0x9e7   :  { %4358 = vrot.lane.b32.xlu0 %v12336_v34, %s8156_s16  ;;  %4040 = vrot.lane.b32.xlu1 %v12364_v41, %s8159_s18 }
 0x9e8   :  { %17258 = vst [vmem:[#allocation100_spill] sm:$0xff] %v12372_v61  ;;  %v12400_v40 = vmul.f32 %v7967_v27, %v3788_v0 }
 0x9e9   :  { %v12370_v5 = vpop.permute.xlu0 %4314  ;;  %v12374_v20 = vpop.permute.xlu1 %3996 }
 0x9ea   :  { %17257 = vst [vmem:[#allocation71_spill] sm:$0xff] %v12370_v5  ;;  %17259 = vst [vmem:[#allocation101_spill] sm:$0xff] %v12374_v20  ;;  %v17291_v5 = vld [vmem:[#allocation9_spill] sm:$0xff] }
 0x9eb   :  { %3946 = vrot.lane.b32.xlu0 %v12372_v61, %s8159_s18  ;;  %4296 = vrot.lane.b32.xlu1 %v12352_v37, %s8156_s16  ;;  %17267 = vst [vmem:[#allocation105_spill] sm:$0xff] %v12400_v40 }
 0x9ed   :  { %v12382_v1 = vpop.permute.xlu0 %3962  ;;  %v12386_v31 = vpop.permute.xlu1 %4252 }
 0x9ee   :  { %17261 = vst [vmem:[#allocation73_spill] sm:$0xff] %v12382_v1  ;;  %17263 = vst [vmem:[#allocation103_spill] sm:$0xff] %v12386_v31  ;;  %v17269_v1 = vld [vmem:[#allocation75_spill] sm:$0xff] }
 0x9ef   :  { %4010 = vrot.lane.b32.xlu0 %v12384_v7, %s8159_s18  ;;  %4360 = vrot.lane.b32.xlu1 %v12364_v41, %s8156_s16  ;;  %v3789_v41 = vsub.f32 %v17269_v1, %v12302_v42  ;;  %v17276_v1 = vld [vmem:[#allocation33_spill] sm:$0xff] }
 0x9f1   :  { %v12392_v34 = vpop.permute.xlu0 %4026  ;;  %v12396_v20 = vpop.permute.xlu1 %4316  ;;  %v12412_v12 = vmul.f32 %v7967_v27, %v3789_v41 }
 0x9f2   :  { %17264 = vst [vmem:[#allocation104_spill] sm:$0xff] %v12392_v34  ;;  %17266 = vst [vmem:[#allocation72_spill] sm:$0xff] %v12396_v20  ;;  %v17272_v34 = vld [vmem:[#allocation81_spill] sm:$0xff] }
 0x9f3   :  { %4266 = vrot.lane.b32.xlu0 %v12372_v61, %s8156_s16  ;;  %3948 = vrot.lane.b32.xlu1 %v12400_v40, %s8159_s18  ;;  %17271 = vst [vmem:[#allocation107_spill] sm:$0xff] %v12412_v12  ;;  %v3818_v61 = vsub.f32 %v17272_v34, %v12266_v44 }
 0x9f5   :  { %v12404_v37 = vpop.permute.xlu0 %4282  ;;  %v12408_v31 = vpop.permute.xlu1 %3964  ;;  %v12420_v20 = vmul.f32 %v7965_v4, %v3818_v61  ;;  %v17280_v61 = vld [vmem:[#allocation4_spill] sm:$0xff] }
 0x9f6   :  { %17268 = vst [vmem:[#allocation106_spill] sm:$0xff] %v12404_v37  ;;  %17270 = vst [vmem:[#allocation75_spill] sm:$0xff] %v12408_v31  ;;  %vm17281_vm5 = vcmp.lt.s32.totalorder %v17280_v61, 112  ;;  %vm17284_vm7 = vcmp.lt.s32.totalorder %v17280_v61, 16  ;;  %vm17297_vm14 = vcmp.lt.s32.totalorder %v17280_v61, 112  ;;  %vm17301_vm3 = vcmp.lt.s32.totalorder %v17280_v61, 16 }
 0x9f7   :  { %4330 = vrot.lane.b32.xlu0 %v12384_v7, %s8156_s16  ;;  %4012 = vrot.lane.b32.xlu1 %v12412_v12, %s8159_s18  ;;  %17274 = vst [vmem:[#allocation108_spill] sm:$0xff] %v12420_v20  ;;  %v3819_v7 = vsub.f32 %v17276_v1, %v12266_v44  ;;  %v17283_v1 = vld [vmem:[#allocation32_spill] sm:$0xff]  ;;  %vm17289_vm15 = vmmov %vm17281_vm5  ;;  %vm17580_vm4 = vcmp.lt.s32.totalorder %v17280_v61, 1 }
 0x9f8   :  { %vm17302_vm8 = vmmov %vm17301_vm3 }
 0x9f9   :  { %v12418_v0 = vpop.permute.xlu0 %4346  ;;  %v12422_v37 = vpop.permute.xlu1 %4028  ;;  %v12432_v34 = vmul.f32 %v7965_v4, %v3819_v7  ;;  %v4398_v4 = vsel %vm17284_vm7, %v12038_v46, %v12020_v39 }
 0x9fa   :  { %17273 = vst [vmem:[#allocation81_spill] sm:$0xff] %v12418_v0  ;;  %17275 = vst [vmem:[#allocation109_spill] sm:$0xff] %v12422_v37  ;;  %v4046_v37 = vsel %vm17281_vm5, %v12012_v23, %v12008_v13  ;;  %vm17292_vm5 = vnez %v17291_v5 }
 0x9fb   :  { %3978 = vrot.lane.b32.xlu0 %v12420_v20, %s8159_s18  ;;  %4268 = vrot.lane.b32.xlu1 %v12400_v40, %s8156_s16  ;;  %17278 = vst [vmem:[#allocation110_spill] sm:$0xff] %v12432_v34  ;;  %v3820_v40 = vsub.f32 %v17283_v1, %v12302_v42  ;;  %v4078_v1 = vsel %vm17289_vm15, %v12008_v13, %v12012_v23  ;;  %v17294_v23 = vld [vmem:[#allocation13_spill] sm:$0xff] }
 0x9fc   :  { %vm17295_vm15 = vnez %v17294_v23 }
 0x9fd   :  { %v12430_v41 = vpop.permute.xlu0 %3934  ;;  %v12434_v31 = vpop.permute.xlu1 %4284 }
 0x9fe   :  { %17277 = vst [vmem:[#allocation33_spill] sm:$0xff] %v12430_v41  ;;  %17279 = vst [vmem:[#allocation111_spill] sm:$0xff] %v12434_v31  ;;  %v12456_v41 = vmul.f32 %v7967_v27, %v3820_v40  ;;  %v17287_v31 = vld [vmem:[#allocation12_spill] sm:$0xff]  ;;  %v4430_v40 = vsel %vm17292_vm5, %v4398_v4, -inf }
 0x9ff   :  { %4042 = vrot.lane.b32.xlu0 %v12432_v34, %s8159_s18  ;;  %4332 = vrot.lane.b32.xlu1 %v12412_v12, %s8156_s16  ;;  %vm17288_vm10 = vnez %v17287_v31 }
 0xa00   :  { %17286 = vst [vmem:[#allocation112_spill] sm:$0xff] %v12456_v41  ;;  %v4110_v12 = vsel %vm17288_vm10, %v4046_v37, -inf  ;;  %v4366_v37 = vsel %vm17284_vm7, %v12020_v39, %v12038_v46  ;;  %v17298_v46 = vld [vmem:[#allocation11_spill] sm:$0xff] }
 0xa01   :  { %v12444_v44 = vpop.permute.xlu0 %3998  ;;  %v12452_v7 = vpop.permute.xlu1 %4348  ;;  %vm17299_vm7 = vnez %v17298_v46 }
 0xa02   :  { %17282 = vst [vmem:[#allocation4_spill] sm:$0xff] %v12444_v44  ;;  %17285 = vst [vmem:[#allocation32_spill] sm:$0xff] %v12452_v7  ;;  %v17290_v7 = vld [vmem:[#allocation61_spill] sm:$0xff] }
 0xa03   :  { %4298 = vrot.lane.b32.xlu0 %v12420_v20, %s8156_s16  ;;  %3980 = vrot.lane.b32.xlu1 %v12456_v41, %s8159_s18  ;;  %v3821_v0 = vsub.f32 %v17290_v7, %v12302_v42  ;;  %v4174_v20 = vmax.f32 %v11713_v53, %v4110_v12  ;;  %v4111_v42 = vsel %vm17295_vm15, %v4078_v1, -inf  ;;  %v4047_v53 = vsel %vm17297_vm14, %v12110_v49, %v12026_v58 }
 0xa04   :  { %v4431_v12 = vsel %vm17299_vm7, %v4366_v37, -inf  ;;  %v4079_v1 = vsel %vm17297_vm14, %v12026_v58, %v12110_v49  ;;  %v4062_v49 = vsel %vm17297_vm14, %v12052_v28, %v12066_v62 }
 0xa05   :  { %v12466_v44 = vpop.permute.xlu0 %4254  ;;  %v12477_v29 = vpop.permute.xlu1 %3936  ;;  %v12481_v13 = vmul.f32 %v7967_v27, %v3821_v0  ;;  %v12485_v7 = vmax.f32 %v4174_v20, %v4430_v40  ;;  %v4175_v27 = vmax.f32 %v11715_v54, %v4111_v42  ;;  %v4112_v20 = vsel %vm17288_vm10, %v4047_v53, -inf }
 0xa06   :  { %v4399_v54 = vsel %vm17301_vm3, %v12058_v15, %v12044_v21  ;;  %v4176_v37 = vmax.f32 %v11738_v33, %v4112_v20  ;;  %v4113_v58 = vsel %vm17295_vm15, %v4079_v1, -inf }
 0xa07   :  { %4362 = vrot.lane.b32.xlu0 %v12432_v34, %s8156_s16  ;;  %17293 = vst [vmem:[#allocation61_spill] sm:$0xff] %v12481_v13  ;;  %17296 = vst [vmem:[#allocation113_spill] sm:$0xff] %v12485_v7  ;;  %4044 = vrot.lane.b32.xlu1 %v12481_v13, %s8159_s18  ;;  %v12504_v4 = vmax.f32 %v4175_v27, %v4431_v12  ;;  %v4432_v33 = vsel %vm17292_vm5, %v4399_v54, -inf  ;;  %v4367_v12 = vsel %vm17301_vm3, %v12044_v21, %v12058_v15  ;;  %v17619_v23 = vld [vmem:[#allocation112_spill] sm:$0xff] }
 0xa08   :  { %v4414_v27 = vsel %vm17302_vm8, %v12098_v22, %v12082_v59  ;;  %v4177_v20 = vmax.f32 %v11729_v32, %v4113_v58  ;;  %v4142_v54 = vsel %vm17288_vm10, %v4062_v49, -inf  ;;  %v4094_v21 = vsel %vm17297_vm14, %v12066_v62, %v12052_v28  ;;  %vm17304_vm8 = vmmov %vm17301_vm3 }
 0xa09   :  { %v12493_v39 = vpop.permute.xlu0 %4318  ;;  %v12498_v0 = vpop.permute.xlu1 %4000  ;;  %17300 = vst [vmem:[#allocation114_spill] sm:$0xff] %v12504_v4  ;;  %v4433_v32 = vsel %vm17299_vm7, %v4367_v12, -inf  ;;  %v4206_v58 = vmax.f32 %v11745_v19, %v4142_v54  ;;  %v4382_v49 = vsel %vm17304_vm8, %v12082_v59, %v12098_v22  ;;  %v4143_v62 = vsel %vm17295_vm15, %v4094_v21, -inf  ;;  %vm17307_vm3 = vmmov %vm17297_vm14 }
 0xa0a   :  { %v12573_v28 = vmax.f32 %v4177_v20, %v4433_v32  ;;  %v4463_v22 = vsel %vm17299_vm7, %v4382_v49, -inf  ;;  %v4207_v59 = vmax.f32 %v11752_v52, %v4143_v62  ;;  %vm17309_vm14 = vmmov %vm17304_vm8 }
 0xa0b   :  { %4558 = vrot.lane.b32.xlu0 %v12485_v7, %s8155_s15  ;;  %4300 = vrot.lane.b32.xlu1 %v12456_v41, %s8156_s16  ;;  %v4415_v21 = vsel %vm17309_vm14, %v12114_v6, %v12102_v38  ;;  %vm17310_vm8 = vmmov %vm17307_vm3 }
 0xa0c   :  { %17305 = vst [vmem:[#allocation116_spill] sm:$0xff] %v12573_v28  ;;  %v12594_v54 = vmax.f32 %v4207_v59, %v4463_v22  ;;  %v4464_v49 = vsel %vm17292_vm5, %v4415_v21, -inf }
 0xa0d   :  { %v12512_v40 = vpop.permute.xlu0 %3966  ;;  %v12519_v42 = vpop.permute.xlu1 %4256 }
 0xa0e   :  { %17308 = vst [vmem:[#allocation118_spill] sm:$0xff] %v12594_v54 }
 0xa0f   :  { %4622 = vrot.lane.b32.xlu0 %v12504_v4, %s8155_s15  ;;  %4364 = vrot.lane.b32.xlu1 %v12481_v13, %s8156_s16  ;;  %v12548_v13 = vmax.f32 %v4176_v37, %v4432_v33  ;;  %v4462_v37 = vsel %vm17292_vm5, %v4414_v27, -inf  ;;  %v4063_v27 = vsel %vm17307_vm3, %v12072_v9, %v12086_v11  ;;  %vm17311_vm3 = vmmov %vm17309_vm14 }
 0xa10   :  { %v12577_v12 = vmax.f32 %v4206_v58, %v4462_v37  ;;  %v4144_v32 = vsel %vm17288_vm10, %v4063_v27, -inf  ;;  %v4095_v37 = vsel %vm17310_vm8, %v12086_v11, %v12072_v9  ;;  %v4383_v22 = vsel %vm17311_vm3, %v12102_v38, %v12114_v6  ;;  %vm17312_vm14 = vmmov %vm17310_vm8 }
 0xa11   :  { %v12531_v53 = vpop.permute.xlu0 %4030  ;;  %v12544_v1 = vpop.permute.xlu1 %4320  ;;  %17303 = vst [vmem:[#allocation115_spill] sm:$0xff] %v12548_v13  ;;  %v4208_v62 = vmax.f32 %v11757_v17, %v4144_v32  ;;  %v4048_v9 = vsel %vm17312_vm14, %v12124_v47, %v12120_v2  ;;  %v4145_v59 = vsel %vm17295_vm15, %v4095_v37, -inf  ;;  %vm17314_vm8 = vmmov %vm17311_vm3  ;;  %v4465_v38 = vsel %vm17299_vm7, %v4383_v22, -inf }
 0xa12   :  { %17306 = vst [vmem:[#allocation117_spill] sm:$0xff] %v12577_v12  ;;  %v4400_v17 = vsel %vm17314_vm8, %v12150_v10, %v12132_v3  ;;  %v4114_v21 = vsel %vm17288_vm10, %v4048_v9, -inf  ;;  %v4209_v32 = vmax.f32 %v11764_v8, %v4145_v59  ;;  %vm17315_vm3 = vmmov %vm17312_vm14 }
 0xa13   :  { %4878 = vrot.lane.b32.xlu0 %v12485_v7, %s8157_s17  ;;  %4560 = vrot.lane.b32.xlu1 %v12548_v13, %s8155_s15  ;;  %v12631_v27 = vmax.f32 %v4208_v62, %v4464_v49  ;;  %v4080_v37 = vsel %vm17315_vm3, %v12120_v2, %v12124_v47  ;;  %v4434_v62 = vsel %vm17292_vm5, %v4400_v17, -inf  ;;  %v4178_v22 = vmax.f32 %v11790_v57, %v4114_v21  ;;  %vm17317_vm14 = vmmov %vm17314_vm8 }
 0xa14   :  { %v12656_v41 = vmax.f32 %v4209_v32, %v4465_v38  ;;  %v4368_v8 = vsel %vm17317_vm14, %v12132_v3, %v12150_v10  ;;  %v4115_v2 = vsel %vm17295_vm15, %v4080_v37, -inf  ;;  %vm17319_vm8 = vmmov %vm17315_vm3 }
 0xa15   :  { %v12558_v15 = vpop.permute.xlu0 %4286  ;;  %v12569_v33 = vpop.permute.xlu1 %3968  ;;  %17313 = vst [vmem:[#allocation119_spill] sm:$0xff] %v12631_v27  ;;  %v12669_v47 = vmax.f32 %v4178_v22, %v4434_v62  ;;  %v4435_v57 = vsel %vm17299_vm7, %v4368_v8, -inf  ;;  %v4179_v3 = vmax.f32 %v11782_v24, %v4115_v2  ;;  %v4049_v10 = vsel %vm17319_vm8, %v12138_v14, %v12156_v43  ;;  %vm17321_vm3 = vmmov %vm17317_vm14 }
 0xa16   :  { %17316 = vst [vmem:[#allocation120_spill] sm:$0xff] %v12656_v41  ;;  %v4401_v21 = vsel %vm17321_vm3, %v12184_v51, %v12170_v48  ;;  %v4116_v32 = vsel %vm17288_vm10, %v4049_v10, -inf  ;;  %vm17322_vm14 = vmmov %vm17319_vm8  ;;  %v4064_v2 = vsel %vm17319_vm8, %v12164_v55, %v12178_v60 }
 0xa17   :  { %4942 = vrot.lane.b32.xlu0 %v12504_v4, %s8157_s17  ;;  %4624 = vrot.lane.b32.xlu1 %v12573_v28, %s8155_s15  ;;  %17318 = vst [vmem:[#allocation121_spill] sm:$0xff] %v12669_v47  ;;  %v12686_v38 = vmax.f32 %v4179_v3, %v4435_v57  ;;  %v4081_v37 = vsel %vm17322_vm14, %v12156_v43, %v12138_v14  ;;  %v4436_v22 = vsel %vm17292_vm5, %v4401_v21, -inf  ;;  %vm17324_vm14 = vmmov %vm17321_vm3 }
 0xa18   :  { %v4180_v8 = vmax.f32 %v11800_v35, %v4116_v32  ;;  %v4369_v14 = vsel %vm17321_vm3, %v12170_v48, %v12184_v51  ;;  %v4117_v57 = vsel %vm17295_vm15, %v4081_v37, -inf  ;;  %v4416_v35 = vsel %vm17324_vm14, %v12210_v56, %v12194_v26  ;;  %vm17330_vm14 = vmmov %vm17319_vm8 }
 0xa19   :  { %v12581_v19 = vpop.permute.xlu0 %4350  ;;  %v12590_v20 = vpop.permute.xlu1 %4032  ;;  %17320 = vst [vmem:[#allocation122_spill] sm:$0xff] %v12686_v38  ;;  %v4146_v51 = vsel %vm17288_vm10, %v4064_v2, -inf  ;;  %v4437_v48 = vsel %vm17299_vm7, %v4369_v14, -inf  ;;  %v4181_v21 = vmax.f32 %v11810_v25, %v4117_v57  ;;  %v4096_v32 = vsel %vm17319_vm8, %v12178_v60, %v12164_v55  ;;  %vm17332_vm8 = vmmov %vm17321_vm3 }
 0xa1a   :  { %v12723_v3 = vmax.f32 %v4180_v8, %v4436_v22  ;;  %v4466_v22 = vsel %vm17292_vm5, %v4416_v35, -inf  ;;  %v17325_v8 = vld [vmem:[#allocation82_spill] sm:$0xff]  ;;  %v4384_v25 = vsel %vm17321_vm3, %v12194_v26, %v12210_v56  ;;  %v4147_v55 = vsel %vm17295_vm15, %v4096_v32, -inf  ;;  %v17329_v26 = vld [vmem:[#allocation51_spill] sm:$0xff]  ;;  %vm17333_vm3 = vmmov %vm17330_vm14 }
 0xa1b   :  { %4590 = vrot.lane.b32.xlu0 %v12577_v12, %s8155_s15  ;;  %4880 = vrot.lane.b32.xlu1 %v12548_v13, %s8157_s17  ;;  %v4210_v2 = vmax.f32 %v17325_v8, %v4146_v51  ;;  %v4467_v35 = vsel %vm17299_vm7, %v4384_v25, -inf  ;;  %v17328_v51 = vld [vmem:[#allocation83_spill] sm:$0xff]  ;;  %v4097_v25 = vsel %vm17333_vm3, %v12214_v16, %v17329_v26  ;;  %v17359_v13 = vld [vmem:[#allocation56_spill] sm:$0xff] }
 0xa1c   :  { %17323 = vst [vmem:[#allocation123_spill] sm:$0xff] %v12723_v3  ;;  %v4211_v56 = vmax.f32 %v17328_v51, %v4147_v55  ;;  %v17334_v51 = vld [vmem:[#allocation84_spill] sm:$0xff] }
 0xa1d   :  { %v12602_v52 = vpop.permute.xlu0 %3938  ;;  %v12610_v58 = vpop.permute.xlu1 %4288  ;;  %v12761_v60 = vmax.f32 %v4210_v2, %v4466_v22  ;;  %v4417_v22 = vsel %vm17332_vm8, %v12236_v36, %v12226_v63 }
 0xa1e   :  { %v12778_v32 = vmax.f32 %v4211_v56, %v4467_v35  ;;  %v4468_v35 = vsel %vm17292_vm5, %v4417_v22, -inf  ;;  %v4149_v22 = vsel %vm17295_vm15, %v4097_v25, -inf }
 0xa1f   :  { %4654 = vrot.lane.b32.xlu0 %v12594_v54, %s8155_s15  ;;  %4944 = vrot.lane.b32.xlu1 %v12573_v28, %s8157_s17  ;;  %17327 = vst [vmem:[#allocation124_spill] sm:$0xff] %v12761_v60  ;;  %v17358_v28 = vld [vmem:[#allocation76_spill] sm:$0xff] }
 0xa20   :  { %17331 = vst [vmem:[#allocation83_spill] sm:$0xff] %v12778_v32 }
 0xa21   :  { %v12627_v11 = vpop.permute.xlu0 %4002  ;;  %v12637_v6 = vpop.permute.xlu1 %4352 }
 0xa23   :  { %4910 = vrot.lane.b32.xlu0 %v12577_v12, %s8157_s17  ;;  %4592 = vrot.lane.b32.xlu1 %v12631_v27, %s8155_s15 }
 0xa25   :  { %v12652_v49 = vpop.permute.xlu0 %4258  ;;  %v12663_v9 = vpop.permute.xlu1 %3940 }
 0xa27   :  { %4974 = vrot.lane.b32.xlu0 %v12594_v54, %s8157_s17  ;;  %4656 = vrot.lane.b32.xlu1 %v12656_v41, %s8155_s15  ;;  %v17343_v54 = vld [vmem:[#allocation86_spill] sm:$0xff] }
 0xa29   :  { %v12673_v59 = vpop.permute.xlu0 %4322  ;;  %v12682_v17 = vpop.permute.xlu1 %4004 }
 0xa2b   :  { %4562 = vrot.lane.b32.xlu0 %v12669_v47, %s8155_s15  ;;  %4912 = vrot.lane.b32.xlu1 %v12631_v27, %s8157_s17 }
 0xa2d   :  { %v12694_v24 = vpop.permute.xlu0 %3970  ;;  %v12702_v62 = vpop.permute.xlu1 %4260 }
 0xa2f   :  { %4626 = vrot.lane.b32.xlu0 %v12686_v38, %s8155_s15  ;;  %4976 = vrot.lane.b32.xlu1 %v12656_v41, %s8157_s17 }
 0xa31   :  { %v12719_v43 = vpop.permute.xlu0 %4034  ;;  %v12729_v10 = vpop.permute.xlu1 %4324 }
 0xa33   :  { %4882 = vrot.lane.b32.xlu0 %v12669_v47, %s8157_s17  ;;  %4564 = vrot.lane.b32.xlu1 %v12723_v3, %s8155_s15  ;;  %v12749_v47 = vmax.f32 %v4181_v21, %v4437_v48  ;;  %v4065_v48 = vsel %vm17330_vm14, %v17329_v26, %v12214_v16  ;;  %vm17337_vm14 = vmmov %vm17333_vm3  ;;  %v4385_v16 = vsel %vm17332_vm8, %v12226_v63, %v12236_v36 }
 0xa34   :  { %v4148_v2 = vsel %vm17288_vm10, %v4065_v48, -inf  ;;  %vm17341_vm3 = vmmov %vm17332_vm8  ;;  %v4469_v36 = vsel %vm17299_vm7, %v4385_v16, -inf }
 0xa35   :  { %v12744_v37 = vpop.permute.xlu0 %4290  ;;  %17326 = vst [vmem:[#allocation82_spill] sm:$0xff] %v12749_v47  ;;  %v12755_v14 = vpop.permute.xlu1 %3972  ;;  %v4212_v56 = vmax.f32 %v17334_v51, %v4148_v2  ;;  %v17339_v2 = vld [vmem:[#allocation35_spill] sm:$0xff]  ;;  %vm17345_vm8 = vmmov %vm17341_vm3 }
 0xa36   :  { %v17340_v51 = vld [vmem:[#allocation55_spill] sm:$0xff] }
 0xa37   :  { %4946 = vrot.lane.b32.xlu0 %v12686_v38, %s8157_s17  ;;  %4628 = vrot.lane.b32.xlu1 %v12749_v47, %s8155_s15  ;;  %v17336_v38 = vld [vmem:[#allocation42_spill] sm:$0xff]  ;;  %v12815_v34 = vmax.f32 %v4212_v56, %v4468_v35  ;;  %v4402_v41 = vsel %vm17341_vm3, %v17340_v51, %v17339_v2  ;;  %vm17350_vm3 = vmmov %vm17337_vm14 }
 0xa39   :  { %v12765_v57 = vpop.permute.xlu0 %4354  ;;  %v12774_v21 = vpop.permute.xlu1 %4036  ;;  %17338 = vst [vmem:[#allocation51_spill] sm:$0xff] %v12815_v34 }
 0xa3b   :  { %4594 = vrot.lane.b32.xlu0 %v12761_v60, %s8155_s15  ;;  %4884 = vrot.lane.b32.xlu1 %v12723_v3, %s8157_s17  ;;  %v17335_v3 = vld [vmem:[#allocation44_spill] sm:$0xff] }
 0xa3c   :  { %v4050_v48 = vsel %vm17337_vm14, %v17336_v38, %v17335_v3  ;;  %v4082_v35 = vsel %vm17337_vm14, %v17335_v3, %v17336_v38  ;;  %vm17353_vm14 = vmmov %vm17345_vm8 }
 0xa3d   :  { %v12786_v8 = vpop.permute.xlu0 %3942  ;;  %v12794_v55 = vpop.permute.xlu1 %4292  ;;  %v4118_v63 = vsel %vm17288_vm10, %v4050_v48, -inf  ;;  %v4119_v38 = vsel %vm17295_vm15, %v4082_v35, -inf  ;;  %v17352_v35 = vld [vmem:[#allocation43_spill] sm:$0xff] }
 0xa3e   :  { %v4182_v48 = vmax.f32 %v17343_v54, %v4118_v63  ;;  %v17349_v63 = vld [vmem:[#allocation77_spill] sm:$0xff] }
 0xa3f   :  { %4658 = vrot.lane.b32.xlu0 %v12778_v32, %s8155_s15  ;;  %4948 = vrot.lane.b32.xlu1 %v12749_v47, %s8157_s17  ;;  %v17342_v47 = vld [vmem:[#allocation85_spill] sm:$0xff] }
 0xa40   :  { %v4213_v25 = vmax.f32 %v17342_v47, %v4149_v22  ;;  %v4370_v47 = vsel %vm17345_vm8, %v17339_v2, %v17340_v51  ;;  %v17347_v22 = vld [vmem:[#allocation87_spill] sm:$0xff]  ;;  %v17348_v51 = vld [vmem:[#allocation34_spill] sm:$0xff]  ;;  %vm17355_vm8 = vmmov %vm17350_vm3 }
 0xa41   :  { %v12811_v26 = vpop.permute.xlu0 %4006  ;;  %v12821_v27 = vpop.permute.xlu1 %4356  ;;  %v4439_v54 = vsel %vm17299_vm7, %v4370_v47, -inf  ;;  %v4183_v2 = vmax.f32 %v17347_v22, %v4119_v38  ;;  %v4083_v22 = vsel %vm17355_vm8, %v17348_v51, %v17349_v63  ;;  %vm17363_vm8 = vmmov %vm17353_vm14 }
 0xa42   :  { %v12841_v12 = vmax.f32 %v4213_v25, %v4469_v36  ;;  %v4051_v36 = vsel %vm17350_vm3, %v17349_v63, %v17348_v51  ;;  %v4371_v51 = vsel %vm17353_vm14, %v17352_v35, %v12296_v50 }
 0xa43   :  { %4914 = vrot.lane.b32.xlu0 %v12761_v60, %s8157_s17  ;;  %4596 = vrot.lane.b32.xlu1 %v12815_v34, %s8155_s15  ;;  %v4438_v60 = vsel %vm17292_vm5, %v4402_v41, -inf  ;;  %v4120_v38 = vsel %vm17288_vm10, %v4051_v36, -inf  ;;  %v4066_v36 = vsel %vm17350_vm3, %v17359_v13, %v17358_v28 }
 0xa44   :  { %17344 = vst [vmem:[#allocation84_spill] sm:$0xff] %v12841_v12  ;;  %v12853_v3 = vmax.f32 %v4182_v48, %v4438_v60  ;;  %v12870_v60 = vmax.f32 %v4183_v2, %v4439_v54  ;;  %v4403_v48 = vsel %vm17353_vm14, %v12296_v50, %v17352_v35  ;;  %v4150_v50 = vsel %vm17288_vm10, %v4066_v36, -inf  ;;  %vm17368_vm14 = vmmov %vm17363_vm8 }
 0xa45   :  { %v12836_v56 = vpop.permute.xlu0 %4262  ;;  %v12847_v16 = vpop.permute.xlu1 %3944  ;;  %v4440_v2 = vsel %vm17292_vm5, %v4403_v48, -inf  ;;  %v4121_v48 = vsel %vm17295_vm15, %v4083_v22, -inf  ;;  %v4441_v35 = vsel %vm17299_vm7, %v4371_v51, -inf }
 0xa46   :  { %17346 = vst [vmem:[#allocation44_spill] sm:$0xff] %v12853_v3  ;;  %17351 = vst [vmem:[#allocation42_spill] sm:$0xff] %v12870_v60 }
 0xa47   :  { %4978 = vrot.lane.b32.xlu0 %v12778_v32, %s8157_s17  ;;  %4660 = vrot.lane.b32.xlu1 %v12841_v12, %s8155_s15  ;;  %v17357_v32 = vld [vmem:[#allocation88_spill] sm:$0xff] }
 0xa49   :  { %v12857_v41 = vpop.permute.xlu0 %4326  ;;  %v12866_v25 = vpop.permute.xlu1 %4008 }
 0xa4b   :  { %4566 = vrot.lane.b32.xlu0 %v12853_v3, %s8155_s15  ;;  %4916 = vrot.lane.b32.xlu1 %v12815_v34, %s8157_s17  ;;  %v4184_v34 = vmax.f32 %v17357_v32, %v4120_v38  ;;  %v17361_v32 = vld [vmem:[#allocation65_spill] sm:$0xff]  ;;  %v17362_v38 = vld [vmem:[#allocation48_spill] sm:$0xff] }
 0xa4c   :  { %v4418_v7 = vsel %vm17363_vm8, %v17362_v38, %v17361_v32  ;;  %vm17373_vm8 = vmmov %vm17350_vm3 }
 0xa4d   :  { %v12878_v47 = vpop.permute.xlu0 %3974  ;;  %v12886_v54 = vpop.permute.xlu1 %4264  ;;  %v12907_v4 = vmax.f32 %v4184_v34, %v4440_v2  ;;  %v4098_v34 = vsel %vm17350_vm3, %v17358_v28, %v17359_v13  ;;  %vm17375_vm3 = vmmov %vm17368_vm14 }
 0xa4e   :  { %17354 = vst [vmem:[#allocation35_spill] sm:$0xff] %v12878_v47  ;;  %17356 = vst [vmem:[#allocation55_spill] sm:$0xff] %v12886_v54  ;;  %v4151_v13 = vsel %vm17295_vm15, %v4098_v34, -inf }
 0xa4f   :  { %4630 = vrot.lane.b32.xlu0 %v12870_v60, %s8155_s15  ;;  %4980 = vrot.lane.b32.xlu1 %v12841_v12, %s8157_s17  ;;  %17360 = vst [vmem:[#allocation85_spill] sm:$0xff] %v12907_v4  ;;  %v17365_v12 = vld [vmem:[#allocation89_spill] sm:$0xff] }
 0xa50   :  { %v4185_v22 = vmax.f32 %v17365_v12, %v4121_v48  ;;  %v4386_v12 = vsel %vm17368_vm14, %v17361_v32, %v17362_v38  ;;  %v17371_v48 = vld [vmem:[#allocation91_spill] sm:$0xff]  ;;  %v17372_v38 = vld [vmem:[#allocation74_spill] sm:$0xff]  ;;  %vm17377_vm14 = vmmov %vm17373_vm8 }
 0xa51   :  { %v12903_v63 = vpop.permute.xlu0 %4038  ;;  %v12913_v54 = vpop.permute.xlu1 %4328  ;;  %v4215_v32 = vmax.f32 %v17371_v48, %v4151_v13  ;;  %v17379_v48 = vld [vmem:[#allocation92_spill] sm:$0xff] }
 0xa52   :  { %17364 = vst [vmem:[#allocation86_spill] sm:$0xff] %v12913_v54  ;;  %v17366_v54 = vld [vmem:[#allocation90_spill] sm:$0xff]  ;;  %v12933_v47 = vmax.f32 %v4185_v22, %v4441_v35  ;;  %v4419_v22 = vsel %vm17375_vm3, %v12348_v18, %v12338_v30 }
 0xa53   :  { %4886 = vrot.lane.b32.xlu0 %v12853_v3, %s8157_s17  ;;  %4568 = vrot.lane.b32.xlu1 %v12907_v4, %s8155_s15  ;;  %v4470_v3 = vsel %vm17292_vm5, %v4418_v7, -inf  ;;  %v4214_v36 = vmax.f32 %v17366_v54, %v4150_v50  ;;  %v4471_v54 = vsel %vm17299_vm7, %v4386_v12, -inf  ;;  %v4067_v50 = vsel %vm17373_vm8, %v17372_v38, %v12326_v45 }
 0xa54   :  { %17367 = vst [vmem:[#allocation87_spill] sm:$0xff] %v12933_v47  ;;  %v4099_v12 = vsel %vm17377_vm14, %v12326_v45, %v17372_v38  ;;  %v4387_v45 = vsel %vm17375_vm3, %v12338_v30, %v12348_v18  ;;  %vm17386_vm14 = vmmov %vm17375_vm3 }
 0xa55   :  { %v12928_v2 = vpop.permute.xlu0 %4294  ;;  %v12939_v51 = vpop.permute.xlu1 %3976  ;;  %v12945_v28 = vmax.f32 %v4214_v36, %v4470_v3  ;;  %v12962_v3 = vmax.f32 %v4215_v32, %v4471_v54  ;;  %v4152_v36 = vsel %vm17288_vm10, %v4067_v50, -inf  ;;  %v4472_v54 = vsel %vm17292_vm5, %v4419_v22, -inf }
 0xa56   :  { %17369 = vst [vmem:[#allocation34_spill] sm:$0xff] %v12939_v51  ;;  %v4216_v32 = vmax.f32 %v17379_v48, %v4152_v36  ;;  %v4153_v22 = vsel %vm17295_vm15, %v4099_v12, -inf  ;;  %v17384_v36 = vld [vmem:[#allocation98_spill] sm:$0xff]  ;;  %v17385_v48 = vld [vmem:[#allocation71_spill] sm:$0xff]  ;;  %v4473_v18 = vsel %vm17299_vm7, %v4387_v45, -inf }
 0xa57   :  { %4950 = vrot.lane.b32.xlu0 %v12870_v60, %s8157_s17  ;;  %17370 = vst [vmem:[#allocation77_spill] sm:$0xff] %v12945_v28  ;;  %4632 = vrot.lane.b32.xlu1 %v12933_v47, %s8155_s15  ;;  %17374 = vst [vmem:[#allocation43_spill] sm:$0xff] %v12962_v3  ;;  %v17381_v60 = vld [vmem:[#allocation59_spill] sm:$0xff] }
 0xa59   :  { %v12949_v7 = vpop.permute.xlu0 %4358  ;;  %v12958_v35 = vpop.permute.xlu1 %4040 }
 0xa5b   :  { %4598 = vrot.lane.b32.xlu0 %v12945_v28, %s8155_s15  ;;  %4888 = vrot.lane.b32.xlu1 %v12907_v4, %s8157_s17  ;;  %v17380_v4 = vld [vmem:[#allocation97_spill] sm:$0xff] }
 0xa5c   :  { %v4052_v50 = vsel %vm17373_vm8, %v17381_v60, %v17380_v4 }
 0xa5d   :  { %v12970_v34 = vpop.permute.xlu0 %3946  ;;  %v12978_v13 = vpop.permute.xlu1 %4296  ;;  %v4122_v30 = vsel %vm17288_vm10, %v4052_v50, -inf }
 0xa5e   :  { %17376 = vst [vmem:[#allocation88_spill] sm:$0xff] %v12970_v34  ;;  %17378 = vst [vmem:[#allocation76_spill] sm:$0xff] %v12978_v13  ;;  %v12999_v13 = vmax.f32 %v4216_v32, %v4472_v54  ;;  %v4404_v34 = vsel %vm17386_vm14, %v17385_v48, %v17384_v36  ;;  %v4084_v54 = vsel %vm17373_vm8, %v17380_v4, %v17381_v60 }
 0xa5f   :  { %4662 = vrot.lane.b32.xlu0 %v12962_v3, %s8155_s15  ;;  %4952 = vrot.lane.b32.xlu1 %v12933_v47, %s8157_s17  ;;  %v17388_v47 = vld [vmem:[#allocation93_spill] sm:$0xff]  ;;  %v4123_v4 = vsel %vm17295_vm15, %v4084_v54, -inf  ;;  %vm17398_vm14 = vmmov %vm17373_vm8  ;;  %v17401_v54 = vld [vmem:[#allocation103_spill] sm:$0xff] }
 0xa60   :  { %17383 = vst [vmem:[#allocation65_spill] sm:$0xff] %v12999_v13  ;;  %v4217_v12 = vmax.f32 %v17388_v47, %v4153_v22  ;;  %v4372_v47 = vsel %vm17375_vm3, %v17384_v36, %v17385_v48  ;;  %v17395_v22 = vld [vmem:[#allocation95_spill] sm:$0xff]  ;;  %v17396_v48 = vld [vmem:[#allocation101_spill] sm:$0xff]  ;;  %vm17403_vm8 = vmmov %vm17375_vm3 }
 0xa61   :  { %v12995_v38 = vpop.permute.xlu0 %4010  ;;  %v13005_v51 = vpop.permute.xlu1 %4360  ;;  %v4187_v36 = vmax.f32 %v17395_v22, %v4123_v4  ;;  %vm17405_vm3 = vmmov %vm17398_vm14 }
 0xa62   :  { %17382 = vst [vmem:[#allocation56_spill] sm:$0xff] %v12995_v38  ;;  %17387 = vst [vmem:[#allocation48_spill] sm:$0xff] %v13005_v51  ;;  %v17390_v51 = vld [vmem:[#allocation94_spill] sm:$0xff]  ;;  %v13025_v38 = vmax.f32 %v4217_v12, %v4473_v18 }
 0xa63   :  { %4918 = vrot.lane.b32.xlu0 %v12945_v28, %s8157_s17  ;;  %4600 = vrot.lane.b32.xlu1 %v12999_v13, %s8155_s15  ;;  %v4442_v28 = vsel %vm17292_vm5, %v4404_v34, -inf  ;;  %v4186_v50 = vmax.f32 %v17390_v51, %v4122_v30  ;;  %v4443_v34 = vsel %vm17299_vm7, %v4372_v47, -inf  ;;  %v17397_v30 = vld [vmem:[#allocation80_spill] sm:$0xff] }
 0xa64   :  { %17391 = vst [vmem:[#allocation90_spill] sm:$0xff] %v13025_v38  ;;  %v4053_v18 = vsel %vm17398_vm14, %v17397_v30, %v17396_v48  ;;  %v4085_v22 = vsel %vm17405_vm3, %v17396_v48, %v17397_v30  ;;  %vm17410_vm14 = vmmov %vm17405_vm3 }
 0xa65   :  { %v13020_v32 = vpop.permute.xlu0 %4266  ;;  %v13031_v45 = vpop.permute.xlu1 %3948  ;;  %v13037_v60 = vmax.f32 %v4186_v50, %v4442_v28  ;;  %v13054_v28 = vmax.f32 %v4187_v36, %v4443_v34  ;;  %v17402_v50 = vld [vmem:[#allocation72_spill] sm:$0xff]  ;;  %v4124_v4 = vsel %vm17288_vm10, %v4053_v18, -inf  ;;  %vm17415_vm3 = vmmov %vm17403_vm8 }
 0xa66   :  { %17389 = vst [vmem:[#allocation89_spill] sm:$0xff] %v13020_v32  ;;  %17392 = vst [vmem:[#allocation91_spill] sm:$0xff] %v13031_v45  ;;  %v17407_v45 = vld [vmem:[#allocation37_spill] sm:$0xff]  ;;  %v4373_v48 = vsel %vm17403_vm8, %v17401_v54, %v17402_v50 }
 0xa67   :  { %4982 = vrot.lane.b32.xlu0 %v12962_v3, %s8157_s17  ;;  %17393 = vst [vmem:[#allocation74_spill] sm:$0xff] %v13037_v60  ;;  %4664 = vrot.lane.b32.xlu1 %v13025_v38, %s8155_s15  ;;  %17400 = vst [vmem:[#allocation59_spill] sm:$0xff] %v13054_v28  ;;  %v4405_v3 = vsel %vm17403_vm8, %v17402_v50, %v17401_v54  ;;  %v4445_v50 = vsel %vm17299_vm7, %v4373_v48, -inf }
 0xa68   :  { %v4444_v36 = vsel %vm17292_vm5, %v4405_v3, -inf  ;;  %v4125_v3 = vsel %vm17295_vm15, %v4085_v22, -inf  ;;  %vm17421_vm8 = vmmov %vm17415_vm3 }
 0xa69   :  { %v13041_v51 = vpop.permute.xlu0 %4330  ;;  %v13050_v12 = vpop.permute.xlu1 %4012 }
 0xa6a   :  { %17394 = vst [vmem:[#allocation92_spill] sm:$0xff] %v13041_v51  ;;  %17399 = vst [vmem:[#allocation97_spill] sm:$0xff] %v13050_v12  ;;  %v17408_v12 = vld [vmem:[#allocation104_spill] sm:$0xff] }
 0xa6b   :  { %4570 = vrot.lane.b32.xlu0 %v13037_v60, %s8155_s15  ;;  %4920 = vrot.lane.b32.xlu1 %v12999_v13, %s8157_s17  ;;  %v4188_v13 = vmax.f32 %v17407_v45, %v4124_v4  ;;  %v17413_v45 = vld [vmem:[#allocation106_spill] sm:$0xff]  ;;  %v17414_v4 = vld [vmem:[#allocation81_spill] sm:$0xff] }
 0xa6c   :  { %v4420_v32 = vsel %vm17415_vm3, %v17414_v4, %v17413_v45  ;;  %vm17428_vm3 = vmmov %vm17410_vm14 }
 0xa6d   :  { %v13062_v47 = vpop.permute.xlu0 %3978  ;;  %v13070_v34 = vpop.permute.xlu1 %4268 }
 0xa6e   :  { %17404 = vst [vmem:[#allocation98_spill] sm:$0xff] %v13062_v47  ;;  %17406 = vst [vmem:[#allocation71_spill] sm:$0xff] %v13070_v34  ;;  %v17409_v47 = vld [vmem:[#allocation73_spill] sm:$0xff]  ;;  %v13091_v34 = vmax.f32 %v4188_v13, %v4444_v36 }
 0xa6f   :  { %4634 = vrot.lane.b32.xlu0 %v13054_v28, %s8155_s15  ;;  %v4068_v18 = vsel %vm17410_vm14, %v17409_v47, %v17408_v12  ;;  %4984 = vrot.lane.b32.xlu1 %v13025_v38, %s8157_s17  ;;  %v17417_v38 = vld [vmem:[#allocation67_spill] sm:$0xff]  ;;  %v4100_v13 = vsel %vm17410_vm14, %v17408_v12, %v17409_v47  ;;  %vm17433_vm14 = vmmov %vm17421_vm8 }
 0xa70   :  { %17412 = vst [vmem:[#allocation94_spill] sm:$0xff] %v13091_v34  ;;  %v4154_v54 = vsel %vm17288_vm10, %v4068_v18, -inf  ;;  %v4189_v22 = vmax.f32 %v17417_v38, %v4125_v3  ;;  %v4388_v38 = vsel %vm17421_vm8, %v17413_v45, %v17414_v4  ;;  %v4155_v12 = vsel %vm17295_vm15, %v4100_v13, -inf  ;;  %v17425_v3 = vld [vmem:[#allocation70_spill] sm:$0xff]  ;;  %v17426_v4 = vld [vmem:[#allocation109_spill] sm:$0xff]  ;;  %v17431_v13 = vld [vmem:[#allocation111_spill] sm:$0xff] }
 0xa71   :  { %v13087_v30 = vpop.permute.xlu0 %4042  ;;  %v13097_v51 = vpop.permute.xlu1 %4332  ;;  %v4219_v45 = vmax.f32 %v17425_v3, %v4155_v12  ;;  %vm17434_vm8 = vmmov %vm17428_vm3 }
 0xa72   :  { %17411 = vst [vmem:[#allocation93_spill] sm:$0xff] %v13087_v30  ;;  %17416 = vst [vmem:[#allocation95_spill] sm:$0xff] %v13097_v51  ;;  %v17419_v51 = vld [vmem:[#allocation36_spill] sm:$0xff]  ;;  %v13117_v30 = vmax.f32 %v4189_v22, %v4445_v50 }
 0xa73   :  { %4890 = vrot.lane.b32.xlu0 %v13037_v60, %s8157_s17  ;;  %4572 = vrot.lane.b32.xlu1 %v13091_v34, %s8155_s15  ;;  %v4474_v60 = vsel %vm17292_vm5, %v4420_v32, -inf  ;;  %v4218_v18 = vmax.f32 %v17419_v51, %v4154_v54  ;;  %v4475_v51 = vsel %vm17299_vm7, %v4388_v38, -inf  ;;  %v17427_v54 = vld [vmem:[#allocation75_spill] sm:$0xff] }
 0xa74   :  { %17420 = vst [vmem:[#allocation80_spill] sm:$0xff] %v13117_v30  ;;  %v4069_v50 = vsel %vm17428_vm3, %v17427_v54, %v17426_v4  ;;  %v4101_v3 = vsel %vm17434_vm8, %v17426_v4, %v17427_v54  ;;  %vm17440_vm8 = vmmov %vm17433_vm14 }
 0xa75   :  { %v13112_v36 = vpop.permute.xlu0 %4298  ;;  %v13123_v48 = vpop.permute.xlu1 %3980  ;;  %v13129_v47 = vmax.f32 %v4218_v18, %v4474_v60  ;;  %v13146_v60 = vmax.f32 %v4219_v45, %v4475_v51  ;;  %v17432_v18 = vld [vmem:[#allocation32_spill] sm:$0xff]  ;;  %v4156_v12 = vsel %vm17288_vm10, %v4069_v50, -inf }
 0xa76   :  { %17418 = vst [vmem:[#allocation101_spill] sm:$0xff] %v13112_v36  ;;  %17422 = vst [vmem:[#allocation103_spill] sm:$0xff] %v13123_v48  ;;  %v17436_v48 = vld [vmem:[#allocation47_spill] sm:$0xff]  ;;  %v4389_v4 = vsel %vm17433_vm14, %v17431_v13, %v17432_v18 }
 0xa77   :  { %4954 = vrot.lane.b32.xlu0 %v13054_v28, %s8157_s17  ;;  %17423 = vst [vmem:[#allocation72_spill] sm:$0xff] %v13129_v47  ;;  %4636 = vrot.lane.b32.xlu1 %v13117_v30, %s8155_s15  ;;  %17430 = vst [vmem:[#allocation73_spill] sm:$0xff] %v13146_v60  ;;  %v4421_v28 = vsel %vm17433_vm14, %v17432_v18, %v17431_v13  ;;  %v4477_v18 = vsel %vm17299_vm7, %v4389_v4, -inf }
 0xa78   :  { %v4476_v45 = vsel %vm17292_vm5, %v4421_v28, -inf  ;;  %v4157_v28 = vsel %vm17295_vm15, %v4101_v3, -inf  ;;  %vm17445_vm14 = vmmov %vm17440_vm8 }
 0xa79   :  { %v13133_v32 = vpop.permute.xlu0 %4362  ;;  %v13142_v22 = vpop.permute.xlu1 %4044 }
 0xa7a   :  { %17424 = vst [vmem:[#allocation37_spill] sm:$0xff] %v13133_v32  ;;  %17429 = vst [vmem:[#allocation104_spill] sm:$0xff] %v13142_v22  ;;  %v17437_v22 = vld [vmem:[#allocation4_spill] sm:$0xff]  ;;  %v17438_v32 = vld [vmem:[#allocation33_spill] sm:$0xff] }
 0xa7b   :  { %4602 = vrot.lane.b32.xlu0 %v13129_v47, %s8155_s15  ;;  %4892 = vrot.lane.b32.xlu1 %v13091_v34, %s8157_s17  ;;  %v4220_v34 = vmax.f32 %v17436_v48, %v4156_v12  ;;  %v4054_v50 = vsel %vm17428_vm3, %v17438_v32, %v17437_v22  ;;  %v4406_v48 = vsel %vm17440_vm8, %v12493_v39, %v12466_v44  ;;  %vm17448_vm8 = vmmov %vm17428_vm3 }
 0xa7c   :  { %v4126_v13 = vsel %vm17288_vm10, %v4054_v50, -inf }
 0xa7d   :  { %v13154_v38 = vpop.permute.xlu0 %4558  ;;  %v13162_v51 = vpop.permute.xlu1 %4300 }
 0xa7e   :  { %17435 = vst [vmem:[#allocation106_spill] sm:$0xff] %v13162_v51  ;;  %v13183_v51 = vmax.f32 %v4220_v34, %v4476_v45  ;;  %v4086_v34 = vsel %vm17428_vm3, %v17437_v22, %v17438_v32  ;;  %vm17450_vm3 = vmmov %vm17445_vm14 }
 0xa7f   :  { %4666 = vrot.lane.b32.xlu0 %v13146_v60, %s8155_s15  ;;  %4956 = vrot.lane.b32.xlu1 %v13117_v30, %s8157_s17  ;;  %v17442_v30 = vld [vmem:[#allocation49_spill] sm:$0xff]  ;;  %v4127_v32 = vsel %vm17295_vm15, %v4086_v34, -inf }
 0xa80   :  { %17439 = vst [vmem:[#allocation81_spill] sm:$0xff] %v13183_v51  ;;  %v4221_v3 = vmax.f32 %v17442_v30, %v4157_v28  ;;  %v4374_v30 = vsel %vm17445_vm14, %v12466_v44, %v12493_v39  ;;  %v4055_v39 = vsel %vm17448_vm8, %v12477_v29, %v12498_v0  ;;  %vm17451_vm14 = vmmov %vm17448_vm8 }
 0xa81   :  { %v13179_v54 = vpop.permute.xlu0 %4622  ;;  %v13189_v12 = vpop.permute.xlu1 %4364  ;;  %v4128_v34 = vsel %vm17288_vm10, %v4055_v39, -inf }
 0xa82   :  { %17441 = vst [vmem:[#allocation67_spill] sm:$0xff] %v13189_v12  ;;  %v17443_v12 = vld [vmem:[#allocation50_spill] sm:$0xff]  ;;  %v13209_v36 = vmax.f32 %v4221_v3, %v4477_v18  ;;  %v4407_v18 = vsel %vm17450_vm3, %v12544_v1, %v12519_v42 }
 0xa83   :  { %4922 = vrot.lane.b32.xlu0 %v13129_v47, %s8157_s17  ;;  %4604 = vrot.lane.b32.xlu1 %v13183_v51, %s8155_s15  ;;  %v4446_v47 = vsel %vm17292_vm5, %v4406_v48, -inf  ;;  %v4190_v50 = vmax.f32 %v17443_v12, %v4126_v13  ;;  %v4447_v48 = vsel %vm17299_vm7, %v4374_v30, -inf  ;;  %v17447_v12 = vld [vmem:[#allocation60_spill] sm:$0xff] }
 0xa84   :  { %17444 = vst [vmem:[#allocation36_spill] sm:$0xff] %v13209_v36  ;;  %v4191_v44 = vmax.f32 %v17447_v12, %v4127_v32  ;;  %v4448_v32 = vsel %vm17292_vm5, %v4407_v18, -inf }
 0xa85   :  { %v13204_v45 = vpop.permute.xlu0 %4878  ;;  %v13215_v4 = vpop.permute.xlu1 %4560  ;;  %v13221_v22 = vmax.f32 %v4190_v50, %v4446_v47  ;;  %v4087_v50 = vsel %vm17451_vm14, %v12498_v0, %v12477_v29  ;;  %v4375_v29 = vsel %vm17450_vm3, %v12519_v42, %v12544_v1  ;;  %vm17454_vm14 = vmmov %vm17450_vm3 }
 0xa86   :  { %v13238_v47 = vmax.f32 %v4191_v44, %v4447_v48  ;;  %v17452_v48 = vld [vmem:[#allocation38_spill] sm:$0xff]  ;;  %v4070_v44 = vsel %vm17448_vm8, %v12512_v40, %v12531_v53  ;;  %v4129_v39 = vsel %vm17295_vm15, %v4087_v50, -inf  ;;  %v4449_v1 = vsel %vm17299_vm7, %v4375_v29, -inf }
 0xa87   :  { %4986 = vrot.lane.b32.xlu0 %v13146_v60, %s8157_s17  ;;  %17446 = vst [vmem:[#allocation70_spill] sm:$0xff] %v13221_v22  ;;  %4668 = vrot.lane.b32.xlu1 %v13209_v36, %s8155_s15  ;;  %v4192_v12 = vmax.f32 %v17452_v48, %v4128_v34  ;;  %v4422_v34 = vsel %vm17454_vm14, %v12581_v19, %v12558_v15  ;;  %v4158_v42 = vsel %vm17288_vm10, %v4070_v44, -inf  ;;  %v17456_v60 = vld [vmem:[#allocation39_spill] sm:$0xff]  ;;  %vm17460_vm14 = vmmov %vm17448_vm8 }
 0xa88   :  { %17449 = vst [vmem:[#allocation109_spill] sm:$0xff] %v13238_v47  ;;  %v4222_v44 = vmax.f32 %v17456_v60, %v4158_v42 }
 0xa89   :  { %v13225_v28 = vpop.permute.xlu0 %4942  ;;  %v13234_v13 = vpop.permute.xlu1 %4624  ;;  %v13275_v18 = vmax.f32 %v4192_v12, %v4448_v32  ;;  %v4102_v32 = vsel %vm17448_vm8, %v12531_v53, %v12512_v40  ;;  %vm17462_vm8 = vmmov %vm17450_vm3 }
 0xa8a   :  { %v4159_v40 = vsel %vm17295_vm15, %v4102_v32, -inf }
 0xa8b   :  { %4574 = vrot.lane.b32.xlu0 %v13221_v22, %s8155_s15  ;;  %4924 = vrot.lane.b32.xlu1 %v13183_v51, %s8157_s17  ;;  %17453 = vst [vmem:[#allocation75_spill] sm:$0xff] %v13275_v18  ;;  %v4478_v51 = vsel %vm17292_vm5, %v4422_v34, -inf  ;;  %v17459_v34 = vld [vmem:[#allocation63_spill] sm:$0xff] }
 0xa8c   :  { %v13313_v53 = vmax.f32 %v4222_v44, %v4478_v51 }
 0xa8d   :  { %v13246_v3 = vpop.permute.xlu0 %4590  ;;  %v13254_v30 = vpop.permute.xlu1 %4880 }
 0xa8e   :  { %17458 = vst [vmem:[#allocation32_spill] sm:$0xff] %v13313_v53 }
 0xa8f   :  { %4638 = vrot.lane.b32.xlu0 %v13238_v47, %s8155_s15  ;;  %4988 = vrot.lane.b32.xlu1 %v13209_v36, %s8157_s17  ;;  %v17455_v36 = vld [vmem:[#allocation66_spill] sm:$0xff] }
 0xa90   :  { %v4193_v50 = vmax.f32 %v17455_v36, %v4129_v39  ;;  %v4390_v36 = vsel %vm17450_vm3, %v12558_v15, %v12581_v19  ;;  %v4223_v15 = vmax.f32 %v17459_v34, %v4159_v40  ;;  %v4071_v19 = vsel %vm17460_vm14, %v12569_v33, %v12590_v20  ;;  %vm17463_vm3 = vmmov %vm17460_vm14 }
 0xa91   :  { %v13271_v0 = vpop.permute.xlu0 %4654  ;;  %v13281_v48 = vpop.permute.xlu1 %4944  ;;  %v4479_v39 = vsel %vm17299_vm7, %v4390_v36, -inf  ;;  %v4160_v32 = vsel %vm17288_vm10, %v4071_v19, -inf  ;;  %v4103_v44 = vsel %vm17463_vm3, %v12590_v20, %v12569_v33  ;;  %vm17465_vm14 = vmmov %vm17463_vm3  ;;  %v4391_v33 = vsel %vm17462_vm8, %v12610_v58, %v12637_v6 }
 0xa92   :  { %v13330_v51 = vmax.f32 %v4223_v15, %v4479_v39  ;;  %v17464_v39 = vld [vmem:[#allocation41_spill] sm:$0xff]  ;;  %v4056_v15 = vsel %vm17465_vm14, %v12602_v52, %v12627_v11  ;;  %v4161_v19 = vsel %vm17295_vm15, %v4103_v44, -inf  ;;  %vm17467_vm3 = vmmov %vm17462_vm8 }
 0xa93   :  { %4894 = vrot.lane.b32.xlu0 %v13221_v22, %s8157_s17  ;;  %4576 = vrot.lane.b32.xlu1 %v13275_v18, %s8155_s15  ;;  %v13301_v22 = vmax.f32 %v4193_v50, %v4449_v1  ;;  %v4423_v1 = vsel %vm17462_vm8, %v12637_v6, %v12610_v58  ;;  %v4224_v34 = vmax.f32 %v17464_v39, %v4160_v32  ;;  %v4130_v58 = vsel %vm17288_vm10, %v4056_v15, -inf  ;;  %vm17471_vm8 = vmmov %vm17467_vm3 }
 0xa94   :  { %17461 = vst [vmem:[#allocation47_spill] sm:$0xff] %v13330_v51  ;;  %v4480_v40 = vsel %vm17292_vm5, %v4423_v1, -inf  ;;  %v4408_v32 = vsel %vm17467_vm3, %v12673_v59, %v12652_v49  ;;  %v4481_v6 = vsel %vm17299_vm7, %v4391_v33, -inf  ;;  %vm17474_vm3 = vmmov %vm17465_vm14 }
 0xa95   :  { %v13296_v12 = vpop.permute.xlu0 %4910  ;;  %17457 = vst [vmem:[#allocation111_spill] sm:$0xff] %v13301_v22  ;;  %v13307_v29 = vpop.permute.xlu1 %4592  ;;  %v13367_v1 = vmax.f32 %v4224_v34, %v4480_v40  ;;  %v4088_v40 = vsel %vm17465_vm14, %v12627_v11, %v12602_v52  ;;  %vm17476_vm14 = vmmov %vm17471_vm8 }
 0xa96   :  { %v4131_v52 = vsel %vm17295_vm15, %v4088_v40, -inf }
 0xa97   :  { %4958 = vrot.lane.b32.xlu0 %v13238_v47, %s8157_s17  ;;  %4640 = vrot.lane.b32.xlu1 %v13301_v22, %s8155_s15  ;;  %17466 = vst [vmem:[#allocation4_spill] sm:$0xff] %v13367_v1 }
 0xa99   :  { %v13317_v60 = vpop.permute.xlu0 %4974  ;;  %v13326_v42 = vpop.permute.xlu1 %4656 }
 0xa9b   :  { %4606 = vrot.lane.b32.xlu0 %v13313_v53, %s8155_s15  ;;  %4896 = vrot.lane.b32.xlu1 %v13275_v18, %s8157_s17  ;;  %v17469_v18 = vld [vmem:[#allocation40_spill] sm:$0xff] }
 0xa9c   :  { %v4194_v15 = vmax.f32 %v17469_v18, %v4130_v58 }
 0xa9d   :  { %v13338_v50 = vpop.permute.xlu0 %4562  ;;  %v13346_v36 = vpop.permute.xlu1 %4912 }
 0xa9f   :  { %4670 = vrot.lane.b32.xlu0 %v13330_v51, %s8155_s15  ;;  %4960 = vrot.lane.b32.xlu1 %v13301_v22, %s8157_s17  ;;  %v17468_v22 = vld [vmem:[#allocation79_spill] sm:$0xff] }
 0xaa0   :  { %v4225_v44 = vmax.f32 %v17468_v22, %v4161_v19  ;;  %v4376_v22 = vsel %vm17471_vm8, %v12652_v49, %v12673_v59  ;;  %v4057_v59 = vsel %vm17474_vm3, %v12663_v9, %v12682_v17  ;;  %vm17477_vm8 = vmmov %vm17474_vm3 }
 0xaa1   :  { %v13363_v20 = vpop.permute.xlu0 %4626  ;;  %v13373_v39 = vpop.permute.xlu1 %4976  ;;  %v4451_v19 = vsel %vm17299_vm7, %v4376_v22, -inf  ;;  %v4132_v40 = vsel %vm17288_vm10, %v4057_v59, -inf }
 0xaa2   :  { %v13393_v47 = vmax.f32 %v4225_v44, %v4481_v6  ;;  %v4409_v6 = vsel %vm17476_vm14, %v12729_v10, %v12702_v62 }
 0xaa3   :  { %4926 = vrot.lane.b32.xlu0 %v13313_v53, %s8157_s17  ;;  %4608 = vrot.lane.b32.xlu1 %v13367_v1, %s8155_s15  ;;  %v4450_v53 = vsel %vm17292_vm5, %v4408_v32, -inf  ;;  %v17473_v32 = vld [vmem:[#allocation31_spill] sm:$0xff] }
 0xaa4   :  { %17470 = vst [vmem:[#allocation33_spill] sm:$0xff] %v13393_v47  ;;  %v13405_v11 = vmax.f32 %v4194_v15, %v4450_v53  ;;  %v4195_v49 = vmax.f32 %v17473_v32, %v4131_v52  ;;  %v4089_v15 = vsel %vm17477_vm8, %v12682_v17, %v12663_v9  ;;  %v4452_v52 = vsel %vm17292_vm5, %v4409_v6, -inf  ;;  %vm17479_vm8 = vmmov %vm17474_vm3 }
 0xaa5   :  { %v13388_v34 = vpop.permute.xlu0 %4882  ;;  %v13399_v33 = vpop.permute.xlu1 %4564  ;;  %v4377_v9 = vsel %vm17476_vm14, %v12702_v62, %v12729_v10  ;;  %v4133_v59 = vsel %vm17295_vm15, %v4089_v15, -inf  ;;  %v4104_v6 = vsel %vm17479_vm8, %v12719_v43, %v12694_v24 }
 0xaa6   :  { %17472 = vst [vmem:[#allocation49_spill] sm:$0xff] %v13405_v11  ;;  %v13422_v53 = vmax.f32 %v4195_v49, %v4451_v19  ;;  %v17478_v19 = vld [vmem:[#allocation53_spill] sm:$0xff]  ;;  %v4072_v49 = vsel %vm17474_vm3, %v12694_v24, %v12719_v43  ;;  %vm17481_vm3 = vmmov %vm17476_vm14 }
 0xaa7   :  { %4990 = vrot.lane.b32.xlu0 %v13330_v51, %s8157_s17  ;;  %4672 = vrot.lane.b32.xlu1 %v13393_v47, %s8155_s15  ;;  %v4196_v32 = vmax.f32 %v17478_v19, %v4132_v40  ;;  %v4424_v62 = vsel %vm17481_vm3, %v12765_v57, %v12744_v37  ;;  %v4162_v15 = vsel %vm17288_vm10, %v4072_v49, -inf  ;;  %v4453_v19 = vsel %vm17299_vm7, %v4377_v9, -inf  ;;  %vm17483_vm14 = vmmov %vm17481_vm3 }
 0xaa8   :  { %17475 = vst [vmem:[#allocation50_spill] sm:$0xff] %v13422_v53  ;;  %v4392_v43 = vsel %vm17483_vm14, %v12744_v37, %v12765_v57  ;;  %v4163_v49 = vsel %vm17295_vm15, %v4104_v6, -inf  ;;  %vm17485_vm3 = vmmov %vm17479_vm8  ;;  %v17486_v57 = vld [vmem:[#allocation69_spill] sm:$0xff] }
 0xaa9   :  { %v13409_v18 = vpop.permute.xlu0 %4946  ;;  %v13418_v58 = vpop.permute.xlu1 %4628  ;;  %v13463_v40 = vmax.f32 %v4196_v32, %v4452_v52  ;;  %v4073_v52 = vsel %vm17479_vm8, %v12755_v14, %v12774_v21  ;;  %v4105_v37 = vsel %vm17485_vm3, %v12774_v21, %v12755_v14  ;;  %v4226_v9 = vmax.f32 %v17486_v57, %v4162_v15  ;;  %vm17491_vm14 = vmmov %vm17485_vm3 }
 0xaaa   :  { %v4483_v6 = vsel %vm17299_vm7, %v4392_v43, -inf  ;;  %v4165_v14 = vsel %vm17295_vm15, %v4105_v37, -inf  ;;  %v4058_v21 = vsel %vm17491_vm14, %v12786_v8, %v12811_v26  ;;  %vm17493_vm8 = vmmov %vm17485_vm3  ;;  %vm17494_vm3 = vcmp.lt.s32.totalorder %v17280_v61, 16  ;;  %v17496_v43 = vld [vmem:[#allocation68_spill] sm:$0xff] }
 0xaab   :  { %4578 = vrot.lane.b32.xlu0 %v13405_v11, %s8155_s15  ;;  %4928 = vrot.lane.b32.xlu1 %v13367_v1, %s8157_s17  ;;  %17480 = vst [vmem:[#allocation60_spill] sm:$0xff] %v13463_v40  ;;  %v17489_v1 = vld [vmem:[#allocation78_spill] sm:$0xff]  ;;  %vm17497_vm14 = vmmov %vm17494_vm3  ;;  %v4134_v37 = vsel %vm17288_vm10, %v4058_v21, -inf }
 0xaac   :  { %v4227_v51 = vmax.f32 %v17489_v1, %v4163_v49  ;;  %v4090_v1 = vsel %vm17493_vm8, %v12811_v26, %v12786_v8  ;;  %v4393_v49 = vsel %vm17497_vm14, %v12794_v55, %v12821_v27  ;;  %vm17498_vm0 = vmmov %vm17494_vm3  ;;  %v17500_v26 = vld [vmem:[#allocation46_spill] sm:$0xff] }
 0xaad   :  { %v13430_v44 = vpop.permute.xlu0 %4594  ;;  %v13438_v22 = vpop.permute.xlu1 %4884  ;;  %vm17501_vm8 = vmmov %vm17498_vm0  ;;  %v4135_v57 = vsel %vm17295_vm15, %v4090_v1, -inf  ;;  %v17508_v1 = vld [vmem:[#allocation86_spill] sm:$0xff] }
 0xaaf   :  { %4642 = vrot.lane.b32.xlu0 %v13422_v53, %s8155_s15  ;;  %4992 = vrot.lane.b32.xlu1 %v13393_v47, %s8157_s17  ;;  %v17482_v47 = vld [vmem:[#allocation52_spill] sm:$0xff] }
 0xab0   :  { %v4197_v24 = vmax.f32 %v17482_v47, %v4133_v59  ;;  %v4482_v47 = vsel %vm17292_vm5, %v4424_v62, -inf  ;;  %v4164_v62 = vsel %vm17288_vm10, %v4073_v52, -inf }
 0xab1   :  { %v13455_v17 = vpop.permute.xlu0 %4658  ;;  %v13469_v10 = vpop.permute.xlu1 %4948  ;;  %v4228_v52 = vmax.f32 %v17496_v43, %v4164_v62  ;;  %v17504_v62 = vld [vmem:[#allocation35_spill] sm:$0xff]  ;;  %v17510_v43 = vld [vmem:[#allocation57_spill] sm:$0xff] }
 0xab2   :  { %v13499_v59 = vmax.f32 %v4197_v24, %v4453_v19  ;;  %v4425_v19 = vsel %vm17494_vm3, %v12821_v27, %v12794_v55  ;;  %v13530_v24 = vmax.f32 %v4227_v51, %v4483_v6  ;;  %v4229_v51 = vmax.f32 %v17500_v26, %v4165_v14 }
 0xab3   :  { %4898 = vrot.lane.b32.xlu0 %v13405_v11, %s8157_s17  ;;  %4580 = vrot.lane.b32.xlu1 %v13463_v40, %s8155_s15  ;;  %v4378_v27 = vsel %vm17501_vm8, %v12836_v56, %v12857_v41  ;;  %vm17502_vm3 = vcmp.lt.s32.totalorder %v17280_v61, 112  ;;  %v4485_v14 = vsel %vm17299_vm7, %v4393_v49, -inf  ;;  %v4198_v26 = vmax.f32 %v17510_v43, %v4134_v37 }
 0xab4   :  { %17487 = vst [vmem:[#allocation66_spill] sm:$0xff] %v13499_v59  ;;  %17495 = vst [vmem:[#allocation79_spill] sm:$0xff] %v13530_v24  ;;  %v4059_v55 = vsel %vm17502_vm3, %v12847_v16, %v12866_v25 }
 0xab5   :  { %v13488_v32 = vpop.permute.xlu0 %4914  ;;  %v13501_v11 = vpop.permute.xlu1 %4596  ;;  %v4136_v49 = vsel %vm17288_vm10, %v4059_v55, -inf  ;;  %v13604_v55 = vmax.f32 %v4229_v51, %v4485_v14  ;;  %v17520_v14 = vld [vmem:[#allocation64_spill] sm:$0xff] }
 0xab6   :  { %17484 = vst [vmem:[#allocation38_spill] sm:$0xff] %v13488_v32  ;;  %17488 = vst [vmem:[#allocation39_spill] sm:$0xff] %v13501_v11  ;;  %v13510_v32 = vmax.f32 %v4226_v9, %v4482_v47  ;;  %v4410_v47 = vsel %vm17498_vm0, %v12857_v41, %v12836_v56  ;;  %v4484_v9 = vsel %vm17292_vm5, %v4425_v19, -inf }
 0xab7   :  { %4962 = vrot.lane.b32.xlu0 %v13422_v53, %s8157_s17  ;;  %4644 = vrot.lane.b32.xlu1 %v13499_v59, %s8155_s15  ;;  %vm17503_vm0 = vmmov %vm17502_vm3  ;;  %v4454_v21 = vsel %vm17292_vm5, %v4410_v47, -inf  ;;  %vm17509_vm3 = vcmp.lt.s32.totalorder %v17280_v61, 16  ;;  %v13598_v11 = vmax.f32 %v4228_v52, %v4484_v9  ;;  %17515 = vst [vmem:[#allocation52_spill] sm:$0xff] %v13604_v55  ;;  %v17518_v9 = vld [vmem:[#allocation45_spill] sm:$0xff] }
 0xab8   :  { %17490 = vst [vmem:[#allocation63_spill] sm:$0xff] %v13510_v32  ;;  %v4091_v6 = vsel %vm17503_vm0, %v12866_v25, %v12847_v16  ;;  %vm17505_vm14 = vmmov %vm17503_vm0  ;;  %v17507_v25 = vld [vmem:[#allocation55_spill] sm:$0xff]  ;;  %v13606_v43 = vmax.f32 %v4198_v26, %v4454_v21 }
 0xab9   :  { %v13520_v15 = vpop.permute.xlu0 %4978  ;;  %v13541_v8 = vpop.permute.xlu1 %4660  ;;  %v4074_v56 = vsel %vm17505_vm14, %v17504_v62, %v12903_v63  ;;  %vm17506_vm8 = vmmov %vm17503_vm0  ;;  %v4411_v19 = vsel %vm17509_vm3, %v17508_v1, %v17507_v25  ;;  %17514 = vst [vmem:[#allocation53_spill] sm:$0xff] %v13598_v11  ;;  %v4137_v37 = vsel %vm17295_vm15, %v4091_v6, -inf  ;;  %v4200_v6 = vmax.f32 %v17518_v9, %v4136_v49 }
 0xaba   :  { %17492 = vst [vmem:[#allocation41_spill] sm:$0xff] %v13520_v15  ;;  %17499 = vst [vmem:[#allocation40_spill] sm:$0xff] %v13541_v8  ;;  %v4106_v16 = vsel %vm17506_vm8, %v12903_v63, %v17504_v62  ;;  %v17513_v63 = vld [vmem:[#allocation62_spill] sm:$0xff]  ;;  %vm17519_vm14 = vcmp.lt.s32.totalorder %v17280_v61, 127  ;;  %v4201_v21 = vmax.f32 %v17520_v14, %v4137_v37  ;;  %v17570_v15 = vld [vmem:[#allocation100_spill] sm:$0xff] }
 0xabb   :  { %4610 = vrot.lane.b32.xlu0 %v13510_v32, %s8155_s15  ;;  %4900 = vrot.lane.b32.xlu1 %v13463_v40, %s8157_s17  ;;  %v4455_v40 = vsel %vm17299_vm7, %v4378_v27, -inf  ;;  %vm17511_vm0 = vmmov %vm17509_vm3  ;;  %v4199_v62 = vmax.f32 %v17513_v63, %v4135_v57  ;;  %v4166_v27 = vsel %vm17288_vm10, %v4074_v56, -inf  ;;  %17516 = vst [vmem:[#allocation69_spill] sm:$0xff] %v13606_v43  ;;  %v4686_v56 = vsel %vm17519_vm14, %v13154_v38, %v13179_v54 }
 0xabc   :  { %v4379_v47 = vsel %vm17511_vm0, %v17507_v25, %v17508_v1  ;;  %v4167_v25 = vsel %vm17295_vm15, %v4106_v16, -inf  ;;  %v4456_v1 = vsel %vm17292_vm5, %v4411_v19, -inf  ;;  %v17521_v16 = vld [vmem:[#allocation54_spill] sm:$0xff]  ;;  %vm17522_vm8 = vmmov %vm17511_vm0  ;;  %vm17527_vm0 = vcmp.lt.s32.totalorder %v17280_v61, 1 }
 0xabd   :  { %v13570_v41 = vpop.permute.xlu0 %4566  ;;  %v13593_v53 = vpop.permute.xlu1 %4916  ;;  %v13616_v57 = vmax.f32 %v4199_v62, %v4455_v40  ;;  %v4457_v51 = vsel %vm17299_vm7, %v4379_v47, -inf  ;;  %v13627_v19 = vmax.f32 %v17521_v16, %v4166_v27  ;;  %v13633_v40 = vsel %vm17522_vm8, %v12949_v7, %v12928_v2  ;;  %vm17523_vm3 = vmmov %vm17519_vm14  ;;  %v17525_v47 = vld [vmem:[#allocation96_spill] sm:$0xff]  ;;  %v17530_v27 = vld [vmem:[#allocation7_spill] sm:$0xff] }
 0xabe   :  { %17512 = vst [vmem:[#allocation31_spill] sm:$0xff] %v13593_v53  ;;  %v4718_v26 = vsel %vm17523_vm3, %v13179_v54, %v13154_v38  ;;  %v13644_v63 = vmax.f32 %v17525_v47, %v4167_v25  ;;  %v13646_v62 = vmax.f32 %v4200_v6, %v4456_v1  ;;  %v5038_v37 = vsel %vm17527_vm0, %v13225_v28, %v13204_v45  ;;  %vm17528_vm14 = vmmov %vm17523_vm3 }
 0xabf   :  { %4674 = vrot.lane.b32.xlu0 %v13530_v24, %s8155_s15  ;;  %4964 = vrot.lane.b32.xlu1 %v13499_v59, %s8157_s17  ;;  %17517 = vst [vmem:[#allocation78_spill] sm:$0xff] %v13616_v57  ;;  %v4687_v38 = vsel %vm17528_vm14, %v13215_v4, %v13234_v13  ;;  %v13656_v54 = vmax.f32 %v4201_v21, %v4457_v51  ;;  %vm17531_vm8 = vnez %v17530_v27  ;;  %vm17532_vm3 = vmmov %vm17527_vm0  ;;  %vm17534_vm0 = vcmp.lt.s32.totalorder %v17280_v61, 16  ;;  %v17540_v21 = vld [vmem:[#allocation5_spill] sm:$0xff] }
 0xac0   :  { %17526 = vst [vmem:[#allocation46_spill] sm:$0xff] %v13646_v62  ;;  %v4750_v9 = vsel %vm17531_vm8, %v4686_v56, -inf  ;;  %v5006_v25 = vsel %vm17532_vm3, %v13204_v45, %v13225_v28  ;;  %vm17533_vm6 = vmmov %vm17528_vm14  ;;  %v4394_v51 = vsel %vm17534_vm0, %v12928_v2, %v12949_v7  ;;  %v4486_v56 = vsel %vm17292_vm5, %v13633_v40, -inf  ;;  %v17535_v45 = vld [vmem:[#allocation8_spill] sm:$0xff] }
 0xac1   :  { %v13614_v52 = vpop.permute.xlu0 %4630  ;;  %v13639_v49 = vpop.permute.xlu1 %4980  ;;  %17529 = vst [vmem:[#allocation35_spill] sm:$0xff] %v13656_v54  ;;  %v4719_v1 = vsel %vm17533_vm6, %v13234_v13, %v13215_v4  ;;  %vm17536_vm14 = vnez %v17535_v45  ;;  %vm17537_vm6 = vmmov %vm17532_vm3  ;;  %v17538_v13 = vld [vmem:[#allocation34_spill] sm:$0xff]  ;;  %vm17539_vm3 = vcmp.lt.s32.totalorder %v17280_v61, 112  ;;  %vm17541_vm11 = vnez %v17540_v21 }
 0xac2   :  { %17524 = vst [vmem:[#allocation68_spill] sm:$0xff] %v13639_v49  ;;  %v4751_v28 = vsel %vm17536_vm14, %v4718_v26, -inf  ;;  %v5039_v4 = vsel %vm17537_vm6, %v13281_v48, %v13254_v30  ;;  %v4075_v14 = vsel %vm17539_vm3, %v17538_v13, %v12958_v35  ;;  %v5070_v2 = vsel %vm17541_vm11, %v5038_v37, -inf  ;;  %vm17542_vm0 = vmmov %vm17537_vm6  ;;  %v17544_v26 = vld [vmem:[#allocation113_spill] sm:$0xff]  ;;  %v17551_v49 = vld [vmem:[#allocation115_spill] sm:$0xff] }
 0xac3   :  { %4930 = vrot.lane.b32.xlu0 %v13510_v32, %s8157_s17  ;;  %4612 = vrot.lane.b32.xlu1 %v13598_v11, %s8155_s15  ;;  %v4752_v7 = vsel %vm17531_vm8, %v4687_v38, -inf  ;;  %v5007_v16 = vsel %vm17542_vm0, %v13254_v30, %v13281_v48  ;;  %v4814_v47 = vmax.f32 %v17544_v26, %v4750_v9  ;;  %v17545_v32 = vld [vmem:[#allocation10_spill] sm:$0xff]  ;;  %v4753_v37 = vsel %vm17536_vm14, %v4719_v1, -inf }
 0xac4   :  { %vm17546_vm6 = vnez %v17545_v32  ;;  %vm17547_vm3 = vcmp.lt.s32.totalorder %v17280_v61, 127  ;;  %vm17548_vm0 = vcmp.lt.s32.totalorder %v17280_v61, 112  ;;  %v17549_v48 = vld [vmem:[#allocation114_spill] sm:$0xff]  ;;  %v4816_v53 = vmax.f32 %v17551_v49, %v4752_v7  ;;  %v17556_v7 = vld [vmem:[#allocation56_spill] sm:$0xff] }
 0xac5   :  { %v13670_v6 = vpop.permute.xlu0 %4886  ;;  %v13697_v40 = vpop.permute.xlu1 %4568  ;;  %v5071_v59 = vsel %vm17546_vm6, %v5006_v25, -inf  ;;  %v4702_v38 = vsel %vm17547_vm3, %v13246_v3, %v13271_v0  ;;  %v4107_v30 = vsel %vm17548_vm0, %v12958_v35, %v17538_v13  ;;  %vm17550_vm13 = vmmov %vm17547_vm3  ;;  %v5072_v25 = vsel %vm17541_vm11, %v5039_v4, -inf }
 0xac6   :  { %17543 = vst [vmem:[#allocation55_spill] sm:$0xff] %v13697_v40  ;;  %v4734_v9 = vsel %vm17550_vm13, %v13271_v0, %v13246_v3  ;;  %v5134_v26 = vmax.f32 %v4814_v47, %v5070_v2  ;;  %v5073_v35 = vsel %vm17546_vm6, %v5007_v16, -inf  ;;  %vm17552_vm3 = vcmp.lt.s32.totalorder %v17280_v61, 1  ;;  %v17553_v0 = vld [vmem:[#allocation116_spill] sm:$0xff]  ;;  %v17571_v40 = vld [vmem:[#allocation102_spill] sm:$0xff] }
 0xac7   :  { %4994 = vrot.lane.b32.xlu0 %v13530_v24, %s8157_s17  ;;  %v4815_v24 = vmax.f32 %v17549_v48, %v4751_v28  ;;  %4676 = vrot.lane.b32.xlu1 %v13604_v55, %s8155_s15  ;;  %v5054_v28 = vsel %vm17552_vm3, %v13317_v60, %v13296_v12  ;;  %v4817_v13 = vmax.f32 %v17553_v0, %v4753_v37  ;;  %v4782_v4 = vsel %vm17531_vm8, %v4702_v38, -inf  ;;  %vm17554_vm13 = vmmov %vm17552_vm3  ;;  %v17557_v16 = vld [vmem:[#allocation88_spill] sm:$0xff] }
 0xac8   :  { %v5022_v2 = vsel %vm17554_vm13, %v13296_v12, %v13317_v60  ;;  %vm17558_vm3 = vmmov %vm17548_vm0  ;;  %v4783_v47 = vsel %vm17536_vm14, %v4734_v9, -inf  ;;  %v5136_v37 = vmax.f32 %v4816_v53, %v5072_v25  ;;  %v4487_v12 = vsel %vm17299_vm7, %v4394_v51, -inf  ;;  %v17560_v53 = vld [vmem:[#allocation117_spill] sm:$0xff] }
 0xac9   :  { %v13723_v1 = vpop.permute.xlu0 %4950  ;;  %v5135_v3 = vmax.f32 %v4815_v24, %v5071_v59  ;;  %v13739_v49 = vpop.permute.xlu1 %4632  ;;  %v4060_v59 = vsel %vm17548_vm0, %v17557_v16, %v17556_v7  ;;  %v4092_v24 = vsel %vm17558_vm3, %v17556_v7, %v17557_v16  ;;  %v4168_v60 = vsel %vm17288_vm10, %v4075_v14, -inf }
 0xaca   :  { %17555 = vst [vmem:[#allocation86_spill] sm:$0xff] %v13739_v49  ;;  %v5137_v38 = vmax.f32 %v4817_v13, %v5073_v35  ;;  %v5102_v48 = vsel %vm17541_vm11, %v5054_v28, -inf  ;;  %v4169_v7 = vsel %vm17295_vm15, %v4107_v30, -inf  ;;  %v5198_v9 = vmul.f32 0.5, %v5134_v26  ;;  %v17561_v13 = vld [vmem:[#allocation118_spill] sm:$0xff]  ;;  %v17564_v26 = vld [vmem:[#allocation76_spill] sm:$0xff] }
 0xacb   :  { %4582 = vrot.lane.b32.xlu0 %v13606_v43, %s8155_s15  ;;  %4932 = vrot.lane.b32.xlu1 %v13598_v11, %s8157_s17  ;;  %v4846_v25 = vmax.f32 %v17560_v53, %v4782_v4  ;;  %v5103_v51 = vsel %vm17546_vm6, %v5022_v2, -inf  ;;  %v4138_v14 = vsel %vm17288_vm10, %v4060_v59, -inf  ;;  %v4139_v35 = vsel %vm17295_vm15, %v4092_v24, -inf  ;;  %v17565_v4 = vld [vmem:[#allocation48_spill] sm:$0xff] }
 0xacc   :  { %v5199_v28 = vmul.f32 0.5, %v5135_v3  ;;  %v4847_v16 = vmax.f32 %v17561_v13, %v4783_v47  ;;  %v13778_v30 = vmax.f32 %v13627_v19, %v4486_v56  ;;  %vm17566_vm13 = vcmp.lt.s32.totalorder %v17280_v61, 16  ;;  %v17568_v3 = vld [vmem:[#allocation58_spill] sm:$0xff]  ;;  %v17569_v19 = vld [vmem:[#allocation99_spill] sm:$0xff] }
 0xacd   :  { %v13761_v0 = vpop.permute.xlu0 %4598  ;;  %v13773_v11 = vpop.permute.xlu1 %4888  ;;  %v4427_v2 = vsel %vm17566_vm13, %v17565_v4, %v17564_v26  ;;  %v5200_v59 = vmul.f32 0.5, %v5136_v37  ;;  %v5166_v53 = vmax.f32 %v4846_v25, %v5102_v48  ;;  %v13785_v24 = vmax.f32 %v13644_v63, %v4487_v12  ;;  %vm17572_vm0 = vmmov %vm17566_vm13  ;;  %v17578_v25 = vld [vmem:[#allocation91_spill] sm:$0xff] }
 0xace   :  { %17559 = vst [vmem:[#allocation57_spill] sm:$0xff] %v13761_v0  ;;  %17562 = vst [vmem:[#allocation62_spill] sm:$0xff] %v13773_v11  ;;  %v4232_v47 = vmax.f32 %v17568_v3, %v4168_v60  ;;  %v5201_v13 = vmul.f32 0.5, %v5137_v38  ;;  %v5167_v8 = vmax.f32 %v4847_v16, %v5103_v51  ;;  %v4233_v56 = vmax.f32 %v17569_v19, %v4169_v7  ;;  %v17584_v3 = vld [vmem:[#allocation93_spill] sm:$0xff] }
 0xacf   :  { %4646 = vrot.lane.b32.xlu0 %v13616_v57, %s8155_s15  ;;  %17563 = vst [vmem:[#allocation45_spill] sm:$0xff] %v13778_v30  ;;  %17567 = vst [vmem:[#allocation64_spill] sm:$0xff] %v13785_v24  ;;  %4996 = vrot.lane.b32.xlu1 %v13604_v55, %s8157_s17  ;;  %v4202_v11 = vmax.f32 %v17570_v15, %v4138_v14  ;;  %v4203_v49 = vmax.f32 %v17571_v40, %v4139_v35  ;;  %7968 = vtanh.f32 %v5198_v9  ;;  %v17574_v15 = vld [vmem:[#allocation92_spill] sm:$0xff]  ;;  %v17575_v40 = vld [vmem:[#allocation89_spill] sm:$0xff] }
 0xad0   :  { %v4395_v63 = vsel %vm17572_vm0, %v17564_v26, %v17565_v4  ;;  %v4488_v37 = vsel %vm17292_vm5, %v4427_v2, -inf  ;;  %7970 = vtanh.f32 %v5199_v28  ;;  %vm17573_vm3 = vcmp.lt.s32.totalorder %v17280_v61, 127  ;;  %vm17576_vm13 = vmmov %vm17572_vm0  ;;  %v17577_v9 = vld [vmem:[#allocation97_spill] sm:$0xff]  ;;  %v17620_v55 = vld [vmem:[#allocation122_spill] sm:$0xff] }
 0xad1   :  { %v13790_v0 = vpop.permute.xlu0 %4662  ;;  %v4703_v12 = vsel %vm17573_vm3, %v13307_v29, %v13326_v42  ;;  %v13805_v60 = vpop.permute.xlu1 %4952  ;;  %v4380_v38 = vsel %vm17576_vm13, %v17575_v40, %v17574_v15  ;;  %v4412_v48 = vsel %vm17572_vm0, %v17574_v15, %v17575_v40  ;;  %7972 = vtanh.f32 %v5200_v59  ;;  %v17589_v15 = vld [vmem:[#allocation119_spill] sm:$0xff] }
 0xad2   :  { %v5206_v7 = vmul.f32 0.5, %v5166_v53  ;;  %vm17579_vm3 = vcmp.lt.s32.totalorder %v17280_v61, 112  ;;  %7974 = vtanh.f32 %v5201_v13  ;;  %v5207_v14 = vmul.f32 0.5, %v5167_v8 }
 0xad3   :  { %4902 = vrot.lane.b32.xlu0 %v13606_v43, %s8157_s17  ;;  %v4061_v51 = vsel %vm17579_vm3, %v17578_v25, %v17577_v9  ;;  %v5055_v35 = vsel %vm17580_vm4, %v13373_v39, %v13346_v36  ;;  %4584 = vrot.lane.b32.xlu1 %v13646_v62, %s8155_s15  ;;  %v4489_v16 = vsel %vm17299_vm7, %v4395_v63, -inf  ;;  %v13831_v26 = vmax.f32 %v4232_v47, %v4488_v37  ;;  %vm17583_vm4 = vmmov %vm17579_vm3  ;;  %v17585_v47 = vld [vmem:[#allocation98_spill] sm:$0xff] }
 0xad4   :  { %vm17582_vm13 = vcmp.lt.s32.totalorder %v17280_v61, 127  ;;  %v4784_v4 = vsel %vm17531_vm8, %v4703_v12, -inf  ;;  %v4458_v2 = vsel %vm17292_vm5, %v4412_v48, -inf  ;;  %v4459_v59 = vsel %vm17299_vm7, %v4380_v38, -inf  ;;  %vm17586_vm0 = vmmov %vm17579_vm3  ;;  %v17590_v48 = vld [vmem:[#allocation95_spill] sm:$0xff] }
 0xad5   :  { %v13827_v28 = vpop.permute.xlu0 %4918  ;;  %17581 = vst [vmem:[#allocation54_spill] sm:$0xff] %v13831_v26  ;;  %v4735_v8 = vsel %vm17582_vm13, %v13326_v42, %v13307_v29  ;;  %v4093_v53 = vsel %vm17583_vm4, %v17577_v9, %v17578_v25  ;;  %v4076_v13 = vsel %vm17586_vm0, %v17585_v47, %v17584_v3  ;;  %v13851_v29 = vpop.permute.xlu1 %4600  ;;  %v4140_v42 = vsel %vm17288_vm10, %v4061_v51, -inf  ;;  %vm17588_vm13 = vmmov %vm17586_vm0  ;;  %v17640_v46 = vld [vmem:[#allocation62_spill] sm:$0xff] }
 0xad6   :  { %7976 = vtanh.f32 %v5206_v7  ;;  %vm17587_vm3 = vcmp.lt.s32.totalorder %v17280_v61, 1  ;;  %v5104_v63 = vsel %vm17541_vm11, %v5055_v35, -inf  ;;  %v4108_v37 = vsel %vm17588_vm13, %v17584_v3, %v17585_v47  ;;  %v17591_v7 = vld [vmem:[#allocation71_spill] sm:$0xff]  ;;  %v17596_v3 = vld [vmem:[#allocation105_spill] sm:$0xff] }
 0xad7   :  { %4966 = vrot.lane.b32.xlu0 %v13616_v57, %s8157_s17  ;;  %v5023_v19 = vsel %vm17587_vm3, %v13346_v36, %v13373_v39  ;;  %7978 = vtanh.f32 %v5207_v14  ;;  %v4785_v12 = vsel %vm17536_vm14, %v4735_v8, -inf  ;;  %v4848_v40 = vmax.f32 %v17589_v15, %v4784_v4  ;;  %4648 = vrot.lane.b32.xlu1 %v13656_v54, %s8155_s15  ;;  %v17599_v15 = vld [vmem:[#allocation108_spill] sm:$0xff] }
 0xad8   :  { %v4141_v36 = vsel %vm17295_vm15, %v4093_v53, -inf  ;;  %v4170_v39 = vsel %vm17288_vm10, %v4076_v13, -inf  ;;  %vm17592_vm4 = vcmp.lt.s32.totalorder %v17280_v61, 16  ;;  %v13886_v51 = vmax.f32 %v4233_v56, %v4489_v16  ;;  %v17597_v56 = vld [vmem:[#allocation120_spill] sm:$0xff] }
 0xad9   :  { %v13872_v38 = vpop.permute.xlu0 %4982  ;;  %v4381_v9 = vsel %vm17592_vm4, %v17591_v7, %v17590_v48  ;;  %vm17593_vm0 = vmmov %vm17592_vm4  ;;  %v13888_v14 = vmax.f32 %v4202_v11, %v4458_v2  ;;  %v5105_v35 = vsel %vm17546_vm6, %v5023_v19, -inf  ;;  %v5168_v8 = vmax.f32 %v4848_v40, %v5104_v63  ;;  %v13892_v4 = vpop.permute.xlu1 %4664  ;;  %v17598_v11 = vld [vmem:[#allocation107_spill] sm:$0xff] }
 0xada   :  { %v4413_v25 = vsel %vm17593_vm0, %v17590_v48, %v17591_v7  ;;  %v13896_v53 = vmax.f32 %v4203_v49, %v4459_v59  ;;  %v4204_v47 = vmax.f32 %v17596_v3, %v4140_v42  ;;  %v4171_v13 = vsel %vm17295_vm15, %v4108_v37, -inf  ;;  %v17601_v59 = vld [vmem:[#allocation101_spill] sm:$0xff]  ;;  %vm17603_vm3 = vmmov %vm17593_vm0  ;;  %v17605_v40 = vld [vmem:[#allocation103_spill] sm:$0xff] }
 0xadb   :  { %17594 = vst [vmem:[#allocation96_spill] sm:$0xff] %v13888_v14  ;;  %4614 = vrot.lane.b32.xlu0 %v13778_v30, %s8155_s15  ;;  %v4849_v16 = vmax.f32 %v17597_v56, %v4785_v12  ;;  %v4205_v2 = vmax.f32 %v17598_v11, %v4141_v36  ;;  %v13904_v48 = vmax.f32 %v17599_v15, %v4170_v39  ;;  %v4460_v19 = vsel %vm17292_vm5, %v4413_v25, -inf  ;;  %v17602_v42 = vld [vmem:[#allocation37_spill] sm:$0xff]  ;;  %v17604_v12 = vld [vmem:[#allocation104_spill] sm:$0xff]  ;;  %v17607_v25 = vld [vmem:[#allocation110_spill] sm:$0xff] }
 0xadc   :  { %17595 = vst [vmem:[#allocation34_spill] sm:$0xff] %v13896_v53  ;;  %v4461_v63 = vsel %vm17299_vm7, %v4381_v9, -inf  ;;  %4904 = vrot.lane.b32.xlu1 %v13646_v62, %s8157_s17  ;;  %v13918_v37 = vsel %vm17603_vm3, %v17602_v42, %v17601_v59  ;;  %v4077_v36 = vsel %vm17588_vm13, %v17605_v40, %v17604_v12  ;;  %vm17606_vm4 = vcmp.lt.s32.totalorder %v17280_v61, 127  ;;  %v7969_v9 = vpop.eup %7968  ;;  %vm17608_vm0 = vmmov %vm17588_vm13 }
 0xadd   :  { %v13912_v49 = vpop.permute.xlu0 %4570  ;;  %v4688_v39 = vsel %vm17606_vm4, %v13338_v50, %v13363_v20  ;;  %v5169_v7 = vmax.f32 %v4849_v16, %v5105_v35  ;;  %v4235_v3 = vmax.f32 %v17607_v25, %v4171_v13  ;;  %v4109_v56 = vsel %vm17608_vm0, %v17604_v12, %v17605_v40  ;;  %vm17609_vm3 = vmmov %vm17606_vm4  ;;  %v13937_v62 = vpop.permute.xlu1 %4920  ;;  %v17615_v25 = vld [vmem:[#allocation106_spill] sm:$0xff] }
 0xade   :  { %17600 = vst [vmem:[#allocation113_spill] sm:$0xff] %v13912_v49  ;;  %v4720_v11 = vsel %vm17609_vm3, %v13363_v20, %v13338_v50  ;;  %v5208_v15 = vmul.f32 0.5, %v5168_v8  ;;  %v7971_v35 = vpop.eup %7970  ;;  %v13941_v16 = vmax.f32 %v4204_v47, %v4460_v19  ;;  %v13943_v13 = vmax.f32 %v4205_v2, %v4461_v63 }
 0xadf   :  { %4678 = vrot.lane.b32.xlu0 %v13785_v24, %s8155_s15  ;;  %vm17611_vm13 = vcmp.lt.s32.totalorder %v17280_v61, 16  ;;  %vm17612_vm4 = vcmp.lt.s32.totalorder %v17280_v61, 1  ;;  %v7973_v20 = vpop.eup %7972  ;;  %v4490_v8 = vsel %vm17292_vm5, %v13918_v37, -inf  ;;  %v4172_v47 = vsel %vm17288_vm10, %v4077_v36, -inf }
 0xae0   :  { %17610 = vst [vmem:[#allocation114_spill] sm:$0xff] %v13943_v13  ;;  %v4396_v12 = vsel %vm17611_vm13, %v17601_v59, %v17602_v42  ;;  %v5040_v50 = vsel %vm17612_vm4, %v13409_v18, %v13388_v34  ;;  %v4754_v2 = vsel %vm17531_vm8, %v4688_v39, -inf  ;;  %vm17613_vm0 = vmmov %vm17612_vm4  ;;  %4968 = vrot.lane.b32.xlu1 %v13656_v54, %s8157_s17  ;;  %v7975_v59 = vpop.eup %7974  ;;  %v4173_v42 = vsel %vm17295_vm15, %v4109_v56, -inf  ;;  %v17614_v39 = vld [vmem:[#allocation67_spill] sm:$0xff]  ;;  %v17618_v56 = vld [vmem:[#allocation121_spill] sm:$0xff] }
 0xae1   :  { %v5008_v19 = vsel %vm17613_vm0, %v13388_v34, %v13409_v18  ;;  %v13966_v63 = vpop.permute.xlu0 %4634  ;;  %v5230_v37 = vmul.f32 0.5, %v7969_v9  ;;  %v4755_v40 = vsel %vm17536_vm14, %v4720_v11, -inf  ;;  %v5209_v36 = vmul.f32 0.5, %v5169_v7  ;;  %vm17616_vm3 = vmmov %vm17611_vm13  ;;  %v13978_v54 = vpop.permute.xlu1 %4984 }
 0xae2   :  { %v4397_v31 = vsel %vm17616_vm3, %v17615_v25, %v17614_v39  ;;  %v5231_v34 = vmul.f32 0.5, %v7971_v35  ;;  %7980 = vtanh.f32 %v5208_v15  ;;  %v5074_v18 = vsel %vm17541_vm11, %v5040_v50, -inf  ;;  %vm17617_vm13 = vmmov %vm17616_vm3 }
 0xae3   :  { %4934 = vrot.lane.b32.xlu0 %v13778_v30, %s8157_s17  ;;  %v4429_v7 = vsel %vm17617_vm13, %v17614_v39, %v17615_v25  ;;  %v5232_v9 = vmul.f32 0.5, %v7973_v20  ;;  %v4818_v11 = vmax.f32 %v17618_v56, %v4754_v2  ;;  %v5075_v35 = vsel %vm17546_vm6, %v5008_v19, -inf  ;;  %v7977_v15 = vpop.eup %7976  ;;  %v17621_v39 = vld [vmem:[#allocation61_spill] sm:$0xff] }
 0xae4   :  { %v4491_v50 = vsel %vm17299_vm7, %v4396_v12, -inf  ;;  %v4236_v57 = vmax.f32 %v17619_v23, %v4172_v47  ;;  %v5233_v43 = vmul.f32 0.5, %v7975_v59  ;;  %v4819_v30 = vmax.f32 %v17620_v55, %v4755_v40  ;;  %4616 = vrot.lane.b32.xlu1 %v13831_v26, %s8155_s15  ;;  %v7979_v20 = vpop.eup %7978  ;;  %v52_v55 = vld [vmem:[%s15940_s1] sm:$0xff] }
 0xae5   :  { %v13995_v49 = vpop.permute.xlu0 %4890  ;;  %v4237_v2 = vmax.f32 %v17621_v39, %v4173_v42  ;;  %v5246_v25 = vadd.f32 0.5, %v5230_v37  ;;  %7982 = vtanh.f32 %v5209_v36  ;;  %v5138_v19 = vmax.f32 %v4818_v11, %v5074_v18  ;;  %v14005_v59 = vpop.permute.xlu1 %4572  ;;  %v53_v42 = vld [vmem:[%s15940_s1 + $0x8] sm:$0xff]  ;;  %v54_v18 = vld [vmem:[%s15940_s1 + $0x10] sm:$0xff] }
 0xae6   :  { %v4492_v56 = vsel %vm17292_vm5, %v4429_v7, -inf  ;;  %v4493_v23 = vsel %vm17299_vm7, %v4397_v31, -inf  ;;  %v5247_v12 = vadd.f32 0.5, %v5231_v34  ;;  %v5139_v47 = vmax.f32 %v4819_v30, %v5075_v35 }
 0xae7   :  { %4586 = vrot.lane.b32.xlu0 %v13888_v14, %s8155_s15  ;;  %v5248_v37 = vadd.f32 0.5, %v5232_v9  ;;  %v5238_v40 = vmul.f32 0.5, %v7977_v15  ;;  %vm17622_vm4 = vcmp.lt.s32.totalorder %v17280_v61, 127  ;;  %v14021_v36 = vmax.f32 %v13904_v48, %v4490_v8 }
 0xae8   :  { %v4689_v31 = vsel %vm17622_vm4, %v13399_v33, %v13418_v58  ;;  %vm17623_vm0 = vmmov %vm17622_vm4  ;;  %v14023_v34 = vmax.f32 %v4235_v3, %v4491_v50  ;;  %v5249_v7 = vadd.f32 0.5, %v5233_v43  ;;  %v5239_v9 = vmul.f32 0.5, %v7979_v20  ;;  %4680 = vrot.lane.b32.xlu1 %v13886_v51, %s8155_s15 }
 0xae9   :  { %v4721_v30 = vsel %vm17623_vm0, %v13418_v58, %v13399_v33  ;;  %17624 = vst [vmem:[#allocation115_spill] sm:$0xff] %v14021_v36  ;;  %v14030_v11 = vpop.permute.xlu0 %4954  ;;  %v14032_v35 = vmax.f32 %v4236_v57, %v4492_v56  ;;  %v14034_v15 = vmax.f32 %v4237_v2, %v4493_v23  ;;  %v14036_v33 = vmul.f32 %v5246_v25, %v52_v55  ;;  %v55_v58 = vld [vmem:[%s15940_s1 + $0x18] sm:$0xff]  ;;  %v14047_v57 = vpop.permute.xlu1 %4636  ;;  %vm17628_vm13 = vmmov %vm17623_vm0  ;;  %v60_v56 = vld [vmem:[%s15940_s1 + $0x40] sm:$0xff] }
 0xaea   :  { %17625 = vst [vmem:[#allocation116_spill] sm:$0xff] %v14023_v34  ;;  %v5202_v48 = vmul.f32 0.5, %v5138_v19  ;;  %v14041_v3 = vmul.f32 %v5247_v12, %v53_v42  ;;  %v5203_v43 = vmul.f32 0.5, %v5139_v47  ;;  %v4756_v8 = vsel %vm17531_vm8, %v4689_v31, -inf  ;;  %v61_v42 = vld [vmem:[%s15940_s1 + $0x48] sm:$0xff]  ;;  %v17631_v31 = vld [vmem:[#allocation82_spill] sm:$0xff] }
 0xaeb   :  { %17626 = vst [vmem:[#allocation56_spill] sm:$0xff] %v14032_v35  ;;  %v4757_v50 = vsel %vm17536_vm14, %v4721_v30, -inf  ;;  %4650 = vrot.lane.b32.xlu0 %v13896_v53, %s8155_s15  ;;  %v14051_v20 = vmul.f32 %v5248_v37, %v54_v18  ;;  %v5254_v39 = vadd.f32 0.5, %v5238_v40  ;;  %vm17627_vm3 = vcmp.lt.s32.totalorder %v17280_v61, 1  ;;  %v17630_v37 = vld [vmem:[#allocation123_spill] sm:$0xff] }
 0xaec   :  { %v5041_v2 = vsel %vm17627_vm3, %v13469_v10, %v13438_v22  ;;  %v4690_v25 = vsel %vm17628_vm13, %v13570_v41, %v13614_v52  ;;  %v14061_v19 = vmul.f32 %v5249_v7, %v55_v58  ;;  %v5255_v23 = vadd.f32 0.5, %v5239_v9  ;;  %vm17629_vm4 = vmmov %vm17627_vm3  ;;  %4936 = vrot.lane.b32.xlu1 %v13831_v26, %s8157_s17 }
 0xaed   :  { %v5009_v55 = vsel %vm17629_vm4, %v13438_v22, %v13469_v10  ;;  %v4722_v12 = vsel %vm17623_vm0, %v13614_v52, %v13570_v41  ;;  %v14076_v47 = vpop.permute.xlu0 %4602  ;;  %7984 = vtanh.f32 %v5202_v48  ;;  %v4820_v40 = vmax.f32 %v17630_v37, %v4756_v8  ;;  %vm17632_vm13 = vmmov %vm17627_vm3  ;;  %v14095_v18 = vpop.permute.xlu1 %4892 }
 0xaee   :  { %v4821_v30 = vmax.f32 %v17631_v31, %v4757_v50  ;;  %v5042_v22 = vsel %vm17627_vm3, %v13723_v1, %v13670_v6  ;;  %7986 = vtanh.f32 %v5203_v43  ;;  %v5076_v10 = vsel %vm17541_vm11, %v5041_v2, -inf  ;;  %vm17633_vm4 = vmmov %vm17623_vm0  ;;  %v17634_v50 = vld [vmem:[#allocation86_spill] sm:$0xff] }
 0xaef   :  { %v4758_v41 = vsel %vm17531_vm8, %v4690_v25, -inf  ;;  %v5010_v52 = vsel %vm17632_vm13, %v13670_v6, %v13723_v1  ;;  %4906 = vrot.lane.b32.xlu0 %v13888_v14, %s8157_s17  ;;  %v7981_v7 = vpop.eup %7980  ;;  %v14099_v9 = vmul.f32 %v5254_v39, %v60_v56  ;;  %v4704_v58 = vsel %vm17633_vm4, %v13430_v44, %v13455_v17  ;;  %v17635_v39 = vld [vmem:[#allocation55_spill] sm:$0xff]  ;;  %vm17636_vm3 = vmmov %vm17623_vm0  ;;  %v17639_v31 = vld [vmem:[#allocation42_spill] sm:$0xff] }
 0xaf0   :  { %v5077_v48 = vsel %vm17546_vm6, %v5009_v55, -inf  ;;  %v4759_v43 = vsel %vm17536_vm14, %v4722_v12, -inf  ;;  %v14109_v6 = vmul.f32 %v5255_v23, %v61_v42  ;;  %v4736_v1 = vsel %vm17623_vm0, %v13455_v17, %v13430_v44  ;;  %4588 = vrot.lane.b32.xlu1 %v13941_v16, %s8155_s15  ;;  %v17637_v23 = vld [vmem:[#allocation44_spill] sm:$0xff]  ;;  %vm17638_vm13 = vmmov %vm17623_vm0 }
 0xaf1   :  { %v5078_v8 = vsel %vm17541_vm11, %v5042_v22, -inf  ;;  %v4691_v2 = vsel %vm17636_vm3, %v17635_v39, %v17634_v50  ;;  %v14123_v25 = vpop.permute.xlu0 %4666  ;;  %v5140_v56 = vmax.f32 %v4820_v40, %v5076_v10  ;;  %v4822_v55 = vmax.f32 %v17637_v23, %v4758_v41  ;;  %v14137_v10 = vpop.permute.xlu1 %4956 }
 0xaf2   :  { %v5079_v12 = vsel %vm17546_vm6, %v5010_v52, -inf  ;;  %v4723_v44 = vsel %vm17638_vm13, %v17634_v50, %v17635_v39  ;;  %v7983_v17 = vpop.eup %7982  ;;  %v5240_v42 = vmul.f32 0.5, %v7981_v7  ;;  %v5141_v37 = vmax.f32 %v4821_v30, %v5077_v48  ;;  %v17644_v50 = vld [vmem:[#allocation41_spill] sm:$0xff] }
 0xaf3   :  { %v4823_v22 = vmax.f32 %v17639_v31, %v4759_v43  ;;  %vm17641_vm4 = vcmp.lt.s32.totalorder %v17280_v61, 1  ;;  %4970 = vrot.lane.b32.xlu0 %v13896_v53, %s8157_s17  ;;  %v4786_v41 = vsel %vm17531_vm8, %v4704_v58, -inf  ;;  %v5142_v52 = vmax.f32 %v4822_v55, %v5078_v8  ;;  %v17643_v43 = vld [vmem:[#allocation38_spill] sm:$0xff]  ;;  %v17647_v31 = vld [vmem:[#allocation85_spill] sm:$0xff] }
 0xaf4   :  { %v5043_v40 = vsel %vm17641_vm4, %v13805_v60, %v17640_v46  ;;  %v4760_v7 = vsel %vm17531_vm8, %v4691_v2, -inf  ;;  %vm17642_vm0 = vmmov %vm17641_vm4  ;;  %v4787_v48 = vsel %vm17536_vm14, %v4736_v1, -inf  ;;  %v4761_v58 = vsel %vm17536_vm14, %v4723_v44, -inf  ;;  %4652 = vrot.lane.b32.xlu1 %v13943_v13, %s8155_s15 }
 0xaf5   :  { %v5011_v30 = vsel %vm17642_vm0, %v17640_v46, %v13805_v60  ;;  %vm17645_vm3 = vmmov %vm17642_vm0  ;;  %v5143_v23 = vmax.f32 %v4823_v22, %v5079_v12  ;;  %v14159_v8 = vpop.permute.xlu0 %4922  ;;  %v5241_v2 = vmul.f32 0.5, %v7983_v17  ;;  %v5204_v55 = vmul.f32 0.5, %v5140_v56  ;;  %v14170_v5 = vpop.permute.xlu1 %4604  ;;  %v62_v56 = vld [vmem:[%s15940_s1 + $0x50] sm:$0xff] }
 0xaf6   :  { %v5056_v39 = vsel %vm17645_vm3, %v17644_v50, %v17643_v43  ;;  %vm17646_vm13 = vmmov %vm17642_vm0  ;;  %v5080_v60 = vsel %vm17541_vm11, %v5043_v40, -inf  ;;  %v5256_v1 = vadd.f32 0.5, %v5240_v42  ;;  %v5205_v12 = vmul.f32 0.5, %v5141_v37  ;;  %v17648_v17 = vld [vmem:[#allocation124_spill] sm:$0xff]  ;;  %v17649_v40 = vld [vmem:[#allocation87_spill] sm:$0xff] }
 0xaf7   :  { %v5024_v46 = vsel %vm17646_vm13, %v17643_v43, %v17644_v50  ;;  %v4824_v22 = vmax.f32 %v17647_v31, %v4760_v7  ;;  %v5081_v44 = vsel %vm17546_vm6, %v5011_v30, -inf  ;;  %4618 = vrot.lane.b32.xlu0 %v14021_v36, %s8155_s15  ;;  %v4850_v43 = vmax.f32 %v17648_v17, %v4786_v41  ;;  %v17650_v31 = vld [vmem:[#allocation57_spill] sm:$0xff] }
 0xaf8   :  { %v5106_v42 = vsel %vm17541_vm11, %v5056_v39, -inf  ;;  %v5262_v37 = vmul.f32 0.5, %v5142_v52  ;;  %v4825_v7 = vmax.f32 %v17649_v40, %v4761_v58  ;;  %v5107_v30 = vsel %vm17546_vm6, %v5024_v46, -inf  ;;  %4908 = vrot.lane.b32.xlu1 %v13941_v16, %s8157_s17  ;;  %v17652_v39 = vld [vmem:[#allocation83_spill] sm:$0xff] }
 0xaf9   :  { %v5263_v50 = vmul.f32 0.5, %v5143_v23  ;;  %vm17651_vm4 = vcmp.lt.s32.totalorder %v17280_v61, 127  ;;  %v5144_v53 = vmax.f32 %v4824_v22, %v5080_v60  ;;  %v14189_v41 = vpop.permute.xlu0 %4986  ;;  %v5257_v17 = vadd.f32 0.5, %v5241_v2  ;;  %v14198_v60 = vpop.permute.xlu1 %4668  ;;  %v17654_v22 = vld [vmem:[#allocation40_spill] sm:$0xff] }
 0xafa   :  { %v4706_v26 = vsel %vm17651_vm4, %v17650_v31, %v13790_v0  ;;  %v4851_v52 = vmax.f32 %v17652_v39, %v4787_v48  ;;  %7988 = vtanh.f32 %v5204_v55  ;;  %v5145_v58 = vmax.f32 %v4825_v7, %v5081_v44  ;;  %v7985_v40 = vpop.eup %7984  ;;  %v63_v48 = vld [vmem:[%s15940_s1 + $0x58] sm:$0xff]  ;;  %vm17653_vm3 = vmmov %vm17651_vm4  ;;  %v17655_v44 = vld [vmem:[#allocation39_spill] sm:$0xff] }
 0xafb   :  { %v14192_v14 = vmul.f32 %v5256_v1, %v62_v56  ;;  %7990 = vtanh.f32 %v5205_v12  ;;  %v5170_v23 = vmax.f32 %v4850_v43, %v5106_v42  ;;  %v5058_v46 = vsel %vm17642_vm0, %v13872_v38, %v13827_v28  ;;  %4682 = vrot.lane.b32.xlu0 %v14023_v34, %s8155_s15  ;;  %v7987_v2 = vpop.eup %7986  ;;  %vm17656_vm13 = vmmov %vm17653_vm3 }
 0xafc   :  { %v5171_v55 = vmax.f32 %v4851_v52, %v5107_v30  ;;  %7992 = vtanh.f32 %v5262_v37  ;;  %v4738_v1 = vsel %vm17653_vm3, %v13790_v0, %v17650_v31  ;;  %v4790_v12 = vsel %vm17531_vm8, %v4706_v26, -inf  ;;  %vm17657_vm4 = vmmov %vm17653_vm3  ;;  %4972 = vrot.lane.b32.xlu1 %v13943_v13, %s8157_s17 }
 0xafd   :  { %v4705_v56 = vsel %vm17656_vm13, %v17655_v44, %v17654_v22  ;;  %v4737_v43 = vsel %vm17657_vm4, %v17654_v22, %v17655_v44  ;;  %7994 = vtanh.f32 %v5263_v50  ;;  %v5264_v42 = vmul.f32 0.5, %v5144_v53  ;;  %v4575_v37 = vpop.permute.xlu0 %4574  ;;  %v17658_v50 = vld [vmem:[#allocation77_spill] sm:$0xff]  ;;  %v14232_v22 = vpop.permute.xlu1 %4924  ;;  %vm17661_vm3 = vmmov %vm17642_vm0  ;;  %v17663_v44 = vld [vmem:[#allocation43_spill] sm:$0xff] }
 0xafe   :  { %v5234_v0 = vmul.f32 0.5, %v7985_v40  ;;  %v5265_v7 = vmul.f32 0.5, %v5145_v58  ;;  %v5026_v26 = vsel %vm17642_vm0, %v13827_v28, %v13872_v38  ;;  %v5110_v30 = vsel %vm17541_vm11, %v5058_v46, -inf  ;;  %v17660_v46 = vld [vmem:[#allocation68_spill] sm:$0xff]  ;;  %vm17662_vm13 = vmmov %vm17642_vm0 }
 0xaff   :  { %v14227_v31 = vmul.f32 %v5257_v17, %v63_v48  ;;  %v5235_v39 = vmul.f32 0.5, %v7987_v2  ;;  %v4791_v53 = vsel %vm17536_vm14, %v4738_v1, -inf  ;;  %v4854_v52 = vmax.f32 %v17658_v50, %v4790_v12  ;;  %4938 = vrot.lane.b32.xlu0 %v14021_v36, %s8157_s17  ;;  %v17659_v17 = vld [vmem:[#allocation31_spill] sm:$0xff]  ;;  %v17665_v50 = vld [vmem:[#allocation84_spill] sm:$0xff]  ;;  %vm17666_vm0 = vmmov %vm17657_vm4 }
 0xb00   :  { %v5210_v58 = vmul.f32 0.5, %v5170_v23  ;;  %v5211_v40 = vmul.f32 0.5, %v5171_v55  ;;  %v4788_v28 = vsel %vm17531_vm8, %v4705_v56, -inf  ;;  %v4789_v38 = vsel %vm17536_vm14, %v4737_v43, -inf  ;;  %4620 = vrot.lane.b32.xlu1 %v14032_v35, %s8155_s15  ;;  %v56_v43 = vld [vmem:[%s15940_s1 + $0x20] sm:$0xff] }
 0xb01   :  { %v5057_v2 = vsel %vm17661_vm3, %v17660_v46, %v17659_v17  ;;  %7996 = vtanh.f32 %v5264_v42  ;;  %v5111_v48 = vsel %vm17546_vm6, %v5026_v26, -inf  ;;  %v5174_v1 = vmax.f32 %v4854_v52, %v5110_v30  ;;  %v4639_v23 = vpop.permute.xlu0 %4638  ;;  %v17664_v26 = vld [vmem:[#allocation51_spill] sm:$0xff]  ;;  %v14262_v36 = vpop.permute.xlu1 %4988  ;;  %vm17667_vm3 = vmmov %vm17666_vm0 }
 0xb02   :  { %v5250_v55 = vadd.f32 0.5, %v5234_v0  ;;  %v5025_v12 = vsel %vm17662_vm13, %v17659_v17, %v17660_v46  ;;  %v4855_v56 = vmax.f32 %v17663_v44, %v4791_v53  ;;  %7998 = vtanh.f32 %v5265_v7  ;;  %v57_v7 = vld [vmem:[%s15940_s1 + $0x28] sm:$0xff] }
 0xb03   :  { %v5251_v42 = vadd.f32 0.5, %v5235_v39  ;;  %v4852_v30 = vmax.f32 %v17664_v26, %v4788_v28  ;;  %v4853_v52 = vmax.f32 %v17665_v50, %v4789_v38  ;;  %v4707_v0 = vsel %vm17657_vm4, %v13851_v29, %v13892_v4  ;;  %5002 = vrot.lane.b32.xlu0 %v14023_v34, %s8157_s17  ;;  %vm17668_vm4 = vmmov %vm17666_vm0 }
 0xb04   :  { %v5108_v39 = vsel %vm17541_vm11, %v5057_v2, -inf  ;;  %v5175_v53 = vmax.f32 %v4855_v56, %v5111_v48  ;;  %v4694_v28 = vsel %vm17666_vm0, %v4575_v37, %v4639_v23  ;;  %v4726_v38 = vsel %vm17667_vm3, %v4639_v23, %v4575_v37  ;;  %4684 = vrot.lane.b32.xlu1 %v14034_v15, %s8155_s15  ;;  %vm17669_vm0 = vmmov %vm17662_vm13 }
 0xb05   :  { %8000 = vtanh.f32 %v5210_v58  ;;  %v5109_v17 = vsel %vm17546_vm6, %v5025_v12, -inf  ;;  %v5270_v46 = vmul.f32 0.5, %v5174_v1  ;;  %v5059_v44 = vsel %vm17662_vm13, %v13978_v54, %v13937_v62  ;;  %v4895_v2 = vpop.permute.xlu0 %4894  ;;  %vm17674_vm13 = vmmov %vm17669_vm0 }
 0xb06   :  { %v14283_v48 = vmul.f32 %v5250_v55, %v56_v43  ;;  %8002 = vtanh.f32 %v5211_v40  ;;  %v4739_v37 = vsel %vm17668_vm4, %v13892_v4, %v13851_v29  ;;  %v4792_v58 = vsel %vm17531_vm8, %v4707_v0, -inf  ;;  %v4577_v40 = vpop.permute.xlu1 %4576  ;;  %v17670_v0 = vld [vmem:[#allocation65_spill] sm:$0xff]  ;;  %vm17675_vm4 = vmmov %vm17669_vm0 }
 0xb07   :  { %v14291_v1 = vpop.eup %7988  ;;  %v14293_v23 = vmul.f32 %v5251_v42, %v57_v7  ;;  %v5172_v12 = vmax.f32 %v4852_v30, %v5108_v39  ;;  %v4766_v56 = vsel %vm17531_vm8, %v4694_v28, -inf  ;;  %v4767_v55 = vsel %vm17536_vm14, %v4726_v38, -inf  ;;  %4998 = vrot.lane.b32.xlu0 %v13785_v24, %s8157_s17  ;;  %v17671_v39 = vld [vmem:[#allocation113_spill] sm:$0xff] }
 0xb08   :  { %v14301_v43 = vpop.eup %7990  ;;  %v5173_v29 = vmax.f32 %v4853_v52, %v5109_v17  ;;  %v5271_v4 = vmul.f32 0.5, %v5175_v53  ;;  %v5027_v42 = vsel %vm17669_vm0, %v13937_v62, %v13978_v54  ;;  %v5112_v26 = vsel %vm17541_vm11, %v5059_v44, -inf  ;;  %4940 = vrot.lane.b32.xlu1 %v14032_v35, %s8157_s17  ;;  %v17672_v54 = vld [vmem:[#allocation70_spill] sm:$0xff]  ;;  %v17673_v38 = vld [vmem:[#allocation109_spill] sm:$0xff]  ;;  %vm17677_vm0 = vmmov %vm17667_vm3 }
 0xb09   :  { %v7993_v30 = vpop.eup %7992  ;;  %8004 = vtanh.f32 %v5270_v46  ;;  %v4793_v50 = vsel %vm17536_vm14, %v4739_v37, -inf  ;;  %v4856_v7 = vmax.f32 %v17670_v0, %v4792_v58  ;;  %v4692_v52 = vsel %vm17667_vm3, %v17671_v39, %v13966_v63  ;;  %v4959_v53 = vpop.permute.xlu0 %4958  ;;  %vm17678_vm3 = vmmov %vm17677_vm0 }
 0xb0a   :  { %v7995_v62 = vpop.eup %7994  ;;  %v4830_v28 = vmax.f32 %v17672_v54, %v4766_v56  ;;  %v4831_v17 = vmax.f32 %v17673_v38, %v4767_v55  ;;  %v5014_v46 = vsel %vm17674_vm13, %v4895_v2, %v4959_v53  ;;  %v5046_v44 = vsel %vm17675_vm4, %v4959_v53, %v4895_v2  ;;  %v4641_v34 = vpop.permute.xlu1 %4640  ;;  %v17676_v54 = vld [vmem:[#allocation90_spill] sm:$0xff]  ;;  %vm17679_vm13 = vmmov %vm17677_vm0 }
 0xb0b   :  { %v5113_v37 = vsel %vm17546_vm6, %v5027_v42, -inf  ;;  %v5176_v58 = vmax.f32 %v4856_v7, %v5112_v26  ;;  %v5086_v0 = vsel %vm17541_vm11, %v5046_v44, -inf  ;;  %v5087_v35 = vsel %vm17546_vm6, %v5014_v46, -inf  ;;  %vm17686_vm7 = vmmov %vm17678_vm3 }
 0xb0c   :  { %v5294_v56 = vmul.f32 0.5, %v7993_v30  ;;  %v4857_v55 = vmax.f32 %v17676_v54, %v4793_v50  ;;  %v5150_v38 = vmax.f32 %v4830_v28, %v5086_v0  ;;  %v5151_v24 = vmax.f32 %v4831_v17, %v5087_v35  ;;  %5004 = vrot.lane.b32.xlu1 %v14034_v15, %s8157_s17 }
 0xb0d   :  { %v5295_v13 = vmul.f32 0.5, %v7995_v62  ;;  %8006 = vtanh.f32 %v5271_v4  ;;  %v4695_v2 = vsel %vm17677_vm0, %v4577_v40, %v4641_v34  ;;  %v4727_v42 = vsel %vm17678_vm3, %v4641_v34, %v4577_v40  ;;  %v4607_v26 = vpop.permute.xlu0 %4606  ;;  %vm17680_vm0 = vmmov %vm17675_vm4 }
 0xb0e   :  { %v7997_v7 = vpop.eup %7996  ;;  %v4724_v30 = vsel %vm17679_vm13, %v13966_v63, %v17671_v39  ;;  %v4762_v35 = vsel %vm17531_vm8, %v4692_v52, -inf  ;;  %v5177_v4 = vmax.f32 %v4857_v55, %v5113_v37  ;;  %8008 = vtanh.f32 %v5150_v38  ;;  %v4897_v40 = vpop.permute.xlu1 %4896  ;;  %v17683_v38 = vld [vmem:[#allocation111_spill] sm:$0xff]  ;;  %vm17684_vm13 = vmmov %vm17678_vm3 }
 0xb0f   :  { %v7999_v50 = vpop.eup %7998  ;;  %v14343_v53 = vmul.f32 0.5, %v5172_v12  ;;  %v5272_v62 = vmul.f32 0.5, %v5176_v58  ;;  %v5044_v34 = vsel %vm17675_vm4, %v14030_v11, %v13995_v49  ;;  %8010 = vtanh.f32 %v5151_v24  ;;  %v17681_v24 = vld [vmem:[#allocation74_spill] sm:$0xff]  ;;  %vm17685_vm4 = vmmov %vm17680_vm0 }
 0xb10   :  { %v14349_v28 = vmul.f32 0.5, %v5173_v29  ;;  %v5012_v63 = vsel %vm17680_vm0, %v13995_v49, %v14030_v11  ;;  %v4768_v39 = vsel %vm17531_vm8, %v4695_v2, -inf  ;;  %v4769_v12 = vsel %vm17536_vm14, %v4727_v42, -inf  ;;  %5000 = vrot.lane.b32.xlu1 %v13886_v51, %s8157_s17 }
 0xb11   :  { %v5310_v52 = vadd.f32 0.5, %v5294_v56  ;;  %v5311_v17 = vadd.f32 0.5, %v5295_v13  ;;  %v4763_v46 = vsel %vm17536_vm14, %v4724_v30, -inf  ;;  %v4826_v44 = vmax.f32 %v17681_v24, %v4762_v35  ;;  %v4671_v29 = vpop.permute.xlu0 %4670  ;;  %v17682_v56 = vld [vmem:[#allocation75_spill] sm:$0xff] }
 0xb12   :  { %v14364_v37 = vpop.eup %8000  ;;  %v5296_v49 = vmul.f32 0.5, %v7997_v7  ;;  %v5297_v11 = vmul.f32 0.5, %v7999_v50  ;;  %v5273_v58 = vmul.f32 0.5, %v5177_v4  ;;  %v5082_v0 = vsel %vm17541_vm11, %v5044_v34, -inf  ;;  %v4961_v42 = vpop.permute.xlu1 %4960 }
 0xb13   :  { %v14368_v54 = vpop.eup %8002  ;;  %8012 = vtanh.f32 %v5272_v62  ;;  %v5083_v13 = vsel %vm17546_vm6, %v5012_v63, -inf  ;;  %v4832_v55 = vmax.f32 %v17682_v56, %v4768_v39  ;;  %v4833_v2 = vmax.f32 %v17683_v38, %v4769_v12  ;;  %v17687_v12 = vld [vmem:[#allocation59_spill] sm:$0xff] }
 0xb14   :  { %v4710_v30 = vsel %vm17678_vm3, %v4607_v26, %v4671_v29  ;;  %v4742_v7 = vsel %vm17684_vm13, %v4671_v29, %v4607_v26  ;;  %v5015_v35 = vsel %vm17685_vm4, %v4897_v40, %v4961_v42  ;;  %v5047_v4 = vsel %vm17680_vm0, %v4961_v42, %v4897_v40  ;;  %vm17691_vm13 = vmmov %vm17680_vm0 }
 0xb15   :  { %v5146_v50 = vmax.f32 %v4826_v44, %v5082_v0  ;;  %v14386_v62 = vsel %vm17686_vm7, %v14005_v59, %v14047_v57  ;;  %v5088_v34 = vsel %vm17541_vm11, %v5047_v4, -inf  ;;  %v5089_v63 = vsel %vm17546_vm6, %v5015_v35, -inf  ;;  %v4927_v26 = vpop.permute.xlu0 %4926  ;;  %vm17690_vm7 = vmmov %vm17680_vm0 }
 0xb16   :  { %v8005_v39 = vpop.eup %8004  ;;  %v4827_v24 = vmax.f32 %v17687_v12, %v4763_v46  ;;  %v4725_v40 = vsel %vm17678_vm3, %v14047_v57, %v14005_v59  ;;  %v5152_v44 = vmax.f32 %v4832_v55, %v5088_v34  ;;  %v5153_v29 = vmax.f32 %v4833_v2, %v5089_v63  ;;  %v4609_v42 = vpop.permute.xlu1 %4608  ;;  %v17688_v2 = vld [vmem:[#allocation32_spill] sm:$0xff]  ;;  %vm17692_vm4 = vmmov %vm17678_vm3 }
 0xb17   :  { %v14397_v0 = vadd.f32 0.5, %v5296_v49  ;;  %8014 = vtanh.f32 %v5273_v58  ;;  %v4798_v56 = vsel %vm17531_vm8, %v4710_v30, -inf  ;;  %v4799_v38 = vsel %vm17536_vm14, %v4742_v7, -inf  ;;  %v17689_v7 = vld [vmem:[#allocation47_spill] sm:$0xff]  ;;  %vm17693_vm0 = vmmov %vm17678_vm3 }
 0xb18   :  { %v14403_v35 = vadd.f32 0.5, %v5297_v11  ;;  %v5147_v46 = vmax.f32 %v4827_v24, %v5083_v13  ;;  %v4764_v4 = vsel %vm17531_vm8, %v14386_v62, -inf  ;;  %8016 = vtanh.f32 %v5152_v44  ;;  %vm17694_vm3 = vmmov %vm17690_vm7 }
 0xb19   :  { %v5302_v59 = vmul.f32 0.5, %v8005_v39  ;;  %v5266_v57 = vmul.f32 0.5, %v5146_v50  ;;  %v4765_v49 = vsel %vm17536_vm14, %v4725_v40, -inf  ;;  %8018 = vtanh.f32 %v5153_v29  ;;  %v4991_v58 = vpop.permute.xlu0 %4990 }
 0xb1a   :  { %v8007_v55 = vpop.eup %8006  ;;  %v4862_v30 = vmax.f32 %v17688_v2, %v4798_v56  ;;  %v4863_v34 = vmax.f32 %v17689_v7, %v4799_v38  ;;  %v5030_v11 = vsel %vm17690_vm7, %v4927_v26, %v4991_v58  ;;  %v5062_v13 = vsel %vm17691_vm13, %v4991_v58, %v4927_v26  ;;  %v4673_v24 = vpop.permute.xlu1 %4672  ;;  %vm17695_vm7 = vmmov %vm17694_vm3 }
 0xb1b   :  { %v8009_v62 = vpop.eup %8008  ;;  %v4708_v50 = vsel %vm17692_vm4, %v14076_v47, %v14123_v25  ;;  %v4740_v63 = vsel %vm17693_vm0, %v14123_v25, %v14076_v47  ;;  %v5118_v39 = vsel %vm17541_vm11, %v5062_v13, -inf  ;;  %v5119_v12 = vsel %vm17546_vm6, %v5030_v11, -inf  ;;  %vm17696_vm13 = vmmov %vm17693_vm0 }
 0xb1c   :  { %v8011_v40 = vpop.eup %8010  ;;  %v5013_v26 = vsel %vm17694_vm3, %v14095_v18, %v14137_v10  ;;  %v5422_v44 = vmul.f32 %v8009_v62, %v5310_v52  ;;  %v5182_v29 = vmax.f32 %v4862_v30, %v5118_v39  ;;  %v5183_v56 = vmax.f32 %v4863_v34, %v5119_v12  ;;  %vm17697_vm4 = vmmov %vm17693_vm0  ;;  %v17698_v34 = vld [vmem:[#allocation94_spill] sm:$0xff] }
 0xb1d   :  { %v5045_v47 = vsel %vm17695_vm7, %v14137_v10, %v14095_v18  ;;  %v5423_v25 = vmul.f32 %v8011_v40, %v5311_v17  ;;  %v4711_v38 = vsel %vm17696_vm13, %v4609_v42, %v4673_v24  ;;  %v4743_v58 = vsel %vm17697_vm4, %v4673_v24, %v4609_v42  ;;  %v4579_v2 = vpop.permute.xlu0 %4578  ;;  %v17700_v24 = vld [vmem:[#allocation72_spill] sm:$0xff]  ;;  %vm17704_vm3 = vmmov %vm17693_vm0 }
 0xb1e   :  { %v5303_v7 = vmul.f32 0.5, %v8007_v55  ;;  %v5267_v11 = vmul.f32 0.5, %v5147_v46  ;;  %v14441_v13 = vadd.f32 %v5422_v44, %v14036_v33  ;;  %8020 = vtanh.f32 %v5182_v29  ;;  %v4929_v17 = vpop.permute.xlu1 %4928  ;;  %vm17705_vm13 = vmmov %vm17695_vm7 }
 0xb1f   :  { %v4794_v52 = vsel %vm17531_vm8, %v4708_v50, -inf  ;;  %v4795_v18 = vsel %vm17536_vm14, %v4740_v63, -inf  ;;  %v14448_v10 = vadd.f32 %v5423_v25, %v14041_v3  ;;  %8022 = vtanh.f32 %v5183_v56  ;;  %v17699_v50 = vld [vmem:[#allocation80_spill] sm:$0xff]  ;;  %vm17706_vm4 = vmmov %vm17695_vm7 }
 0xb20   :  { %v8013_v30 = vpop.eup %8012  ;;  %v5084_v42 = vsel %vm17541_vm11, %v5045_v47, -inf  ;;  %v5085_v33 = vsel %vm17546_vm6, %v5013_v26, -inf  ;;  %5486 = vst [vmem:[%s15941_s8] sm:$0xff] %v14441_v13  ;;  %v4800_v46 = vsel %vm17531_vm8, %v4711_v38, -inf  ;;  %v4801_v3 = vsel %vm17536_vm14, %v4743_v58, -inf  ;;  %v17701_v26 = vld [vmem:[#allocation73_spill] sm:$0xff] }
 0xb21   :  { %v5318_v55 = vadd.f32 0.5, %v5302_v59  ;;  %8024 = vtanh.f32 %v5266_v57  ;;  %v4828_v62 = vmax.f32 %v17698_v34, %v4764_v4  ;;  %v4829_v63 = vmax.f32 %v17699_v50, %v4765_v49  ;;  %5487 = vst [vmem:[%s15941_s8 + $0x8] sm:$0xff] %v14448_v10  ;;  %v4643_v39 = vpop.permute.xlu0 %4642  ;;  %v17702_v59 = vld [vmem:[#allocation4_spill] sm:$0xff]  ;;  %v17703_v47 = vld [vmem:[#allocation33_spill] sm:$0xff] }
 0xb22   :  { %v5319_v12 = vadd.f32 0.5, %v5303_v7  ;;  %8026 = vtanh.f32 %v5267_v11  ;;  %v4858_v40 = vmax.f32 %v17700_v24, %v4794_v52  ;;  %v4859_v44 = vmax.f32 %v17701_v26, %v4795_v18  ;;  %v4993_v25 = vpop.permute.xlu1 %4992 }
 0xb23   :  { %v5148_v29 = vmax.f32 %v4828_v62, %v5084_v42  ;;  %v5149_v56 = vmax.f32 %v4829_v63, %v5085_v33  ;;  %v4864_v57 = vmax.f32 %v17702_v59, %v4800_v46  ;;  %v4865_v4 = vmax.f32 %v17703_v47, %v4801_v3 }
 0xb24   :  { %v8015_v49 = vpop.eup %8014  ;;  %v4696_v38 = vsel %vm17693_vm0, %v4579_v2, %v4643_v39  ;;  %v4728_v58 = vsel %vm17704_vm3, %v4643_v39, %v4579_v2  ;;  %v5031_v7 = vsel %vm17695_vm7, %v4929_v17, %v4993_v25  ;;  %v5063_v11 = vsel %vm17705_vm13, %v4993_v25, %v4929_v17  ;;  %vm17707_vm0 = vmmov %vm17706_vm4 }
 0xb25   :  { %v8017_v52 = vpop.eup %8016  ;;  %v5304_v18 = vmul.f32 0.5, %v8013_v30  ;;  %v5060_v42 = vsel %vm17706_vm4, %v14189_v41, %v14159_v8  ;;  %v5120_v33 = vsel %vm17541_vm11, %v5063_v11, -inf  ;;  %v5121_v46 = vsel %vm17546_vm6, %v5031_v7, -inf  ;;  %v4899_v2 = vpop.permute.xlu0 %4898  ;;  %vm17710_vm3 = vmmov %vm17707_vm0 }
 0xb26   :  { %v8019_v3 = vpop.eup %8018  ;;  %v5028_v17 = vsel %vm17707_vm0, %v14159_v8, %v14189_v41  ;;  %v5424_v30 = vmul.f32 %v8017_v52, %v14397_v0  ;;  %v5184_v34 = vmax.f32 %v4864_v57, %v5120_v33  ;;  %v5185_v62 = vmax.f32 %v4865_v4, %v5121_v46  ;;  %v4581_v26 = vpop.permute.xlu1 %4580  ;;  %v17709_v4 = vld [vmem:[#allocation50_spill] sm:$0xff]  ;;  %vm17711_vm7 = vmmov %vm17707_vm0 }
 0xb27   :  { %v5268_v50 = vmul.f32 0.5, %v5148_v29  ;;  %v5425_v63 = vmul.f32 %v8019_v3, %v14403_v35  ;;  %v4770_v39 = vsel %vm17531_vm8, %v4696_v38, -inf  ;;  %v4771_v24 = vsel %vm17536_vm14, %v4728_v58, -inf }
 0xb28   :  { %v5269_v59 = vmul.f32 0.5, %v5149_v56  ;;  %v5114_v47 = vsel %vm17541_vm11, %v5060_v42, -inf  ;;  %v14501_v8 = vadd.f32 %v5424_v30, %v14051_v20  ;;  %8028 = vtanh.f32 %v5184_v34  ;;  %v17708_v56 = vld [vmem:[#allocation49_spill] sm:$0xff] }
 0xb29   :  { %v5305_v41 = vmul.f32 0.5, %v8015_v49  ;;  %v5115_v0 = vsel %vm17546_vm6, %v5028_v17, -inf  ;;  %v14506_v35 = vadd.f32 %v5425_v63, %v14061_v19  ;;  %8030 = vtanh.f32 %v5185_v62  ;;  %v4963_v29 = vpop.permute.xlu0 %4962 }
 0xb2a   :  { %5488 = vst [vmem:[%s15941_s8 + $0x10] sm:$0xff] %v14501_v8  ;;  %v4834_v57 = vmax.f32 %v17708_v56, %v4770_v39  ;;  %v4835_v20 = vmax.f32 %v17709_v4, %v4771_v24  ;;  %v5016_v25 = vsel %vm17710_vm3, %v4899_v2, %v4963_v29  ;;  %v5048_v49 = vsel %vm17711_vm7, %v4963_v29, %v4899_v2  ;;  %v4645_v52 = vpop.permute.xlu1 %4644  ;;  %v17716_v29 = vld [vmem:[#allocation81_spill] sm:$0xff]  ;;  %v17718_v4 = vld [vmem:[#allocation60_spill] sm:$0xff] }
 0xb2b   :  { %v8021_v38 = vpop.eup %8020  ;;  %v5178_v19 = vmax.f32 %v4858_v40, %v5114_v47  ;;  %vm17712_vm13 = vcmp.lt.s32.totalorder %v17280_v61, 127  ;;  %5489 = vst [vmem:[%s15941_s8 + $0x18] sm:$0xff] %v14506_v35  ;;  %v5090_v7 = vsel %vm17541_vm11, %v5048_v49, -inf  ;;  %v5091_v11 = vsel %vm17546_vm6, %v5016_v25, -inf  ;;  %v17719_v25 = vld [vmem:[#allocation66_spill] sm:$0xff] }
 0xb2c   :  { %v4709_v58 = vsel %vm17712_vm13, %v14170_v5, %v14198_v60  ;;  %v8023_v42 = vpop.eup %8022  ;;  %8032 = vtanh.f32 %v5268_v50  ;;  %v5430_v40 = vmul.f32 %v8021_v38, %v5318_v55  ;;  %v5154_v33 = vmax.f32 %v4834_v57, %v5090_v7  ;;  %vm17713_vm4 = vmmov %vm17712_vm13 }
 0xb2d   :  { %v5155_v46 = vmax.f32 %v4835_v20, %v5091_v11  ;;  %v5179_v2 = vmax.f32 %v4859_v44, %v5115_v0  ;;  %v5431_v3 = vmul.f32 %v8023_v42, %v5319_v12  ;;  %v4697_v17 = vsel %vm17713_vm4, %v4581_v26, %v4645_v52  ;;  %vm17714_vm0 = vmmov %vm17713_vm4  ;;  %v4611_v34 = vpop.permute.xlu0 %4610 }
 0xb2e   :  { %v4729_v30 = vsel %vm17714_vm0, %v4645_v52, %v4581_v26  ;;  %v8025_v62 = vpop.eup %8024  ;;  %vm17715_vm3 = vmmov %vm17714_vm0  ;;  %v4796_v55 = vsel %vm17531_vm8, %v4709_v58, -inf  ;;  %v14541_v50 = vadd.f32 %v5430_v40, %v14099_v9  ;;  %8034 = vtanh.f32 %v5154_v33  ;;  %v4901_v26 = vpop.permute.xlu1 %4900 }
 0xb2f   :  { %v4741_v63 = vsel %vm17715_vm3, %v14198_v60, %v14170_v5  ;;  %v8027_v12 = vpop.eup %8026  ;;  %v5274_v44 = vmul.f32 0.5, %v5178_v19  ;;  %v5061_v39 = vsel %vm17711_vm7, %v14262_v36, %v14232_v22  ;;  %v14548_v24 = vadd.f32 %v5431_v3, %v14109_v6  ;;  %vm17717_vm13 = vmmov %vm17711_vm7 }
 0xb30   :  { %8036 = vtanh.f32 %v5155_v46  ;;  %v5320_v5 = vadd.f32 0.5, %v5304_v18  ;;  %5494 = vst [vmem:[%s15941_s8 + $0x40] sm:$0xff] %v14541_v50  ;;  %v4772_v9 = vsel %vm17531_vm8, %v4697_v17, -inf  ;;  %v4773_v60 = vsel %vm17536_vm14, %v4729_v30, -inf  ;;  %vm17720_vm4 = vmmov %vm17714_vm0 }
 0xb31   :  { %8038 = vtanh.f32 %v14343_v53  ;;  %v5321_v47 = vadd.f32 0.5, %v5305_v41  ;;  %v5298_v0 = vmul.f32 0.5, %v8025_v62  ;;  %v4797_v6 = vsel %vm17536_vm14, %v4741_v63, -inf  ;;  %5495 = vst [vmem:[%s15941_s8 + $0x48] sm:$0xff] %v14548_v24  ;;  %v4675_v53 = vpop.permute.xlu0 %4674  ;;  %vm17721_vm3 = vmmov %vm17711_vm7 }
 0xb32   :  { %8040 = vtanh.f32 %v5269_v59  ;;  %v5275_v18 = vmul.f32 0.5, %v5179_v2  ;;  %v4860_v56 = vmax.f32 %v17716_v29, %v4796_v55  ;;  %v5029_v57 = vsel %vm17717_vm13, %v14232_v22, %v14262_v36  ;;  %v4965_v38 = vpop.permute.xlu1 %4964  ;;  %vm17722_vm7 = vmmov %vm17721_vm3  ;;  %v17723_v2 = vld [vmem:[#allocation36_spill] sm:$0xff] }
 0xb33   :  { %v5116_v59 = vsel %vm17541_vm11, %v5061_v39, -inf  ;;  %v5299_v41 = vmul.f32 0.5, %v8027_v12  ;;  %8042 = vtanh.f32 %v5274_v44  ;;  %v4836_v20 = vmax.f32 %v17718_v4, %v4772_v9  ;;  %vm17726_vm13 = vmmov %vm17721_vm3 }
 0xb34   :  { %v4837_v49 = vmax.f32 %v17719_v25, %v4773_v60  ;;  %v4712_v19 = vsel %vm17720_vm4, %v4611_v34, %v4675_v53  ;;  %v4744_v58 = vsel %vm17714_vm0, %v4675_v53, %v4611_v34  ;;  %v5017_v7 = vsel %vm17721_vm3, %v4901_v26, %v4965_v38  ;;  %v17724_v53 = vld [vmem:[#allocation63_spill] sm:$0xff]  ;;  %vm17727_vm4 = vmmov %vm17721_vm3 }
 0xb35   :  { %v5049_v36 = vsel %vm17722_vm7, %v4965_v38, %v4901_v26  ;;  %v8029_v22 = vpop.eup %8028  ;;  %v5117_v11 = vsel %vm17546_vm6, %v5029_v57, -inf  ;;  %v5180_v52 = vmax.f32 %v4860_v56, %v5116_v59  ;;  %v5093_v40 = vsel %vm17546_vm6, %v5017_v7, -inf  ;;  %v4931_v33 = vpop.permute.xlu0 %4930  ;;  %vm17728_vm3 = vmmov %vm17714_vm0 }
 0xb36   :  { %v5092_v42 = vsel %vm17541_vm11, %v5049_v36, -inf  ;;  %v8031_v46 = vpop.eup %8030  ;;  %v4861_v3 = vmax.f32 %v17723_v2, %v4797_v6  ;;  %v5432_v17 = vmul.f32 %v8029_v22, %v5320_v5  ;;  %v5157_v34 = vmax.f32 %v4837_v49, %v5093_v40  ;;  %v4613_v12 = vpop.permute.xlu1 %4612  ;;  %v58_v40 = vld [vmem:[%s15940_s1 + $0x30] sm:$0xff]  ;;  %vm17731_vm7 = vmmov %vm17714_vm0 }
 0xb37   :  { %v5156_v30 = vmax.f32 %v4836_v20, %v5092_v42  ;;  %8044 = vtanh.f32 %v5275_v18  ;;  %v5433_v62 = vmul.f32 %v8031_v46, %v5321_v47  ;;  %v4802_v63 = vsel %vm17531_vm8, %v4712_v19, -inf  ;;  %v17725_v18 = vld [vmem:[#allocation79_spill] sm:$0xff] }
 0xb38   :  { %v4803_v55 = vsel %vm17536_vm14, %v4744_v58, -inf  ;;  %v5236_v44 = vmul.f32 0.5, %v14291_v1  ;;  %v5181_v39 = vmax.f32 %v4861_v3, %v5117_v11  ;;  %v14595_v26 = vadd.f32 %v5432_v17, %v14192_v14 }
 0xb39   :  { %8046 = vtanh.f32 %v5156_v30  ;;  %v8033_v9 = vpop.eup %8032  ;;  %v5314_v5 = vadd.f32 0.5, %v5298_v0  ;;  %v5276_v60 = vmul.f32 0.5, %v5180_v52  ;;  %v14598_v6 = vadd.f32 %v5433_v62, %v14227_v31  ;;  %v4995_v47 = vpop.permute.xlu0 %4994 }
 0xb3a   :  { %8048 = vtanh.f32 %v5157_v34  ;;  %5496 = vst [vmem:[%s15941_s8 + $0x50] sm:$0xff] %v14595_v26  ;;  %v4866_v1 = vmax.f32 %v17724_v53, %v4802_v63  ;;  %v4867_v29 = vmax.f32 %v17725_v18, %v4803_v55  ;;  %v5032_v14 = vsel %vm17726_vm13, %v4931_v33, %v4995_v47  ;;  %v4677_v4 = vpop.permute.xlu1 %4676  ;;  %v59_v63 = vld [vmem:[%s15940_s1 + $0x38] sm:$0xff]  ;;  %vm17732_vm13 = vmmov %vm17714_vm0 }
 0xb3b   :  { %v5064_v0 = vsel %vm17727_vm4, %v4995_v47, %v4931_v33  ;;  %v8035_v56 = vpop.eup %8034  ;;  %8050 = vtanh.f32 %v14349_v28  ;;  %v5315_v31 = vadd.f32 0.5, %v5299_v41  ;;  %5497 = vst [vmem:[%s15941_s8 + $0x58] sm:$0xff] %v14598_v6  ;;  %v5123_v59 = vsel %vm17546_vm6, %v5032_v14, -inf }
 0xb3c   :  { %v5122_v57 = vsel %vm17541_vm11, %v5064_v0, -inf  ;;  %v5277_v25 = vmul.f32 0.5, %v5181_v39  ;;  %v5426_v49 = vmul.f32 %v8035_v56, %v5314_v5  ;;  %v5187_v19 = vmax.f32 %v4867_v29, %v5123_v59 }
 0xb3d   :  { %v8037_v20 = vpop.eup %8036  ;;  %v5186_v38 = vmax.f32 %v4866_v1, %v5122_v57  ;;  %8052 = vtanh.f32 %v5276_v60  ;;  %v4713_v41 = vsel %vm17714_vm0, %v4613_v12, %v4677_v4  ;;  %v4745_v7 = vsel %vm17728_vm3, %v4677_v4, %v4613_v12  ;;  %v4583_v36 = vpop.permute.xlu0 %4582  ;;  %vm17733_vm0 = vmmov %vm17727_vm4 }
 0xb3e   :  { %v14619_v58 = vpop.eup %8038  ;;  %v5427_v28 = vmul.f32 %v8037_v20, %v5315_v31  ;;  %v5237_v11 = vmul.f32 0.5, %v14301_v43  ;;  %v5252_v52 = vadd.f32 0.5, %v5236_v44  ;;  %v14627_v42 = vadd.f32 %v5426_v49, %v14283_v48  ;;  %v4933_v2 = vpop.permute.xlu1 %4932  ;;  %v17729_v44 = vld [vmem:[#allocation53_spill] sm:$0xff]  ;;  %vm17736_vm3 = vmmov %vm17733_vm0 }
 0xb3f   :  { %v8041_v22 = vpop.eup %8040  ;;  %8054 = vtanh.f32 %v5186_v38  ;;  %v5300_v33 = vmul.f32 0.5, %v8033_v9  ;;  %v4804_v48 = vsel %vm17531_vm8, %v4713_v41, -inf  ;;  %v4805_v43 = vsel %vm17536_vm14, %v4745_v7, -inf  ;;  %v17730_v9 = vld [vmem:[#allocation52_spill] sm:$0xff] }
 0xb40   :  { %v14633_v46 = vadd.f32 %v5427_v28, %v14293_v23  ;;  %8056 = vtanh.f32 %v5187_v19  ;;  %v8043_v3 = vpop.eup %8042  ;;  %5490 = vst [vmem:[%s15941_s8 + $0x20] sm:$0xff] %v14627_v42  ;;  %v5301_v17 = vmul.f32 0.5, %v8041_v22  ;;  %v5253_v30 = vadd.f32 0.5, %v5237_v11  ;;  %v64_v11 = vld [vmem:[%s15940_s1 + $0x60] sm:$0xff] }
 0xb41   :  { %8058 = vtanh.f32 %v5277_v25  ;;  %v4647_v23 = vpop.permute.xlu0 %4646  ;;  %v5412_v34 = vmul.f32 %v5252_v52, %v58_v40  ;;  %v5242_v62 = vmul.f32 0.5, %v14364_v37  ;;  %v5243_v55 = vmul.f32 0.5, %v14368_v54 }
 0xb42   :  { %5491 = vst [vmem:[%s15941_s8 + $0x28] sm:$0xff] %v14633_v46  ;;  %v5316_v12 = vadd.f32 0.5, %v5300_v33  ;;  %v4868_v39 = vmax.f32 %v17729_v44, %v4804_v48  ;;  %v4869_v5 = vmax.f32 %v17730_v9, %v4805_v43  ;;  %v4997_v60 = vpop.permute.xlu1 %4996  ;;  %v4698_v53 = vsel %vm17731_vm7, %v4583_v36, %v4647_v23  ;;  %v65_v48 = vld [vmem:[%s15940_s1 + $0x68] sm:$0xff]  ;;  %v17734_v43 = vld [vmem:[#allocation69_spill] sm:$0xff]  ;;  %vm17737_vm7 = vmmov %vm17733_vm0 }
 0xb43   :  { %v4730_v1 = vsel %vm17732_vm13, %v4647_v23, %v4583_v36  ;;  %v5033_v37 = vsel %vm17727_vm4, %v4933_v2, %v4997_v60  ;;  %v5065_v18 = vsel %vm17733_vm0, %v4997_v60, %v4933_v2  ;;  %v5317_v29 = vadd.f32 0.5, %v5301_v17  ;;  %v17735_v23 = vld [vmem:[#allocation78_spill] sm:$0xff]  ;;  %vm17738_vm4 = vmmov %vm17732_vm13 }
 0xb44   :  { %v8045_v47 = vpop.eup %8044  ;;  %v5306_v14 = vmul.f32 0.5, %v8043_v3  ;;  %v5124_v0 = vsel %vm17541_vm11, %v5065_v18, -inf  ;;  %v5125_v56 = vsel %vm17546_vm6, %v5033_v37, -inf  ;;  %v5413_v59 = vmul.f32 %v5253_v30, %v59_v63 }
 0xb45   :  { %v4903_v31 = vpop.permute.xlu0 %4902  ;;  %v5188_v20 = vmax.f32 %v4868_v39, %v5124_v0  ;;  %v5189_v25 = vmax.f32 %v4869_v5, %v5125_v56  ;;  %v5307_v49 = vmul.f32 0.5, %v8045_v47  ;;  %v4774_v19 = vsel %vm17531_vm8, %v4698_v53, -inf }
 0xb46   :  { %v8047_v54 = vpop.eup %8046  ;;  %v4775_v28 = vsel %vm17536_vm14, %v4730_v1, -inf  ;;  %v4585_v41 = vpop.permute.xlu1 %4584  ;;  %v5258_v36 = vadd.f32 0.5, %v5242_v62  ;;  %v5259_v52 = vadd.f32 0.5, %v5243_v55  ;;  %v5322_v40 = vadd.f32 0.5, %v5306_v14 }
 0xb47   :  { %v8049_v57 = vpop.eup %8048  ;;  %v5428_v4 = vmul.f32 %v8047_v54, %v5316_v12  ;;  %8060 = vtanh.f32 %v5188_v20  ;;  %v4838_v17 = vmax.f32 %v17734_v43, %v4774_v19  ;;  %v4839_v30 = vmax.f32 %v17735_v23, %v4775_v28 }
 0xb48   :  { %v5429_v38 = vmul.f32 %v8049_v57, %v5317_v29  ;;  %v8051_v7 = vpop.eup %8050  ;;  %8062 = vtanh.f32 %v5189_v25  ;;  %v5323_v55 = vadd.f32 0.5, %v5307_v49  ;;  %v5418_v5 = vmul.f32 %v5258_v36, %v64_v11 }
 0xb49   :  { %v14670_v22 = vadd.f32 %v5428_v4, %v5412_v34  ;;  %v4967_v2 = vpop.permute.xlu0 %4966  ;;  %v5419_v1 = vmul.f32 %v5259_v52, %v65_v48  ;;  %v5244_v37 = vmul.f32 0.5, %v14619_v58  ;;  %v5245_v57 = vmul.f32 0.5, %v8051_v7  ;;  %v67_v52 = vld [vmem:[%s15940_s1 + $0x78] sm:$0xff] }
 0xb4a   :  { %v14675_v33 = vadd.f32 %v5429_v38, %v5413_v59  ;;  %v8053_v3 = vpop.eup %8052  ;;  %v5018_v34 = vsel %vm17736_vm3, %v4903_v31, %v4967_v2  ;;  %v5050_v62 = vsel %vm17737_vm7, %v4967_v2, %v4903_v31  ;;  %v4649_v39 = vpop.permute.xlu1 %4648  ;;  %vm17741_vm3 = vmmov %vm17733_vm0 }
 0xb4b   :  { %5492 = vst [vmem:[%s15941_s8 + $0x30] sm:$0xff] %v14670_v22  ;;  %v5094_v12 = vsel %vm17541_vm11, %v5050_v62, -inf  ;;  %v5095_v44 = vsel %vm17546_vm6, %v5018_v34, -inf  ;;  %v4699_v56 = vsel %vm17732_vm13, %v4585_v41, %v4649_v39  ;;  %v4731_v31 = vsel %vm17738_vm4, %v4649_v39, %v4585_v41  ;;  %v66_v41 = vld [vmem:[%s15940_s1 + $0x70] sm:$0xff]  ;;  %vm17742_vm7 = vmmov %vm17738_vm4 }
 0xb4c   :  { %v8055_v63 = vpop.eup %8054  ;;  %5493 = vst [vmem:[%s15941_s8 + $0x38] sm:$0xff] %v14675_v33  ;;  %v5158_v47 = vmax.f32 %v4838_v17, %v5094_v12  ;;  %v5159_v53 = vmax.f32 %v4839_v30, %v5095_v44  ;;  %v5308_v59 = vmul.f32 0.5, %v8053_v3  ;;  %v5260_v58 = vadd.f32 0.5, %v5244_v37  ;;  %v17740_v3 = vld [vmem:[#allocation35_spill] sm:$0xff]  ;;  %vm17743_vm13 = vmmov %vm17738_vm4 }
 0xb4d   :  { %v8057_v9 = vpop.eup %8056  ;;  %v5434_v60 = vmul.f32 %v8055_v63, %v5322_v40  ;;  %v14699_v54 = vpop.permute.xlu0 %4614  ;;  %v4776_v38 = vsel %vm17531_vm8, %v4699_v56, -inf  ;;  %v4777_v19 = vsel %vm17536_vm14, %v4731_v31, -inf  ;;  %v5261_v7 = vadd.f32 0.5, %v5245_v57  ;;  %v17739_v40 = vld [vmem:[#allocation46_spill] sm:$0xff]  ;;  %vm17747_vm4 = vmmov %vm17733_vm0 }
 0xb4e   :  { %v5435_v18 = vmul.f32 %v8057_v9, %v5323_v55  ;;  %v8059_v29 = vpop.eup %8058  ;;  %v5342_v0 = vmul.f32 0.5, %v5158_v47  ;;  %v5343_v20 = vmul.f32 0.5, %v5159_v53  ;;  %v4905_v25 = vpop.permute.xlu1 %4904  ;;  %v5324_v36 = vadd.f32 0.5, %v5308_v59 }
 0xb4f   :  { %v14701_v14 = vadd.f32 %v5434_v60, %v5418_v5  ;;  %v5309_v49 = vmul.f32 0.5, %v8059_v29  ;;  %v4840_v2 = vmax.f32 %v17739_v40, %v4776_v38  ;;  %v4841_v48 = vmax.f32 %v17740_v3, %v4777_v19  ;;  %v17745_v40 = vld [vmem:[#allocation96_spill] sm:$0xff]  ;;  %v17746_v3 = vld [vmem:[#allocation34_spill] sm:$0xff] }
 0xb50   :  { %v14707_v4 = vadd.f32 %v5435_v18, %v5419_v1  ;;  %8064 = vtanh.f32 %v5342_v0  ;;  %v5420_v30 = vmul.f32 %v5260_v58, %v66_v41  ;;  %v5421_v5 = vmul.f32 %v5261_v7, %v67_v52 }
 0xb51   :  { %5498 = vst [vmem:[%s15941_s8 + $0x60] sm:$0xff] %v14701_v14  ;;  %v14721_v28 = vpop.permute.xlu0 %4678  ;;  %8066 = vtanh.f32 %v5343_v20  ;;  %v5325_v34 = vadd.f32 0.5, %v5309_v49 }
 0xb52   :  { %5499 = vst [vmem:[%s15941_s8 + $0x68] sm:$0xff] %v14707_v4  ;;  %v4969_v11 = vpop.permute.xlu1 %4968  ;;  %8068 = vtanh.f32 %v14441_v13 }
 0xb53   :  { %v5019_v43 = vsel %vm17733_vm0, %v4905_v25, %v4969_v11  ;;  %v5051_v17 = vsel %vm17741_vm3, %v4969_v11, %v4905_v25  ;;  %8070 = vtanh.f32 %v14448_v10  ;;  %vm17748_vm3 = vmmov %vm17742_vm7 }
 0xb54   :  { %v8061_v23 = vpop.eup %8060  ;;  %v5096_v62 = vsel %vm17541_vm11, %v5051_v17, -inf  ;;  %v5097_v63 = vsel %vm17546_vm6, %v5019_v43, -inf }
 0xb55   :  { %v14739_v55 = vpop.permute.xlu0 %4934  ;;  %v8063_v12 = vpop.eup %8062  ;;  %v5436_v44 = vmul.f32 %v8061_v23, %v5324_v36  ;;  %v5160_v39 = vmax.f32 %v4840_v2, %v5096_v62  ;;  %v5161_v9 = vmax.f32 %v4841_v48, %v5097_v63 }
 0xb56   :  { %v5437_v60 = vmul.f32 %v8063_v12, %v5325_v34  ;;  %v14743_v47 = vpop.permute.xlu1 %4616 }
 0xb57   :  { %v14745_v53 = vadd.f32 %v5436_v44, %v5420_v30  ;;  %v5344_v1 = vmul.f32 0.5, %v5160_v39  ;;  %v5345_v18 = vmul.f32 0.5, %v5161_v9 }
 0xb58   :  { %v14747_v37 = vadd.f32 %v5437_v60, %v5421_v5 }
 0xb59   :  { %v4587_v29 = vpop.permute.xlu0 %4586  ;;  %5500 = vst [vmem:[%s15941_s8 + $0x70] sm:$0xff] %v14745_v53  ;;  %8072 = vtanh.f32 %v5344_v1 }
 0xb5a   :  { %5501 = vst [vmem:[%s15941_s8 + $0x78] sm:$0xff] %v14747_v37  ;;  %v14757_v13 = vpop.permute.xlu1 %4680  ;;  %8074 = vtanh.f32 %v5345_v18 }
 0xb5b   :  { %8076 = vtanh.f32 %v14501_v8 }
 0xb5c   :  { %8078 = vtanh.f32 %v14506_v35 }
 0xb5d   :  { %v4651_v10 = vpop.permute.xlu0 %4650  ;;  %v8065_v0 = vpop.eup %8064  ;;  %8080 = vtanh.f32 %v14541_v50 }
 0xb5e   :  { %v14759_v56 = vpop.permute.xlu1 %4936  ;;  %v8067_v31 = vpop.eup %8066  ;;  %v5374_v57 = vmul.f32 0.5, %v8065_v0  ;;  %v4700_v59 = vsel %vm17742_vm7, %v4587_v29, %v4651_v10  ;;  %v4732_v20 = vsel %vm17743_vm13, %v4651_v10, %v4587_v29  ;;  %8082 = vtanh.f32 %v14548_v24  ;;  %vm17749_vm7 = vmmov %vm17748_vm3 }
 0xb5f   :  { %v5375_v25 = vmul.f32 0.5, %v8067_v31  ;;  %v8069_v38 = vpop.eup %8068  ;;  %v4778_v41 = vsel %vm17531_vm8, %v4700_v59, -inf  ;;  %v4779_v8 = vsel %vm17536_vm14, %v4732_v20, -inf  ;;  %8084 = vtanh.f32 %v14595_v26  ;;  %vm17750_vm13 = vmmov %vm17748_vm3 }
 0xb60   :  { %v5390_v49 = vadd.f32 0.5, %v5374_v57  ;;  %v8071_v36 = vpop.eup %8070  ;;  %v4842_v2 = vmax.f32 %v17745_v40, %v4778_v41  ;;  %v4843_v48 = vmax.f32 %v17746_v3, %v4779_v8  ;;  %8086 = vtanh.f32 %v14627_v42 }
 0xb61   :  { %v4907_v58 = vpop.permute.xlu0 %4906  ;;  %v5391_v19 = vadd.f32 0.5, %v5375_v25  ;;  %8088 = vtanh.f32 %v14633_v46  ;;  %v4714_v42 = vsel %vm17750_vm13, %v14699_v54, %v14721_v28 }
 0xb62   :  { %v4589_v7 = vpop.permute.xlu1 %4588  ;;  %v14772_v11 = vmul.f32 %v8069_v38, %v5390_v49  ;;  %8090 = vtanh.f32 %v14670_v22  ;;  %v4806_v57 = vsel %vm17531_vm8, %v4714_v42, -inf  ;;  %v17755_v49 = vld [vmem:[#allocation114_spill] sm:$0xff] }
 0xb63   :  { %v14775_v35 = vmul.f32 %v8071_v36, %v5391_v19  ;;  %8092 = vtanh.f32 %v14675_v33 }
 0xb64   :  { %17744 = vst [vmem:[#allocation88_spill] sm:$0xff] %v14772_v11  ;;  %5502 = vst [vmem:[%s15942_s9] sm:$0xff] %v14772_v11 }
 0xb65   :  { %v4971_v52 = vpop.permute.xlu0 %4970  ;;  %5503 = vst [vmem:[%s15942_s9 + $0x8] sm:$0xff] %v14775_v35 }
 0xb66   :  { %v5020_v43 = vsel %vm17747_vm4, %v4907_v58, %v4971_v52  ;;  %v5052_v50 = vsel %vm17733_vm0, %v4971_v52, %v4907_v58  ;;  %v4653_v23 = vpop.permute.xlu1 %4652  ;;  %v8073_v62 = vpop.eup %8072  ;;  %vm17751_vm4 = vmmov %vm17748_vm3 }
 0xb67   :  { %v5098_v24 = vsel %vm17541_vm11, %v5052_v50, -inf  ;;  %v5099_v17 = vsel %vm17546_vm6, %v5020_v43, -inf  ;;  %v4701_v26 = vsel %vm17748_vm3, %v4589_v7, %v4653_v23  ;;  %v4733_v63 = vsel %vm17749_vm7, %v4653_v23, %v4589_v7  ;;  %v8075_v44 = vpop.eup %8074  ;;  %vm17753_vm0 = vmmov %vm17748_vm3  ;;  %v17758_v50 = vld [vmem:[#allocation45_spill] sm:$0xff] }
 0xb68   :  { %v5162_v30 = vmax.f32 %v4842_v2, %v5098_v24  ;;  %v5163_v34 = vmax.f32 %v4843_v48, %v5099_v17  ;;  %v5376_v39 = vmul.f32 0.5, %v8073_v62  ;;  %v4746_v46 = vsel %vm17751_vm4, %v14721_v28, %v14699_v54  ;;  %v8077_v29 = vpop.eup %8076  ;;  %vm17754_vm3 = vmmov %vm17753_vm0  ;;  %v17759_v17 = vld [vmem:[#allocation64_spill] sm:$0xff] }
 0xb69   :  { %v4619_v12 = vpop.permute.xlu0 %4618  ;;  %v5377_v60 = vmul.f32 0.5, %v8075_v44  ;;  %v4780_v22 = vsel %vm17531_vm8, %v4701_v26, -inf  ;;  %v4781_v33 = vsel %vm17536_vm14, %v4733_v63, -inf  ;;  %v8079_v31 = vpop.eup %8078  ;;  %v4807_v20 = vsel %vm17536_vm14, %v4746_v46, -inf  ;;  %vm17760_vm4 = vmmov %vm17753_vm0  ;;  %v17761_v26 = vld [vmem:[#allocation115_spill] sm:$0xff] }
 0xb6a   :  { %v5346_v9 = vmul.f32 0.5, %v5162_v30  ;;  %v5347_v5 = vmul.f32 0.5, %v5163_v34  ;;  %v4909_v1 = vpop.permute.xlu1 %4908  ;;  %v5392_v18 = vadd.f32 0.5, %v5376_v39  ;;  %v4844_v58 = vmax.f32 %v13941_v16, %v4780_v22  ;;  %v14842_v36 = vpop.eup %8080 }
 0xb6b   :  { %v5393_v10 = vadd.f32 0.5, %v5377_v60  ;;  %v4845_v38 = vmax.f32 %v17755_v49, %v4781_v33  ;;  %vm17756_vm7 = vcmp.lt.s32.totalorder %v17280_v61, 1  ;;  %v14860_v43 = vpop.eup %8082  ;;  %v4870_v24 = vmax.f32 %v17758_v50, %v4806_v57 }
 0xb6c   :  { %8094 = vtanh.f32 %v5346_v9  ;;  %v14818_v59 = vmul.f32 %v8077_v29, %v5392_v18  ;;  %vm17757_vm13 = vmmov %vm17756_vm7  ;;  %v4871_v23 = vmax.f32 %v17759_v17, %v4807_v20  ;;  %v14869_v62 = vsel %vm17760_vm4, %v14757_v13, %v14743_v47  ;;  %v14877_v9 = vpop.eup %8084 }
 0xb6d   :  { %8096 = vtanh.f32 %v5347_v5  ;;  %v4683_v0 = vpop.permute.xlu0 %4682  ;;  %v14826_v25 = vmul.f32 %v8079_v31, %v5393_v10  ;;  %v8087_v42 = vpop.eup %8086 }
 0xb6e   :  { %17752 = vst [vmem:[#allocation117_spill] sm:$0xff] %v14818_v59  ;;  %v4716_v54 = vsel %vm17753_vm0, %v4619_v12, %v4683_v0  ;;  %v4748_v28 = vsel %vm17754_vm3, %v4683_v0, %v4619_v12  ;;  %v4973_v19 = vpop.permute.xlu1 %4972  ;;  %5504 = vst [vmem:[%s15942_s9 + $0x10] sm:$0xff] %v14818_v59  ;;  %v14854_v2 = vpack.i.bf16 %v14818_v59, %v14772_v11  ;;  %8098 = vtanh.f32 %v14701_v14  ;;  %v17762_v12 = vld [vmem:[#allocation116_spill] sm:$0xff]  ;;  %v8089_v60 = vpop.eup %8088 }
 0xb6f   :  { %v4810_v41 = vsel %vm17531_vm8, %v4716_v54, -inf  ;;  %v4811_v8 = vsel %vm17536_vm14, %v4748_v28, -inf  ;;  %v5021_v7 = vsel %vm17756_vm7, %v4909_v1, %v4973_v19  ;;  %v5053_v16 = vsel %vm17757_vm13, %v4973_v19, %v4909_v1  ;;  %5505 = vst [vmem:[%s15942_s9 + $0x18] sm:$0xff] %v14826_v25  ;;  %vm17763_vm0 = vmmov %vm17756_vm7  ;;  %v14883_v22 = vpop.eup %8090 }
 0xb70   :  { %v5100_v52 = vsel %vm17541_vm11, %v5053_v16, -inf  ;;  %v5101_v40 = vsel %vm17546_vm6, %v5021_v7, -inf  ;;  %v14858_v3 = vpack.i.bf16 %v14826_v25, %v14775_v35  ;;  %v4874_v63 = vmax.f32 %v17761_v26, %v4810_v41  ;;  %7556 = vrot.lane.b32.xlu0 %v14854_v2, %s8157_s17  ;;  %vm17764_vm3 = vmmov %vm17763_vm0  ;;  %v14893_v0 = vpop.eup %8092 }
 0xb71   :  { %v4939_v48 = vpop.permute.xlu0 %4938  ;;  %v5164_v30 = vmax.f32 %v4844_v58, %v5100_v52  ;;  %v5165_v34 = vmax.f32 %v4845_v38, %v5101_v40  ;;  %v4875_v44 = vmax.f32 %v17762_v12, %v4811_v8  ;;  %vm17765_vm7 = vmmov %vm17760_vm4 }
 0xb72   :  { %7561 = vrot.lane.b32.xlu1 %v14858_v3, %s8157_s17  ;;  %v4621_v39 = vpop.permute.xlu1 %4620  ;;  %vm17766_vm13 = vmmov %vm17760_vm4 }
 0xb73   :  { %v5348_v14 = vmul.f32 0.5, %v5164_v30  ;;  %v5349_v5 = vmul.f32 0.5, %v5165_v34  ;;  %vm17767_vm4 = vmmov %vm17763_vm0 }
 0xb74   :  { %7566 = vrot.lane.b32.xlu0 %v14854_v2, %s8160_s19 }
 0xb75   :  { %v5003_v46 = vpop.permute.xlu0 %5002  ;;  %8100 = vtanh.f32 %v5348_v14  ;;  %v4809_v14 = vsel %vm17536_vm14, %v14869_v62, -inf }
 0xb76   :  { %v5036_v1 = vsel %vm17763_vm0, %v4939_v48, %v5003_v46  ;;  %v5068_v18 = vsel %vm17764_vm3, %v5003_v46, %v4939_v48  ;;  %8102 = vtanh.f32 %v5349_v5  ;;  %7571 = vrot.lane.b32.xlu1 %v14858_v3, %s8160_s19  ;;  %v4685_v10 = vpop.permute.xlu1 %4684  ;;  %vm17768_vm3 = vmmov %vm17765_vm7 }
 0xb77   :  { %v5130_v33 = vsel %vm17541_vm11, %v5068_v18, -inf  ;;  %v5131_v29 = vsel %vm17546_vm6, %v5036_v1, -inf  ;;  %v4717_v54 = vsel %vm17765_vm7, %v4621_v39, %v4685_v10  ;;  %v4749_v28 = vsel %vm17766_vm13, %v4685_v10, %v4621_v39  ;;  %vm17770_vm7 = vmmov %vm17763_vm0 }
 0xb78   :  { %v5194_v31 = vmax.f32 %v4874_v63, %v5130_v33  ;;  %v5195_v57 = vmax.f32 %v4875_v44, %v5131_v29  ;;  %v4812_v7 = vsel %vm17531_vm8, %v4717_v54, -inf  ;;  %v4813_v52 = vsel %vm17536_vm14, %v4749_v28, -inf  ;;  %7576 = vrot.lane.b32.xlu0 %v14854_v2, %s8156_s16  ;;  %vm17771_vm13 = vmmov %vm17763_vm0 }
 0xb79   :  { %v8095_v20 = vpop.eup %8094  ;;  %v4999_v58 = vpop.permute.xlu0 %4998 }
 0xb7a   :  { %v8097_v38 = vpop.eup %8096  ;;  %v5378_v19 = vmul.f32 0.5, %v8095_v20  ;;  %v5354_v41 = vmul.f32 0.5, %v5194_v31  ;;  %v5355_v8 = vmul.f32 0.5, %v5195_v57  ;;  %7581 = vrot.lane.b32.xlu1 %v14858_v3, %s8156_s16  ;;  %v5034_v40 = vsel %vm17767_vm4, %v14739_v55, %v4999_v58  ;;  %v4941_v50 = vpop.permute.xlu1 %4940  ;;  %vm17772_vm4 = vmmov %vm17763_vm0 }
 0xb7b   :  { %v5379_v16 = vmul.f32 0.5, %v8097_v38  ;;  %v5066_v48 = vsel %vm17763_vm0, %v4999_v58, %v14739_v55  ;;  %v5127_v34 = vsel %vm17546_vm6, %v5034_v40, -inf  ;;  %v4715_v55 = vsel %vm17768_vm3, %v14743_v47, %v14757_v13  ;;  %v17769_v47 = vld [vmem:[#allocation56_spill] sm:$0xff]  ;;  %vm17784_vm3 = vmmov %vm17763_vm0 }
 0xb7c   :  { %v5394_v17 = vadd.f32 0.5, %v5378_v19  ;;  %8104 = vtanh.f32 %v5354_v41  ;;  %v5126_v30 = vsel %vm17541_vm11, %v5066_v48, -inf  ;;  %v5191_v12 = vmax.f32 %v4871_v23, %v5127_v34  ;;  %v17773_v19 = vld [vmem:[#allocation54_spill] sm:$0xff] }
 0xb7d   :  { %v5395_v26 = vadd.f32 0.5, %v5379_v16  ;;  %8106 = vtanh.f32 %v5355_v8  ;;  %v5190_v63 = vmax.f32 %v4870_v24, %v5126_v30  ;;  %v4876_v13 = vmax.f32 %v17769_v47, %v4812_v7 }
 0xb7e   :  { %8108 = vtanh.f32 %v14707_v4  ;;  %v14924_v44 = vmul.f32 %v8087_v42, %v5394_v17  ;;  %v5351_v23 = vmul.f32 0.5, %v5191_v12  ;;  %v5005_v46 = vpop.permute.xlu1 %5004  ;;  %v8099_v4 = vpop.eup %8098  ;;  %v4877_v42 = vmax.f32 %v14034_v15, %v4813_v52 }
 0xb7f   :  { %v14931_v5 = vmul.f32 %v8089_v60, %v5395_v26  ;;  %v5350_v24 = vmul.f32 0.5, %v5190_v63  ;;  %v5037_v1 = vsel %vm17770_vm7, %v4941_v50, %v5005_v46  ;;  %v5069_v62 = vsel %vm17771_vm13, %v5005_v46, %v4941_v50  ;;  %vm17785_vm7 = vmmov %vm17763_vm0 }
 0xb80   :  { %5506 = vst [vmem:[%s15942_s9 + $0x20] sm:$0xff] %v14924_v44  ;;  %v5132_v60 = vsel %vm17541_vm11, %v5069_v62, -inf  ;;  %v5133_v18 = vsel %vm17546_vm6, %v5037_v1, -inf  ;;  %v4808_v15 = vsel %vm17531_vm8, %v4715_v55, -inf  ;;  %v4873_v31 = vmax.f32 %v13886_v51, %v4809_v14  ;;  %vm17786_vm13 = vmmov %vm17763_vm0 }
 0xb81   :  { %5507 = vst [vmem:[%s15942_s9 + $0x28] sm:$0xff] %v14931_v5  ;;  %8110 = vtanh.f32 %v5350_v24  ;;  %v5196_v33 = vmax.f32 %v4876_v13, %v5132_v60  ;;  %v5197_v29 = vmax.f32 %v4877_v42, %v5133_v18  ;;  %v4872_v41 = vmax.f32 %v17773_v19, %v4808_v15 }
 0xb82   :  { %8112 = vtanh.f32 %v5351_v23  ;;  %v8101_v10 = vpop.eup %8100  ;;  %v5001_v57 = vpop.permute.xlu1 %5000 }
 0xb83   :  { %8114 = vtanh.f32 %v14598_v6  ;;  %v8103_v54 = vpop.eup %8102  ;;  %v5380_v28 = vmul.f32 0.5, %v8101_v10  ;;  %v5356_v20 = vmul.f32 0.5, %v5196_v33  ;;  %v5357_v58 = vmul.f32 0.5, %v5197_v29 }
 0xb84   :  { %v5035_v38 = vsel %vm17772_vm4, %v14759_v56, %v5001_v57  ;;  %v5381_v8 = vmul.f32 0.5, %v8103_v54  ;;  %v5067_v7 = vsel %vm17763_vm0, %v5001_v57, %v14759_v56  ;;  %vm17787_vm4 = vmmov %vm17763_vm0  ;;  %vm17788_vm0 = vcmp.lt.s32.totalorder %v17280_v61, 15 }
 0xb85   :  { %v5129_v6 = vsel %vm17546_vm6, %v5035_v38, -inf  ;;  %v5396_v51 = vadd.f32 0.5, %v5380_v28  ;;  %8116 = vtanh.f32 %v5356_v20  ;;  %v5128_v16 = vsel %vm17541_vm11, %v5067_v7, -inf }
 0xb86   :  { %v5193_v52 = vmax.f32 %v4873_v31, %v5129_v6  ;;  %v5397_v40 = vadd.f32 0.5, %v5381_v8  ;;  %8118 = vtanh.f32 %v5357_v58  ;;  %v5192_v48 = vmax.f32 %v4872_v41, %v5128_v16 }
 0xb87   :  { %8120 = vtanh.f32 %v14745_v53  ;;  %v14968_v50 = vmul.f32 %v14883_v22, %v5396_v51  ;;  %vm17802_vm6 = vcmp.lt.s32.totalorder %v17280_v61, 15 }
 0xb88   :  { %v5353_v17 = vmul.f32 0.5, %v5193_v52  ;;  %8122 = vtanh.f32 %v14747_v37  ;;  %v14972_v56 = vmul.f32 %v14893_v0, %v5397_v40  ;;  %v5352_v34 = vmul.f32 0.5, %v5192_v48 }
 0xb89   :  { %v8105_v30 = vpop.eup %8104  ;;  %5508 = vst [vmem:[%s15942_s9 + $0x30] sm:$0xff] %v14968_v50  ;;  %v14980_v53 = vpack.i.bf16 %v14968_v50, %v14924_v44 }
 0xb8a   :  { %v8107_v26 = vpop.eup %8106  ;;  %v5386_v63 = vmul.f32 0.5, %v8105_v30  ;;  %8124 = vtanh.f32 %v5353_v17  ;;  %5509 = vst [vmem:[%s15942_s9 + $0x38] sm:$0xff] %v14972_v56  ;;  %v14988_v0 = vpack.i.bf16 %v14972_v56, %v14931_v5 }
 0xb8b   :  { %v8109_v22 = vpop.eup %8108  ;;  %v5387_v37 = vmul.f32 0.5, %v8107_v26  ;;  %8126 = vtanh.f32 %v5352_v34  ;;  %v15170_v26 = vld.sshfl [vmem:[%s15943_s6] sm:$0x13 pattern:$0x75316420] }
 0xb8c   :  { %v5402_v12 = vadd.f32 0.5, %v5386_v63  ;;  %17782 = vst [vmem:[#allocation89_spill] sm:$0xff] %v15170_v26  ;;  %v6047_v63 = vcombine.high %v15170_v26, %v15170_v26 }
 0xb8d   :  { %v5403_v55 = vadd.f32 0.5, %v5387_v37 }
 0xb8e   :  { %v8111_v14 = vpop.eup %8110  ;;  %v14990_v24 = vmul.f32 %v8099_v4, %v5402_v12  ;;  %v17783_v12 = vld [vmem:[#allocation6_spill] sm:$0xff] }
 0xb8f   :  { %v8113_v23 = vpop.eup %8112  ;;  %v14992_v46 = vmul.f32 %v8109_v22, %v5403_v55  ;;  %v5382_v47 = vmul.f32 0.5, %v8111_v14  ;;  %v6061_v55 = vrot.slane %v6047_v63, %v17783_v12 }
 0xb90   :  { %17774 = vst [vmem:[#allocation118_spill] sm:$0xff] %v14990_v24  ;;  %v8115_v13 = vpop.eup %8114  ;;  %5514 = vst [vmem:[%s15942_s9 + $0x60] sm:$0xff] %v14990_v24  ;;  %v5383_v42 = vmul.f32 0.5, %v8113_v23 }
 0xb91   :  { %17775 = vst [vmem:[#allocation76_spill] sm:$0xff] %v14992_v46  ;;  %5515 = vst [vmem:[%s15942_s9 + $0x68] sm:$0xff] %v14992_v46  ;;  %v5398_v4 = vadd.f32 0.5, %v5382_v47  ;;  %6101 = vmatprep.mubr.bf16.mxu1 %v6061_v55  ;;  %6183 = vmatprep.mubr.bf16.mxu0 %v6061_v55 }
 0xb92   :  { %v5399_v60 = vadd.f32 0.5, %v5383_v42  ;;  %v8117_v18 = vpop.eup %8116 }
 0xb93   :  { %v15007_v15 = vmul.f32 %v14842_v36, %v5398_v4  ;;  %v8119_v33 = vpop.eup %8118  ;;  %v5388_v10 = vmul.f32 0.5, %v8117_v18 }
 0xb94   :  { %v15010_v29 = vmul.f32 %v14860_v43, %v5399_v60  ;;  %v8121_v31 = vpop.eup %8120  ;;  %v5389_v57 = vmul.f32 0.5, %v8119_v33 }
 0xb95   :  { %17776 = vst [vmem:[#allocation48_spill] sm:$0xff] %v15007_v15  ;;  %5510 = vst [vmem:[%s15942_s9 + $0x40] sm:$0xff] %v15007_v15  ;;  %v8123_v54 = vpop.eup %8122  ;;  %v5404_v36 = vadd.f32 0.5, %v5388_v10 }
 0xb96   :  { %17777 = vst [vmem:[#allocation58_spill] sm:$0xff] %v15010_v29  ;;  %5511 = vst [vmem:[%s15942_s9 + $0x48] sm:$0xff] %v15010_v29  ;;  %v5405_v20 = vadd.f32 0.5, %v5389_v57 }
 0xb97   :  { %v8125_v28 = vpop.eup %8124  ;;  %v15020_v43 = vmul.f32 %v8121_v31, %v5404_v36 }
 0xb98   :  { %v8127_v58 = vpop.eup %8126  ;;  %v5385_v38 = vmul.f32 0.5, %v8125_v28  ;;  %v15022_v19 = vmul.f32 %v8123_v54, %v5405_v20 }
 0xb99   :  { %17778 = vst [vmem:[#allocation99_spill] sm:$0xff] %v15020_v43  ;;  %v5384_v41 = vmul.f32 0.5, %v8127_v58  ;;  %5516 = vst [vmem:[%s15942_s9 + $0x70] sm:$0xff] %v15020_v43  ;;  %v15030_v7 = vpack.i.bf16 %v15020_v43, %v14990_v24 }
 0xb9a   :  { %17779 = vst [vmem:[#allocation100_spill] sm:$0xff] %v15022_v19  ;;  %v5401_v8 = vadd.f32 0.5, %v5385_v38  ;;  %5517 = vst [vmem:[%s15942_s9 + $0x78] sm:$0xff] %v15022_v19  ;;  %v15038_v51 = vpack.i.bf16 %v15022_v19, %v14992_v46 }
 0xb9b   :  { %v5400_v6 = vadd.f32 0.5, %v5384_v41 }
 0xb9c   :  { %v15040_v16 = vmul.f32 %v8115_v13, %v5401_v8 }
 0xb9d   :  { %v15043_v52 = vmul.f32 %v14877_v9, %v5400_v6 }
 0xb9e   :  { %17780 = vst [vmem:[#allocation102_spill] sm:$0xff] %v15040_v16  ;;  %5513 = vst [vmem:[%s15942_s9 + $0x58] sm:$0xff] %v15040_v16  ;;  %v15051_v40 = vpack.i.bf16 %v15040_v16, %v15010_v29 }
 0xb9f   :  { %17781 = vst [vmem:[#allocation92_spill] sm:$0xff] %v15043_v52  ;;  %5512 = vst [vmem:[%s15942_s9 + $0x50] sm:$0xff] %v15043_v52  ;;  %v15059_v48 = vpack.i.bf16 %v15043_v52, %v15007_v15 }
 0xba0   :  { %7591 = vrot.lane.b32.xlu1 %v15051_v40, %s8157_s17 }
 0xba1   :  { %7586 = vrot.lane.b32.xlu0 %v15059_v48, %s8157_s17 }
 0xba4   :  { %7601 = vrot.lane.b32.xlu1 %v14858_v3, %s8158_s0 }
 0xba5   :  { %7596 = vrot.lane.b32.xlu0 %v14854_v2, %s8158_s0 }
 0xba8   :  { %7611 = vrot.lane.b32.xlu1 %v15051_v40, %s8160_s19 }
 0xba9   :  { %7606 = vrot.lane.b32.xlu0 %v15059_v48, %s8160_s19 }
 0xbac   :  { %7621 = vrot.lane.b32.xlu1 %v15051_v40, %s8156_s16 }
 0xbad   :  { %7616 = vrot.lane.b32.xlu0 %v15059_v48, %s8156_s16 }
 0xbb0   :  { %7631 = vrot.lane.b32.xlu1 %v14858_v3, %s8159_s18 }
 0xbb1   :  { %7626 = vrot.lane.b32.xlu0 %v14854_v2, %s8159_s18 }
 0xbb4   :  { %7641 = vrot.lane.b32.xlu1 %v15051_v40, %s8158_s0 }
 0xbb5   :  { %7636 = vrot.lane.b32.xlu0 %v15059_v48, %s8158_s0 }
 0xbb8   :  { %7651 = vrot.lane.b32.xlu1 %v14858_v3, %s8161_s20 }
 0xbb9   :  { %7646 = vrot.lane.b32.xlu0 %v14854_v2, %s8161_s20 }
 0xbbc   :  { %7661 = vrot.lane.b32.xlu1 %v14858_v3, %s8155_s15 }
 0xbbd   :  { %7656 = vrot.lane.b32.xlu0 %v14854_v2, %s8155_s15 }
 0xbc0   :  { %7671 = vrot.lane.b32.xlu1 %v15051_v40, %s8159_s18 }
 0xbc1   :  { %7666 = vrot.lane.b32.xlu0 %v15059_v48, %s8159_s18 }
 0xbc4   :  { %7686 = vrot.lane.b32.xlu1 %v14988_v0, %s8157_s17 }
 0xbc5   :  { %7676 = vrot.lane.b32.xlu0 %v14980_v53, %s8157_s17 }
 0xbc8   :  { %7691 = vrot.lane.b32.xlu1 %v15051_v40, %s8161_s20 }
 0xbc9   :  { %7681 = vrot.lane.b32.xlu0 %v15059_v48, %s8161_s20 }
 0xbcc   :  { %7701 = vrot.lane.b32.xlu1 %v14988_v0, %s8160_s19 }
 0xbcd   :  { %7696 = vrot.lane.b32.xlu0 %v14980_v53, %s8160_s19 }
 0xbd0   :  { %7711 = vrot.lane.b32.xlu1 %v14988_v0, %s8156_s16 }
 0xbd1   :  { %7706 = vrot.lane.b32.xlu0 %v14980_v53, %s8156_s16 }
 0xbd4   :  { %7721 = vrot.lane.b32.xlu1 %v15038_v51, %s8157_s17 }
 0xbd5   :  { %7716 = vrot.lane.b32.xlu0 %v15030_v7, %s8157_s17 }
 0xbd8   :  { %7731 = vrot.lane.b32.xlu1 %v14988_v0, %s8158_s0 }
 0xbd9   :  { %7726 = vrot.lane.b32.xlu0 %v14980_v53, %s8158_s0 }
 0xbdc   :  { %7741 = vrot.lane.b32.xlu1 %v15038_v51, %s8160_s19 }
 0xbdd   :  { %7736 = vrot.lane.b32.xlu0 %v15030_v7, %s8160_s19 }
 0xbe0   :  { %7751 = vrot.lane.b32.xlu1 %v15038_v51, %s8156_s16 }
 0xbe1   :  { %7746 = vrot.lane.b32.xlu0 %v15030_v7, %s8156_s16 }
 0xbe2   :  { %v7557_v37 = vpop.permute.xlu0 %7556 }
 0xbe3   :  { %v7559_v54 = vunpack.i.h.bf16 %v7557_v37  ;;  %v7558_v36 = vunpack.i.l.bf16 %v7557_v37 }
 0xbe4   :  { %7761 = vrot.lane.b32.xlu1 %v14988_v0, %s8159_s18  ;;  %v7562_v22 = vpop.permute.xlu1 %7561 }
 0xbe5   :  { %7756 = vrot.lane.b32.xlu0 %v14980_v53, %s8159_s18  ;;  %v7564_v31 = vunpack.i.h.bf16 %v7562_v22  ;;  %v7563_v57 = vunpack.i.l.bf16 %v7562_v22 }
 0xbe6   :  { %v7567_v23 = vpop.permute.xlu0 %7566 }
 0xbe7   :  { %v5752_v58 = vsel %vm17784_vm3, %v7564_v31, %v7559_v54  ;;  %v5751_v38 = vsel %vm17785_vm7, %v7563_v57, %v7558_v36  ;;  %v7568_v6 = vunpack.i.l.bf16 %v7567_v23  ;;  %v15235_v55 = vsel %vm17786_vm13, %v7559_v54, %v7564_v31  ;;  %vm17789_vm3 = vmmov %vm17788_vm0 }
 0xbe8   :  { %7771 = vrot.lane.b32.xlu1 %v15038_v51, %s8158_s0  ;;  %v7572_v14 = vpop.permute.xlu1 %7571  ;;  %vm17790_vm7 = vmmov %vm17788_vm0 }
 0xbe9   :  { %7766 = vrot.lane.b32.xlu0 %v15030_v7, %s8158_s0  ;;  %v7574_v41 = vunpack.i.h.bf16 %v7572_v14  ;;  %v7573_v8 = vunpack.i.l.bf16 %v7572_v14  ;;  %v15239_v14 = vsel %vm17787_vm4, %v7558_v36, %v7563_v57  ;;  %vm17791_vm13 = vmmov %vm17788_vm0  ;;  %vm17792_vm4 = vcmp.lt.s32.totalorder %v17280_v61, 16 }
 0xbea   :  { %v15191_v47 = vpop.permute.xlu0 %7576 }
 0xbeb   :  { %v7579_v63 = vunpack.i.h.bf16 %v15191_v47  ;;  %v7578_v22 = vunpack.i.l.bf16 %v15191_v47  ;;  %v5759_v47 = vpack.c.bf16 %v5752_v58, %v5751_v38  ;;  %v15253_v30 = vsel %vm17790_vm7, %v7568_v6, %v7573_v8 }
 0xbec   :  { %7781 = vrot.lane.b32.xlu1 %v14988_v0, %s8161_s20  ;;  %v5687_v31 = vsel %vm17791_vm13, %v7573_v8, %v7568_v6 }
 0xbed   :  { %7776 = vrot.lane.b32.xlu0 %v14980_v53, %s8161_s20  ;;  %v15285_v21 = vsel %vm17087_vm2, %v5759_v47, 0 }
 0xbf0   :  { %7791 = vrot.lane.b32.xlu1 %v14988_v0, %s8155_s15 }
 0xbf1   :  { %7786 = vrot.lane.b32.xlu0 %v14980_v53, %s8155_s15 }
 0xbf4   :  { %7806 = vrot.lane.b32.xlu1 %v15038_v51, %s8159_s18 }
 0xbf5   :  { %7796 = vrot.lane.b32.xlu0 %v15030_v7, %s8159_s18 }
 0xbf8   :  { %7811 = vrot.lane.b32.xlu1 %v15051_v40, %s8155_s15 }
 0xbf9   :  { %7801 = vrot.lane.b32.xlu0 %v15059_v48, %s8155_s15 }
 0xbfc   :  { %7821 = vrot.lane.b32.xlu1 %v15038_v51, %s8161_s20 }
 0xbfd   :  { %7816 = vrot.lane.b32.xlu0 %v15030_v7, %s8161_s20 }
 0xc00   :  { %7831 = vrot.lane.b32.xlu1 %v15038_v51, %s8155_s15 }
 0xc01   :  { %7826 = vrot.lane.b32.xlu0 %v15030_v7, %s8155_s15 }
 0xc04   :  { %7846 = vrot.lane.b32.xlu1 %v14988_v0, %s8162_s21  ;;  %v15189_v0 = vpop.permute.xlu1 %7581 }
 0xc05   :  { %7836 = vrot.lane.b32.xlu0 %v14980_v53, %s8162_s21 }
 0xc08   :  { %7851 = vrot.lane.b32.xlu1 %v14858_v3, %s8162_s21 }
 0xc09   :  { %7841 = vrot.lane.b32.xlu0 %v14854_v2, %s8162_s21 }
 0xc0c   :  { %7866 = vrot.lane.b32.xlu1 %v15038_v51, %s8162_s21 }
 0xc0d   :  { %7856 = vrot.lane.b32.xlu0 %v15030_v7, %s8162_s21  ;;  %v7569_v7 = vunpack.i.h.bf16 %v7567_v23 }
 0xc0f   :  { %v15243_v23 = vsel %vm17788_vm0, %v7569_v7, %v7574_v41  ;;  %vm17793_vm0 = vmmov %vm17792_vm4 }
 0xc10   :  { %7871 = vrot.lane.b32.xlu1 %v15051_v40, %s8162_s21  ;;  %v7584_v40 = vunpack.i.h.bf16 %v15189_v0  ;;  %vm17797_vm13 = vmmov %vm17793_vm0 }
 0xc11   :  { %7861 = vrot.lane.b32.xlu0 %v15059_v48, %s8162_s21  ;;  %v7583_v48 = vunpack.i.l.bf16 %v15189_v0  ;;  %v15247_v0 = vsel %vm17789_vm3, %v7574_v41, %v7569_v7  ;;  %vm17795_vm3 = vcmp.lt.s32.totalorder %v17280_v61, 1 }
 0xc12   :  { %v15197_v3 = vpop.permute.xlu1 %7591  ;;  %v15259_v57 = vsel %vm17792_vm4, %v7584_v40, %v7579_v63  ;;  %vm17796_vm7 = vmmov %vm17795_vm3  ;;  %v5695_v45 = vpack.c.bf16 %v15247_v0, %v5687_v31 }
 0xc13   :  { %v15199_v53 = vpop.permute.xlu0 %7586  ;;  %v5623_v54 = vsel %vm17793_vm0, %v7583_v48, %v7578_v22  ;;  %v7594_v41 = vunpack.i.h.bf16 %v15197_v3  ;;  %v7593_v58 = vunpack.i.l.bf16 %v15197_v3  ;;  %vm17798_vm4 = vmmov %vm17793_vm0 }
 0xc14   :  { %v7589_v38 = vunpack.i.h.bf16 %v15199_v53  ;;  %v7588_v7 = vunpack.i.l.bf16 %v15199_v53  ;;  %v5760_v53 = vpack.c.bf16 %v15235_v55, %v15239_v14  ;;  %v15296_v55 = vsel %vm17797_vm13, %v7579_v63, %v7584_v40  ;;  %vm17799_vm0 = vmmov %vm17795_vm3 }
 0xc15   :  { %v15300_v14 = vsel %vm17798_vm4, %v7578_v22, %v7583_v48  ;;  %vm17803_vm13 = vmmov %vm17802_vm6 }
 0xc16   :  { %v15201_v2 = vpop.permute.xlu1 %7601  ;;  %v15304_v47 = vsel %vm17799_vm0, %v7589_v38, %v7594_v41  ;;  %vm17804_vm4 = vmmov %vm17799_vm0 }
 0xc17   :  { %v15203_v13 = vpop.permute.xlu0 %7596  ;;  %v7604_v17 = vunpack.i.h.bf16 %v15201_v2  ;;  %v7603_v8 = vunpack.i.l.bf16 %v15201_v2  ;;  %v15317_v22 = vsel %vm17804_vm4, %v7588_v7, %v7593_v58 }
 0xc18   :  { %v7599_v6 = vunpack.i.h.bf16 %v15203_v13  ;;  %v7598_v9 = vunpack.i.l.bf16 %v15203_v13  ;;  %v5631_v13 = vpack.c.bf16 %v15259_v57, %v5623_v54 }
 0xc1a   :  { %v15205_v42 = vpop.permute.xlu1 %7611 }
 0xc1b   :  { %v15207_v4 = vpop.permute.xlu0 %7606  ;;  %v7614_v39 = vunpack.i.h.bf16 %v15205_v42  ;;  %v7613_v49 = vunpack.i.l.bf16 %v15205_v42  ;;  %v5756_v42 = vsel %vm17795_vm3, %v7594_v41, %v7589_v38  ;;  %vm17800_vm3 = vcmp.lt.s32.totalorder %v17280_v61, 17 }
 0xc1c   :  { %v7609_v62 = vunpack.i.h.bf16 %v15207_v4  ;;  %v7608_v3 = vunpack.i.l.bf16 %v15207_v4  ;;  %v5755_v4 = vsel %vm17796_vm7, %v7593_v58, %v7588_v7  ;;  %v5560_v27 = vsel %vm17800_vm3, %v7604_v17, %v7599_v6  ;;  %vm17801_vm7 = vmmov %vm17800_vm3 }
 0xc1d   :  { %v5559_v0 = vsel %vm17801_vm7, %v7603_v8, %v7598_v9  ;;  %v5763_v54 = vpack.c.bf16 %v5756_v42, %v5755_v4  ;;  %vm17805_vm0 = vmmov %vm17800_vm3 }
 0xc1e   :  { %v15209_v60 = vpop.permute.xlu1 %7621  ;;  %v5692_v40 = vsel %vm17802_vm6, %v7614_v39, %v7609_v62  ;;  %v5691_v63 = vsel %vm17803_vm13, %v7613_v49, %v7608_v3  ;;  %v15321_v38 = vsel %vm17805_vm0, %v7599_v6, %v7604_v17  ;;  %vm17806_vm3 = vmmov %vm17805_vm0  ;;  %v15329_v16 = vsel %vm17802_vm6, %v7609_v62, %v7614_v39 }
 0xc1f   :  { %v15211_v18 = vpop.permute.xlu0 %7616  ;;  %v15325_v15 = vsel %vm17806_vm3, %v7598_v9, %v7603_v8  ;;  %vm17807_vm7 = vmmov %vm17802_vm6  ;;  %v5567_v7 = vpack.c.bf16 %v5560_v27, %v5559_v0  ;;  %v5699_v42 = vpack.c.bf16 %v5692_v40, %v5691_v63  ;;  %v7624_v62 = vunpack.i.h.bf16 %v15209_v60 }
 0xc20   :  { %v15333_v58 = vsel %vm17807_vm7, %v7608_v3, %v7613_v49  ;;  %vm17808_vm13 = vmmov %vm17804_vm4  ;;  %v7619_v49 = vunpack.i.h.bf16 %v15211_v18  ;;  %v7618_v40 = vunpack.i.l.bf16 %v15211_v18  ;;  %vm17816_vm7 = vcmp.lt.s32.totalorder %v17280_v61, 16 }
 0xc21   :  { %vm17809_vm0 = vmmov %vm17804_vm4 }
 0xc22   :  { %v15213_v33 = vpop.permute.xlu1 %7631  ;;  %vm17810_vm3 = vmmov %vm17809_vm0 }
 0xc23   :  { %v15215_v10 = vpop.permute.xlu0 %7626  ;;  %v7634_v0 = vunpack.i.h.bf16 %v15213_v33 }
 0xc26   :  { %v15217_v28 = vpop.permute.xlu1 %7641 }
 0xc27   :  { %v15219_v20 = vpop.permute.xlu0 %7636 }
 0xc2a   :  { %v15225_v51 = vpop.permute.xlu1 %7651 }
 0xc2b   :  { %v15231_v37 = vpop.permute.xlu0 %7646 }
 0xc2e   :  { %v15249_v34 = vpop.permute.xlu1 %7661 }
 0xc2f   :  { %v15263_v36 = vpop.permute.xlu0 %7656 }
 0xc32   :  { %v15277_v1 = vpop.permute.xlu1 %7671 }
 0xc33   :  { %v15281_v32 = vpop.permute.xlu0 %7666 }
 0xc36   :  { %v7687_v48 = vpop.permute.xlu1 %7686 }
 0xc37   :  { %v7689_v31 = vunpack.i.h.bf16 %v7687_v48  ;;  %v7688_v41 = vunpack.i.l.bf16 %v7687_v48  ;;  %v7677_v57 = vpop.permute.xlu0 %7676 }
 0xc38   :  { %v7679_v52 = vunpack.i.h.bf16 %v7677_v57  ;;  %v7678_v29 = vunpack.i.l.bf16 %v7677_v57 }
 0xc3a   :  { %v5746_v17 = vsel %vm17808_vm13, %v7679_v52, %v7689_v31  ;;  %v5754_v6 = vsel %vm17804_vm4, %v7689_v31, %v7679_v52  ;;  %v5745_v9 = vsel %vm17809_vm0, %v7678_v29, %v7688_v41  ;;  %v5753_v8 = vsel %vm17810_vm3, %v7688_v41, %v7678_v29  ;;  %v15343_v39 = vpop.permute.xlu1 %7691  ;;  %vm17817_vm13 = vmmov %vm17816_vm7 }
 0xc3b   :  { %v5762_v27 = vpack.c.bf16 %v5746_v17, %v5745_v9  ;;  %v15347_v3 = vpop.permute.xlu0 %7681  ;;  %v5761_v4 = vpack.c.bf16 %v5754_v6, %v5753_v8  ;;  %v7623_v52 = vunpack.i.l.bf16 %v15209_v60  ;;  %v15355_v29 = vsel %vm16603_vm9, %v5695_v45, 0  ;;  %v17814_v9 = vld [vmem:[#allocation21_spill] sm:$0xff]  ;;  %vm17818_vm4 = vmmov %vm17816_vm7 }
 0xc3c   :  { %v15365_v17 = vsel %vm16765_vm12, %v5631_v13, 0  ;;  %v15369_v60 = vsel %vm17087_vm2, %v5763_v54, 0  ;;  %vm17815_vm6 = vnez %v17814_v9  ;;  %v15381_v13 = vsel %vm16603_vm9, %v5699_v42, 0  ;;  %vm17819_vm0 = vmmov %vm17818_vm4 }
 0xc3d   :  { %6665 = vmatprep.subr.msk.bf16.mxu1 %vm17084_vm1, %v5762_v27  ;;  %v5769_v41 = vsel %vm17087_vm2, %v5761_v4, 0  ;;  %v15377_v8 = vsel %vm17815_vm6, %v5567_v7, 0  ;;  %v15385_v54 = vsel %vm17816_vm7, %v7619_v49, %v7624_v62  ;;  %v15389_v27 = vsel %vm17817_vm13, %v7624_v62, %v7619_v49 }
 0xc3e   :  { %6070 = vmatpush1.bf16.msra.mxu1 %v5769_v41  ;;  %v7702_v6 = vpop.permute.xlu1 %7701  ;;  %v15395_v7 = vsel %vm17818_vm4, %v7618_v40, %v7623_v52  ;;  %v15399_v42 = vsel %vm17819_vm0, %v7623_v52, %v7618_v40  ;;  %v7633_v62 = vunpack.i.l.bf16 %v15213_v33  ;;  %v7629_v49 = vunpack.i.h.bf16 %v15215_v10 }
 0xc3f   :  { %v7704_v4 = vunpack.i.h.bf16 %v7702_v6  ;;  %v7703_v18 = vunpack.i.l.bf16 %v7702_v6  ;;  %v7697_v41 = vpop.permute.xlu0 %7696  ;;  %6666 = vmatprep.subr.msk.bf16.mxu1 %vm17084_vm1, %v5760_v53  ;;  %v7628_v6 = vunpack.i.l.bf16 %v15215_v10  ;;  %vm17820_vm3 = vcmp.lt.s32.totalorder %v17280_v61, 15 }
 0xc40   :  { %v7699_v45 = vunpack.i.h.bf16 %v7697_v41  ;;  %v7698_v48 = vunpack.i.l.bf16 %v7697_v41  ;;  %vm17821_vm7 = vmmov %vm17820_vm3  ;;  %vm17824_vm0 = vcmp.lt.s32.totalorder %v17280_v61, 112 }
 0xc41   :  { %vm17822_vm13 = vmmov %vm17820_vm3 }
 0xc42   :  { %v5682_v53 = vsel %vm17820_vm3, %v7699_v45, %v7704_v4  ;;  %v5690_v24 = vsel %vm17821_vm7, %v7704_v4, %v7699_v45  ;;  %v5681_v52 = vsel %vm17822_vm13, %v7698_v48, %v7703_v18  ;;  %vm17823_vm4 = vmmov %vm17820_vm3  ;;  %6072 = vmatpush1.bf16.msra.mxu1 %v15285_v21  ;;  %v7712_v41 = vpop.permute.xlu1 %7711  ;;  %v5635_v45 = vpack.c.bf16 %v15389_v27, %v15399_v42 }
 0xc43   :  { %v5689_v40 = vsel %vm17823_vm4, %v7703_v18, %v7698_v48  ;;  %v5698_v33 = vpack.c.bf16 %v5682_v53, %v5681_v52  ;;  %v7714_v43 = vunpack.i.h.bf16 %v7712_v41  ;;  %v7713_v46 = vunpack.i.l.bf16 %v7712_v41  ;;  %v7707_v19 = vpop.permute.xlu0 %7706  ;;  %vm17825_vm3 = vmmov %vm17824_vm0  ;;  %v17827_v18 = vld [vmem:[#allocation26_spill] sm:$0xff] }
 0xc44   :  { %v5697_v10 = vpack.c.bf16 %v5690_v24, %v5689_v40  ;;  %v7709_v59 = vunpack.i.h.bf16 %v7707_v19  ;;  %v7708_v26 = vunpack.i.l.bf16 %v7707_v19  ;;  %v5944_v4 = vsel %vm17824_vm0, %v7629_v49, %v7634_v0  ;;  %vm17826_vm7 = vmmov %vm17824_vm0 }
 0xc45   :  { %v15422_v21 = vsel %vm17825_vm3, %v7634_v0, %v7629_v49  ;;  %v5943_v48 = vsel %vm17826_vm7, %v7628_v6, %v7633_v62  ;;  %vm17828_vm13 = vnez %v17827_v18  ;;  %vm17829_vm4 = vcmp.lt.s32.totalorder %v17280_v61, 16 }
 0xc46   :  { %6667 = vmatprep.subr.msk.bf16.mxu1 %vm17828_vm13, %v5698_v33  ;;  %v5705_v24 = vsel %vm16603_vm9, %v5697_v10, 0  ;;  %v5618_v19 = vsel %vm17829_vm4, %v7709_v59, %v7714_v43  ;;  %vm17830_vm11 = vmmov %vm17829_vm4  ;;  %v7722_v49 = vpop.permute.xlu1 %7721  ;;  %v15440_v53 = vsel %vm17826_vm7, %v7633_v62, %v7628_v6  ;;  %v7644_v52 = vunpack.i.h.bf16 %v15217_v28 }
 0xc47   :  { %v5626_v27 = vsel %vm17830_vm11, %v7714_v43, %v7709_v59  ;;  %vm17831_vm0 = vmmov %vm17829_vm4  ;;  %6074 = vmatpush1.bf16.msra.mxu1 %v5705_v24  ;;  %v7724_v40 = vunpack.i.h.bf16 %v7722_v49  ;;  %v7723_v41 = vunpack.i.l.bf16 %v7722_v49  ;;  %v7717_v33 = vpop.permute.xlu0 %7716  ;;  %v17833_v59 = vpack.c.bf16 %v15243_v23, %v15253_v30 }
 0xc48   :  { %v5617_v42 = vsel %vm17831_vm0, %v7708_v26, %v7713_v46  ;;  %vm17832_vm3 = vmmov %vm17831_vm0  ;;  %v5959_v10 = vpack.c.bf16 %v5944_v4, %v5943_v48  ;;  %v7639_v24 = vunpack.i.h.bf16 %v15219_v20  ;;  %v7638_v62 = vunpack.i.l.bf16 %v15219_v20 }
 0xc49   :  { %v5625_v0 = vsel %vm17832_vm3, %v7713_v46, %v7708_v26  ;;  %6668 = vmatprep.subr.msk.bf16.mxu1 %vm17828_vm13, %v17833_v59  ;;  %v7719_v46 = vunpack.i.h.bf16 %v7717_v33  ;;  %v7718_v26 = vunpack.i.l.bf16 %v7717_v33  ;;  %v5634_v6 = vpack.c.bf16 %v5618_v19, %v5617_v42 }
 0xc4a   :  { %v5633_v11 = vpack.c.bf16 %v5626_v27, %v5625_v0  ;;  %vm17834_vm11 = vcmp.lt.s32.totalorder %v17280_v61, 1  ;;  %v7732_v4 = vpop.permute.xlu1 %7731  ;;  %v17838_v27 = vld [vmem:[#allocation18_spill] sm:$0xff]  ;;  %v5960_v0 = vpack.c.bf16 %v15422_v21, %v15440_v53  ;;  %v15466_v43 = vsel %vm16765_vm12, %v5635_v45, 0 }
 0xc4b   :  { %v5750_v49 = vsel %vm17834_vm11, %v7719_v46, %v7724_v40  ;;  %vm17835_vm4 = vmmov %vm17834_vm11  ;;  %6076 = vmatpush1.bf16.msra.mxu1 %v15355_v29  ;;  %v7734_v33 = vunpack.i.h.bf16 %v7732_v4  ;;  %v7733_v20 = vunpack.i.l.bf16 %v7732_v4  ;;  %v7727_v19 = vpop.permute.xlu0 %7726  ;;  %vm17839_vm7 = vnez %v17838_v27 }
 0xc4c   :  { %v5758_v30 = vsel %vm17835_vm4, %v7724_v40, %v7719_v46  ;;  %vm17836_vm0 = vmmov %vm17835_vm4  ;;  %6669 = vmatprep.subr.msk.bf16.mxu1 %vm17839_vm7, %v5634_v6  ;;  %v7729_v40 = vunpack.i.h.bf16 %v7727_v19  ;;  %v7728_v46 = vunpack.i.l.bf16 %v7727_v19  ;;  %vm17840_vm11 = vcmp.lt.s32.totalorder %v17280_v61, 17  ;;  %v17841_v6 = vld [vmem:[#allocation23_spill] sm:$0xff] }
 0xc4d   :  { %v5749_v23 = vsel %vm17836_vm0, %v7718_v26, %v7723_v41  ;;  %vm17837_vm3 = vmmov %vm17836_vm0  ;;  %v15470_v29 = vsel %vm17840_vm11, %v7639_v24, %v7644_v52  ;;  %vm17842_vm4 = vnez %v17841_v6  ;;  %v7669_v21 = vunpack.i.h.bf16 %v15281_v32 }
 0xc4e   :  { %v5757_v59 = vsel %vm17837_vm3, %v7723_v41, %v7718_v26  ;;  %v5766_v48 = vpack.c.bf16 %v5750_v49, %v5749_v23  ;;  %v5641_v41 = vsel %vm16765_vm12, %v5633_v11, 0  ;;  %v15480_v49 = vsel %vm17842_vm4, %v5959_v10, 0  ;;  %vm17843_vm0 = vmmov %vm17840_vm11  ;;  %v7742_v11 = vpop.permute.xlu1 %7741 }
 0xc4f   :  { %v5765_v42 = vpack.c.bf16 %v5758_v30, %v5757_v59  ;;  %v5554_v45 = vsel %vm17843_vm0, %v7729_v40, %v7734_v33  ;;  %vm17844_vm3 = vmmov %vm17843_vm0  ;;  %6078 = vmatpush1.bf16.msra.mxu1 %v5641_v41  ;;  %v17848_v10 = vunpack.i.l.bf16 %v15217_v28  ;;  %v7737_v19 = vpop.permute.xlu0 %7736  ;;  %v7649_v41 = vunpack.i.h.bf16 %v15231_v37 }
 0xc50   :  { %6682 = vmatprep.subr.msk.bf16.mxu0 %vm17084_vm1, %v5766_v48  ;;  %v5562_v30 = vsel %vm17844_vm3, %v7734_v33, %v7729_v40  ;;  %vm17845_vm11 = vmmov %vm17843_vm0  ;;  %v7744_v48 = vunpack.i.h.bf16 %v7742_v11  ;;  %v7743_v33 = vunpack.i.l.bf16 %v7742_v11  ;;  %v7738_v40 = vunpack.i.l.bf16 %v7737_v19 }
 0xc51   :  { %v5773_v26 = vsel %vm17087_vm2, %v5765_v42, 0  ;;  %v5553_v23 = vsel %vm17845_vm11, %v7728_v46, %v7733_v20  ;;  %vm17846_vm14 = vmmov %vm17843_vm0  ;;  %v17850_v42 = vpack.c.bf16 %v15296_v55, %v15300_v14  ;;  %v7668_v53 = vunpack.i.l.bf16 %v15281_v32 }
 0xc52   :  { %v5561_v59 = vsel %vm17846_vm14, %v7733_v20, %v7728_v46  ;;  %vm17847_vm2 = vmmov %vm17843_vm0  ;;  %6152 = vmatpush1.bf16.msra.mxu0 %v5773_v26  ;;  %v7654_v20 = vunpack.i.h.bf16 %v15225_v51  ;;  %v17851_v46 = vpack.c.bf16 %v15304_v47, %v15317_v22  ;;  %v7648_v26 = vunpack.i.l.bf16 %v15231_v37  ;;  %v7752_v22 = vpop.permute.xlu1 %7751 }
 0xc53   :  { %v15492_v2 = vsel %vm17847_vm2, %v7644_v52, %v7639_v24  ;;  %vm17849_vm8 = vmmov %vm17843_vm0  ;;  %6670 = vmatprep.subr.msk.bf16.mxu1 %vm17839_vm7, %v17850_v42  ;;  %v7653_v52 = vunpack.i.l.bf16 %v15225_v51  ;;  %v7739_v24 = vunpack.i.h.bf16 %v7737_v19  ;;  %v5570_v55 = vpack.c.bf16 %v5554_v45, %v5553_v23  ;;  %v17856_v23 = vld [vmem:[#allocation22_spill] sm:$0xff] }
 0xc54   :  { %v15498_v4 = vsel %vm17849_vm8, %v7638_v62, %v17848_v10  ;;  %6683 = vmatprep.subr.msk.bf16.mxu0 %vm17084_vm1, %v17851_v46  ;;  %v5569_v14 = vpack.c.bf16 %v5562_v30, %v5561_v59  ;;  %vm17852_vm8 = vcmp.lt.s32.totalorder %v17280_v61, 15  ;;  %6080 = vmatpush1.bf16.msra.mxu1 %v15365_v17  ;;  %v7754_v37 = vunpack.i.h.bf16 %v7752_v22  ;;  %v7747_v30 = vpop.permute.xlu0 %7746  ;;  %vm17859_vm11 = vmmov %vm17847_vm2 }
 0xc55   :  { %v5686_v11 = vsel %vm17852_vm8, %v7739_v24, %v7744_v48  ;;  %vm17853_vm14 = vmmov %vm17852_vm8  ;;  %v7753_v45 = vunpack.i.l.bf16 %v7752_v22  ;;  %vm17857_vm1 = vnez %v17856_v23  ;;  %v7749_v17 = vunpack.i.h.bf16 %v7747_v30 }
 0xc56   :  { %v5694_v51 = vsel %vm17853_vm14, %v7744_v48, %v7739_v24  ;;  %vm17854_vm0 = vmmov %vm17852_vm8  ;;  %6154 = vmatpush1.bf16.msra.mxu0 %v15369_v60  ;;  %6671 = vmatprep.subr.msk.bf16.mxu1 %vm17857_vm1, %v5570_v55  ;;  %v17858_v48 = vunpack.i.l.bf16 %v15217_v28  ;;  %v7748_v42 = vunpack.i.l.bf16 %v7747_v30  ;;  %vm17860_vm2 = vcmp.lt.s32.totalorder %v17280_v61, 113 }
 0xc57   :  { %v5685_v10 = vsel %vm17854_vm0, %v7738_v40, %v7743_v33  ;;  %vm17855_vm3 = vmmov %vm17854_vm0  ;;  %v5880_v60 = vsel %vm17860_vm2, %v7649_v41, %v7654_v20  ;;  %v5577_v28 = vsel %vm17815_vm6, %v5569_v14, 0  ;;  %vm17862_vm14 = vcmp.lt.s32.totalorder %v17280_v61, 16 }
 0xc58   :  { %v5693_v47 = vsel %vm17855_vm3, %v7743_v33, %v7738_v40  ;;  %v5702_v31 = vpack.c.bf16 %v5686_v11, %v5685_v10  ;;  %v5563_v19 = vsel %vm17859_vm11, %v17858_v48, %v7638_v62  ;;  %v5572_v33 = vpack.c.bf16 %v15470_v29, %v15498_v4  ;;  %vm17861_vm8 = vmmov %vm17860_vm2  ;;  %6082 = vmatpush1.bf16.msra.mxu1 %v5577_v28 }
 0xc59   :  { %v5701_v59 = vpack.c.bf16 %v5694_v51, %v5693_v47  ;;  %v5879_v24 = vsel %vm17861_vm8, %v7648_v26, %v7653_v52  ;;  %v5622_v40 = vsel %vm17862_vm14, %v7749_v17, %v7754_v37  ;;  %vm17863_vm0 = vmmov %vm17862_vm14  ;;  %v7762_v51 = vpop.permute.xlu1 %7761  ;;  %v15552_v14 = vsel %vm17860_vm2, %v7654_v20, %v7649_v41  ;;  %v7757_v47 = vpop.permute.xlu0 %7756 }
 0xc5a   :  { %6684 = vmatprep.subr.msk.bf16.mxu0 %vm17828_vm13, %v5702_v31  ;;  %v5630_v46 = vsel %vm17863_vm0, %v7754_v37, %v7749_v17  ;;  %vm17864_vm3 = vmmov %vm17863_vm0  ;;  %v7764_v63 = vunpack.i.h.bf16 %v7762_v51  ;;  %v7763_v10 = vunpack.i.l.bf16 %v7762_v51  ;;  %v17866_v22 = vpack.c.bf16 %v15321_v38, %v15325_v15 }
 0xc5b   :  { %v5709_v62 = vsel %vm16603_vm9, %v5701_v59, 0  ;;  %v5621_v55 = vsel %vm17864_vm3, %v7748_v42, %v7753_v45  ;;  %vm17865_vm11 = vmmov %vm17863_vm0  ;;  %v5571_v31 = vpack.c.bf16 %v15492_v2, %v5563_v19  ;;  %v7759_v20 = vunpack.i.h.bf16 %v7757_v47 }
 0xc5c   :  { %v5629_v11 = vsel %vm17865_vm11, %v7753_v45, %v7748_v42  ;;  %6156 = vmatpush1.bf16.msra.mxu0 %v5709_v62  ;;  %6672 = vmatprep.subr.msk.bf16.mxu1 %vm17857_vm1, %v17866_v22  ;;  %vm17867_vm9 = vmmov %vm17860_vm2  ;;  %v7664_v45 = vunpack.i.h.bf16 %v15249_v34  ;;  %v7758_v41 = vunpack.i.l.bf16 %v7757_v47  ;;  %v17868_v30 = vpack.c.bf16 %v15329_v16, %v15333_v58 }
 0xc5d   :  { %v15562_v37 = vsel %vm17867_vm9, %v7653_v52, %v7648_v26  ;;  %v7659_v15 = vunpack.i.h.bf16 %v15263_v36  ;;  %v5638_v38 = vpack.c.bf16 %v5622_v40, %v5621_v55  ;;  %v5637_v59 = vpack.c.bf16 %v5630_v46, %v5629_v11  ;;  %6084 = vmatpush1.bf16.msra.mxu1 %v15377_v8  ;;  %v7772_v58 = vpop.permute.xlu1 %7771  ;;  %v7767_v42 = vpop.permute.xlu0 %7766  ;;  %v17873_v46 = vld [vmem:[#allocation24_spill] sm:$0xff] }
 0xc5e   :  { %6685 = vmatprep.subr.msk.bf16.mxu0 %vm17828_vm13, %v17868_v30  ;;  %v5895_v48 = vpack.c.bf16 %v5880_v60, %v5879_v24  ;;  %vm17869_vm8 = vcmp.lt.s32.totalorder %v17280_v61, 112  ;;  %v7774_v19 = vunpack.i.h.bf16 %v7772_v58  ;;  %v7773_v17 = vunpack.i.l.bf16 %v7772_v58 }
 0xc5f   :  { %v5946_v2 = vsel %vm17869_vm8, %v7759_v20, %v7764_v63  ;;  %vm17870_vm14 = vmmov %vm17869_vm8  ;;  %v5896_v24 = vpack.c.bf16 %v15552_v14, %v15562_v37  ;;  %v7769_v28 = vunpack.i.h.bf16 %v7767_v42  ;;  %v7768_v62 = vunpack.i.l.bf16 %v7767_v42 }
 0xc60   :  { %v5954_v52 = vsel %vm17870_vm14, %v7764_v63, %v7759_v20  ;;  %vm17871_vm0 = vmmov %vm17869_vm8  ;;  %6158 = vmatpush1.bf16.msra.mxu0 %v15381_v13  ;;  %v15587_v40 = vsel %vm17815_vm6, %v5571_v31, 0  ;;  %v7663_v8 = vunpack.i.l.bf16 %v15249_v34  ;;  %v7658_v13 = vunpack.i.l.bf16 %v15263_v36 }
 0xc61   :  { %v5945_v26 = vsel %vm17871_vm0, %v7758_v41, %v7763_v10  ;;  %vm17872_vm3 = vmmov %vm17871_vm0  ;;  %6686 = vmatprep.subr.msk.bf16.mxu0 %vm17839_vm7, %v5638_v38  ;;  %vm17874_vm13 = vnez %v17873_v46  ;;  %v5645_v11 = vsel %vm16765_vm12, %v5637_v59, 0  ;;  %vm17875_vm11 = vcmp.lt.s32.totalorder %v17280_v61, 17  ;;  %v7782_v47 = vpop.permute.xlu1 %7781  ;;  %v7777_v20 = vpop.permute.xlu0 %7776 }
 0xc62   :  { %v5953_v16 = vsel %vm17872_vm3, %v7763_v10, %v7758_v41  ;;  %v5961_v60 = vpack.c.bf16 %v5946_v2, %v5945_v26  ;;  %v5558_v51 = vsel %vm17875_vm11, %v7769_v28, %v7774_v19  ;;  %vm17876_vm2 = vmmov %vm17875_vm11  ;;  %vm17879_vm14 = vcmp.lt.s32.totalorder %v17280_v61, 127  ;;  %v17880_v41 = vld [vmem:[#allocation27_spill] sm:$0xff] }
 0xc63   :  { %v5962_v18 = vpack.c.bf16 %v5954_v52, %v5953_v16  ;;  %v5566_v63 = vsel %vm17876_vm2, %v7774_v19, %v7769_v28  ;;  %vm17877_vm9 = vmmov %vm17876_vm2  ;;  %v15609_v57 = vsel %vm17879_vm14, %v7659_v15, %v7664_v45  ;;  %v7784_v22 = vunpack.i.h.bf16 %v7782_v47 }
 0xc64   :  { %v5969_v55 = vsel %vm17842_vm4, %v5961_v60, 0  ;;  %v5557_v10 = vsel %vm17877_vm9, %v7768_v62, %v7773_v17  ;;  %vm17878_vm8 = vmmov %vm17876_vm2  ;;  %6160 = vmatpush1.bf16.msra.mxu0 %v5645_v11  ;;  %v7783_v31 = vunpack.i.l.bf16 %v7782_v47  ;;  %vm17881_vm12 = vnez %v17880_v41 }
 0xc65   :  { %6673 = vmatprep.subr.msk.bf16.mxu1 %vm17874_vm13, %v5962_v18  ;;  %v5565_v36 = vsel %vm17878_vm8, %v7773_v17, %v7768_v62  ;;  %v5903_v30 = vsel %vm17881_vm12, %v5895_v48, 0  ;;  %v7674_v38 = vunpack.i.h.bf16 %v15277_v1  ;;  %v7673_v59 = vunpack.i.l.bf16 %v15277_v1  ;;  %v7787_v19 = vpop.permute.xlu0 %7786 }
 0xc66   :  { %6086 = vmatpush2.bf16.msra.mxu1 %v5969_v55  ;;  %v7779_v2 = vunpack.i.h.bf16 %v7777_v20  ;;  %v7778_v52 = vunpack.i.l.bf16 %v7777_v20  ;;  %v17882_v26 = vpack.c.bf16 %v15385_v54, %v15395_v7  ;;  %v5573_v16 = vpack.c.bf16 %v5566_v63, %v5565_v36  ;;  %v7792_v7 = vpop.permute.xlu1 %7791  ;;  %v17891_v55 = vld [vmem:[#allocation28_spill] sm:$0xff] }
 0xc67   :  { %6674 = vmatprep.subr.msk.bf16.mxu1 %vm17874_vm13, %v5960_v0  ;;  %v5574_v0 = vpack.c.bf16 %v5558_v51, %v5557_v10  ;;  %vm17883_vm0 = vcmp.lt.s32.totalorder %v17280_v61, 113  ;;  %v7794_v32 = vunpack.i.h.bf16 %v7792_v7  ;;  %v7793_v18 = vunpack.i.l.bf16 %v7792_v7 }
 0xc68   :  { %6687 = vmatprep.subr.msk.bf16.mxu0 %vm17839_vm7, %v17882_v26  ;;  %v5882_v48 = vsel %vm17883_vm0, %v7779_v2, %v7784_v22  ;;  %vm17884_vm3 = vmmov %vm17883_vm0  ;;  %v7789_v28 = vunpack.i.h.bf16 %v7787_v19  ;;  %v7788_v62 = vunpack.i.l.bf16 %v7787_v19 }
 0xc69   :  { %v5890_v1 = vsel %vm17884_vm3, %v7784_v22, %v7779_v2  ;;  %vm17885_vm11 = vmmov %vm17883_vm0  ;;  %6162 = vmatpush1.bf16.msra.mxu0 %v15466_v43  ;;  %v7797_v47 = vpop.permute.xlu0 %7796  ;;  %v7694_v22 = vunpack.i.h.bf16 %v15343_v39 }
 0xc6a   :  { %v5881_v58 = vsel %vm17885_vm11, %v7778_v52, %v7783_v31  ;;  %vm17886_vm2 = vmmov %vm17883_vm0  ;;  %6088 = vmatpush2.bf16.msra.mxu1 %v15480_v49  ;;  %6688 = vmatprep.subr.msk.bf16.mxu0 %vm17857_vm1, %v5574_v0  ;;  %vm17892_vm0 = vnez %v17891_v55  ;;  %v7807_v51 = vpop.permute.xlu1 %7806  ;;  %v7799_v20 = vunpack.i.h.bf16 %v7797_v47  ;;  %v7798_v2 = vunpack.i.l.bf16 %v7797_v47 }
 0xc6b   :  { %v5889_v54 = vsel %vm17886_vm2, %v7783_v31, %v7778_v52  ;;  %v5897_v17 = vpack.c.bf16 %v5882_v48, %v5881_v58  ;;  %vm17887_vm7 = vmmov %vm17879_vm14  ;;  %vm17890_vm14 = vcmp.lt.s32.totalorder %v17280_v61, 112  ;;  %v7809_v10 = vunpack.i.h.bf16 %v7807_v51 }
 0xc6c   :  { %v5898_v27 = vpack.c.bf16 %v5890_v1, %v5889_v54  ;;  %v5824_v42 = vsel %vm17887_vm7, %v7664_v45, %v7659_v15  ;;  %vm17888_vm9 = vmmov %vm17887_vm7  ;;  %v5948_v49 = vsel %vm17890_vm14, %v7669_v21, %v7674_v38  ;;  %v5581_v45 = vsel %vm17815_vm6, %v5573_v16, 0 }
 0xc6d   :  { %v15643_v60 = vsel %vm17888_vm9, %v7658_v13, %v7663_v8  ;;  %vm17889_vm8 = vmmov %vm17887_vm7  ;;  %v5905_v34 = vsel %vm17881_vm12, %v5897_v17, 0  ;;  %6164 = vmatpush1.bf16.msra.mxu0 %v5581_v45  ;;  %v7808_v36 = vunpack.i.l.bf16 %v7807_v51  ;;  %v7693_v31 = vunpack.i.l.bf16 %v15343_v39 }
 0xc6e   :  { %v5823_v43 = vsel %vm17889_vm8, %v7663_v8, %v7658_v13  ;;  %6675 = vmatprep.subr.msk.bf16.mxu1 %vm17892_vm0, %v5898_v27  ;;  %vm17893_vm3 = vmmov %vm17887_vm7  ;;  %6689 = vmatprep.subr.msk.bf16.mxu0 %vm17857_vm1, %v5572_v33  ;;  %v7683_v52 = vunpack.i.l.bf16 %v15347_v3  ;;  %v15691_v4 = vpop.permute.xlu1 %7811  ;;  %v15696_v33 = vpop.permute.xlu0 %7801  ;;  %v5831_v16 = vpack.c.bf16 %v15609_v57, %v15643_v60 }
 0xc6f   :  { %v5818_v15 = vsel %vm17893_vm3, %v7789_v28, %v7794_v32  ;;  %vm17894_vm11 = vmmov %vm17893_vm3  ;;  %6090 = vmatpush2.bf16.msra.mxu1 %v5905_v34  ;;  %v5832_v48 = vpack.c.bf16 %v5824_v42, %v5823_v43 }
 0xc70   :  { %v5826_v11 = vsel %vm17894_vm11, %v7794_v32, %v7789_v28  ;;  %vm17895_vm2 = vmmov %vm17893_vm3  ;;  %6676 = vmatprep.subr.msk.bf16.mxu1 %vm17892_vm0, %v5896_v24 }
 0xc71   :  { %v5817_v8 = vsel %vm17895_vm2, %v7788_v62, %v7793_v18  ;;  %vm17896_vm7 = vmmov %vm17895_vm2  ;;  %6166 = vmatpush1.bf16.msra.mxu0 %v15587_v40 }
 0xc72   :  { %v5825_v13 = vsel %vm17896_vm7, %v7793_v18, %v7788_v62  ;;  %vm17897_vm9 = vmmov %vm17890_vm14  ;;  %v5833_v37 = vpack.c.bf16 %v5818_v15, %v5817_v8  ;;  %v7822_v57 = vpop.permute.xlu1 %7821  ;;  %v7817_v32 = vpop.permute.xlu0 %7816 }
 0xc73   :  { %v5956_v63 = vsel %vm17897_vm9, %v7674_v38, %v7669_v21  ;;  %vm17898_vm8 = vmmov %vm17897_vm9  ;;  %v7684_v38 = vunpack.i.h.bf16 %v15347_v3  ;;  %v5834_v14 = vpack.c.bf16 %v5826_v11, %v5825_v13  ;;  %6092 = vmatpush2.bf16.msra.mxu1 %v5903_v30  ;;  %v17904_v21 = vld [vmem:[#allocation16_spill] sm:$0xff]  ;;  %v17906_v30 = vld [vmem:[#allocation15_spill] sm:$0xff]  ;;  %vm17908_vm9 = vcmp.lt.s32.totalorder %v17280_v61, 113 }
 0xc74   :  { %v5947_v9 = vsel %vm17898_vm8, %v7668_v53, %v7673_v59  ;;  %vm17899_vm6 = vmmov %vm17898_vm8  ;;  %vm17905_vm2 = vnez %v17904_v21  ;;  %vm17907_vm7 = vnez %v17906_v30  ;;  %v7824_v7 = vunpack.i.h.bf16 %v7822_v57 }
 0xc75   :  { %v5950_v24 = vsel %vm17899_vm6, %v7799_v20, %v7809_v10  ;;  %vm17900_vm14 = vmmov %vm17899_vm6  ;;  %6677 = vmatprep.subr.msk.bf16.mxu1 %vm17905_vm2, %v5834_v14  ;;  %v5841_v1 = vsel %vm17907_vm7, %v5833_v37, 0  ;;  %v5963_v40 = vpack.c.bf16 %v5948_v49, %v5947_v9  ;;  %v5884_v58 = vsel %vm17908_vm9, %v7684_v38, %v7694_v22 }
 0xc76   :  { %v5958_v39 = vsel %vm17900_vm14, %v7809_v10, %v7799_v20  ;;  %vm17901_vm3 = vmmov %vm17899_vm6  ;;  %v7823_v27 = vunpack.i.l.bf16 %v7822_v57  ;;  %v7819_v18 = vunpack.i.h.bf16 %v7817_v32  ;;  %v7818_v19 = vunpack.i.l.bf16 %v7817_v32  ;;  %v7832_v45 = vpop.permute.xlu1 %7831  ;;  %v7827_v8 = vpop.permute.xlu0 %7826 }
 0xc77   :  { %v5949_v26 = vsel %vm17901_vm3, %v7798_v2, %v7808_v36  ;;  %vm17902_vm11 = vmmov %vm17901_vm3  ;;  %6094 = vmatpush2.bf16.msra.mxu1 %v5841_v1  ;;  %v5839_v17 = vsel %vm17907_vm7, %v5831_v16, 0  ;;  %v5971_v28 = vsel %vm17842_vm4, %v5963_v40, 0  ;;  %v7834_v11 = vunpack.i.h.bf16 %v7832_v45  ;;  %v17933_v40 = vld [vmem:[#allocation88_spill] sm:$0xff] }
 0xc78   :  { %v5957_v29 = vsel %vm17902_vm11, %v7808_v36, %v7798_v2  ;;  %vm17903_vm1 = vmmov %vm17901_vm3  ;;  %v5965_v0 = vpack.c.bf16 %v5950_v24, %v5949_v26  ;;  %6678 = vmatprep.subr.msk.bf16.mxu1 %vm17905_vm2, %v5832_v48  ;;  %v7833_v6 = vunpack.i.l.bf16 %v7832_v45  ;;  %v17916_v13 = vpack.c.bf16 %v14972_v56, %v14931_v5 }
 0xc79   :  { %v5955_v3 = vsel %vm17903_vm1, %v7673_v59, %v7668_v53  ;;  %v5966_v23 = vpack.c.bf16 %v5958_v39, %v5957_v29  ;;  %vm17909_vm8 = vmmov %vm17908_vm9  ;;  %v7804_v9 = vunpack.i.h.bf16 %v15696_v33  ;;  %v7829_v10 = vunpack.i.h.bf16 %v7827_v8 }
 0xc7a   :  { %v5973_v59 = vsel %vm17842_vm4, %v5965_v0, 0  ;;  %v5964_v53 = vpack.c.bf16 %v5956_v63, %v5955_v3  ;;  %v5883_v54 = vsel %vm17909_vm8, %v7683_v52, %v7693_v31  ;;  %vm17910_vm6 = vmmov %vm17909_vm8  ;;  %v7814_v63 = vunpack.i.h.bf16 %v15691_v4  ;;  %v7847_v14 = vpop.permute.xlu1 %7846  ;;  %v7837_v39 = vpop.permute.xlu0 %7836 }
 0xc7b   :  { %6690 = vmatprep.subr.msk.bf16.mxu0 %vm17874_vm13, %v5966_v23  ;;  %v5892_v42 = vsel %vm17910_vm6, %v7694_v22, %v7684_v38  ;;  %vm17911_vm14 = vmmov %vm17910_vm6  ;;  %v5899_v62 = vpack.c.bf16 %v5884_v58, %v5883_v54  ;;  %6096 = vmatpush2.bf16.msra.mxu1 %v5839_v17  ;;  %v7828_v36 = vunpack.i.l.bf16 %v7827_v8  ;;  %v7813_v22 = vunpack.i.l.bf16 %v15691_v4  ;;  %v17923_v4 = vld [vmem:[#allocation89_spill] sm:$0xff] }
 0xc7c   :  { %6168 = vmatpush2.bf16.msra.mxu0 %v5973_v59  ;;  %v5891_v60 = vsel %vm17911_vm14, %v7693_v31, %v7683_v52  ;;  %vm17912_vm3 = vmmov %vm17910_vm6  ;;  %6097 = vmatprep.subr.bf16.mxu1 %v17916_v13  ;;  %v7803_v31 = vunpack.i.l.bf16 %v15696_v33  ;;  %vm17917_vm4 = vcmp.lt.s32.totalorder %v17280_v61, 127  ;;  %v17921_v52 = vpack.c.bf16 %v14968_v50, %v14924_v44  ;;  %v17932_v59 = vld [vmem:[#allocation117_spill] sm:$0xff] }
 0xc7d   :  { %6691 = vmatprep.subr.msk.bf16.mxu0 %vm17874_vm13, %v5964_v53  ;;  %v5886_v43 = vsel %vm17912_vm3, %v7819_v18, %v7824_v7  ;;  %vm17913_vm11 = vmmov %vm17912_vm3  ;;  %v5900_v47 = vpack.c.bf16 %v5892_v42, %v5891_v60  ;;  %v5822_v5 = vsel %vm17917_vm4, %v7829_v10, %v7834_v11  ;;  %v7849_v37 = vunpack.i.h.bf16 %v7847_v14  ;;  %v17935_v42 = vld [vmem:[#allocation30_spill] sm:$0xff]  ;;  %v17937_v60 = vld [vmem:[#allocation29_spill] sm:$0xff] }
 0xc7e   :  { %v5894_v46 = vsel %vm17913_vm11, %v7824_v7, %v7819_v18  ;;  %vm17914_vm13 = vmmov %vm17912_vm3  ;;  %v7848_v24 = vunpack.i.l.bf16 %v7847_v14  ;;  %v17922_v26 = vpack.c.bf16 %v14826_v25, %v14775_v35  ;;  %v5907_v29 = vsel %vm17881_vm12, %v5899_v62, 0  ;;  %v7852_v58 = vpop.permute.xlu1 %7851 }
 0xc7f   :  { %v5885_v49 = vsel %vm17914_vm13, %v7818_v19, %v7823_v27  ;;  %vm17915_vm1 = vmmov %vm17912_vm3  ;;  %6098 = vmatpush2.bf16.msra.mxu1 %v17921_v52  ;;  %v15761_v3 = vrot.slane %v17923_v4, %v17783_v12  ;;  %v7839_v23 = vunpack.i.h.bf16 %v7837_v39  ;;  %v7838_v33 = vunpack.i.l.bf16 %v7837_v39  ;;  %v17947_v39 = vld [vmem:[#allocation100_spill] sm:$0xff] }
 0xc80   :  { %v5893_v34 = vsel %vm17915_vm1, %v7823_v27, %v7818_v19  ;;  %6170 = vmatpush2.bf16.msra.mxu0 %v5971_v28  ;;  %v5901_v51 = vpack.c.bf16 %v5886_v43, %v5885_v49  ;;  %vm17918_vm9 = vmmov %vm17917_vm4  ;;  %6099 = vmatprep.subr.bf16.mxu1 %v17922_v26  ;;  %vm17928_vm13 = vcmp.lt.s32.totalorder %v17280_v61, 111  ;;  %v17934_v53 = vpack.c.bf16 %v17932_v59, %v17933_v40  ;;  %v7842_v27 = vpop.permute.xlu0 %7841  ;;  %v17948_v26 = vld [vmem:[#allocation76_spill] sm:$0xff] }
 0xc81   :  { %v5902_v15 = vpack.c.bf16 %v5894_v46, %v5893_v34  ;;  %v5830_v56 = vsel %vm17918_vm9, %v7834_v11, %v7829_v10  ;;  %vm17919_vm8 = vmmov %vm17917_vm4  ;;  %v6010_v16 = vsel %vm17928_vm13, %v7839_v23, %v7849_v37  ;;  %v7854_v57 = vunpack.i.h.bf16 %v7852_v58  ;;  %v17960_v40 = vld [vmem:[#allocation92_spill] sm:$0xff] }
 0xc82   :  { %v5909_v20 = vsel %vm17881_vm12, %v5901_v51, 0  ;;  %v5821_v2 = vsel %vm17919_vm8, %v7828_v36, %v7833_v6  ;;  %vm17920_vm6 = vmmov %vm17917_vm4  ;;  %v7853_v7 = vunpack.i.l.bf16 %v7852_v58  ;;  %v7844_v18 = vunpack.i.h.bf16 %v7842_v27 }
 0xc83   :  { %6692 = vmatprep.subr.msk.bf16.mxu0 %vm17892_vm0, %v5902_v15  ;;  %v5829_v38 = vsel %vm17920_vm6, %v7833_v6, %v7828_v36  ;;  %vm17924_vm14 = vmmov %vm17917_vm4  ;;  %v5837_v0 = vpack.c.bf16 %v5822_v5, %v5821_v2  ;;  %6100 = vmatpush2.bf16.msra.mxu1 %v17934_v53  ;;  %v7843_v19 = vunpack.i.l.bf16 %v7842_v27  ;;  %vm17938_vm8 = vnez %v17937_v60  ;;  %v7867_v15 = vpop.permute.xlu1 %7866  ;;  %v17961_v53 = vld [vmem:[#allocation48_spill] sm:$0xff] }
 0xc84   :  { %6172 = vmatpush2.bf16.msra.mxu0 %v5909_v20  ;;  %v5820_v44 = vsel %vm17924_vm14, %v7804_v9, %v7814_v63  ;;  %vm17925_vm3 = vmmov %vm17917_vm4  ;;  %v5838_v41 = vpack.c.bf16 %v5830_v56, %v5829_v38  ;;  %v7869_v6 = vunpack.i.h.bf16 %v7867_v15  ;;  %v7868_v8 = vunpack.i.l.bf16 %v7867_v15  ;;  %v7857_v13 = vpop.permute.xlu0 %7856 }
 0xc85   :  { %v5828_v50 = vsel %vm17925_vm3, %v7814_v63, %v7804_v9  ;;  %6693 = vmatprep.subr.msk.bf16.mxu0 %vm17892_vm0, %v5900_v47  ;;  %vm17926_vm11 = vmmov %vm17925_vm3  ;;  %vm17936_vm0 = vnez %v17935_v42  ;;  %v5845_v62 = vsel %vm17907_vm7, %v5837_v0, 0  ;;  %v17943_v63 = vmov 0  }
 0xc86   :  { %v5819_v35 = vsel %vm17926_vm11, %v7803_v31, %v7813_v22  ;;  %vm17927_vm12 = vmmov %vm17925_vm3  ;;  %6102 = vmatmul.mubr.bf16.vlgmr.msra.gmra.mxu1 %v15761_v3  ;;  %v7859_v9 = vunpack.i.h.bf16 %v7857_v13  ;;  %v7858_v10 = vunpack.i.l.bf16 %v7857_v13  ;;  %v17962_v58 = vpack.c.bf16 %v17960_v40, %v17961_v53 }
 0xc87   :  { %v5827_v25 = vsel %vm17927_vm12, %v7813_v22, %v7803_v31  ;;  %vm17929_vm1 = vmmov %vm17928_vm13  ;;  %v5835_v43 = vpack.c.bf16 %v5820_v44, %v5819_v35  ;;  %6142 = vmatprep.mubr.bf16.mxu1 %v17943_v63  ;;  %v6062_v22 = vcombine.high %v15761_v3, %v15761_v3  ;;  %vm6065_vm12 = vcmask 261120   ;;  %v7872_v56 = vpop.permute.xlu1 %7871 }
 0xc88   :  { %v6018_v48 = vsel %vm17929_vm1, %v7849_v37, %v7839_v23  ;;  %vm17930_vm4 = vmmov %vm17929_vm1  ;;  %6174 = vmatpush2.bf16.msra.mxu0 %v5907_v29  ;;  %v5836_v17 = vpack.c.bf16 %v5828_v50, %v5827_v25  ;;  %v6022_v21 = vsel %vm17929_vm1, %v7869_v6, %v7859_v9  ;;  %v7874_v2 = vunpack.i.h.bf16 %v7872_v56  ;;  %v7862_v52 = vpop.permute.xlu0 %7861  ;;  %v17954_v25 = vld [vmem:[#allocation99_spill] sm:$0xff] }
 0xc89   :  { %v6009_v1 = vsel %vm17930_vm4, %v7838_v33, %v7848_v24  ;;  %vm17931_vm9 = vmmov %vm17929_vm1  ;;  %6694 = vmatprep.subr.msk.bf16.mxu0 %vm17905_vm2, %v5838_v41  ;;  %v5843_v47 = vsel %vm17907_vm7, %v5835_v43, 0  ;;  %v7873_v38 = vunpack.i.l.bf16 %v7872_v56  ;;  %v7864_v37 = vunpack.i.h.bf16 %v7862_v52  ;;  %v17955_v41 = vld [vmem:[#allocation118_spill] sm:$0xff] }
 0xc8a   :  { %v6017_v55 = vsel %vm17931_vm9, %v7848_v24, %v7838_v33  ;;  %v6025_v32 = vpack.c.bf16 %v6010_v16, %v6009_v1  ;;  %vm17939_vm6 = vmmov %vm17929_vm1  ;;  %v7863_v24 = vunpack.i.l.bf16 %v7862_v52  ;;  %v17949_v29 = vpack.c.bf16 %v17947_v39, %v17948_v26  ;;  %v17958_v1 = vld [vmem:[#allocation58_spill] sm:$0xff] }
 0xc8b   :  { %v6026_v54 = vpack.c.bf16 %v6018_v48, %v6017_v55  ;;  %v6008_v46 = vsel %vm17939_vm6, %v7844_v18, %v7854_v57  ;;  %vm17940_vm14 = vmmov %vm17929_vm1  ;;  %v17956_v0 = vpack.c.bf16 %v17954_v25, %v17955_v41  ;;  %v17957_v48 = vld [vmem:[#allocation102_spill] sm:$0xff] }
 0xc8c   :  { %v6033_v28 = vsel %vm17938_vm8, %v6025_v32, 0  ;;  %v6016_v49 = vsel %vm17940_vm14, %v7854_v57, %v7844_v18  ;;  %vm17941_vm3 = vmmov %vm17929_vm1  ;;  %6176 = vmatpush2.bf16.msra.mxu0 %v5845_v62  ;;  %v17959_v55 = vpack.c.bf16 %v17957_v48, %v17958_v1 }
 0xc8d   :  { %6679 = vmatprep.subr.msk.bf16.mxu1 %vm17936_vm0, %v6026_v54  ;;  %v6007_v34 = vsel %vm17941_vm3, %v7843_v19, %v7853_v7  ;;  %vm17942_vm11 = vmmov %vm17929_vm1  ;;  %6695 = vmatprep.subr.msk.bf16.mxu0 %vm17905_vm2, %v5836_v17 }
 0xc8e   :  { %v6015_v45 = vsel %vm17942_vm11, %v7853_v7, %v7843_v19  ;;  %6123 = vmatpush1.bf16.msra.mxu1 %v6033_v28  ;;  %v6023_v51 = vpack.c.bf16 %v6008_v46, %v6007_v34  ;;  %vm17944_vm13 = vmmov %vm17929_vm1 }
 0xc8f   :  { %v6024_v11 = vpack.c.bf16 %v6016_v49, %v6015_v45  ;;  %v6014_v31 = vsel %vm17944_vm13, %v7859_v9, %v7869_v6  ;;  %vm17945_vm2 = vmmov %vm17929_vm1 }
 0xc90   :  { %v6031_v36 = vsel %vm17938_vm8, %v6023_v51, 0  ;;  %v6013_v20 = vsel %vm17945_vm2, %v7858_v10, %v7868_v8  ;;  %vm17946_vm4 = vmmov %vm17929_vm1  ;;  %6178 = vmatpush2.bf16.msra.mxu0 %v5843_v47 }
 0xc91   :  { %6680 = vmatprep.subr.msk.bf16.mxu1 %vm17936_vm0, %v6024_v11  ;;  %v6021_v5 = vsel %vm17946_vm4, %v7868_v8, %v7858_v10  ;;  %v6029_v14 = vpack.c.bf16 %v6014_v31, %v6013_v20  ;;  %6179 = vmatprep.subr.bf16.mxu0 %v17949_v29  ;;  %vm17950_vm7 = vmmov %vm17929_vm1 }
 0xc92   :  { %6125 = vmatpush1.bf16.msra.mxu1 %v6031_v36  ;;  %v6030_v30 = vpack.c.bf16 %v6022_v21, %v6021_v5  ;;  %v6012_v44 = vsel %vm17950_vm7, %v7864_v37, %v7874_v2  ;;  %vm17951_vm9 = vmmov %vm17929_vm1 }
 0xc93   :  { %v6037_v4 = vsel %vm17938_vm8, %v6029_v14, 0  ;;  %v6020_v50 = vsel %vm17951_vm9, %v7874_v2, %v7864_v37  ;;  %vm17952_vm6 = vmmov %vm17929_vm1 }
 0xc94   :  { %6696 = vmatprep.subr.msk.bf16.mxu1 %vm17936_vm0, %v6030_v30  ;;  %v6011_v23 = vsel %vm17952_vm6, %v7863_v24, %v7873_v38  ;;  %vm17953_vm14 = vmmov %vm17929_vm1  ;;  %6180 = vmatpush2.bf16.msra.mxu0 %v17956_v0 }
 0xc95   :  { %6681 = vmatmul.mubr.msk.bf16.vlgmr.msra.gmra.mxu1 %vm6065_vm12, %v6062_v22  ;;  %v6019_v33 = vsel %vm17953_vm14, %v7873_v38, %v7863_v24  ;;  %v6027_v16 = vpack.c.bf16 %v6012_v44, %v6011_v23  ;;  %6181 = vmatprep.subr.bf16.mxu0 %v17959_v55  ;;  %vm17976_vm14 = vcmp.lt.s32.totalorder %v17280_v61, 112 }
 0xc96   :  { %6205 = vmatpush1.bf16.msra.mxu1 %v6037_v4  ;;  %v6028_v35 = vpack.c.bf16 %v6020_v50, %v6019_v33  ;;  %6224 = vmatprep.mubr.bf16.mxu1 %v17943_v63 }
 0xc97   :  { %v6035_v59 = vsel %vm17938_vm8, %v6027_v16, 0 }
 0xc98   :  { %6697 = vmatprep.subr.msk.bf16.mxu1 %vm17936_vm0, %v6028_v35  ;;  %6182 = vmatpush2.bf16.msra.mxu0 %v17962_v58  ;;  %vm17963_vm0 = vcmask 1041408  }
 0xc99   :  { %vm17964_vm8 = vmmov %vm17963_vm0 }
 0xc9a   :  { %6207 = vmatpush1.bf16.msra.mxu1 %v6035_v59  ;;  %vm17965_vm3 = vmmov %vm17963_vm0 }
 0xc9b   :  { %6184 = vmatmul.mubr.bf16.vlgmr.msra.gmra.mxu0 %v15761_v3  ;;  %vm17966_vm11 = vmmov %vm17963_vm0 }
 0xc9c   :  { %vm17968_vm13 = vmmov %vm17963_vm0 }
 0xc9d   :  { %6698 = vmatmul.mubr.msk.bf16.vlgmr.msra.gmra.mxu1 %vm6065_vm12, %v6062_v22  ;;  %vm17967_vm12 = vmmov %vm17963_vm0 }
 0xc9e   :  { %vm17969_vm1 = vmmov %vm17963_vm0 }
 0xc9f   :  { %vm17970_vm2 = vmmov %vm17963_vm0 }
 0xca0   :  { %vm17971_vm4 = vmmov %vm17963_vm0 }
 0xca1   :  { %vm17972_vm7 = vmmov %vm17963_vm0 }
 0xca2   :  { %vm17973_vm9 = vmmov %vm17963_vm0 }
 0xca3   :  { %vm17974_vm6 = vmmov %vm17963_vm0 }
 0xd46   :  { %v6103_v54 = vpop.f32.mrf.mxu1 }
 0xd48   :  { %v6105_v57 = vpop.f32.mrf.mxu1 }
 0xd4a   :  { %v6107_v7 = vpop.f32.mrf.mxu1 }
 0xd4c   :  { %v6108_v27 = vpop.f32.mrf.mxu1 }
 0xd55   :  { %v6144_v32 = vpop.f32.mrf.mxu1 }
 0xd56   :  { %v6145_v18 = vadd.f32 %v6144_v32, %v6103_v54  ;;  %v17975_v54 = vld [vmem:[#allocation3_spill] sm:$0xff] }
 0xd57   :  { %v6146_v19 = vpop.f32.mrf.mxu1 }
 0xd58   :  { %v6147_v17 = vadd.f32 %v6146_v19, %v6105_v57  ;;  %v6246_v60 = vmul.f32 %v6145_v18, %v6145_v18  ;;  %v6233_v62 = vsel %vm17963_vm0, %v6145_v18, 0.0  ;;  %vm17977_vm0 = vmmov %vm17976_vm14 }
 0xd59   :  { %v6148_v42 = vpop.f32.mrf.mxu1 }
 0xd5a   :  { %v6247_v28 = vmul.f32 %v6147_v17, %v6147_v17  ;;  %v6234_v43 = vsel %vm17964_vm8, %v6147_v17, 0.0  ;;  %v6250_v15 = vsel %vm17966_vm11, %v6246_v60, 0.0  ;;  %vm17980_vm8 = vcmp.lt.s32.totalorder %v17280_v61, 16 }
 0xd5b   :  { %v6149_v46 = vpop.f32.mrf.mxu1  ;;  %v6235_v49 = vadd.f32 %v6234_v43, %v6233_v62  ;;  %v6185_v45 = vpop.f32.mrf.mxu0 }
 0xd5c   :  { %v6251_v34 = vsel %vm17965_vm3, %v6247_v28, 0.0  ;;  %vm17981_vm3 = vmmov %vm17980_vm8  ;;  %v6701_v28 = vld [vmem:[%s15944_s7 + $0x1] ss:$2 sm:$0x3] }
 0xd5d   :  { %v6226_v3 = vpop.f32.mrf.mxu1  ;;  %6236 = vadd.xlane.f32.xlu0 %v6235_v49  ;;  %v6252_v8 = vadd.f32 %v6251_v34, %v6250_v15  ;;  %v6187_v13 = vpop.f32.mrf.mxu0 }
 0xd5e   :  { %v6227_v11 = vadd.f32 %v6226_v3, %v6185_v45 }
 0xd5f   :  { %v6228_v6 = vpop.f32.mrf.mxu1  ;;  %v6189_v10 = vpop.f32.mrf.mxu0 }
 0xd60   :  { %v6248_v51 = vmul.f32 %v6227_v11, %v6227_v11  ;;  %v6229_v63 = vadd.f32 %v6228_v6, %v6187_v13  ;;  %v6238_v22 = vsel %vm17967_vm12, %v6227_v11, 0.0  ;;  %v17983_v13 = vld [vmem:[#allocation11_spill] sm:$0xff]  ;;  %v17998_v6 = vld [vmem:[#allocation14_spill] sm:$0xff] }
 0xd61   :  { %v6230_v9 = vpop.f32.mrf.mxu1  ;;  %6253 = vadd.xlane.f32.xlu0 %v6252_v8  ;;  %v6190_v21 = vpop.f32.mrf.mxu0  ;;  %vm17984_vm11 = vnez %v17983_v13 }
 0xd62   :  { %v6249_v36 = vmul.f32 %v6229_v63, %v6229_v63  ;;  %v6239_v31 = vsel %vm17968_vm13, %v6229_v63, 0.0  ;;  %v6255_v5 = vsel %vm17969_vm1, %v6248_v51, 0.0  ;;  %vm17991_vm13 = vcmp.lt.s32.totalorder %v17280_v61, 1 }
 0xd63   :  { %v6231_v47 = vpop.f32.mrf.mxu1  ;;  %v6240_v20 = vadd.f32 %v6239_v31, %v6238_v22  ;;  %vm17992_vm1 = vmmov %vm17991_vm13 }
 0xd64   :  { %v6256_v56 = vsel %vm17970_vm2, %v6249_v36, 0.0 }
 0xd65   :  { %6241 = vadd.xlane.f32.xlu1 %v6240_v20  ;;  %v6257_v30 = vadd.f32 %v6256_v56, %v6255_v5 }
 0xd67   :  { %6258 = vadd.xlane.f32.xlu0 %v6257_v30 }
 0xde6   :  { %v6237_v2 = vpop.xlane.xlu0 %6236 }
 0xde7   :  { %v6243_v14 = vsel %vm17971_vm4, %v6237_v2, 0.0 }
 0xdea   :  { %v6254_v38 = vpop.xlane.xlu0 %6253 }
 0xdeb   :  { %v6260_v26 = vsel %vm17973_vm9, %v6254_v38, 0.0 }
 0xdee   :  { %v6242_v52 = vpop.xlane.xlu1 %6241 }
 0xdef   :  { %v6244_v37 = vsel %vm17972_vm7, %v6242_v52, 0.0  ;;  %vm17999_vm7 = vcmask 1040384  }
 0xdf0   :  { %v6245_v24 = vadd.f32 %v6244_v37, %v6243_v14  ;;  %v6259_v39 = vpop.xlane.xlu0 %6258  ;;  %v17987_v14 = vld [vmem:[#allocation7_spill] sm:$0xff]  ;;  %vm18000_vm9 = vmmov %vm17999_vm7 }
 0xdf1   :  { %v6261_v29 = vsel %vm17974_vm6, %v6259_v39, 0.0  ;;  %vm18001_vm6 = vmmov %vm17999_vm7 }
 0xdf2   :  { %v6263_v4 = vmul.f32 0.001953125, %v6245_v24  ;;  %v6262_v44 = vadd.f32 %v6261_v29, %v6260_v26  ;;  %v17989_v24 = vld [vmem:[#allocation8_spill] sm:$0xff] }
 0xdf3   :  { %vm17990_vm12 = vnez %v17989_v24 }
 0xdf4   :  { %v6265_v50 = vmul.f32 %v6263_v4, %v6263_v4  ;;  %v6264_v23 = vmul.f32 0.001953125, %v6262_v44  ;;  %v6267_v25 = vsub.f32 %v6145_v18, %v6263_v4  ;;  %v6268_v41 = vsub.f32 %v6147_v17, %v6263_v4 }
 0xdf5   :  { %v6269_v0 = vsub.f32 %v6227_v11, %v6263_v4  ;;  %v6270_v16 = vsub.f32 %v6229_v63, %v6263_v4 }
 0xdf6   :  { %v6266_v33 = vsub.f32 %v6264_v23, %v6265_v50 }
 0xdf8   :  { %v6271_v35 = vadd.f32 1e-05, %v6266_v33  ;;  %v17993_v33 = vld [vmem:[#allocation5_spill] sm:$0xff] }
 0xdf9   :  { %vm17994_vm2 = vnez %v17993_v33 }
 0xdfa   :  { %8128 = vrsqrt.f32 %v6271_v35 }
 0xe07   :  { %v8129_v48 = vpop.eup %8128 }
 0xe08   :  { %v6273_v1 = vmul.f32 %v8129_v48, %v6267_v25  ;;  %v6274_v55 = vmul.f32 %v8129_v48, %v6268_v41  ;;  %v6275_v59 = vmul.f32 %v8129_v48, %v6269_v0  ;;  %v6276_v40 = vmul.f32 %v8129_v48, %v6270_v16  ;;  %v17995_v25 = vld [vmem:[#allocation10_spill] sm:$0xff] }
 0xe09   :  { %vm17996_vm4 = vnez %v17995_v25 }
 0xe0a   :  { %v6281_v53 = vcombine.low %v6273_v1, %v6274_v55  ;;  %v6289_v58 = vcombine.low %v6275_v59, %v6276_v40 }
 0xe0c   :  { %v6288_v57 = vrot.slane %v6281_v53, %v17975_v54  ;;  %v6296_v7 = vrot.slane %v6289_v58, %v17975_v54 }
 0xe0e   :  { %v6299_v27 = vcombine.low %v6288_v57, %v6296_v7 }
 0xe10   :  { %v6306_v32 = vrot.slane %v6299_v27, %v17975_v54 }
 0xe12   :  { %6310 = vrot.lane.b32.xlu1 %v6306_v32, %s8159_s18  ;;  %v6307_v18 = vcombine.high %v6306_v32, %v6306_v32 }
 0xe14   :  { %6312 = vrot.lane.b32.xlu0 %v6307_v18, %s8159_s18 }
 0xe16   :  { %6333 = vrot.lane.b32.xlu1 %v6306_v32, %s8156_s16 }
 0xe1a   :  { %6335 = vrot.lane.b32.xlu1 %v6307_v18, %s8156_s16 }
 0xe84   :  { %v6311_v19 = vpop.permute.xlu1 %6310 }
 0xe86   :  { %v6313_v17 = vpop.permute.xlu0 %6312 }
 0xe87   :  { %v6314_v42 = vsel %vm17976_vm14, %v6311_v19, %v6313_v17  ;;  %v6315_v60 = vsel %vm17977_vm0, %v6313_v17, %v6311_v19  ;;  %vm18002_vm14 = vmmov %vm18001_vm6 }
 0xe88   :  { %v6316_v62 = vsel %vm17288_vm10, %v6314_v42, -inf  ;;  %v6317_v46 = vsel %vm17295_vm15, %v6315_v60, -inf  ;;  %v6334_v49 = vpop.permute.xlu1 %6333  ;;  %vm17985_vm10 = vcmp.lt.s32.totalorder %v17280_v61, 127  ;;  %vm17988_vm15 = vnez %v17987_v14 }
 0xe89   :  { %v6320_v34 = vcombine.low %v6316_v62, %v6317_v46  ;;  %v17997_v62 = vld [vmem:[#allocation2_spill] sm:$0xff] }
 0xe8a   :  { %v6466_v43 = vsub.s32 1, %v17997_v62 }
 0xe8b   :  { %v6327_v3 = vrot.slane %v6320_v34, %v17975_v54 }
 0xe8c   :  { %v6336_v45 = vpop.permute.xlu1 %6335 }
 0xe8d   :  { %v6337_v15 = vsel %vm17980_vm8, %v6334_v49, %v6336_v45  ;;  %v6338_v11 = vsel %vm17981_vm3, %v6336_v45, %v6334_v49  ;;  %v6328_v63 = vcombine.high %v6327_v3, %v6327_v3  ;;  %v6331_v36 = vmax.f32 %v6288_v57, %v6327_v3 }
 0xe8e   :  { %v6339_v8 = vsel %vm17292_vm5, %v6338_v11, -inf  ;;  %v6340_v51 = vsel %vm17984_vm11, %v6337_v15, -inf  ;;  %vm17986_vm5 = vmmov %vm17985_vm10 }
 0xe8f   :  { %v6343_v9 = vcombine.low %v6339_v8, %v6340_v51  ;;  %v6332_v47 = vmax.f32 %v6296_v7, %v6328_v63 }
 0xe91   :  { %v6350_v10 = vrot.slane %v6343_v9, %v17975_v54 }
 0xe93   :  { %v6351_v22 = vcombine.high %v6350_v10, %v6350_v10  ;;  %v6354_v31 = vmax.f32 %v6331_v36, %v6350_v10 }
 0xe95   :  { %v6355_v21 = vmax.f32 %v6332_v47, %v6351_v22 }
 0xe97   :  { %v6358_v20 = vcombine.low %v6354_v31, %v6355_v21 }
 0xe99   :  { %v6365_v5 = vrot.slane %v6358_v20, %v17975_v54 }
 0xe9b   :  { %6369 = vrot.lane.b32.xlu0 %v6365_v5, %s8155_s15  ;;  %v6366_v56 = vcombine.high %v6365_v5, %v6365_v5 }
 0xe9d   :  { %6371 = vrot.lane.b32.xlu1 %v6366_v56, %s8155_s15 }
 0xe9f   :  { %6392 = vrot.lane.b32.xlu0 %v6365_v5, %s8157_s17 }
 0xea1   :  { %6394 = vrot.lane.b32.xlu1 %v6366_v56, %s8157_s17 }
 0xf0d   :  { %v6370_v30 = vpop.permute.xlu0 %6369 }
 0xf0f   :  { %v6372_v2 = vpop.permute.xlu1 %6371 }
 0xf10   :  { %v6373_v38 = vsel %vm17985_vm10, %v6370_v30, %v6372_v2  ;;  %v6374_v52 = vsel %vm17986_vm5, %v6372_v2, %v6370_v30 }
 0xf11   :  { %v6375_v37 = vsel %vm17988_vm15, %v6373_v38, -inf  ;;  %v6376_v39 = vsel %vm17990_vm12, %v6374_v52, -inf  ;;  %v6393_v29 = vpop.permute.xlu0 %6392 }
 0xf12   :  { %v6379_v26 = vcombine.low %v6375_v37, %v6376_v39 }
 0xf13   :  { %v6395_v4 = vpop.permute.xlu1 %6394 }
 0xf14   :  { %v6386_v44 = vrot.slane %v6379_v26, %v17975_v54  ;;  %v6396_v50 = vsel %vm17991_vm13, %v6393_v29, %v6395_v4  ;;  %v6397_v23 = vsel %vm17992_vm1, %v6395_v4, %v6393_v29 }
 0xf15   :  { %v6398_v35 = vsel %vm17994_vm2, %v6397_v23, -inf  ;;  %v6399_v41 = vsel %vm17996_vm4, %v6396_v50, -inf }
 0xf16   :  { %v6387_v0 = vcombine.high %v6386_v44, %v6386_v44  ;;  %v6402_v16 = vcombine.low %v6398_v35, %v6399_v41  ;;  %v6390_v48 = vmax.f32 %v6354_v31, %v6386_v44 }
 0xf18   :  { %v6409_v1 = vrot.slane %v6402_v16, %v17975_v54  ;;  %v6391_v55 = vmax.f32 %v6355_v21, %v6387_v0  ;;  %v6433_v54 = vld [vmem:[%s15944_s7] ss:$2 sm:$0x3] }
 0xf1a   :  { %v6410_v59 = vcombine.high %v6409_v1, %v6409_v1  ;;  %v6413_v40 = vmax.f32 %v6390_v48, %v6409_v1 }
 0xf1c   :  { %v6414_v53 = vmax.f32 %v6391_v55, %v6410_v59  ;;  %v6699_v58 = vrot.slane %v6413_v40, 9 }
 0xf1e   :  { %v6700_v57 = vrot.slane %v6414_v53, 9  ;;  %v6423_v7 = vsub.f32 %v6413_v40, %v6699_v58 }
 0xf20   :  { %v6424_v61 = vsub.f32 %v6414_v53, %v6700_v57  ;;  %v6425_v27 = vmul.f32 0.5, %v6423_v7 }
 0xf22   :  { %v6426_v32 = vmul.f32 0.5, %v6424_v61  ;;  %8130 = vtanh.f32 %v6425_v27 }
 0xf24   :  { %8132 = vtanh.f32 %v6426_v32 }
 0xf2f   :  { %v8131_v18 = vpop.eup %8130 }
 0xf30   :  { %v6429_v19 = vmul.f32 0.5, %v8131_v18 }
 0xf31   :  { %v8133_v17 = vpop.eup %8132 }
 0xf32   :  { %v6430_v42 = vmul.f32 0.5, %v8133_v17  ;;  %v6431_v60 = vadd.f32 0.5, %v6429_v19 }
 0xf34   :  { %v6432_v46 = vadd.f32 0.5, %v6430_v42  ;;  %v6444_v49 = vrot.slane %v6431_v60, %v17783_v12 }
 0xf36   :  { %v6451_v34 = vrot.slane %v6432_v46, %v17783_v12  ;;  %v6454_v3 = vsub.f32 %v6433_v54, %v6444_v49  ;;  %v6456_v45 = vadd.f32 %v6701_v28, %v6444_v49 }
 0xf38   :  { %v6455_v15 = vsub.f32 %v6433_v54, %v6451_v34  ;;  %v6457_v11 = vadd.f32 %v6701_v28, %v6451_v34  ;;  %v6463_v8 = vrot.slane %v6454_v3, %v17998_v6  ;;  %v6467_v13 = vrot.slane %v6454_v3, %v6466_v43 }
 0xf39   :  { %v6485_v51 = vrot.slane %v6456_v45, %v17998_v6  ;;  %v6489_v63 = vrot.slane %v6456_v45, %v6466_v43 }
 0xf3a   :  { %v6471_v9 = vrot.slane %v6455_v15, %v17998_v6  ;;  %v6475_v10 = vrot.slane %v6455_v15, %v6466_v43  ;;  %v6493_v36 = vrot.slane %v6457_v11, %v17998_v6  ;;  %v6497_v47 = vrot.slane %v6457_v11, %v6466_v43 }
 0xf3b   :  { %v6502_v22 = vsel %vm17999_vm7, %v6463_v8, %v6485_v51  ;;  %v6503_v12 = vsel %vm18000_vm9, %v6467_v13, %v6489_v63 }
 0xf3c   :  { %v6504_v31 = vsel %vm18001_vm6, %v6471_v9, %v6493_v36  ;;  %v6505_v21 = vsel %vm18002_vm14, %v6475_v10, %v6497_v47  ;;  %v6510_v20 = vcombine.low %v6502_v22, %v6503_v12 }
 0xf3d   :  { %v6518_v5 = vcombine.low %v6504_v31, %v6505_v21 }
 0xf3e   :  { %6702 = vst.sshfl [vmem:[%s15945_s10] sm:$0x33 pattern:$0x76325410] %v6510_v20 }
 0xf3f   :  { %6703 = vst.sshfl [vmem:[%s15945_s10 + $0x4] sm:$0x33 pattern:$0x76325410] %v6518_v5 }

</bundles_post_ra>
